<compile_context>
chip_gen: v6e
topology: v6e:2x2x1
jax: 0.10.0
libtpu: 0.0.40
codegen_flags: <defaults>
</compile_context>

<pallas_src>
import jax
import jax.numpy as jnp
import numpy as np
from jax import lax
from jax.experimental import pallas as pl
from jax.experimental.pallas import tpu as pltpu


# ----------------------------------------------------------------------------
# Fused Pallas kernel
# ----------------------------------------------------------------------------
def crossm_kernel(x1_ref, x2_ref, wc_ref, bc_ref, w1_ref, b1_ref,
                  wdw_ref, bdw_ref, w3_ref, b3_ref,
                  out_ref, x1p_ref, patch_ref, t1p_ref):
    """out = relu(conv1x1_bn3(relu(dw3x3_bn2(relu(conv1x1_bn1(h))))) + h)
       with h = relu(conv3x3_bn(high_x1) + low_x2)."""
    _, H, W, C = x1_ref.shape
    HW = H * W
    WC = W * C
    PC = x2_ref.shape[-1]          # packed lane width (P*C = 128)
    P = PC // C                    # pixels packed per row (4)
    Rp = HW // P                   # packed rows (64)
    f32 = jnp.float32
    bf16 = jnp.bfloat16

    def to_packed(x_rows):
        # (H, W*C) -> (HW/P, P*C): lane-split into P pieces and row-interleave.
        pieces = [x_rows[:, j * PC:(j + 1) * PC].reshape(H, 1, PC)
                  for j in range(P)]
        return jnp.concatenate(pieces, axis=1).reshape(Rp, PC)

    def to_rows(x_packed):
        # (HW/P, P*C) -> (H, W*C): inverse of to_packed.
        x3 = x_packed.reshape(H, P, PC)
        return jnp.concatenate([x3[:, j, :] for j in range(P)], axis=-1)

    # ---- cross_l: 3x3 conv (+ folded BN) on high_x1 -------------------------
    # Zero only the one-pixel border (interior is fully overwritten each step).
    zrow = jnp.zeros((1, W + 2, C), f32)
    zcol = jnp.zeros((H + 2, 1, C), f32)
    x1p_ref[0:1] = zrow
    x1p_ref[H + 1:H + 2] = zrow
    x1p_ref[:, 0:1] = zcol
    x1p_ref[:, W + 1:W + 2] = zcol
    x1p_ref[1:H + 1, 1:W + 1, :] = x1_ref[0]

    # im2col: write each (ky,kx) tap directly as one bf16 column block of the
    # (HW, 9C) patch matrix (no 9-way f32 concat, no materialized f32 buffer).
    for ky in range(3):
        for kx in range(3):
            t = ky * 3 + kx
            tap = x1p_ref[ky:ky + H, kx:kx + W, :].reshape(HW, C)
            patch_ref[:, t * C:(t + 1) * C] = tap.astype(bf16)

    # Single MXU matmul for the whole 3x3 conv (K = 9C), f32 accumulation.
    acc = jnp.dot(patch_ref[...], wc_ref[...], preferred_element_type=f32)

    # Pack to the lane-dense (HW/P, P*C) view used by the elementwise chain
    # and the block-diag 1x1 matmuls (C=32 alone would waste 3/4 of the lanes).
    accp = jnp.concatenate(
        [acc.reshape(Rp, P, C)[:, g, :] for g in range(P)], axis=-1)
    h = jnp.maximum(accp + bc_ref[...] + x2_ref[0], 0.0)            # (Rp, PC)

    # ---- proj_l.conv1 (1x1) + bn1 + relu : block-diag packed matmul --------
    t1 = jnp.maximum(
        jnp.dot(h.astype(bf16), w1_ref[...], preferred_element_type=f32)
        + b1_ref[...], 0.0)                                          # (Rp, PC)

    # ---- proj_l.conv2 (depthwise 3x3) + bn2 + relu --------------------------
    # Lane-dense padded scratch (H+2, (W+4)*C): image at rows [1:H+1], lane
    # columns [C:(W+1)*C]; only the read borders are zeroed.
    Wp = t1p_ref.shape[1]
    t1p_ref[0:1, :] = jnp.zeros((1, Wp), f32)
    t1p_ref[H + 1:H + 2, :] = jnp.zeros((1, Wp), f32)
    t1p_ref[:, 0:C] = jnp.zeros((H + 2, C), f32)
    t1p_ref[:, (W + 1) * C:] = jnp.zeros((H + 2, Wp - (W + 1) * C), f32)
    t1p_ref[1:H + 1, C:(W + 1) * C] = to_rows(t1)

    acc2 = None
    for ky in range(3):
        band = t1p_ref[ky:ky + H, :]                       # (H, (W+4)*C) row band
        for kx in range(3):
            # dx handled as a lane slice of the lane-dense band (XLU shift).
            term = band[:, kx * C:kx * C + WC] * wdw_ref[ky * 3 + kx]
            acc2 = term if acc2 is None else acc2 + term   # first tap inits
    t2 = jnp.maximum(acc2 + bdw_ref[...], 0.0)             # (H, W*C)

    # ---- proj_l.conv3 (1x1) + bn3, residual with h, final relu --------------
    out = jnp.maximum(
        jnp.dot(to_packed(t2).astype(bf16), w3_ref[...],
                preferred_element_type=f32)
        + b3_ref[...] + h, 0.0)
    out_ref[0] = out                                       # lane-dense (64,128)


# ----------------------------------------------------------------------------
# Wrapper
# ----------------------------------------------------------------------------
def crossm_pallas(high_x1_nhwc, low_x2_nhwc, kp, pack=4):
    """kp: dict of BN-folded, kernel-layout parameters (see to_kernel_params)."""
    N, H, W, C = high_x1_nhwc.shape
    P = pack
    assert W % P == 0 and (H * W) % P == 0
    Rp, PC = (H * W) // P, P * C
    f32 = jnp.float32

    # Free row-major relayouts so the kernel sees lane-dense blocks.
    x2_packed = low_x2_nhwc.reshape(N, Rp, PC)

    def const_spec(shape):
        nd = len(shape)
        return pl.BlockSpec(shape, lambda n, _nd=nd: (0,) * _nd)

    out_packed = pl.pallas_call(
        crossm_kernel,
        out_shape=jax.ShapeDtypeStruct((N, Rp, PC), f32),
        grid=(N,),
        in_specs=[pl.BlockSpec((1, H, W, C), lambda n: (n, 0, 0, 0)),
                  pl.BlockSpec((1, Rp, PC), lambda n: (n, 0, 0)),
                  const_spec(kp["wc"].shape), const_spec(kp["bc"].shape),
                  const_spec(kp["w1"].shape), const_spec(kp["b1"].shape),
                  const_spec(kp["wdw"].shape), const_spec(kp["bdw"].shape),
                  const_spec(kp["w3"].shape), const_spec(kp["b3"].shape)],
        out_specs=pl.BlockSpec((1, Rp, PC), lambda n: (n, 0, 0)),
        scratch_shapes=[pltpu.VMEM((H + 2, W + 2, C), f32),        # padded x1
                        pltpu.VMEM((H * W, 9 * C), jnp.bfloat16),  # im2col bf16
                        pltpu.VMEM((H + 2, (W + 4) * C), f32)],    # padded t1
        compiler_params=pltpu.CompilerParams(
            dimension_semantics=("parallel",)),   # v7x: 2 TCs split the batch
    )(high_x1_nhwc, x2_packed,
      kp["wc"], kp["bc"], kp["w1"], kp["b1"],
      kp["wdw"], kp["bdw"], kp["w3"], kp["b3"])
    return out_packed.reshape(N, H, W, C)


# ----------------------------------------------------------------------------
# Deterministic parameter setup (PyTorch shapes), BN folding, layout conversion
# ----------------------------------------------------------------------------
EPS = 1e-5


def make_params(key, C):
    ks = jax.random.split(key, 16)
    n = lambda k, shape, s=0.1: s * jax.random.normal(k, shape, jnp.float32)

    def bn_params(k):
        k1, k2, k3, k4 = jax.random.split(k, 4)
        gamma = 1.0 + 0.1 * jax.random.normal(k1, (C,), jnp.float32)
        beta = 0.1 * jax.random.normal(k2, (C,), jnp.float32)
        mean = 0.1 * jax.random.normal(k3, (C,), jnp.float32)
        var = jax.random.uniform(k4, (C,), jnp.float32, 0.5, 1.5)
        return gamma, beta, mean, var

    return {
        # cross_l: ConvModule(C, C, 3, pad=1, bias=False because norm_cfg=BN)
        "wc": n(ks[0], (C, C, 3, 3)), "bnc": bn_params(ks[1]),
        # proj_l.conv1 1x1 (bias=True) + bn1
        "w1": n(ks[2], (C, C, 1, 1)), "b1": n(ks[3], (C,)), "bn1": bn_params(ks[4]),
        # proj_l.conv2 depthwise 3x3 (bias=False) + bn2
        "wdw": n(ks[5], (C, 1, 3, 3)), "bn2": bn_params(ks[6]),
        # proj_l.conv3 1x1 (bias=True) + bn3
        "w3": n(ks[7], (C, C, 1, 1)), "b3": n(ks[8], (C,)), "bn3": bn_params(ks[9]),
    }


def fold_conv_bn(w_oihw, b_o, bn):
    gamma, beta, mean, var = bn
    scale = gamma / jnp.sqrt(var + EPS)
    w = w_oihw * scale[:, None, None, None]
    if b_o is None:
        b_o = jnp.zeros_like(gamma)
    b = (b_o - mean) * scale + beta
    return w, b


def to_kernel_params(p, C, W, pack=4):
    """BN-fold and convert to kernel layouts (bf16 matmul weights, pre-tiled
    lane-dense biases / depthwise taps, block-diag packed 1x1 weights)."""
    P = pack
    wc, bc = fold_conv_bn(p["wc"], None, p["bnc"])
    w1, b1 = fold_conv_bn(p["w1"], p["b1"], p["bn1"])
    wdw, bdw = fold_conv_bn(p["wdw"], None, p["bn2"])
    w3, b3 = fold_conv_bn(p["w3"], p["b3"], p["bn3"])
    bf16 = jnp.bfloat16
    eye_p = jnp.eye(P, dtype=jnp.float32)
    w1_io = jnp.transpose(w1[:, :, 0, 0], (1, 0))      # (Cin, Cout)
    w3_io = jnp.transpose(w3[:, :, 0, 0], (1, 0))
    wdw_taps = jnp.transpose(wdw[:, 0, :, :], (1, 2, 0)).reshape(9, C)  # (t, C)
    return {
        # 3x3 full conv, im2col layout: OIHW -> (kh*kw*Cin, Cout), tap-major
        "wc": jnp.transpose(wc, (2, 3, 1, 0)).reshape(9 * C, C).astype(bf16),
        "bc": jnp.tile(bc, P).reshape(1, P * C),
        # 1x1 convs: (Cin, Cout) replicated block-diagonally P times, bf16
        "w1": jnp.kron(eye_p, w1_io).astype(bf16),
        "b1": jnp.tile(b1, P).reshape(1, P * C),
        # depthwise 3x3: per-tap per-channel weights tiled to lane width W*C
        "wdw": jnp.tile(wdw_taps, (1, W)).reshape(9, 1, W * C),
        "bdw": jnp.tile(bdw, W).reshape(1, W * C),
        "w3": jnp.kron(eye_p, w3_io).astype(bf16),
        "b3": jnp.tile(b3, P).reshape(1, P * C),
    }


# ----------------------------------------------------------------------------
# Pure-JAX reference (unfolded BN, lax.conv, all-f32) for verification
# ----------------------------------------------------------------------------
def conv_nhwc(x, w_oihw, padding, groups=1):
    w = jnp.transpose(w_oihw, (2, 3, 1, 0))  # OIHW -> HWIO
    return lax.conv_general_dilated(
        x, w, (1, 1), padding,
        dimension_numbers=("NHWC", "HWIO", "NHWC"),
        feature_group_count=groups)


def bn_inf(x, bn):
    gamma, beta, mean, var = bn
    return (x - mean) / jnp.sqrt(var + EPS) * gamma + beta


def ref_forward(x1, x2, p, C):
    y = bn_inf(conv_nhwc(x1, p["wc"], ((1, 1), (1, 1))), p["bnc"])
    h = jax.nn.relu(y + x2)
    t = jax.nn.relu(bn_inf(conv_nhwc(h, p["w1"], ((0, 0), (0, 0))) + p["b1"], p["bn1"]))
    t = jax.nn.relu(bn_inf(conv_nhwc(t, p["wdw"], ((1, 1), (1, 1)), groups=C), p["bn2"]))
    o = bn_inf(conv_nhwc(t, p["w3"], ((0, 0), (0, 0))) + p["b3"], p["bn3"])
    return jax.nn.relu(o + h)


# ----------------------------------------------------------------------------
if __name__ == "__main__":
    N, C, H, W = 2, 32, 16, 16   # mid_channels = 32

    key = jax.random.PRNGKey(0)
    k_in1, k_in2, k_par = jax.random.split(key, 3)

    # PyTorch-convention NCHW inputs; convert to NHWC for the kernel.
    high_x1_nchw = jax.random.normal(k_in1, (N, C, H, W), jnp.float32)
    low_x2_nchw = jax.random.normal(k_in2, (N, C, H, W), jnp.float32)
    high_x1 = jnp.transpose(high_x1_nchw, (0, 2, 3, 1))
    low_x2 = jnp.transpose(low_x2_nchw, (0, 2, 3, 1))

    params = make_params(k_par, C)
    kparams = to_kernel_params(params, C, W)

    out = jax.block_until_ready(crossm_pallas(high_x1, low_x2, kparams))
    ref = jax.block_until_ready(ref_forward(high_x1, low_x2, params, C))

    # Tolerance covers bf16 matmul operands (accumulation stays f32);
    # errors are O(1e-3..1e-2), bugs would be O(1).
    np.testing.assert_allclose(np.asarray(out), np.asarray(ref), rtol=2e-2, atol=2e-2)
    print("KERNEL_OK")
</pallas_src>

<mosaic_0001>
module attributes {stable_mosaic.version = 11 : i64} {
  func.func @crossm_kernel(%arg0: i32, %arg1: memref<1x16x16x32xf32, #tpu.memory_space<vmem>>, %arg2: memref<1x64x128xf32, #tpu.memory_space<vmem>>, %arg3: memref<288x32xbf16, #tpu.memory_space<vmem>>, %arg4: memref<1x128xf32, #tpu.memory_space<vmem>>, %arg5: memref<128x128xbf16, #tpu.memory_space<vmem>>, %arg6: memref<1x128xf32, #tpu.memory_space<vmem>>, %arg7: memref<9x1x512xf32, #tpu.memory_space<vmem>>, %arg8: memref<1x512xf32, #tpu.memory_space<vmem>>, %arg9: memref<128x128xbf16, #tpu.memory_space<vmem>>, %arg10: memref<1x128xf32, #tpu.memory_space<vmem>>, %arg11: memref<1x64x128xf32, #tpu.memory_space<vmem>>, %arg12: memref<18x18x32xf32, #tpu.memory_space<vmem>>, %arg13: memref<256x288xbf16, #tpu.memory_space<vmem>>, %arg14: memref<18x640xf32, #tpu.memory_space<vmem>>) attributes {dimension_semantics = [#tpu.dimension_semantics<parallel>], iteration_bounds = array<i64: 2>, scalar_prefetch = 0 : i64, scratch_operands = 3 : i64, tpu.core_type = #tpu.core_type<tc>, window_params = [{transform_indices = @transform_0, window_bounds = array<i64: 1, 16, 16, 32>}, {transform_indices = @transform_1, window_bounds = array<i64: 1, 64, 128>}, {pipeline_mode = #tpu.pipeline_mode<synchronous>, transform_indices = @transform_2, window_bounds = array<i64: 288, 32>}, {pipeline_mode = #tpu.pipeline_mode<synchronous>, transform_indices = @transform_3, window_bounds = array<i64: 1, 128>}, {pipeline_mode = #tpu.pipeline_mode<synchronous>, transform_indices = @transform_4, window_bounds = array<i64: 128, 128>}, {pipeline_mode = #tpu.pipeline_mode<synchronous>, transform_indices = @transform_5, window_bounds = array<i64: 1, 128>}, {pipeline_mode = #tpu.pipeline_mode<synchronous>, transform_indices = @transform_6, window_bounds = array<i64: 9, 1, 512>}, {pipeline_mode = #tpu.pipeline_mode<synchronous>, transform_indices = @transform_7, window_bounds = array<i64: 1, 512>}, {pipeline_mode = #tpu.pipeline_mode<synchronous>, transform_indices = @transform_8, window_bounds = array<i64: 128, 128>}, {pipeline_mode = #tpu.pipeline_mode<synchronous>, transform_indices = @transform_9, window_bounds = array<i64: 1, 128>}, {transform_indices = @transform_10, window_bounds = array<i64: 1, 64, 128>}]} {
    %cst = arith.constant 0.000000e+00 : f32
    %0 = vector.broadcast %cst : f32 to vector<1x18x32xf32>
    %cst_0 = arith.constant 0.000000e+00 : f32
    %1 = vector.broadcast %cst_0 : f32 to vector<18x1x32xf32>
    %c0 = arith.constant 0 : index
    %c0_1 = arith.constant 0 : index
    %c0_2 = arith.constant 0 : index
    %2 = vector.load %arg12[%c0, %c0_1, %c0_2] : memref<18x18x32xf32, #tpu.memory_space<vmem>>, vector<1x18x32xf32>
    tpu.vector_store %arg12[%c0, %c0_1, %c0_2], %0 {strides = array<i32>} : memref<18x18x32xf32, #tpu.memory_space<vmem>>, vector<1x18x32xf32>,
    %c17 = arith.constant 17 : index
    %c0_3 = arith.constant 0 : index
    %c0_4 = arith.constant 0 : index
    %3 = vector.load %arg12[%c17, %c0_3, %c0_4] : memref<18x18x32xf32, #tpu.memory_space<vmem>>, vector<1x18x32xf32>
    tpu.vector_store %arg12[%c17, %c0_3, %c0_4], %0 {strides = array<i32>} : memref<18x18x32xf32, #tpu.memory_space<vmem>>, vector<1x18x32xf32>,
    %c0_5 = arith.constant 0 : index
    %c0_6 = arith.constant 0 : index
    %c0_7 = arith.constant 0 : index
    %4 = vector.load %arg12[%c0_5, %c0_6, %c0_7] : memref<18x18x32xf32, #tpu.memory_space<vmem>>, vector<18x1x32xf32>
    tpu.vector_store %arg12[%c0_5, %c0_6, %c0_7], %1 {strides = array<i32>} : memref<18x18x32xf32, #tpu.memory_space<vmem>>, vector<18x1x32xf32>,
    %c0_8 = arith.constant 0 : index
    %c17_9 = arith.constant 17 : index
    %c0_10 = arith.constant 0 : index
    %5 = vector.load %arg12[%c0_8, %c17_9, %c0_10] : memref<18x18x32xf32, #tpu.memory_space<vmem>>, vector<18x1x32xf32>
    tpu.vector_store %arg12[%c0_8, %c17_9, %c0_10], %1 {strides = array<i32>} : memref<18x18x32xf32, #tpu.memory_space<vmem>>, vector<18x1x32xf32>,
    %c0_11 = arith.constant 0 : index
    %c0_12 = arith.constant 0 : index
    %c0_13 = arith.constant 0 : index
    %c0_14 = arith.constant 0 : index
    %6 = vector.load %arg1[%c0_11, %c0_12, %c0_13, %c0_14] : memref<1x16x16x32xf32, #tpu.memory_space<vmem>>, vector<1x16x16x32xf32>
    %7 = vector.shape_cast %6 : vector<1x16x16x32xf32> to vector<16x16x32xf32>
    %c1 = arith.constant 1 : index
    %c1_15 = arith.constant 1 : index
    %c0_16 = arith.constant 0 : index
    %8 = vector.load %arg12[%c1, %c1_15, %c0_16] : memref<18x18x32xf32, #tpu.memory_space<vmem>>, vector<16x16x32xf32>
    tpu.vector_store %arg12[%c1, %c1_15, %c0_16], %7 {strides = array<i32>} : memref<18x18x32xf32, #tpu.memory_space<vmem>>, vector<16x16x32xf32>,
    %c0_17 = arith.constant 0 : index
    %c0_18 = arith.constant 0 : index
    %c0_19 = arith.constant 0 : index
    %9 = vector.load %arg12[%c0_17, %c0_18, %c0_19] : memref<18x18x32xf32, #tpu.memory_space<vmem>>, vector<16x16x32xf32>
    %10 = vector.shape_cast %9 : vector<16x16x32xf32> to vector<256x32xf32>
    %11 = arith.truncf %10 : vector<256x32xf32> to vector<256x32xbf16>
    %c0_20 = arith.constant 0 : index
    %c0_21 = arith.constant 0 : index
    %12 = vector.load %arg13[%c0_20, %c0_21] : memref<256x288xbf16, #tpu.memory_space<vmem>>, vector<256x32xbf16>
    tpu.vector_store %arg13[%c0_20, %c0_21], %11 {strides = array<i32>} : memref<256x288xbf16, #tpu.memory_space<vmem>>, vector<256x32xbf16>,
    %c0_22 = arith.constant 0 : index
    %c1_23 = arith.constant 1 : index
    %c0_24 = arith.constant 0 : index
    %13 = vector.load %arg12[%c0_22, %c1_23, %c0_24] : memref<18x18x32xf32, #tpu.memory_space<vmem>>, vector<16x16x32xf32>
    %14 = vector.shape_cast %13 : vector<16x16x32xf32> to vector<256x32xf32>
    %15 = arith.truncf %14 : vector<256x32xf32> to vector<256x32xbf16>
    %c0_25 = arith.constant 0 : index
    %c32 = arith.constant 32 : index
    %16 = vector.load %arg13[%c0_25, %c32] : memref<256x288xbf16, #tpu.memory_space<vmem>>, vector<256x32xbf16>
    tpu.vector_store %arg13[%c0_25, %c32], %15 {strides = array<i32>} : memref<256x288xbf16, #tpu.memory_space<vmem>>, vector<256x32xbf16>,
    %c0_26 = arith.constant 0 : index
    %c2 = arith.constant 2 : index
    %c0_27 = arith.constant 0 : index
    %17 = vector.load %arg12[%c0_26, %c2, %c0_27] : memref<18x18x32xf32, #tpu.memory_space<vmem>>, vector<16x16x32xf32>
    %18 = vector.shape_cast %17 : vector<16x16x32xf32> to vector<256x32xf32>
    %19 = arith.truncf %18 : vector<256x32xf32> to vector<256x32xbf16>
    %c0_28 = arith.constant 0 : index
    %c64 = arith.constant 64 : index
    %20 = vector.load %arg13[%c0_28, %c64] : memref<256x288xbf16, #tpu.memory_space<vmem>>, vector<256x32xbf16>
    tpu.vector_store %arg13[%c0_28, %c64], %19 {strides = array<i32>} : memref<256x288xbf16, #tpu.memory_space<vmem>>, vector<256x32xbf16>,
    %c1_29 = arith.constant 1 : index
    %c0_30 = arith.constant 0 : index
    %c0_31 = arith.constant 0 : index
    %21 = vector.load %arg12[%c1_29, %c0_30, %c0_31] : memref<18x18x32xf32, #tpu.memory_space<vmem>>, vector<16x16x32xf32>
    %22 = vector.shape_cast %21 : vector<16x16x32xf32> to vector<256x32xf32>
    %23 = arith.truncf %22 : vector<256x32xf32> to vector<256x32xbf16>
    %c0_32 = arith.constant 0 : index
    %c96 = arith.constant 96 : index
    %24 = vector.load %arg13[%c0_32, %c96] : memref<256x288xbf16, #tpu.memory_space<vmem>>, vector<256x32xbf16>
    tpu.vector_store %arg13[%c0_32, %c96], %23 {strides = array<i32>} : memref<256x288xbf16, #tpu.memory_space<vmem>>, vector<256x32xbf16>,
    %c1_33 = arith.constant 1 : index
    %c1_34 = arith.constant 1 : index
    %c0_35 = arith.constant 0 : index
    %25 = vector.load %arg12[%c1_33, %c1_34, %c0_35] : memref<18x18x32xf32, #tpu.memory_space<vmem>>, vector<16x16x32xf32>
    %26 = vector.shape_cast %25 : vector<16x16x32xf32> to vector<256x32xf32>
    %27 = arith.truncf %26 : vector<256x32xf32> to vector<256x32xbf16>
    %c0_36 = arith.constant 0 : index
    %c128 = arith.constant 128 : index
    %28 = vector.load %arg13[%c0_36, %c128] : memref<256x288xbf16, #tpu.memory_space<vmem>>, vector<256x32xbf16>
    tpu.vector_store %arg13[%c0_36, %c128], %27 {strides = array<i32>} : memref<256x288xbf16, #tpu.memory_space<vmem>>, vector<256x32xbf16>,
    %c1_37 = arith.constant 1 : index
    %c2_38 = arith.constant 2 : index
    %c0_39 = arith.constant 0 : index
    %29 = vector.load %arg12[%c1_37, %c2_38, %c0_39] : memref<18x18x32xf32, #tpu.memory_space<vmem>>, vector<16x16x32xf32>
    %30 = vector.shape_cast %29 : vector<16x16x32xf32> to vector<256x32xf32>
    %31 = arith.truncf %30 : vector<256x32xf32> to vector<256x32xbf16>
    %c0_40 = arith.constant 0 : index
    %c160 = arith.constant 160 : index
    %32 = vector.load %arg13[%c0_40, %c160] : memref<256x288xbf16, #tpu.memory_space<vmem>>, vector<256x32xbf16>
    tpu.vector_store %arg13[%c0_40, %c160], %31 {strides = array<i32>} : memref<256x288xbf16, #tpu.memory_space<vmem>>, vector<256x32xbf16>,
    %c2_41 = arith.constant 2 : index
    %c0_42 = arith.constant 0 : index
    %c0_43 = arith.constant 0 : index
    %33 = vector.load %arg12[%c2_41, %c0_42, %c0_43] : memref<18x18x32xf32, #tpu.memory_space<vmem>>, vector<16x16x32xf32>
    %34 = vector.shape_cast %33 : vector<16x16x32xf32> to vector<256x32xf32>
    %35 = arith.truncf %34 : vector<256x32xf32> to vector<256x32xbf16>
    %c0_44 = arith.constant 0 : index
    %c192 = arith.constant 192 : index
    %36 = vector.load %arg13[%c0_44, %c192] : memref<256x288xbf16, #tpu.memory_space<vmem>>, vector<256x32xbf16>
    tpu.vector_store %arg13[%c0_44, %c192], %35 {strides = array<i32>} : memref<256x288xbf16, #tpu.memory_space<vmem>>, vector<256x32xbf16>,
    %c2_45 = arith.constant 2 : index
    %c1_46 = arith.constant 1 : index
    %c0_47 = arith.constant 0 : index
    %37 = vector.load %arg12[%c2_45, %c1_46, %c0_47] : memref<18x18x32xf32, #tpu.memory_space<vmem>>, vector<16x16x32xf32>
    %38 = vector.shape_cast %37 : vector<16x16x32xf32> to vector<256x32xf32>
    %39 = arith.truncf %38 : vector<256x32xf32> to vector<256x32xbf16>
    %c0_48 = arith.constant 0 : index
    %c224 = arith.constant 224 : index
    %40 = vector.load %arg13[%c0_48, %c224] : memref<256x288xbf16, #tpu.memory_space<vmem>>, vector<256x32xbf16>
    tpu.vector_store %arg13[%c0_48, %c224], %39 {strides = array<i32>} : memref<256x288xbf16, #tpu.memory_space<vmem>>, vector<256x32xbf16>,
    %c2_49 = arith.constant 2 : index
    %c2_50 = arith.constant 2 : index
    %c0_51 = arith.constant 0 : index
    %41 = vector.load %arg12[%c2_49, %c2_50, %c0_51] : memref<18x18x32xf32, #tpu.memory_space<vmem>>, vector<16x16x32xf32>
    %42 = vector.shape_cast %41 : vector<16x16x32xf32> to vector<256x32xf32>
    %43 = arith.truncf %42 : vector<256x32xf32> to vector<256x32xbf16>
    %c0_52 = arith.constant 0 : index
    %c256 = arith.constant 256 : index
    %44 = vector.load %arg13[%c0_52, %c256] : memref<256x288xbf16, #tpu.memory_space<vmem>>, vector<256x32xbf16>
    tpu.vector_store %arg13[%c0_52, %c256], %43 {strides = array<i32>} : memref<256x288xbf16, #tpu.memory_space<vmem>>, vector<256x32xbf16>,
    %c0_53 = arith.constant 0 : index
    %c0_54 = arith.constant 0 : index
    %45 = vector.load %arg13[%c0_53, %c0_54] : memref<256x288xbf16, #tpu.memory_space<vmem>>, vector<256x288xbf16>
    %c0_55 = arith.constant 0 : index
    %c0_56 = arith.constant 0 : index
    %46 = vector.load %arg3[%c0_55, %c0_56] : memref<288x32xbf16, #tpu.memory_space<vmem>>, vector<288x32xbf16>
    %cst_57 = arith.constant dense<0.000000e+00> : vector<256x32xf32>
    %47 = tpu.matmul %45, %46, %cst_57 {dimension_numbers = #tpu.dot_dimension_numbers<[1], [0], [0], [1], [0, 0, 1, 1], [], []>} : vector<256x288xbf16>, vector<288x32xbf16>, vector<256x32xf32> -> vector<256x32xf32>
    %48 = vector.shape_cast %47 : vector<256x32xf32> to vector<64x4x32xf32>
    %49 = vector.extract_strided_slice %48 {offsets = [0, 0, 0], sizes = [64, 1, 32], strides = [1, 1, 1]} : vector<64x4x32xf32> to vector<64x1x32xf32>
    %50 = vector.shape_cast %49 : vector<64x1x32xf32> to vector<64x32xf32>
    %51 = vector.shape_cast %47 : vector<256x32xf32> to vector<64x4x32xf32>
    %52 = vector.extract_strided_slice %51 {offsets = [0, 1, 0], sizes = [64, 1, 32], strides = [1, 1, 1]} : vector<64x4x32xf32> to vector<64x1x32xf32>
    %53 = vector.shape_cast %52 : vector<64x1x32xf32> to vector<64x32xf32>
    %54 = vector.shape_cast %47 : vector<256x32xf32> to vector<64x4x32xf32>
    %55 = vector.extract_strided_slice %54 {offsets = [0, 2, 0], sizes = [64, 1, 32], strides = [1, 1, 1]} : vector<64x4x32xf32> to vector<64x1x32xf32>
    %56 = vector.shape_cast %55 : vector<64x1x32xf32> to vector<64x32xf32>
    %57 = vector.shape_cast %47 : vector<256x32xf32> to vector<64x4x32xf32>
    %58 = vector.extract_strided_slice %57 {offsets = [0, 3, 0], sizes = [64, 1, 32], strides = [1, 1, 1]} : vector<64x4x32xf32> to vector<64x1x32xf32>
    %59 = vector.shape_cast %58 : vector<64x1x32xf32> to vector<64x32xf32>
    %60 = tpu.concatenate %50, %53, %56, %59 in 1 : vector<64x32xf32>, vector<64x32xf32>, vector<64x32xf32>, vector<64x32xf32> -> vector<64x128xf32>
    %c0_58 = arith.constant 0 : index
    %c0_59 = arith.constant 0 : index
    %61 = vector.load %arg4[%c0_58, %c0_59] : memref<1x128xf32, #tpu.memory_space<vmem>>, vector<1x128xf32>
    %62 = vector.broadcast %61 : vector<1x128xf32> to vector<64x128xf32>
    %63 = arith.addf %60, %62 : vector<64x128xf32>
    %c0_60 = arith.constant 0 : index
    %c0_61 = arith.constant 0 : index
    %c0_62 = arith.constant 0 : index
    %64 = vector.load %arg2[%c0_60, %c0_61, %c0_62] : memref<1x64x128xf32, #tpu.memory_space<vmem>>, vector<1x64x128xf32>
    %65 = vector.shape_cast %64 : vector<1x64x128xf32> to vector<64x128xf32>
    %66 = arith.addf %63, %65 : vector<64x128xf32>
    %cst_63 = arith.constant 0.000000e+00 : f32
    %67 = vector.broadcast %cst_63 : f32 to vector<64x128xf32>
    %68 = arith.maximumf %66, %67 : vector<64x128xf32>
    %69 = arith.truncf %68 : vector<64x128xf32> to vector<64x128xbf16>
    %c0_64 = arith.constant 0 : index
    %c0_65 = arith.constant 0 : index
    %70 = vector.load %arg5[%c0_64, %c0_65] : memref<128x128xbf16, #tpu.memory_space<vmem>>, vector<128x128xbf16>
    %cst_66 = arith.constant dense<0.000000e+00> : vector<64x128xf32>
    %71 = tpu.matmul %69, %70, %cst_66 {dimension_numbers = #tpu.dot_dimension_numbers<[1], [0], [0], [1], [0, 0, 1, 1], [], []>} : vector<64x128xbf16>, vector<128x128xbf16>, vector<64x128xf32> -> vector<64x128xf32>
    %c0_67 = arith.constant 0 : index
    %c0_68 = arith.constant 0 : index
    %72 = vector.load %arg6[%c0_67, %c0_68] : memref<1x128xf32, #tpu.memory_space<vmem>>, vector<1x128xf32>
    %73 = vector.broadcast %72 : vector<1x128xf32> to vector<64x128xf32>
    %74 = arith.addf %71, %73 : vector<64x128xf32>
    %cst_69 = arith.constant 0.000000e+00 : f32
    %75 = vector.broadcast %cst_69 : f32 to vector<64x128xf32>
    %76 = arith.maximumf %74, %75 : vector<64x128xf32>
    %cst_70 = arith.constant 0.000000e+00 : f32
    %77 = vector.broadcast %cst_70 : f32 to vector<1x640xf32>
    %c0_71 = arith.constant 0 : index
    %c0_72 = arith.constant 0 : index
    %78 = vector.load %arg14[%c0_71, %c0_72] : memref<18x640xf32, #tpu.memory_space<vmem>>, vector<1x640xf32>
    tpu.vector_store %arg14[%c0_71, %c0_72], %77 {strides = array<i32>} : memref<18x640xf32, #tpu.memory_space<vmem>>, vector<1x640xf32>,
    %cst_73 = arith.constant 0.000000e+00 : f32
    %79 = vector.broadcast %cst_73 : f32 to vector<1x640xf32>
    %c17_74 = arith.constant 17 : index
    %c0_75 = arith.constant 0 : index
    %80 = vector.load %arg14[%c17_74, %c0_75] : memref<18x640xf32, #tpu.memory_space<vmem>>, vector<1x640xf32>
    tpu.vector_store %arg14[%c17_74, %c0_75], %79 {strides = array<i32>} : memref<18x640xf32, #tpu.memory_space<vmem>>, vector<1x640xf32>,
    %cst_76 = arith.constant 0.000000e+00 : f32
    %81 = vector.broadcast %cst_76 : f32 to vector<18x32xf32>
    %c0_77 = arith.constant 0 : index
    %c0_78 = arith.constant 0 : index
    %82 = vector.load %arg14[%c0_77, %c0_78] : memref<18x640xf32, #tpu.memory_space<vmem>>, vector<18x32xf32>
    tpu.vector_store %arg14[%c0_77, %c0_78], %81 {strides = array<i32>} : memref<18x640xf32, #tpu.memory_space<vmem>>, vector<18x32xf32>,
    %cst_79 = arith.constant 0.000000e+00 : f32
    %83 = vector.broadcast %cst_79 : f32 to vector<18x96xf32>
    %c0_80 = arith.constant 0 : index
    %c544 = arith.constant 544 : index
    %84 = vector.load %arg14[%c0_80, %c544] : memref<18x640xf32, #tpu.memory_space<vmem>>, vector<18x96xf32>
    tpu.vector_store %arg14[%c0_80, %c544], %83 {strides = array<i32>} : memref<18x640xf32, #tpu.memory_space<vmem>>, vector<18x96xf32>,
    %85 = vector.shape_cast %76 : vector<64x128xf32> to vector<16x4x128xf32>
    %86 = vector.extract_strided_slice %85 {offsets = [0, 0, 0], sizes = [16, 1, 128], strides = [1, 1, 1]} : vector<16x4x128xf32> to vector<16x1x128xf32>
    %87 = vector.shape_cast %86 : vector<16x1x128xf32> to vector<16x128xf32>
    %88 = vector.extract_strided_slice %85 {offsets = [0, 1, 0], sizes = [16, 1, 128], strides = [1, 1, 1]} : vector<16x4x128xf32> to vector<16x1x128xf32>
    %89 = vector.shape_cast %88 : vector<16x1x128xf32> to vector<16x128xf32>
    %90 = vector.extract_strided_slice %85 {offsets = [0, 2, 0], sizes = [16, 1, 128], strides = [1, 1, 1]} : vector<16x4x128xf32> to vector<16x1x128xf32>
    %91 = vector.shape_cast %90 : vector<16x1x128xf32> to vector<16x128xf32>
    %92 = vector.extract_strided_slice %85 {offsets = [0, 3, 0], sizes = [16, 1, 128], strides = [1, 1, 1]} : vector<16x4x128xf32> to vector<16x1x128xf32>
    %93 = vector.shape_cast %92 : vector<16x1x128xf32> to vector<16x128xf32>
    %94 = tpu.concatenate %87, %89, %91, %93 in 1 : vector<16x128xf32>, vector<16x128xf32>, vector<16x128xf32>, vector<16x128xf32> -> vector<16x512xf32>
    %c1_81 = arith.constant 1 : index
    %c32_82 = arith.constant 32 : index
    %95 = vector.load %arg14[%c1_81, %c32_82] : memref<18x640xf32, #tpu.memory_space<vmem>>, vector<16x512xf32>
    tpu.vector_store %arg14[%c1_81, %c32_82], %94 {strides = array<i32>} : memref<18x640xf32, #tpu.memory_space<vmem>>, vector<16x512xf32>,
    %c0_83 = arith.constant 0 : index
    %c0_84 = arith.constant 0 : index
    %96 = vector.load %arg14[%c0_83, %c0_84] : memref<18x640xf32, #tpu.memory_space<vmem>>, vector<16x640xf32>
    %97 = vector.extract_strided_slice %96 {offsets = [0, 0], sizes = [16, 512], strides = [1, 1]} : vector<16x640xf32> to vector<16x512xf32>
    %c0_85 = arith.constant 0 : index
    %c0_86 = arith.constant 0 : index
    %c0_87 = arith.constant 0 : index
    %98 = vector.load %arg7[%c0_85, %c0_86, %c0_87] : memref<9x1x512xf32, #tpu.memory_space<vmem>>, vector<1x1x512xf32>
    %99 = vector.shape_cast %98 : vector<1x1x512xf32> to vector<1x512xf32>
    %100 = vector.broadcast %99 : vector<1x512xf32> to vector<16x512xf32>
    %101 = arith.mulf %97, %100 : vector<16x512xf32>
    %102 = vector.extract_strided_slice %96 {offsets = [0, 32], sizes = [16, 512], strides = [1, 1]} : vector<16x640xf32> to vector<16x512xf32>
    %c1_88 = arith.constant 1 : index
    %c0_89 = arith.constant 0 : index
    %c0_90 = arith.constant 0 : index
    %103 = vector.load %arg7[%c1_88, %c0_89, %c0_90] : memref<9x1x512xf32, #tpu.memory_space<vmem>>, vector<1x1x512xf32>
    %104 = vector.shape_cast %103 : vector<1x1x512xf32> to vector<1x512xf32>
    %105 = vector.broadcast %104 : vector<1x512xf32> to vector<16x512xf32>
    %106 = arith.mulf %102, %105 : vector<16x512xf32>
    %107 = arith.addf %101, %106 : vector<16x512xf32>
    %108 = vector.extract_strided_slice %96 {offsets = [0, 64], sizes = [16, 512], strides = [1, 1]} : vector<16x640xf32> to vector<16x512xf32>
    %c2_91 = arith.constant 2 : index
    %c0_92 = arith.constant 0 : index
    %c0_93 = arith.constant 0 : index
    %109 = vector.load %arg7[%c2_91, %c0_92, %c0_93] : memref<9x1x512xf32, #tpu.memory_space<vmem>>, vector<1x1x512xf32>
    %110 = vector.shape_cast %109 : vector<1x1x512xf32> to vector<1x512xf32>
    %111 = vector.broadcast %110 : vector<1x512xf32> to vector<16x512xf32>
    %112 = arith.mulf %108, %111 : vector<16x512xf32>
    %113 = arith.addf %107, %112 : vector<16x512xf32>
    %c1_94 = arith.constant 1 : index
    %c0_95 = arith.constant 0 : index
    %114 = vector.load %arg14[%c1_94, %c0_95] : memref<18x640xf32, #tpu.memory_space<vmem>>, vector<16x640xf32>
    %115 = vector.extract_strided_slice %114 {offsets = [0, 0], sizes = [16, 512], strides = [1, 1]} : vector<16x640xf32> to vector<16x512xf32>
    %c3 = arith.constant 3 : index
    %c0_96 = arith.constant 0 : index
    %c0_97 = arith.constant 0 : index
    %116 = vector.load %arg7[%c3, %c0_96, %c0_97] : memref<9x1x512xf32, #tpu.memory_space<vmem>>, vector<1x1x512xf32>
    %117 = vector.shape_cast %116 : vector<1x1x512xf32> to vector<1x512xf32>
    %118 = vector.broadcast %117 : vector<1x512xf32> to vector<16x512xf32>
    %119 = arith.mulf %115, %118 : vector<16x512xf32>
    %120 = arith.addf %113, %119 : vector<16x512xf32>
    %121 = vector.extract_strided_slice %114 {offsets = [0, 32], sizes = [16, 512], strides = [1, 1]} : vector<16x640xf32> to vector<16x512xf32>
    %c4 = arith.constant 4 : index
    %c0_98 = arith.constant 0 : index
    %c0_99 = arith.constant 0 : index
    %122 = vector.load %arg7[%c4, %c0_98, %c0_99] : memref<9x1x512xf32, #tpu.memory_space<vmem>>, vector<1x1x512xf32>
    %123 = vector.shape_cast %122 : vector<1x1x512xf32> to vector<1x512xf32>
    %124 = vector.broadcast %123 : vector<1x512xf32> to vector<16x512xf32>
    %125 = arith.mulf %121, %124 : vector<16x512xf32>
    %126 = arith.addf %120, %125 : vector<16x512xf32>
    %127 = vector.extract_strided_slice %114 {offsets = [0, 64], sizes = [16, 512], strides = [1, 1]} : vector<16x640xf32> to vector<16x512xf32>
    %c5 = arith.constant 5 : index
    %c0_100 = arith.constant 0 : index
    %c0_101 = arith.constant 0 : index
    %128 = vector.load %arg7[%c5, %c0_100, %c0_101] : memref<9x1x512xf32, #tpu.memory_space<vmem>>, vector<1x1x512xf32>
    %129 = vector.shape_cast %128 : vector<1x1x512xf32> to vector<1x512xf32>
    %130 = vector.broadcast %129 : vector<1x512xf32> to vector<16x512xf32>
    %131 = arith.mulf %127, %130 : vector<16x512xf32>
    %132 = arith.addf %126, %131 : vector<16x512xf32>
    %c2_102 = arith.constant 2 : index
    %c0_103 = arith.constant 0 : index
    %133 = vector.load %arg14[%c2_102, %c0_103] : memref<18x640xf32, #tpu.memory_space<vmem>>, vector<16x640xf32>
    %134 = vector.extract_strided_slice %133 {offsets = [0, 0], sizes = [16, 512], strides = [1, 1]} : vector<16x640xf32> to vector<16x512xf32>
    %c6 = arith.constant 6 : index
    %c0_104 = arith.constant 0 : index
    %c0_105 = arith.constant 0 : index
    %135 = vector.load %arg7[%c6, %c0_104, %c0_105] : memref<9x1x512xf32, #tpu.memory_space<vmem>>, vector<1x1x512xf32>
    %136 = vector.shape_cast %135 : vector<1x1x512xf32> to vector<1x512xf32>
    %137 = vector.broadcast %136 : vector<1x512xf32> to vector<16x512xf32>
    %138 = arith.mulf %134, %137 : vector<16x512xf32>
    %139 = arith.addf %132, %138 : vector<16x512xf32>
    %140 = vector.extract_strided_slice %133 {offsets = [0, 32], sizes = [16, 512], strides = [1, 1]} : vector<16x640xf32> to vector<16x512xf32>
    %c7 = arith.constant 7 : index
    %c0_106 = arith.constant 0 : index
    %c0_107 = arith.constant 0 : index
    %141 = vector.load %arg7[%c7, %c0_106, %c0_107] : memref<9x1x512xf32, #tpu.memory_space<vmem>>, vector<1x1x512xf32>
    %142 = vector.shape_cast %141 : vector<1x1x512xf32> to vector<1x512xf32>
    %143 = vector.broadcast %142 : vector<1x512xf32> to vector<16x512xf32>
    %144 = arith.mulf %140, %143 : vector<16x512xf32>
    %145 = arith.addf %139, %144 : vector<16x512xf32>
    %146 = vector.extract_strided_slice %133 {offsets = [0, 64], sizes = [16, 512], strides = [1, 1]} : vector<16x640xf32> to vector<16x512xf32>
    %c8 = arith.constant 8 : index
    %c0_108 = arith.constant 0 : index
    %c0_109 = arith.constant 0 : index
    %147 = vector.load %arg7[%c8, %c0_108, %c0_109] : memref<9x1x512xf32, #tpu.memory_space<vmem>>, vector<1x1x512xf32>
    %148 = vector.shape_cast %147 : vector<1x1x512xf32> to vector<1x512xf32>
    %149 = vector.broadcast %148 : vector<1x512xf32> to vector<16x512xf32>
    %150 = arith.mulf %146, %149 : vector<16x512xf32>
    %151 = arith.addf %145, %150 : vector<16x512xf32>
    %c0_110 = arith.constant 0 : index
    %c0_111 = arith.constant 0 : index
    %152 = vector.load %arg8[%c0_110, %c0_111] : memref<1x512xf32, #tpu.memory_space<vmem>>, vector<1x512xf32>
    %153 = vector.broadcast %152 : vector<1x512xf32> to vector<16x512xf32>
    %154 = arith.addf %151, %153 : vector<16x512xf32>
    %cst_112 = arith.constant 0.000000e+00 : f32
    %155 = vector.broadcast %cst_112 : f32 to vector<16x512xf32>
    %156 = arith.maximumf %154, %155 : vector<16x512xf32>
    %157 = vector.extract_strided_slice %156 {offsets = [0, 0], sizes = [16, 128], strides = [1, 1]} : vector<16x512xf32> to vector<16x128xf32>
    %158 = vector.shape_cast %157 : vector<16x128xf32> to vector<16x1x128xf32>
    %159 = vector.extract_strided_slice %156 {offsets = [0, 128], sizes = [16, 128], strides = [1, 1]} : vector<16x512xf32> to vector<16x128xf32>
    %160 = vector.shape_cast %159 : vector<16x128xf32> to vector<16x1x128xf32>
    %161 = vector.extract_strided_slice %156 {offsets = [0, 256], sizes = [16, 128], strides = [1, 1]} : vector<16x512xf32> to vector<16x128xf32>
    %162 = vector.shape_cast %161 : vector<16x128xf32> to vector<16x1x128xf32>
    %163 = vector.extract_strided_slice %156 {offsets = [0, 384], sizes = [16, 128], strides = [1, 1]} : vector<16x512xf32> to vector<16x128xf32>
    %164 = vector.shape_cast %163 : vector<16x128xf32> to vector<16x1x128xf32>
    %165 = tpu.concatenate %158, %160, %162, %164 in 1 : vector<16x1x128xf32>, vector<16x1x128xf32>, vector<16x1x128xf32>, vector<16x1x128xf32> -> vector<16x4x128xf32>
    %166 = vector.shape_cast %165 : vector<16x4x128xf32> to vector<64x128xf32>
    %167 = arith.truncf %166 : vector<64x128xf32> to vector<64x128xbf16>
    %c0_113 = arith.constant 0 : index
    %c0_114 = arith.constant 0 : index
    %168 = vector.load %arg9[%c0_113, %c0_114] : memref<128x128xbf16, #tpu.memory_space<vmem>>, vector<128x128xbf16>
    %cst_115 = arith.constant dense<0.000000e+00> : vector<64x128xf32>
    %169 = tpu.matmul %167, %168, %cst_115 {dimension_numbers = #tpu.dot_dimension_numbers<[1], [0], [0], [1], [0, 0, 1, 1], [], []>} : vector<64x128xbf16>, vector<128x128xbf16>, vector<64x128xf32> -> vector<64x128xf32>
    %c0_116 = arith.constant 0 : index
    %c0_117 = arith.constant 0 : index
    %170 = vector.load %arg10[%c0_116, %c0_117] : memref<1x128xf32, #tpu.memory_space<vmem>>, vector<1x128xf32>
    %171 = vector.broadcast %170 : vector<1x128xf32> to vector<64x128xf32>
    %172 = arith.addf %169, %171 : vector<64x128xf32>
    %173 = arith.addf %172, %68 : vector<64x128xf32>
    %cst_118 = arith.constant 0.000000e+00 : f32
    %174 = vector.broadcast %cst_118 : f32 to vector<64x128xf32>
    %175 = arith.maximumf %173, %174 : vector<64x128xf32>
    %c0_119 = arith.constant 0 : index
    %c0_120 = arith.constant 0 : index
    %c0_121 = arith.constant 0 : index
    %176 = vector.load %arg11[%c0_119, %c0_120, %c0_121] : memref<1x64x128xf32, #tpu.memory_space<vmem>>, vector<1x64x128xf32>
    %177 = vector.shape_cast %176 : vector<1x64x128xf32> to vector<64x128xf32>
    %178 = vector.shape_cast %175 : vector<64x128xf32> to vector<1x64x128xf32>
    tpu.vector_store %arg11[%c0_119, %c0_120, %c0_121], %178 {strides = array<i32>} : memref<1x64x128xf32, #tpu.memory_space<vmem>>, vector<1x64x128xf32>,
    return
  }
  func.func @transform_0(%arg0: i32) -> (i32, i32, i32, i32) {
    %c0_i32 = arith.constant 0 : i32
    %c0_i32_0 = arith.constant 0 : i32
    %c0_i32_1 = arith.constant 0 : i32
    %c0_i32_2 = arith.constant 0 : i32
    return %arg0, %c0_i32, %c0_i32_0, %c0_i32_1 : i32, i32, i32, i32
  }
  func.func @transform_1(%arg0: i32) -> (i32, i32, i32) {
    %c0_i32 = arith.constant 0 : i32
    %c0_i32_0 = arith.constant 0 : i32
    %c0_i32_1 = arith.constant 0 : i32
    return %arg0, %c0_i32, %c0_i32_0 : i32, i32, i32
  }
  func.func @transform_2(%arg0: i32) -> (i32, i32) {
    %c0_i32 = arith.constant 0 : i32
    %c0_i32_0 = arith.constant 0 : i32
    %c0_i32_1 = arith.constant 0 : i32
    return %c0_i32, %c0_i32_0 : i32, i32
  }
  func.func @transform_3(%arg0: i32) -> (i32, i32) {
    %c0_i32 = arith.constant 0 : i32
    %c0_i32_0 = arith.constant 0 : i32
    %c0_i32_1 = arith.constant 0 : i32
    return %c0_i32, %c0_i32_0 : i32, i32
  }
  func.func @transform_4(%arg0: i32) -> (i32, i32) {
    %c0_i32 = arith.constant 0 : i32
    %c0_i32_0 = arith.constant 0 : i32
    %c0_i32_1 = arith.constant 0 : i32
    return %c0_i32, %c0_i32_0 : i32, i32
  }
  func.func @transform_5(%arg0: i32) -> (i32, i32) {
    %c0_i32 = arith.constant 0 : i32
    %c0_i32_0 = arith.constant 0 : i32
    %c0_i32_1 = arith.constant 0 : i32
    return %c0_i32, %c0_i32_0 : i32, i32
  }
  func.func @transform_6(%arg0: i32) -> (i32, i32, i32) {
    %c0_i32 = arith.constant 0 : i32
    %c0_i32_0 = arith.constant 0 : i32
    %c0_i32_1 = arith.constant 0 : i32
    %c0_i32_2 = arith.constant 0 : i32
    return %c0_i32, %c0_i32_0, %c0_i32_1 : i32, i32, i32
  }
  func.func @transform_7(%arg0: i32) -> (i32, i32) {
    %c0_i32 = arith.constant 0 : i32
    %c0_i32_0 = arith.constant 0 : i32
    %c0_i32_1 = arith.constant 0 : i32
    return %c0_i32, %c0_i32_0 : i32, i32
  }
  func.func @transform_8(%arg0: i32) -> (i32, i32) {
    %c0_i32 = arith.constant 0 : i32
    %c0_i32_0 = arith.constant 0 : i32
    %c0_i32_1 = arith.constant 0 : i32
    return %c0_i32, %c0_i32_0 : i32, i32
  }
  func.func @transform_9(%arg0: i32) -> (i32, i32) {
    %c0_i32 = arith.constant 0 : i32
    %c0_i32_0 = arith.constant 0 : i32
    %c0_i32_1 = arith.constant 0 : i32
    return %c0_i32, %c0_i32_0 : i32, i32
  }
  func.func @transform_10(%arg0: i32) -> (i32, i32, i32) {
    %c0_i32 = arith.constant 0 : i32
    %c0_i32_0 = arith.constant 0 : i32
    %c0_i32_1 = arith.constant 0 : i32
    return %arg0, %c0_i32, %c0_i32_0 : i32, i32, i32
  }
}

</mosaic_0001>

<bundles_post_ra>
// kernel: tpu_custom_call.1
= control target key start
LH: loop header
LB: loop body
LE: loop exit
PB: predicated region body
PF: predicated region fallthrough
CT: control target
= control target key end

     0   :  { %s13014_s0 = inlined_call_operand.hbm [shape: f32[2,16,16,32], index: 0, kind: input, shape index: {}]   ;;  %s13015_s1 = inlined_call_operand.vmem [shape: f32[2,64,128], index: 1, kind: input, shape index: {}]   ;;  %s13016_s2 = inlined_call_operand.vmem [shape: bf16[288,32], index: 2, kind: input, shape index: {}]   ;;  %s13017_s3 = inlined_call_operand.vmem [shape: f32[1,128], index: 3, kind: input, shape index: {}]   ;;  %s13018_s4 = inlined_call_operand.vmem [shape: bf16[128,128], index: 4, kind: input, shape index: {}]   ;;  %s13019_s5 = inlined_call_operand.vmem [shape: f32[1,128], index: 5, kind: input, shape index: {}]   ;;  %s13020_s6 = inlined_call_operand.hbm [shape: f32[9,1,512], index: 6, kind: input, shape index: {}]   ;;  %s13021_s7 = inlined_call_operand.vmem [shape: f32[1,512], index: 7, kind: input, shape index: {}]   ;;  %s13022_s8 = inlined_call_operand.hbm [shape: bf16[128,128], index: 8, kind: input, shape index: {}]   ;;  %s13023_s9 = inlined_call_operand.vmem [shape: f32[1,128], index: 9, kind: input, shape index: {}]   ;;  %s13024_s10 = inlined_call_operand.hbm [shape: f32[2,64,128], index: 10, kind: output, shape index: {}]  }
   0x1   :  { %13109 = sst [smem:[#allocation75_spill]] %s13020_s6 }
   0x2   :  { %13110 = sst [smem:[#allocation76_spill]] %s13022_s8 }
   0x3   :  { %15 = vsyncpa [#allocation6], 0 }
   0x4   :  { %17 = vsyncpa [#allocation6 + $0x1], 0 }
   0x5   :  { %18 = vsyncpa [#allocation9], 0 }
   0x6   :  { %19 = vsyncpa [#allocation7], 0 }
   0x7   :  { %21 = vsyncpa [#allocation7 + $0x1], 0  ;;  %s8867_s13 = smov 0   ;;  %s8869_s14 = smov 0  }
   0x8   :  { %s8871_s15 = smov 0   ;;  %s8873_s16 = smov 0  }
   0x9 LB: > { %13111 = sst [smem:[#allocation15_spill]] %s8791_s15  ;;  %s8888_s17 = sadd.s32 4294967295, %s8795_s16   ;;  %s8795_s16 = sphi %s8873_s16, %s13345_s16   ;;  %s8791_s15 = sphi %s8871_s15, %s13342_s15   ;;  %s8787_s14 = sphi %s8869_s14, %s13344_s14   ;;  %s8783_s13 = sphi %s8867_s13, %s13343_s13  }
   0xa   : > { %s7530_s18 = sadd.s32 4294967294, %s8795_s16   ;;  %p47_p0 = scmp.ne.s32.totalorder %s8787_s14, %s8783_s13 }
   0xb   : > { %p13025_p1 = scmp.eq.s32.totalorder %s8888_s17, 0  ;;  %p271_p3 = scmp.eq.s32.totalorder %s7530_s18, 1 }
   0xc   : > { %p7531_p5 = scmp.ge.s32.totalorder %s8795_s16, 1  ;;  %p278_p7 = scmp.lt.s32.totalorder %s8795_s16, 3 }
   0xd   : > { %p8897_p4 = por %p13025_p1, %p47_p0  ;;  %p8902_p6 = por %p271_p3, %p47_p0 }
   0xe   : > { %p8907_p8 = pnand %p7531_p5, %p278_p7  ;;  %s8797_s22 = smov [#allocation8]  }
   0xf   : > { %s13112_s19 = scalar_select %p8897_p4, 1, 0 }
  0x10   : > { %s13113_s20 = scalar_select %p8902_p6, 1, 0 }
  0x11   : > { %s13114_s21 = scalar_select %p8907_p8, 1, 0 }
  0x12   : > { %s302_s23 = sshll.u32 %s8797_s22, 4  ;;  %p8496_p9 = pneg %p8907_p8  ;;  %s303_s23 = int_to_ptr.vmem [resolvable:$true] %s302_s23 }
  0x13   : > { %s8798_s25 = smov [#allocation10]   ;;  %s8658_s27 = scalar_lea.vmem %s303_s23, 576 }
  0x14   : > { %p8916_p11 = pnand %p8496_p9, %p13025_p1  ;;  %s318_s26 = sshll.u32 %s8798_s25, 4  ;;  %s319_s26 = int_to_ptr.vmem [resolvable:$true] %s318_s26 }
  0x15   : > { %p8659_p13 = scmp.ne.s32.totalorder %s303_s23, %s8658_s27  ;;  %p8666_p5 = scmp.lt.s32.totalorder %s303_s23, %s303_s23 }
  0x16   : > { %p8649_p12 = pneg %p8916_p11  ;;  %p8667_p7 = scmp.lt.s32.totalorder %s8658_s27, %s8658_s27 }
  0x18   : > { %p8661_p0 = pnand %p8659_p13, %p8649_p12  ;;  %p8668_p10 = por %p8667_p7, %p8666_p5 }
  0x1a   : > { %p8662_p3 = pneg %p8661_p0 }
  0x1c   : > { %p8669_p9 = pnand %p8668_p10, %p8662_p3 }
  0x1e   : > { %8672 = shalt.err (!%p8669_p9)
}
  0x1f   : > { %s8799_s28 = smov 64   ;;  %s8800_s29 = smov 4  }
  0x20   : > { %s13116_s6 = sld [smem:[#allocation75_spill]]  ;;  %s8684_s12 = scalar_lea.vmem %s319_s26, 1024 }
  0x21   : > { %p8685_p1 = scmp.ne.s32.totalorder %s319_s26, %s8684_s12  ;;  %p8692_p2 = scmp.lt.s32.totalorder %s319_s26, %s319_s26 }
  0x22   : > { %p8693_p6 = scmp.lt.s32.totalorder %s8684_s12, %s8684_s12 }
  0x23   : > { %p8687_p13 = pnand %p8685_p1, %p8649_p12 }
  0x24   : > { %p8694_p5 = por %p8693_p6, %p8692_p2 }
  0x25   : > { %p8688_p0 = pneg %p8687_p13 }
  0x26   : > { %8499 = dma.hbm_to_vmem [thread:$0]  (!%p8916_p11), %s13116_s6, 576, %s303_s23, [#allocation9], %s8799_s28, %s8799_s28, %s8800_s29  }
  0x27   : > { %p8695_p10 = pnand %p8694_p5, %p8688_p0 }
  0x29   : > { %8698 = shalt.err (!%p8695_p10)
}
  0x2a   : > { %s13117_s8 = sld [smem:[#allocation76_spill]]  ;;  %s8939_s23 = sadd.s32 1, %s8795_s16  }
  0x2b   : > { %s34_s25 = sadd.s32 1, %s8791_s15  ;;  %s31_s24 = ssub.s32 %s8795_s16, %s8939_s23 }
  0x2c   : > { %p41_p1 = scmp.ne.s32.totalorder %s8791_s15, %s8787_s14  ;;  %p32_p2 = scmp.eq.s32.totalorder %s31_s24, 0 }
  0x2d   : > { %p42_p6 = scmp.eq.s32.totalorder %s8795_s16, 0  ;;  %p13118_p12 = scmp.eq.s32.totalorder %s8888_s17, 1 }
  0x2e   : > { %p8513_p7 = scmp.lt.s32.totalorder %s8795_s16, 2  ;;  %s335_s11 = sand.u32 1, %s8791_s15  }
  0x2f   : > { %p8949_p3 = por %p13118_p12, %p41_p1  ;;  %p43_p9 = por %p42_p6, %p41_p1 }
  0x30   : > { %8502 = dma.hbm_to_vmem [thread:$0]  (!%p8916_p11), %s13117_s8, 1024, %s319_s26, [#allocation9], %s8799_s28, %s8799_s28, %s8800_s29  }
  0x31   : > { %s13119_s27 = scalar_select %p8949_p3, 1, 0 }
  0x32   : > { %s8955_s30 = scalar_select %p32_p2, %s8791_s15, %s34_s25  }
  0x33   : > { %s7535_s12 = sshll.u32 %s335_s11, 8  ;;  %s7939_s26 = sshll.u32 %s8795_s16, 12 }
  0x34   : > { %13120 = sst [smem:[#allocation16_spill]] %s8955_s30  ;;  %s8962_s18 = scalar_lea.hbm %s13014_s0, %s7939_s26 }
  0x35   : > { %s339_s22 = scalar_lea.vmem [#allocation5], %s7535_s12  ;;  %p8966_p11 = pnand %p8513_p7, %p43_p9 }
  0x36   : > { %s346_s24 = sshll.u32 %s339_s22, 4  ;;  %s8970_s25 = scalar_lea.sflag [#allocation6], %s335_s11  ;;  %s8964_s24 = int_to_ptr.vmem [resolvable:$true] %s346_s24 }
  0x37   : > { %s8699_s8 = scalar_lea.hbm %s8962_s18, 4096  ;;  %p8701_p0 = pneg %p8966_p11 }
  0x38   : > { %p8700_p13 = scmp.ne.s32.totalorder %s8962_s18, %s8699_s8  ;;  %s8704_s12 = scalar_lea.hbm %s13014_s0, 8192 }
  0x39   : > { %p8705_p1 = scmp.lt.s32.totalorder %s8962_s18, %s13014_s0  ;;  %p8706_p2 = scmp.lt.s32.totalorder %s8704_s12, %s8699_s8 }
  0x3a   : > { %p8702_p5 = pnand %p8701_p0, %p8700_p13 }
  0x3b   : > { %p8707_p6 = por %p8706_p2, %p8705_p1 }
  0x3c   : > { %p8703_p10 = pneg %p8702_p5 }
  0x3e   : > { %p8708_p12 = pnand %p8707_p6, %p8703_p10 }
  0x40   : > { %8711 = shalt.err (!%p8708_p12)
}
  0x41   : > { %s8712_s11 = scalar_lea.vmem %s8964_s24, 4096  ;;  %s8801_s30 = smov [#allocation5]  }
  0x42   : > { %p8713_p7 = scmp.ne.s32.totalorder %s8964_s24, %s8712_s11  ;;  %s8717_s15 = sshll.u32 %s8801_s30, 4  ;;  %s8718_s15 = int_to_ptr.vmem [resolvable:$false] %s8717_s15 }
  0x43   : > { %s8719_s26 = scalar_lea.vmem %s8718_s15, 8192  ;;  %p8720_p5 = scmp.lt.s32.totalorder %s8964_s24, %s8718_s15 }
  0x44   : > { %p8715_p9 = pnand %p8713_p7, %p8701_p0  ;;  %p8721_p3 = scmp.lt.s32.totalorder %s8719_s26, %s8712_s11 }
  0x46   : > { %p8716_p13 = pneg %p8715_p9  ;;  %p8722_p4 = por %p8721_p3, %p8720_p5 }
  0x48   : > { %p8723_p8 = pnand %p8722_p4, %p8716_p13 }
  0x4a   : > { %8726 = shalt.err (!%p8723_p8)
}
  0x4b   : > { %s8802_s8 = smov 128   ;;  %s8803_s28 = smov 8  }
  0x4c   : > { %8506 = dma.hbm_to_vmem [thread:$0]  (!%p8966_p11), %s8962_s18, 4096, %s8964_s24, %s8970_s25, %s8802_s8, %s8802_s8, %s8803_s28  }
  0x4d   : > { %p13122_p0 = scmp.ne.s32.totalorder %s13114_s21, 0 }
  0x4f   : > { %366 = sbr.rel (%p13122_p0) target bundleno = 1808 (0x710), region = 60 }
  0x54   : > { %s8994_s30 = sand.u32 1, %s8787_s14   ;;  %p13123_p4 = scmp.ne.s32.totalorder %s13112_s19, 0 }
  0x55   : > { %s7539_s15 = sshll.u32 %s8994_s30, 8  ;;  %s369_s12 = scalar_lea.sflag [#allocation6], %s8994_s30 }
  0x56   : > { %s8998_s29 = scalar_lea.vmem [#allocation5], %s7539_s15 }
  0x57   : > { %8770 = dma.done.wait (%p13123_p4), %s369_s12, 4096  }
  0x58   : > { %8772 = vsyncadd (%p13123_p4), %s369_s12, 4294963200  ;;  %p13124_p8 = scmp.eq.s32.totalorder %s8888_s17, 0 }
  0x5a   : > { %8774 = dma.done.wait (%p13124_p8), [#allocation9], 1600   ;;  %p13125_p3 = pmov %p13124_p8 }
  0x5b   : > { %vm428_vm0 = vcmask 261120   ;;  %vm437_vm1 = vcmask 253952   ;;  %v13030_v0 = vmov 0.0   ;;  %vm431_vm2 = vcmask 254976   ;;  %v474_v1 = vld [vmem:[%s8998_s29] sm:$0xff]  ;;  %v475_v2 = vld [vmem:[%s8998_s29 + $0x8] sm:$0xff] }
  0x5c   : > { %8776 = vsyncadd (%p13125_p3), [#allocation9], 4294965696  ;;  %429 = vst.msk [vmem:[#allocation2] sm:$0xff] %vm428_vm0, %v13030_v0  ;;  %v476_v3 = vld [vmem:[%s8998_s29 + $0x10] sm:$0xff]  ;;  %v477_v5 = vld [vmem:[%s8998_s29 + $0x18] sm:$0xff]  ;;  %s8805_s6 = smov 32  }
  0x5d   : > { %430 = vst.msk [vmem:[#allocation2 + $0x8] sm:$0xff] %vm428_vm0, %v13030_v0  ;;  %434 = vst.msk [vmem:[#allocation2 + $0x198] sm:$0xff] %vm428_vm0, %v13030_v0  ;;  %v478_v8 = vld [vmem:[%s8998_s29 + $0x20] sm:$0xff]  ;;  %v479_v9 = vld [vmem:[%s8998_s29 + $0x28] sm:$0xff]  ;;  %vm699_vm3 = vcmask 257024   ;;  %s8806_s19 = smov 64  }
  0x5e   : > { %435 = vst.msk [vmem:[#allocation2 + $0x1a0] sm:$0xff] %vm428_vm0, %v13030_v0  ;;  %5096 = vst.msk [vmem:[#allocation4 + $0x28] sm:$0xff] %vm428_vm0, %v13030_v0  ;;  %v480_v12 = vld [vmem:[%s8998_s29 + $0x30] sm:$0xff]  ;;  %v481_v13 = vld [vmem:[%s8998_s29 + $0x38] sm:$0xff]  ;;  %s8807_s22 = smov 96   ;;  %vm956_vm4 = vcmask 519424  }
  0x5f   : > { %439 = vst.msk [vmem:[#allocation2 + $0x18] sm:$0x1] %vm437_vm1, %v13030_v0  ;;  %440 = vst.msk [vmem:[#allocation2 + $0x30] sm:$0x1] %vm437_vm1, %v13030_v0  ;;  %v482_v16 = vld [vmem:[%s8998_s29 + $0x40] sm:$0xff]  ;;  %v483_v17 = vld [vmem:[%s8998_s29 + $0x48] sm:$0xff] }
  0x60   : > { %441 = vst.msk [vmem:[#allocation2 + $0x48] sm:$0x1] %vm437_vm1, %v13030_v0  ;;  %442 = vst.msk [vmem:[#allocation2 + $0x60] sm:$0x1] %vm437_vm1, %v13030_v0  ;;  %v484_v18 = vld [vmem:[%s8998_s29 + $0x50] sm:$0xff]  ;;  %v485_v19 = vld [vmem:[%s8998_s29 + $0x58] sm:$0xff] }
  0x61   : > { %443 = vst.msk [vmem:[#allocation2 + $0x78] sm:$0x1] %vm437_vm1, %v13030_v0  ;;  %444 = vst.msk [vmem:[#allocation2 + $0x90] sm:$0x1] %vm437_vm1, %v13030_v0  ;;  %v8562_v22 = vld [vmem:[%s13016_s2 + $0x78] sm:$0xff]   ;;  %vm1213_vm5 = vcmask 781824  }
  0x62   : > { %445 = vst.msk [vmem:[#allocation2 + $0xa8] sm:$0x1] %vm437_vm1, %v13030_v0  ;;  %446 = vst.msk [vmem:[#allocation2 + $0xc0] sm:$0x1] %vm437_vm1, %v13030_v0  ;;  %v8563_v23 = vld [vmem:[%s13016_s2 + $0x38] sm:$0xff]   ;;  %8230 = vmatprep.subr.bf16.mxu0 %v8562_v22  ;;  %8468 = vmatprep.subr.bf16.mxu1 %v8562_v22  ;;  %v8572_v22 = vld [vmem:[%s13016_s2 + $0x50] sm:$0xff]  }
  0x63   : > { %447 = vst.msk [vmem:[#allocation2 + $0xd8] sm:$0x1] %vm437_vm1, %v13030_v0  ;;  %448 = vst.msk [vmem:[#allocation2 + $0xf0] sm:$0x1] %vm437_vm1, %v13030_v0  ;;  %8231 = vmatpush3.bf16.msra.mxu0 %v8563_v23  ;;  %8476 = vmatpush3.bf16.msra.mxu1 %v8563_v23  ;;  %vm1470_vm6 = vcmask 1044224   ;;  %vm3794_vm7 = vcmask 1041409  }
  0x64   : > { %449 = vst.msk [vmem:[#allocation2 + $0x108] sm:$0x1] %vm437_vm1, %v13030_v0  ;;  %450 = vst.msk [vmem:[#allocation2 + $0x120] sm:$0x1] %vm437_vm1, %v13030_v0  ;;  %v732_v4 = vld [vmem:[#allocation2 + $0x1] sm:$0xff]  ;;  %vm3796_vm8 = vcmask 1042434  }
  0x65   : > { %451 = vst.msk [vmem:[#allocation2 + $0x138] sm:$0x1] %vm437_vm1, %v13030_v0  ;;  %452 = vst.msk [vmem:[#allocation2 + $0x150] sm:$0x1] %vm437_vm1, %v13030_v0  ;;  %v7973_v6 = vpack.c.bf16 %v732_v4, %v732_v4  ;;  %v989_v11 = vld [vmem:[#allocation2 + $0x2] sm:$0xff]  ;;  %vm3798_vm9 = vcmask 1043459  }
  0x66   : > { %453 = vst.msk [vmem:[#allocation2 + $0x168] sm:$0x1] %vm437_vm1, %v13030_v0  ;;  %454 = vst.msk [vmem:[#allocation2 + $0x180] sm:$0x1] %vm437_vm1, %v13030_v0  ;;  %v540_v24 = vld [vmem:[#allocation2 + $0x8] sm:$0xff]  ;;  %v8005_v26 = vpack.c.bf16 %v989_v11, %v989_v11  ;;  %vm3800_vm10 = vcmask 1044484  }
  0x67   : > { %457 = vst.msk [vmem:[#allocation2 + $0x29] sm:$0x1] %vm437_vm1, %v13030_v0  ;;  %458 = vst.msk [vmem:[#allocation2 + $0x41] sm:$0x1] %vm437_vm1, %v13030_v0  ;;  %860 = vrot.lane.b32.xlu0 %v7973_v6, %s8805_s6  ;;  %v7942_v29 = vpack.c.bf16 %v540_v24, %v540_v24  ;;  %v8567_v11 = vld [vmem:[%s13016_s2 + $0x28] sm:$0xff]   ;;  %v8573_v24 = vld [vmem:[%s13016_s2 + $0x10] sm:$0xff]  }
  0x68   : > { %459 = vst.msk [vmem:[#allocation2 + $0x59] sm:$0x1] %vm437_vm1, %v13030_v0  ;;  %460 = vst.msk [vmem:[#allocation2 + $0x71] sm:$0x1] %vm437_vm1, %v13030_v0  ;;  %vm3802_vm11 = vcmask 1045509   ;;  %vm3804_vm12 = vcmask 1046534  }
  0x69   : > { %461 = vst.msk [vmem:[#allocation2 + $0x89] sm:$0x1] %vm437_vm1, %v13030_v0  ;;  %462 = vst.msk [vmem:[#allocation2 + $0xa1] sm:$0x1] %vm437_vm1, %v13030_v0  ;;  %vm3806_vm13 = vcmask 1047559   ;;  %p422_p11 = scmp.lt.s32.totalorder %s8888_s17, 1 }
  0x6a   : > { %463 = vst.msk [vmem:[#allocation2 + $0xb9] sm:$0x1] %vm437_vm1, %v13030_v0  ;;  %464 = vst.msk [vmem:[#allocation2 + $0xd1] sm:$0x1] %vm437_vm1, %v13030_v0  ;;  %vm4881_vm14 = vcmask 523264   ;;  %vm4890_vm15 = vcmask 785408  }
  0x6b   : > { %465 = vst.msk [vmem:[#allocation2 + $0xe9] sm:$0x1] %vm437_vm1, %v13030_v0  ;;  %466 = vst.msk [vmem:[#allocation2 + $0x101] sm:$0x1] %vm437_vm1, %v13030_v0  ;;  %s423_s21 = scalar_select %p422_p11, %s8888_s17, 1 }
  0x6c   : > { %467 = vst.msk [vmem:[#allocation2 + $0x119] sm:$0x1] %vm437_vm1, %v13030_v0  ;;  %468 = vst.msk [vmem:[#allocation2 + $0x131] sm:$0x1] %vm437_vm1, %v13030_v0  ;;  %s7542_s12 = sshll.u32 %s8994_s30, 6  ;;  %s8229_s24 = sshll.u32 %s8888_s17, 10 }
  0x6d   : > { %469 = vst.msk [vmem:[#allocation2 + $0x149] sm:$0x1] %vm437_vm1, %v13030_v0  ;;  %470 = vst.msk [vmem:[#allocation2 + $0x161] sm:$0x1] %vm437_vm1, %v13030_v0  ;;  %s7940_s18 = sshll.u32 %s423_s21, 6  ;;  %s12942_s21 = scalar_lea.vmem [#allocation11], %s7542_s12 }
  0x6e   : > { %471 = vst.msk [vmem:[#allocation2 + $0x179] sm:$0x1] %vm437_vm1, %v13030_v0  ;;  %472 = vst.msk [vmem:[#allocation2 + $0x191] sm:$0x1] %vm437_vm1, %v13030_v0  ;;  %s11073_s26 = scalar_lea.vmem %s13015_s1, %s7940_s18  ;;  %s7426_s18 = sshll.u32 %s12942_s21, 4  ;;  %s12961_s18 = int_to_ptr.vmem [resolvable:$true] %s7426_s18 }
  0x6f   : > { %438 = vst.msk [vmem:[#allocation2] sm:$0x1] %vm437_vm1, %v13030_v0  ;;  %455 = vst.msk [vmem:[#allocation2 + $0x198] sm:$0x1] %vm437_vm1, %v13030_v0  ;;  %s12969_s11 = scalar_lea.hbm %s13024_s10, %s8229_s24  ;;  %s8727_s17 = scalar_lea.vmem %s12961_s18, 1024 }
  0x70   : > { %432 = vst.msk [vmem:[#allocation2 + $0x10] sm:$0x3] %vm431_vm2, %v13030_v0  ;;  %436 = vst.msk [vmem:[#allocation2 + $0x1a8] sm:$0x3] %vm431_vm2, %v13030_v0  ;;  %p8728_p10 = scmp.ne.s32.totalorder %s12961_s18, %s8727_s17  ;;  %p13338_p1 = scmp.ne.s32.totalorder %s13119_s27, 0 }
  0x71   : > { %456 = vst.msk [vmem:[#allocation2 + $0x11] sm:$0x1] %vm437_vm1, %v13030_v0  ;;  %473 = vst.msk [vmem:[#allocation2 + $0x1a9] sm:$0x1] %vm437_vm1, %v13030_v0  ;;  %s8809_s8 = smov [#allocation11]  }
  0x72   : > { %507 = vst.msk [vmem:[#allocation2 + $0x19] sm:$0xff] %vm428_vm0, %v474_v1  ;;  %508 = vst.msk [vmem:[#allocation2 + $0x21] sm:$0xff] %vm428_vm0, %v475_v2  ;;  %p8729_p2 = pnand %p8728_p10, %p13338_p1  ;;  %s8731_s28 = sshll.u32 %s8809_s8, 4  ;;  %s8732_s28 = int_to_ptr.vmem [resolvable:$false] %s8731_s28 }
  0x73   : > { %509 = vst.msk [vmem:[#allocation2 + $0x31] sm:$0xff] %vm428_vm0, %v476_v3  ;;  %510 = vst.msk [vmem:[#allocation2 + $0x39] sm:$0xff] %vm428_vm0, %v477_v5  ;;  %p8734_p12 = scmp.lt.s32.totalorder %s12961_s18, %s8732_s28 }
  0x74   : > { %511 = vst.msk [vmem:[#allocation2 + $0x49] sm:$0xff] %vm428_vm0, %v478_v8  ;;  %512 = vst.msk [vmem:[#allocation2 + $0x51] sm:$0xff] %vm428_vm0, %v479_v9  ;;  %v8564_v8 = vld [vmem:[%s13016_s2 + $0x70] sm:$0xff]   ;;  %p8730_p6 = pneg %p8729_p2 }
  0x75   : > { %513 = vst.msk [vmem:[#allocation2 + $0x61] sm:$0xff] %vm428_vm0, %v480_v12  ;;  %514 = vst.msk [vmem:[#allocation2 + $0x69] sm:$0xff] %vm428_vm0, %v481_v13  ;;  %v8565_v9 = vld [vmem:[%s13016_s2 + $0x30] sm:$0xff]   ;;  %8232 = vmatprep.subr.bf16.mxu0 %v8564_v8  ;;  %8469 = vmatprep.subr.bf16.mxu1 %v8564_v8  ;;  %v8568_v12 = vld [vmem:[%s13016_s2 + $0x60] sm:$0xff]  }
  0x76   : > { %515 = vst.msk [vmem:[#allocation2 + $0x79] sm:$0xff] %vm428_vm0, %v482_v16  ;;  %516 = vst.msk [vmem:[#allocation2 + $0x81] sm:$0xff] %vm428_vm0, %v483_v17  ;;  %v539_v20 = vld [vmem:[#allocation2] sm:$0xff]  ;;  %8233 = vmatpush3.bf16.msra.mxu0 %v8565_v9  ;;  %8477 = vmatpush3.bf16.msra.mxu1 %v8565_v9 }
  0x77   : > { %v733_v7 = vld [vmem:[#allocation2 + $0x9] sm:$0xff]  ;;  %517 = vst.msk [vmem:[#allocation2 + $0x91] sm:$0xff] %vm428_vm0, %v484_v18  ;;  %518 = vst.msk [vmem:[#allocation2 + $0x99] sm:$0xff] %vm428_vm0, %v485_v19  ;;  %v7941_v21 = vpack.c.bf16 %v539_v20, %v539_v20  ;;  %v8569_v16 = vld [vmem:[%s13016_s2 + $0x20] sm:$0xff]  }
  0x78   : > { %v990_v10 = vld [vmem:[#allocation2 + $0xa] sm:$0xff]  ;;  %v7974_v15 = vpack.c.bf16 %v733_v7, %v733_v7  ;;  %701 = vst.msk [vmem:[#allocation3 + $0xc] sm:$0xf] %vm699_vm3, %v7942_v29  ;;  %v8570_v18 = vld [vmem:[%s13016_s2 + $0x58] sm:$0xff]  }
  0x79   : > { %v8006_v14 = vpack.c.bf16 %v990_v10, %v990_v10  ;;  %v1695_v25 = vld [vmem:[#allocation2 + $0x1a] sm:$0xff]  ;;  %v1696_v27 = vld [vmem:[#allocation2 + $0x22] sm:$0xff]  ;;  %700 = vst.msk [vmem:[#allocation3] sm:$0xf] %vm699_vm3, %v7941_v21  ;;  %v487_v19 = vld [vmem:[%s8998_s29 + $0x68] sm:$0xff] }
  0x7a   : > { %862 = vrot.lane.b32.xlu0 %v7974_v15, %s8805_s6  ;;  %v1952_v28 = vld [vmem:[#allocation2 + $0x30] sm:$0xff]  ;;  %v9128_v30 = vpack.c.bf16 %v1695_v25, %v1695_v25  ;;  %v1953_v32 = vld [vmem:[#allocation2 + $0x38] sm:$0xff]  ;;  %v1247_v34 = vld [vmem:[#allocation2 + $0x20] sm:$0xff]  ;;  %v9139_v41 = vpack.c.bf16 %v1696_v27, %v1696_v27  ;;  %520 = vst.msk [vmem:[#allocation2 + $0xb1] sm:$0xff] %vm428_vm0, %v487_v19 }
  0x7b   : > { %1119 = vrot.lane.b32.xlu1 %v8006_v14, %s8806_s19  ;;  %v9130_v31 = vpack.c.bf16 %v1952_v28, %v1952_v28  ;;  %v1246_v33 = vld [vmem:[#allocation2 + $0x18] sm:$0xff]  ;;  %v9132_v35 = vpack.c.bf16 %v1953_v32, %v1953_v32  ;;  %v9134_v37 = vpack.c.bf16 %v1247_v34, %v1247_v34  ;;  %v735_v45 = vld [vmem:[#allocation2 + $0x21] sm:$0xff]  ;;  %v1955_v48 = vld [vmem:[#allocation2 + $0x50] sm:$0xff] }
  0x7c   : > { %v8037_v36 = vpack.c.bf16 %v1246_v33, %v1246_v33  ;;  %v2208_v38 = vld [vmem:[#allocation2 + $0x31] sm:$0xff]  ;;  %v2209_v39 = vld [vmem:[#allocation2 + $0x39] sm:$0xff]  ;;  %v9150_v46 = vpack.c.bf16 %v735_v45, %v735_v45  ;;  %v1954_v47 = vld [vmem:[#allocation2 + $0x48] sm:$0xff]  ;;  %v9159_v51 = vpack.c.bf16 %v1955_v48, %v1955_v48 }
  0x7d   : > { %v734_v40 = vld [vmem:[#allocation2 + $0x19] sm:$0xff]  ;;  %v9141_v42 = vpack.c.bf16 %v2208_v38, %v2208_v38  ;;  %v9143_v43 = vpack.c.bf16 %v2209_v39, %v2209_v39  ;;  %704 = vst.msk [vmem:[#allocation3 + $0x30] sm:$0xf] %vm699_vm3, %v9130_v31  ;;  %v2210_v49 = vld [vmem:[#allocation2 + $0x49] sm:$0xff]  ;;  %703 = vst.msk [vmem:[#allocation3 + $0x24] sm:$0xf] %vm699_vm3, %v9134_v37  ;;  %v9157_v50 = vpack.c.bf16 %v1954_v47, %v1954_v47 }
  0x7e   : > { %v9145_v44 = vpack.c.bf16 %v734_v40, %v734_v40  ;;  %1117 = vrot.lane.b32.xlu0 %v8005_v26, %s8806_s19  ;;  %702 = vst.msk [vmem:[#allocation3 + $0x18] sm:$0xf] %vm699_vm3, %v8037_v36  ;;  %705 = vst.msk [vmem:[#allocation3 + $0x3c] sm:$0xf] %vm699_vm3, %v9132_v35  ;;  %v9161_v52 = vpack.c.bf16 %v2210_v49, %v2210_v49  ;;  %v2211_v53 = vld [vmem:[#allocation2 + $0x51] sm:$0xff]  ;;  %v1956_v55 = vld [vmem:[#allocation2 + $0x60] sm:$0xff] }
  0x7f   : > { %1823 = vrot.lane.b32.xlu1 %v9128_v30, %s8805_s6  ;;  %1665 = vst.msk [vmem:[#allocation3 + $0x1c] sm:$0xf] %vm699_vm3, %v9141_v42  ;;  %1666 = vst.msk [vmem:[#allocation3 + $0x28] sm:$0xf] %vm699_vm3, %v9143_v43  ;;  %v9169_v54 = vpack.c.bf16 %v2211_v53, %v2211_v53  ;;  %v1957_v56 = vld [vmem:[#allocation2 + $0x68] sm:$0xff]  ;;  %v9175_v58 = vpack.c.bf16 %v1956_v55, %v1956_v55  ;;  %v2214_v63 = vld [vmem:[#allocation2 + $0x79] sm:$0xff] }
  0x80   : > { %1663 = vst.msk [vmem:[#allocation3 + $0x4] sm:$0xf] %vm699_vm3, %v9145_v44  ;;  %v2212_v57 = vld [vmem:[#allocation2 + $0x61] sm:$0xff]  ;;  %1664 = vst.msk [vmem:[#allocation3 + $0x10] sm:$0xf] %vm699_vm3, %v9150_v46  ;;  %v9177_v59 = vpack.c.bf16 %v1957_v56, %v1957_v56  ;;  %v2213_v61 = vld [vmem:[#allocation2 + $0x69] sm:$0xff]  ;;  %v9193_v1 = vpack.c.bf16 %v2214_v63, %v2214_v63 }
  0x81   : > { %v9179_v60 = vpack.c.bf16 %v2212_v57, %v2212_v57  ;;  %1667 = vst.msk [vmem:[#allocation3 + $0x34] sm:$0xf] %vm699_vm3, %v9161_v52  ;;  %706 = vst.msk [vmem:[#allocation3 + $0x48] sm:$0xf] %vm699_vm3, %v9157_v50  ;;  %v9189_v62 = vpack.c.bf16 %v2213_v61, %v2213_v61  ;;  %v2215_v2 = vld [vmem:[#allocation2 + $0x81] sm:$0xff]  ;;  %v2216_v4 = vld [vmem:[#allocation2 + $0x91] sm:$0xff] }
  0x82   : > { %707 = vst.msk [vmem:[#allocation3 + $0x54] sm:$0xf] %vm699_vm3, %v9159_v51  ;;  %2080 = vrot.lane.b32.xlu0 %v9130_v31, %s8806_s19  ;;  %1668 = vst.msk [vmem:[#allocation3 + $0x40] sm:$0xf] %vm699_vm3, %v9169_v54  ;;  %v9201_v3 = vpack.c.bf16 %v2215_v2, %v2215_v2  ;;  %v9207_v5 = vpack.c.bf16 %v2216_v4, %v2216_v4  ;;  %v2217_v6 = vld [vmem:[#allocation2 + $0x99] sm:$0xff]  ;;  %v8566_v10 = vld [vmem:[%s13016_s2 + $0x68] sm:$0xff]  }
  0x83   : > { %1825 = vrot.lane.b32.xlu1 %v9139_v41, %s8805_s6  ;;  %1669 = vst.msk [vmem:[#allocation3 + $0x4c] sm:$0xf] %vm699_vm3, %v9179_v60  ;;  %708 = vst.msk [vmem:[#allocation3 + $0x60] sm:$0xf] %vm699_vm3, %v9175_v58  ;;  %v9212_v7 = vpack.c.bf16 %v2217_v6, %v2217_v6  ;;  %8234 = vmatprep.subr.bf16.mxu0 %v8566_v10  ;;  %v1697_v13 = vld [vmem:[#allocation2 + $0x32] sm:$0xff]  ;;  %v1698_v14 = vld [vmem:[#allocation2 + $0x3a] sm:$0xff] }
  0x84   : > { %709 = vst.msk [vmem:[#allocation3 + $0x6c] sm:$0xf] %vm699_vm3, %v9177_v59  ;;  %1670 = vst.msk [vmem:[#allocation3 + $0x58] sm:$0xf] %vm699_vm3, %v9189_v62  ;;  %v486_v15 = vld [vmem:[%s8998_s29 + $0x60] sm:$0xff]  ;;  %8470 = vmatprep.subr.bf16.mxu1 %v8566_v10  ;;  %8235 = vmatpush3.bf16.msra.mxu0 %v8567_v11  ;;  %v9248_v17 = vpack.c.bf16 %v1697_v13, %v1697_v13  ;;  %v9257_v20 = vpack.c.bf16 %v1698_v14, %v1698_v14  ;;  %v8571_v21 = vld [vmem:[%s13016_s2 + $0x18] sm:$0xff]  }
  0x85   : > { %1671 = vst.msk [vmem:[#allocation3 + $0x64] sm:$0xf] %vm699_vm3, %v9193_v1  ;;  %1672 = vst.msk [vmem:[#allocation3 + $0x70] sm:$0xf] %vm699_vm3, %v9201_v3  ;;  %8236 = vmatprep.subr.bf16.mxu0 %v8568_v12  ;;  %8478 = vmatpush3.bf16.msra.mxu1 %v8567_v11  ;;  %v488_v26 = vld [vmem:[%s8998_s29 + $0x70] sm:$0xff]  ;;  %v489_v27 = vld [vmem:[%s8998_s29 + $0x78] sm:$0xff] }
  0x86   : > { %1374 = vrot.lane.b32.xlu0 %v8037_v36, %s8807_s22  ;;  %1673 = vst.msk [vmem:[#allocation3 + $0x7c] sm:$0xf] %vm699_vm3, %v9207_v5  ;;  %1674 = vst.msk [vmem:[#allocation3 + $0x88] sm:$0xf] %vm699_vm3, %v9212_v7  ;;  %8471 = vmatprep.subr.bf16.mxu1 %v8568_v12  ;;  %v8574_v28 = vld [vmem:[%s13016_s2 + $0x48] sm:$0xff]   ;;  %v2219_v29 = vld [vmem:[#allocation2 + $0xb1] sm:$0xff] }
  0x87   : > { %2082 = vrot.lane.b32.xlu1 %v9132_v35, %s8806_s19  ;;  %519 = vst.msk [vmem:[#allocation2 + $0xa9] sm:$0xff] %vm428_vm0, %v486_v15  ;;  %521 = vst.msk [vmem:[#allocation2 + $0xc1] sm:$0xff] %vm428_vm0, %v488_v26  ;;  %v8575_v32 = vld [vmem:[%s13016_s2 + $0x8] sm:$0xff]   ;;  %v9286_v33 = vpack.c.bf16 %v2219_v29, %v2219_v29  ;;  %v503_v36 = vld [vmem:[%s8998_s29 + $0xe8] sm:$0xff] }
  0x88   : > { %8237 = vmatpush3.bf16.msra.mxu0 %v8569_v16  ;;  %522 = vst.msk [vmem:[#allocation2 + $0xc9] sm:$0xff] %vm428_vm0, %v489_v27  ;;  %v502_v34 = vld [vmem:[%s8998_s29 + $0xe0] sm:$0xff]  ;;  %536 = vst.msk [vmem:[#allocation2 + $0x171] sm:$0xff] %vm428_vm0, %v503_v36  ;;  %v505_v38 = vld [vmem:[%s8998_s29 + $0xf8] sm:$0xff] }
  0x89   : > { %8238 = vmatprep.subr.bf16.mxu0 %v8570_v18  ;;  %8479 = vmatpush3.bf16.msra.mxu1 %v8569_v16  ;;  %535 = vst.msk [vmem:[#allocation2 + $0x169] sm:$0xff] %vm428_vm0, %v502_v34  ;;  %538 = vst.msk [vmem:[#allocation2 + $0x189] sm:$0xff] %vm428_vm0, %v505_v38  ;;  %v8577_v39 = vld [vmem:[%s13016_s2] sm:$0xff]   ;;  %v1699_v45 = vld [vmem:[#allocation2 + $0x4a] sm:$0xff] }
  0x8a   : > { %2336 = vrot.lane.b32.xlu0 %v9141_v42, %s8807_s22  ;;  %8472 = vmatprep.subr.bf16.mxu1 %v8570_v18  ;;  %1676 = vst.msk [vmem:[#allocation3 + $0xa0] sm:$0xf] %vm699_vm3, %v9286_v33  ;;  %v1701_v48 = vld [vmem:[#allocation2 + $0x62] sm:$0xff]  ;;  %v492_v2 = vld [vmem:[%s8998_s29 + $0x90] sm:$0xff] }
  0x8b   : > { %1376 = vrot.lane.b32.xlu1 %v9134_v37, %s8807_s22  ;;  %v504_v37 = vld [vmem:[%s8998_s29 + $0xf0] sm:$0xff]  ;;  %v8107_v49 = vpack.c.bf16 %v1701_v48, %v1701_v48  ;;  %v1959_v56 = vld [vmem:[#allocation2 + $0x80] sm:$0xff]  ;;  %525 = vst.msk [vmem:[#allocation2 + $0xf1] sm:$0xff] %vm428_vm0, %v492_v2  ;;  %v494_v16 = vld [vmem:[%s8998_s29 + $0xa0] sm:$0xff] }
  0x8c   : > { %8239 = vmatpush3.bf16.msra.mxu0 %v8571_v21  ;;  %537 = vst.msk [vmem:[#allocation2 + $0x181] sm:$0xff] %vm428_vm0, %v504_v37  ;;  %v493_v4 = vld [vmem:[%s8998_s29 + $0x98] sm:$0xff]  ;;  %v1961_v11 = vld [vmem:[#allocation2 + $0x98] sm:$0xff]  ;;  %527 = vst.msk [vmem:[#allocation2 + $0x109] sm:$0xff] %vm428_vm0, %v494_v16 }
  0x8d   : > { %8240 = vmatprep.subr.bf16.mxu0 %v8572_v22  ;;  %8480 = vmatpush3.bf16.msra.mxu1 %v8571_v21  ;;  %v1703_v6 = vld [vmem:[#allocation2 + $0x7a] sm:$0xff]  ;;  %526 = vst.msk [vmem:[#allocation2 + $0xf9] sm:$0xff] %vm428_vm0, %v493_v4  ;;  %v1704_v8 = vld [vmem:[#allocation2 + $0x82] sm:$0xff]  ;;  %v9397_v13 = vpack.c.bf16 %v1961_v11, %v1961_v11  ;;  %v495_v21 = vld [vmem:[%s8998_s29 + $0xa8] sm:$0xff] }
  0x8e   : > { %864 = vrot.lane.b32.xlu0 %v9145_v44, %s8805_s6  ;;  %v2218_v23 = vld [vmem:[#allocation2 + $0xa9] sm:$0xff]  ;;  %8473 = vmatprep.subr.bf16.mxu1 %v8572_v22  ;;  %v2220_v40 = vld [vmem:[#allocation2 + $0xc1] sm:$0xff]  ;;  %v9388_v9 = vpack.c.bf16 %v1704_v8, %v1704_v8  ;;  %v1705_v22 = vld [vmem:[#allocation2 + $0x92] sm:$0xff]  ;;  %528 = vst.msk [vmem:[#allocation2 + $0x111] sm:$0xff] %vm428_vm0, %v495_v21 }
  0x8f   : > { %2338 = vrot.lane.b32.xlu1 %v9143_v43, %s8807_s22  ;;  %v9272_v25 = vpack.c.bf16 %v2218_v23, %v2218_v23  ;;  %v2221_v44 = vld [vmem:[#allocation2 + $0xc9] sm:$0xff]  ;;  %v550_v12 = vld [vmem:[#allocation2 + $0x80] sm:$0xff]  ;;  %v9428_v26 = vpack.c.bf16 %v1705_v22, %v1705_v22  ;;  %v496_v48 = vld [vmem:[%s8998_s29 + $0xb0] sm:$0xff] }
  0x90   : > { %8241 = vmatpush3.bf16.msra.mxu0 %v8573_v24  ;;  %v7952_v14 = vpack.c.bf16 %v550_v12, %v550_v12  ;;  %v1706_v27 = vld [vmem:[#allocation2 + $0x9a] sm:$0xff]  ;;  %v1962_v34 = vld [vmem:[#allocation2 + $0xa8] sm:$0xff]  ;;  %529 = vst.msk [vmem:[#allocation2 + $0x121] sm:$0xff] %vm428_vm0, %v496_v48  ;;  %v1708_v2 = vld [vmem:[#allocation2 + $0xb2] sm:$0xff] }
  0x91   : > { %1675 = vst.msk [vmem:[#allocation3 + $0x94] sm:$0xf] %vm699_vm3, %v9272_v25  ;;  %8242 = vmatprep.subr.bf16.mxu0 %v8574_v28  ;;  %8481 = vmatpush3.bf16.msra.mxu1 %v8573_v24  ;;  %v1964_v12 = vld [vmem:[#allocation2 + $0xc0] sm:$0xff] }
  0x92   : > { %1827 = vrot.lane.b32.xlu0 %v9248_v17, %s8805_s6  ;;  %8474 = vmatprep.subr.bf16.mxu1 %v8574_v28  ;;  %711 = vst.msk [vmem:[#allocation3 + $0x84] sm:$0xf] %vm699_vm3, %v7952_v14 }
  0x93   : > { %866 = vrot.lane.b32.xlu1 %v9150_v46, %s8805_s6  ;;  %v9322_v46 = vpack.c.bf16 %v2221_v44, %v2221_v44 }
  0x94   : > { %8243 = vmatpush3.bf16.msra.mxu0 %v8575_v32  ;;  %v1713_v15 = vld [vmem:[#allocation2 + $0xf2] sm:$0xff] }
  0x95   : > { %8482 = vmatpush3.bf16.msra.mxu1 %v8575_v32  ;;  %1678 = vst.msk [vmem:[#allocation3 + $0xb8] sm:$0xf] %vm699_vm3, %v9322_v46  ;;  %v9407_v18 = vpack.c.bf16 %v1713_v15, %v1713_v15  ;;  %v9434_v32 = vpack.c.bf16 %v1706_v27, %v1706_v27  ;;  %v762_v15 = vld [vmem:[#allocation2 + $0x169] sm:$0xff] }
  0x96   : > { %1121 = vrot.lane.b32.xlu0 %v9128_v30, %s8806_s19  ;;  %v8576_v30 = vld [vmem:[%s13016_s2 + $0x40] sm:$0xff]  }
  0x97   : > { %1829 = vrot.lane.b32.xlu1 %v9257_v20, %s8805_s6  ;;  %8244 = vmatprep.subr.bf16.mxu0 %v8576_v30  ;;  %2640 = vst.msk [vmem:[#allocation3 + $0xc8] sm:$0xf] %vm699_vm3, %v9407_v18 }
  0x98   : > { %8475 = vmatprep.subr.bf16.mxu1 %v8576_v30  ;;  %8245 = vmatpush3.bf16.msra.mxu0 %v8577_v39  ;;  %v9443_v30 = vpack.c.bf16 %v1962_v34, %v1962_v34 }
  0x99   : > { %8483 = vmatpush3.bf16.msra.mxu1 %v8577_v39  ;;  %v551_v39 = vld [vmem:[#allocation2 + $0x90] sm:$0xff] }
  0x9a   : > { %2084 = vrot.lane.b32.xlu0 %v9157_v50, %s8806_s19 }
  0x9b   : > { %1123 = vrot.lane.b32.xlu1 %v9139_v41, %s8806_s19  ;;  %v9314_v41 = vpack.c.bf16 %v2220_v40, %v2220_v40  ;;  %v552_v40 = vld [vmem:[#allocation2 + $0x98] sm:$0xff] }
  0x9d   : > { %1677 = vst.msk [vmem:[#allocation3 + $0xac] sm:$0xf] %vm699_vm3, %v9314_v41 }
  0x9e   : > { %1378 = vrot.lane.b32.xlu0 %v9130_v31, %s8807_s22  ;;  %v8105_v31 = vpack.c.bf16 %v1699_v45, %v1699_v45  ;;  %v7953_v45 = vpack.c.bf16 %v551_v39, %v551_v39  ;;  %v1726_v39 = vld [vmem:[#allocation2 + $0x18a] sm:$0xff] }
  0x9f   : > { %2086 = vrot.lane.b32.xlu1 %v9159_v51, %s8806_s19 }
  0xa0   : > { %712 = vst.msk [vmem:[#allocation3 + $0x90] sm:$0xf] %vm699_vm3, %v7953_v45  ;;  %v499_v45 = vld [vmem:[%s8998_s29 + $0xc8] sm:$0xff] }
  0xa1   : > { %532 = vst.msk [vmem:[#allocation2 + $0x141] sm:$0xff] %vm428_vm0, %v499_v45 }
  0xa2   : > { %2340 = vrot.lane.b32.xlu0 %v9161_v52, %s8807_s22 }
  0xa3   : > { %1380 = vrot.lane.b32.xlu1 %v9132_v35, %s8807_s22  ;;  %v1700_v35 = vld [vmem:[#allocation2 + $0x52] sm:$0xff] }
  0xa4   : > { %v8106_v47 = vpack.c.bf16 %v1700_v35, %v1700_v35 }
  0xa6   : > { %868 = vrot.lane.b32.xlu0 %v9141_v42, %s8805_s6  ;;  %v490_v42 = vld [vmem:[%s8998_s29 + $0x80] sm:$0xff] }
  0xa7   : > { %2342 = vrot.lane.b32.xlu1 %v9169_v54, %s8807_s22  ;;  %523 = vst.msk [vmem:[#allocation2 + $0xd9] sm:$0xff] %vm428_vm0, %v490_v42 }
  0xaa   : > { %1831 = vrot.lane.b32.xlu0 %v8105_v31, %s8805_s6 }
  0xab   : > { %870 = vrot.lane.b32.xlu1 %v9143_v43, %s8805_s6  ;;  %v491_v43 = vld [vmem:[%s8998_s29 + $0x88] sm:$0xff] }
  0xac   : > { %524 = vst.msk [vmem:[#allocation2 + $0xe1] sm:$0xff] %vm428_vm0, %v491_v43  ;;  %v1715_v43 = vld [vmem:[#allocation2 + $0x10a] sm:$0xff] }
  0xae   : > { %1125 = vrot.lane.b32.xlu0 %v9248_v17, %s8806_s19  ;;  %v2222_v57 = vld [vmem:[#allocation2 + $0xd9] sm:$0xff] }
  0xaf   : > { %1833 = vrot.lane.b32.xlu1 %v8106_v47, %s8805_s6  ;;  %v9361_v61 = vpack.c.bf16 %v2222_v57, %v2222_v57 }
  0xb1   : > { %1679 = vst.msk [vmem:[#allocation3 + $0xc4] sm:$0xf] %vm699_vm3, %v9361_v61 }
  0xb2   : > { %2088 = vrot.lane.b32.xlu0 %v9175_v58, %s8806_s19 }
  0xb3   : > { %1127 = vrot.lane.b32.xlu1 %v9257_v20, %s8806_s19  ;;  %v1714_v20 = vld [vmem:[#allocation2 + $0xfa] sm:$0xff] }
  0xb4   : > { %v9417_v23 = vpack.c.bf16 %v1714_v20, %v1714_v20 }
  0xb6   : > { %1382 = vrot.lane.b32.xlu0 %v9157_v50, %s8807_s22  ;;  %v1702_v50 = vld [vmem:[#allocation2 + $0x6a] sm:$0xff]  ;;  %2641 = vst.msk [vmem:[#allocation3 + $0xd4] sm:$0xf] %vm699_vm3, %v9417_v23 }
  0xb7   : > { %2090 = vrot.lane.b32.xlu1 %v9177_v59, %s8806_s19  ;;  %v8108_v53 = vpack.c.bf16 %v1702_v50, %v1702_v50  ;;  %v9463_v50 = vpack.c.bf16 %v1715_v43, %v1715_v43 }
  0xb9   : > { %2642 = vst.msk [vmem:[#allocation3 + $0xe0] sm:$0xf] %vm699_vm3, %v9463_v50 }
  0xba   : > { %2344 = vrot.lane.b32.xlu0 %v9179_v60, %s8807_s22 }
  0xbb   : > { %1384 = vrot.lane.b32.xlu1 %v9159_v51, %s8807_s22  ;;  %v1958_v51 = vld [vmem:[#allocation2 + $0x78] sm:$0xff] }
  0xbc   : > { %v8139_v55 = vpack.c.bf16 %v1958_v51, %v1958_v51  ;;  %v497_v51 = vld [vmem:[%s8998_s29 + $0xb8] sm:$0xff] }
  0xbd   : > { %530 = vst.msk [vmem:[#allocation2 + $0x129] sm:$0xff] %vm428_vm0, %v497_v51 }
  0xbe   : > { %872 = vrot.lane.b32.xlu0 %v9161_v52, %s8805_s6  ;;  %v8140_v52 = vpack.c.bf16 %v1959_v56, %v1959_v56  ;;  %v1707_v56 = vld [vmem:[#allocation2 + $0xaa] sm:$0xff] }
  0xbf   : > { %2346 = vrot.lane.b32.xlu1 %v9189_v62, %s8807_s22 }
  0xc2   : > { %1835 = vrot.lane.b32.xlu0 %v8107_v49, %s8805_s6 }
  0xc3   : > { %874 = vrot.lane.b32.xlu1 %v9169_v54, %s8805_s6  ;;  %v2223_v54 = vld [vmem:[#allocation2 + $0xe1] sm:$0xff] }
  0xc4   : > { %v9367_v63 = vpack.c.bf16 %v2223_v54, %v2223_v54  ;;  %v9485_v54 = vpack.c.bf16 %v1707_v56, %v1707_v56  ;;  %v1717_v34 = vld [vmem:[#allocation2 + $0x122] sm:$0xff]  ;;  %v1020_v56 = vld [vmem:[#allocation2 + $0x172] sm:$0xff] }
  0xc6   : > { %1129 = vrot.lane.b32.xlu0 %v8105_v31, %s8806_s19  ;;  %1680 = vst.msk [vmem:[#allocation3 + $0xd0] sm:$0xf] %vm699_vm3, %v9367_v63  ;;  %v7954_v31 = vpack.c.bf16 %v552_v40, %v552_v40  ;;  %v1718_v40 = vld [vmem:[#allocation2 + $0x12a] sm:$0xff] }
  0xc7   : > { %1837 = vrot.lane.b32.xlu1 %v8108_v53, %s8805_s6 }
  0xc8   : > { %713 = vst.msk [vmem:[#allocation3 + $0x9c] sm:$0xf] %vm699_vm3, %v7954_v31 }
  0xca   : > { %2092 = vrot.lane.b32.xlu0 %v8139_v55, %s8806_s19 }
  0xcb   : > { %1131 = vrot.lane.b32.xlu1 %v8106_v47, %s8806_s19 }
  0xce   : > { %1386 = vrot.lane.b32.xlu0 %v9175_v58, %s8807_s22  ;;  %v8109_v58 = vpack.c.bf16 %v1703_v6, %v1703_v6 }
  0xcf   : > { %2094 = vrot.lane.b32.xlu1 %v8140_v52, %s8806_s19 }
  0xd2   : > { %2348 = vrot.lane.b32.xlu0 %v9193_v1, %s8807_s22 }
  0xd3   : > { %1388 = vrot.lane.b32.xlu1 %v9177_v59, %s8807_s22  ;;  %v1960_v59 = vld [vmem:[#allocation2 + $0x90] sm:$0xff] }
  0xd4   : > { %v9394_v10 = vpack.c.bf16 %v1960_v59, %v1960_v59  ;;  %v570_v59 = vld [vmem:[#allocation2 + $0x170] sm:$0xff] }
  0xd5   : > { %v9495_v11 = vpack.c.bf16 %v570_v59, %v570_v59  ;;  %v1276_v59 = vld [vmem:[#allocation2 + $0x180] sm:$0xff] }
  0xd6   : > { %876 = vrot.lane.b32.xlu0 %v9179_v60, %s8805_s6  ;;  %v549_v60 = vld [vmem:[#allocation2 + $0x78] sm:$0xff] }
  0xd7   : > { %2350 = vrot.lane.b32.xlu1 %v9201_v3, %s8807_s22  ;;  %731 = vst.msk [vmem:[#allocation3 + $0x174] sm:$0xf] %vm699_vm3, %v9495_v11 }
  0xd9   : > { %v861_v17 = vpop.permute.xlu0 %860 }
  0xda   : > { %1839 = vrot.lane.b32.xlu0 %v8109_v58, %s8805_s6  ;;  %957 = vst.msk [vmem:[#allocation3] sm:$0xf] %vm956_vm4, %v861_v17  ;;  %v1533_v17 = vld [vmem:[#allocation2 + $0x181] sm:$0xff] }
  0xdb   : > { %878 = vrot.lane.b32.xlu1 %v9189_v62, %s8805_s6  ;;  %v7951_v62 = vpack.c.bf16 %v549_v60, %v549_v60  ;;  %v9517_v21 = vpack.c.bf16 %v1533_v17, %v1533_v17  ;;  %v1277_v17 = vld [vmem:[#allocation2 + $0x188] sm:$0xff] }
  0xdd   : > { %710 = vst.msk [vmem:[#allocation3 + $0x78] sm:$0xf] %vm699_vm3, %v7951_v62  ;;  %v1965_v62 = vld [vmem:[#allocation2 + $0xc8] sm:$0xff]  ;;  %1693 = vst.msk [vmem:[#allocation3 + $0x16c] sm:$0xf] %vm699_vm3, %v9517_v21 }
  0xde   : > { %1133 = vrot.lane.b32.xlu0 %v8107_v49, %s8806_s19  ;;  %v9515_v20 = vpack.c.bf16 %v1965_v62, %v1965_v62 }
  0xdf   : > { %1841 = vrot.lane.b32.xlu1 %v9388_v9, %s8805_s6 }
  0xe2   : > { %2096 = vrot.lane.b32.xlu0 %v9394_v10, %s8806_s19 }
  0xe3   : > { %1135 = vrot.lane.b32.xlu1 %v8108_v53, %s8806_s19  ;;  %v1716_v53 = vld [vmem:[#allocation2 + $0x112] sm:$0xff] }
  0xe4   : > { %v9474_v57 = vpack.c.bf16 %v1716_v53, %v1716_v53 }
  0xe6   : > { %1390 = vrot.lane.b32.xlu0 %v8139_v55, %s8807_s22  ;;  %2643 = vst.msk [vmem:[#allocation3 + $0xec] sm:$0xf] %vm699_vm3, %v9474_v57 }
  0xe7   : > { %2098 = vrot.lane.b32.xlu1 %v9397_v13, %s8806_s19 }
  0xea   : > { %2352 = vrot.lane.b32.xlu0 %v9207_v5, %s8807_s22 }
  0xeb   : > { %1392 = vrot.lane.b32.xlu1 %v8140_v52, %s8807_s22 }
  0xec   : > { %v863_v24 = vpop.permute.xlu0 %862 }
  0xed   : > { %v1120_v19 = vpop.permute.xlu1 %1119  ;;  %958 = vst.msk [vmem:[#allocation3 + $0xc] sm:$0xf] %vm956_vm4, %v863_v24  ;;  %v8003_v24 = vpack.c.bf16 %v762_v15, %v762_v15 }
  0xee   : > { %880 = vrot.lane.b32.xlu0 %v9193_v1, %s8805_s6  ;;  %1215 = vst.msk [vmem:[#allocation3 + $0xc] sm:$0xf] %vm1213_vm5, %v1120_v19  ;;  %v1534_v19 = vld [vmem:[#allocation2 + $0x189] sm:$0xff] }
  0xef   : > { %2354 = vrot.lane.b32.xlu1 %v9212_v7, %s8807_s22  ;;  %v8100_v22 = vpack.c.bf16 %v1534_v19, %v1534_v19 }
  0xf0   : > { %v1118_v29 = vpop.permute.xlu0 %1117 }
  0xf1   : > { %v1824_v28 = vpop.permute.xlu1 %1823  ;;  %1214 = vst.msk [vmem:[#allocation3] sm:$0xf] %vm1213_vm5, %v1118_v29 }
  0xf2   : > { %1919 = vst.msk [vmem:[#allocation3 + $0x4] sm:$0xf] %vm956_vm4, %v1824_v28  ;;  %1843 = vrot.lane.b32.xlu0 %v9428_v26, %s8805_s6 }
  0xf3   : > { %882 = vrot.lane.b32.xlu1 %v9201_v3, %s8805_s6  ;;  %v1963_v3 = vld [vmem:[#allocation2 + $0xb0] sm:$0xff]  ;;  %1694 = vst.msk [vmem:[#allocation3 + $0x178] sm:$0xf] %vm699_vm3, %v8100_v22  ;;  %v2238_v22 = vld [vmem:[#allocation2 + $0x199] sm:$0xff] }
  0xf4   : > { %v2081_v36 = vpop.permute.xlu0 %2080  ;;  %v9449_v44 = vpack.c.bf16 %v1963_v3, %v1963_v3 }
  0xf5   : > { %v1826_v1 = vpop.permute.xlu1 %1825  ;;  %2176 = vst.msk [vmem:[#allocation3 + $0x4] sm:$0xf] %vm1213_vm5, %v2081_v36  ;;  %v498_v36 = vld [vmem:[%s8998_s29 + $0xc0] sm:$0xff] }
  0xf6   : > { %1920 = vst.msk [vmem:[#allocation3 + $0x10] sm:$0xf] %vm956_vm4, %v1826_v1  ;;  %1137 = vrot.lane.b32.xlu0 %v8109_v58, %s8806_s19  ;;  %v1725_v1 = vld [vmem:[#allocation2 + $0x182] sm:$0xff] }
  0xf7   : > { %1845 = vrot.lane.b32.xlu1 %v9434_v32, %s8805_s6  ;;  %531 = vst.msk [vmem:[#allocation2 + $0x139] sm:$0xff] %vm428_vm0, %v498_v36  ;;  %v2466_v36 = vld [vmem:[#allocation2 + $0x4a] sm:$0xff] }
  0xf8   : > { %v1375_v38 = vpop.permute.xlu0 %1374  ;;  %v8199_v45 = vpack.c.bf16 %v2466_v36, %v2466_v36 }
  0xf9   : > { %v2083_v37 = vpop.permute.xlu1 %2082  ;;  %1471 = vst.msk [vmem:[#allocation3] sm:$0xf] %vm1470_vm6, %v1375_v38  ;;  %v8131_v38 = vpack.c.bf16 %v1725_v1, %v1725_v1 }
  0xfa   : > { %2177 = vst.msk [vmem:[#allocation3 + $0x10] sm:$0xf] %vm1213_vm5, %v2083_v37  ;;  %2100 = vrot.lane.b32.xlu0 %v9443_v30, %s8806_s19  ;;  %v9531_v37 = vpack.c.bf16 %v1717_v34, %v1717_v34 }
  0xfb   : > { %1139 = vrot.lane.b32.xlu1 %v9388_v9, %s8806_s19  ;;  %v569_v9 = vld [vmem:[#allocation2 + $0x168] sm:$0xff]  ;;  %2626 = vst.msk [vmem:[#allocation3 + $0x20] sm:$0xf] %vm699_vm3, %v8199_v45 }
  0xfc   : > { %v2337_v47 = vpop.permute.xlu0 %2336  ;;  %2644 = vst.msk [vmem:[#allocation3 + $0xf8] sm:$0xf] %vm699_vm3, %v9531_v37 }
  0xfd   : > { %v1377_v35 = vpop.permute.xlu1 %1376  ;;  %2432 = vst.msk [vmem:[#allocation3 + $0x4] sm:$0xf] %vm1470_vm6, %v2337_v47 }
  0xfe   : > { %1472 = vst.msk [vmem:[#allocation3 + $0xc] sm:$0xf] %vm1470_vm6, %v1377_v35  ;;  %1394 = vrot.lane.b32.xlu0 %v9394_v10, %s8807_s22  ;;  %v9491_v10 = vpack.c.bf16 %v1708_v2, %v1708_v2  ;;  %v9541_v35 = vpack.c.bf16 %v1718_v40, %v1718_v40  ;;  %v1982_v2 = vld [vmem:[#allocation2 + $0x198] sm:$0xff] }
  0xff   : > { %2102 = vrot.lane.b32.xlu1 %v9449_v44, %s8806_s19  ;;  %v500_v40 = vld [vmem:[%s8998_s29 + $0xd0] sm:$0xff] }
 0x100   : > { %v865_v49 = vpop.permute.xlu0 %864  ;;  %2645 = vst.msk [vmem:[#allocation3 + $0x104] sm:$0xf] %vm699_vm3, %v9541_v35 }
 0x101   : > { %v2339_v42 = vpop.permute.xlu1 %2338  ;;  %959 = vst.msk [vmem:[#allocation3 + $0x18] sm:$0xf] %vm956_vm4, %v865_v49 }
 0x102   : > { %2433 = vst.msk [vmem:[#allocation3 + $0x10] sm:$0xf] %vm1470_vm6, %v2339_v42  ;;  %2356 = vrot.lane.b32.xlu0 %v9272_v25, %s8807_s22  ;;  %v1019_v42 = vld [vmem:[#allocation2 + $0x16a] sm:$0xff] }
 0x103   : > { %1396 = vrot.lane.b32.xlu1 %v9397_v13, %s8807_s22  ;;  %v9509_v13 = vpack.c.bf16 %v1964_v12, %v1964_v12  ;;  %v553_v12 = vld [vmem:[#allocation2 + $0xa8] sm:$0xff]  ;;  %533 = vst.msk [vmem:[#allocation2 + $0x151] sm:$0xff] %vm428_vm0, %v500_v40  ;;  %v555_v40 = vld [vmem:[#allocation2 + $0xc0] sm:$0xff] }
 0x104   : > { %v1828_v52 = vpop.permute.xlu0 %1827 }
 0x105   : > { %v867_v55 = vpop.permute.xlu1 %866  ;;  %1921 = vst.msk [vmem:[#allocation3 + $0x1c] sm:$0xf] %vm956_vm4, %v1828_v52  ;;  %v8578_v6 = vld [vmem:[#allocation3] ss:$12 sps:$4 sm:$0xff]  }
 0x106   : > { %960 = vst.msk [vmem:[#allocation3 + $0x24] sm:$0xf] %vm956_vm4, %v867_v55  ;;  %884 = vrot.lane.b32.xlu0 %v9207_v5, %s8805_s6  ;;  %v9493_v5 = vpack.c.bf16 %v569_v9, %v569_v9 }
 0x107   : > { %2358 = vrot.lane.b32.xlu1 %v9286_v33, %s8807_s22 }
 0x108   : > { %v1122_v8 = vpop.permute.xlu0 %1121  ;;  %730 = vst.msk [vmem:[#allocation3 + $0x168] sm:$0xf] %vm699_vm3, %v9493_v5 }
 0x109   : > { %v1830_v4 = vpop.permute.xlu1 %1829  ;;  %v8580_v58 = vld [vmem:[#allocation3 + $0x4] ss:$12 sps:$4 sm:$0xff]   ;;  %1216 = vst.msk [vmem:[#allocation3 + $0x18] sm:$0xf] %vm1213_vm5, %v1122_v8 }
 0x10a   : > { %1922 = vst.msk [vmem:[#allocation3 + $0x28] sm:$0xf] %vm956_vm4, %v1830_v4  ;;  %3184 = vmatprep.mubr.bf16.mxu0 %v8580_v58  ;;  %1847 = vrot.lane.b32.xlu0 %v9485_v54, %s8805_s6  ;;  %v8163_v58 = vpack.c.bf16 %v1982_v2, %v1982_v2  ;;  %v1983_v8 = vld [vmem:[#allocation2 + $0x1a0] sm:$0xff]  ;;  %v2232_v36 = vld [vmem:[#allocation2 + $0x151] sm:$0xff] }
 0x10b   : > { %886 = vrot.lane.b32.xlu1 %v9212_v7, %s8805_s6  ;;  %3185 = vmatmul.mubr.bf16.vlgmr.msra.gmra.mxu0 %v8578_v6  ;;  %v8036_v6 = vpack.c.bf16 %v1020_v56, %v1020_v56  ;;  %v8164_v62 = vpack.c.bf16 %v1983_v8, %v1983_v8  ;;  %v2468_v56 = vld [vmem:[#allocation2 + $0x62] sm:$0xff]  ;;  %v2470_v8 = vld [vmem:[#allocation2 + $0x7a] sm:$0xff]  ;;  %v9625_v45 = vpack.c.bf16 %v2232_v36, %v2232_v36 }
 0x10c   : > { %v2085_v7 = vpop.permute.xlu0 %2084 }
 0x10d   : > { %v1124_v60 = vpop.permute.xlu1 %1123  ;;  %2178 = vst.msk [vmem:[#allocation3 + $0x1c] sm:$0xf] %vm1213_vm5, %v2085_v7  ;;  %v554_v7 = vld [vmem:[#allocation2 + $0xb0] sm:$0xff] }
 0x10e   : > { %1217 = vst.msk [vmem:[#allocation3 + $0x24] sm:$0xf] %vm1213_vm5, %v1124_v60  ;;  %1141 = vrot.lane.b32.xlu0 %v9428_v26, %s8806_s19  ;;  %v763_v26 = vld [vmem:[#allocation2 + $0x171] sm:$0xff]  ;;  %v7956_v15 = vpack.c.bf16 %v554_v7, %v554_v7 }
 0x10f   : > { %1849 = vrot.lane.b32.xlu1 %v9491_v10, %s8805_s6  ;;  %v8004_v29 = vpack.c.bf16 %v763_v26, %v763_v26  ;;  %v8068_v26 = vpack.c.bf16 %v1277_v17, %v1277_v17  ;;  %1689 = vst.msk [vmem:[#allocation3 + $0x13c] sm:$0xf] %vm699_vm3, %v9625_v45 }
 0x110   : > { %v1379_v16 = vpop.permute.xlu0 %1378  ;;  %715 = vst.msk [vmem:[#allocation3 + $0xb4] sm:$0xf] %vm699_vm3, %v7956_v15 }
 0x111   : > { %v2087_v14 = vpop.permute.xlu1 %2086  ;;  %1473 = vst.msk [vmem:[#allocation3 + $0x18] sm:$0xf] %vm1470_vm6, %v1379_v16  ;;  %v8067_v16 = vpack.c.bf16 %v1276_v59, %v1276_v59 }
 0x112   : > { %2179 = vst.msk [vmem:[#allocation3 + $0x28] sm:$0xf] %vm1213_vm5, %v2087_v14  ;;  %2104 = vrot.lane.b32.xlu0 %v9509_v13, %s8806_s19  ;;  %v7955_v14 = vpack.c.bf16 %v553_v12, %v553_v12 }
 0x113   : > { %1143 = vrot.lane.b32.xlu1 %v9434_v32, %s8806_s19 }
 0x114   : > { %v2341_v28 = vpop.permute.xlu0 %2340  ;;  %714 = vst.msk [vmem:[#allocation3 + $0xa8] sm:$0xf] %vm699_vm3, %v7955_v14 }
 0x115   : > { %v1381_v27 = vpop.permute.xlu1 %1380  ;;  %2434 = vst.msk [vmem:[#allocation3 + $0x1c] sm:$0xf] %vm1470_vm6, %v2341_v28  ;;  %v2465_v28 = vld [vmem:[#allocation2 + $0x3a] sm:$0xff] }
 0x116   : > { %1474 = vst.msk [vmem:[#allocation3 + $0x24] sm:$0xf] %vm1470_vm6, %v1381_v27  ;;  %920 = vrot.lane.b32.xlu0 %v8003_v24, %s8805_s6  ;;  %v2464_v27 = vld [vmem:[#allocation2 + $0x32] sm:$0xff]  ;;  %v8198_v34 = vpack.c.bf16 %v2465_v28, %v2465_v28 }
 0x117   : > { %2106 = vrot.lane.b32.xlu1 %v9515_v20, %s8806_s19  ;;  %v8197_v1 = vpack.c.bf16 %v2464_v27, %v2464_v27  ;;  %v1967_v27 = vld [vmem:[#allocation2 + $0xe0] sm:$0xff] }
 0x118   : > { %v869_v3 = vpop.permute.xlu0 %868  ;;  %2625 = vst.msk [vmem:[#allocation3 + $0x14] sm:$0xf] %vm699_vm3, %v8198_v34 }
 0x119   : > { %v2343_v32 = vpop.permute.xlu1 %2342  ;;  %961 = vst.msk [vmem:[#allocation3 + $0x30] sm:$0xf] %vm956_vm4, %v869_v3  ;;  %v2467_v3 = vld [vmem:[#allocation2 + $0x52] sm:$0xff] }
 0x11a   : > { %2435 = vst.msk [vmem:[#allocation3 + $0x28] sm:$0xf] %vm1470_vm6, %v2343_v32  ;;  %1398 = vrot.lane.b32.xlu0 %v9443_v30, %s8807_s22  ;;  %v8132_v30 = vpack.c.bf16 %v1726_v39, %v1726_v39  ;;  %v2239_v32 = vld [vmem:[#allocation2 + $0x1a1] sm:$0xff] }
 0x11b   : > { %922 = vrot.lane.b32.xlu1 %v8004_v29, %s8805_s6  ;;  %v8195_v29 = vpack.c.bf16 %v2238_v22, %v2238_v22  ;;  %v1719_v39 = vld [vmem:[#allocation2 + $0x13a] sm:$0xff]  ;;  %2624 = vst.msk [vmem:[#allocation3 + $0x8] sm:$0xf] %vm699_vm3, %v8197_v1  ;;  %v2475_v1 = vld [vmem:[#allocation2 + $0xb2] sm:$0xff] }
 0x11c   : > { %v1832_v47 = vpop.permute.xlu0 %1831  ;;  %v2660_v48 = vld [vmem:[#allocation3 + $0x18] sm:$0xff] }
 0x11d   : > { %v871_v31 = vpop.permute.xlu1 %870  ;;  %1923 = vst.msk [vmem:[#allocation3 + $0x34] sm:$0xf] %vm956_vm4, %v1832_v47 }
 0x11e   : > { %962 = vst.msk [vmem:[#allocation3 + $0x3c] sm:$0xf] %vm956_vm4, %v871_v31  ;;  %1883 = vrot.lane.b32.xlu0 %v8131_v38, %s8805_s6  ;;  %v8200_v31 = vpack.c.bf16 %v2467_v3, %v2467_v3 }
 0x11f   : > { %1400 = vrot.lane.b32.xlu1 %v9449_v44, %s8807_s22  ;;  %v8035_v44 = vpack.c.bf16 %v1019_v42, %v1019_v42  ;;  %v9578_v42 = vld [vmem:[%s13016_s2 + $0x88] sm:$0xff]  }
 0x120   : > { %v1126_v51 = vpop.permute.xlu0 %1125  ;;  %2627 = vst.msk [vmem:[#allocation3 + $0x2c] sm:$0xf] %vm699_vm3, %v8200_v31  ;;  %8384 = vmatprep.subr.bf16.mxu1 %v9578_v42  ;;  %v556_v31 = vld [vmem:[#allocation2 + $0xc8] sm:$0xff] }
 0x121   : > { %v1834_v43 = vpop.permute.xlu1 %1833  ;;  %v2662_v49 = vld [vmem:[#allocation3 + $0x24] sm:$0xff]  ;;  %1218 = vst.msk [vmem:[#allocation3 + $0x30] sm:$0xf] %vm1213_vm5, %v1126_v51  ;;  %v1709_v51 = vld [vmem:[#allocation2 + $0xc2] sm:$0xff] }
 0x122   : > { %v8581_v53 = vld [vmem:[#allocation3 + $0x1c] ss:$12 sps:$4 sm:$0xff]   ;;  %1924 = vst.msk [vmem:[#allocation3 + $0x40] sm:$0xf] %vm956_vm4, %v1834_v43  ;;  %v7836_v55 = vcombine.low %v2660_v48, %v2662_v49  ;;  %2360 = vrot.lane.b32.xlu0 %v9314_v41, %s8807_s22  ;;  %v8196_v43 = vpack.c.bf16 %v2239_v32, %v2239_v32  ;;  %v1720_v48 = vld [vmem:[#allocation2 + $0x142] sm:$0xff]  ;;  %v9602_v2 = vpack.c.bf16 %v1709_v51, %v1709_v51 }
 0x123   : > { %1885 = vrot.lane.b32.xlu1 %v8132_v30, %s8805_s6  ;;  %3192 = vmatprep.mubr.bf16.mxu0 %v8581_v53  ;;  %v9573_v30 = vpack.c.bf16 %v1719_v39, %v1719_v39  ;;  %v501_v49 = vld [vmem:[%s8998_s29 + $0xd8] sm:$0xff]  ;;  %v2474_v32 = vld [vmem:[#allocation2 + $0xaa] sm:$0xff] }
 0x124   : > { %3193 = vmatmul.mubr.bf16.gmra.mxu0 %v7836_v55  ;;  %v2089_v4 = vpop.permute.xlu0 %2088  ;;  %v9592_v55 = vpack.c.bf16 %v1720_v48, %v1720_v48  ;;  %534 = vst.msk [vmem:[#allocation2 + $0x159] sm:$0xff] %vm428_vm0, %v501_v49  ;;  %v8207_v3 = vpack.c.bf16 %v2474_v32, %v2474_v32  ;;  %v2476_v51 = vld [vmem:[#allocation2 + $0xc2] sm:$0xff] }
 0x125   : > { %v1128_v52 = vpop.permute.xlu1 %1127  ;;  %2180 = vst.msk [vmem:[#allocation3 + $0x34] sm:$0xf] %vm1213_vm5, %v2089_v4  ;;  %v1710_v4 = vld [vmem:[#allocation2 + $0xca] sm:$0xff] }
 0x126   : > { %1219 = vst.msk [vmem:[#allocation3 + $0x3c] sm:$0xf] %vm1213_vm5, %v1128_v52  ;;  %1177 = vrot.lane.b32.xlu0 %v8035_v44, %s8806_s19  ;;  %v2469_v52 = vld [vmem:[#allocation2 + $0x6a] sm:$0xff] }
 0x127   : > { %2362 = vrot.lane.b32.xlu1 %v9322_v46, %s8807_s22  ;;  %2646 = vst.msk [vmem:[#allocation3 + $0x110] sm:$0xf] %vm699_vm3, %v9573_v30  ;;  %2647 = vst.msk [vmem:[#allocation3 + $0x11c] sm:$0xf] %vm699_vm3, %v9592_v55 }
 0x128   : > { %v1383_v60 = vpop.permute.xlu0 %1382  ;;  %2634 = vst.msk [vmem:[#allocation3 + $0x80] sm:$0xf] %vm699_vm3, %v8207_v3  ;;  %v557_v3 = vld [vmem:[#allocation2 + $0xd8] sm:$0xff] }
 0x129   : > { %v2091_v9 = vpop.permute.xlu1 %2090  ;;  %1475 = vst.msk [vmem:[#allocation3 + $0x30] sm:$0xf] %vm1470_vm6, %v1383_v60 }
 0x12a   : > { %2181 = vst.msk [vmem:[#allocation3 + $0x40] sm:$0xf] %vm1213_vm5, %v2091_v9  ;;  %2140 = vrot.lane.b32.xlu0 %v8163_v58, %s8806_s19  ;;  %v8202_v58 = vpack.c.bf16 %v2469_v52, %v2469_v52  ;;  %v2471_v9 = vld [vmem:[#allocation2 + $0x82] sm:$0xff] }
 0x12b   : > { %1179 = vrot.lane.b32.xlu1 %v8036_v6, %s8806_s19  ;;  %v8201_v6 = vpack.c.bf16 %v2468_v56, %v2468_v56  ;;  %v8204_v14 = vpack.c.bf16 %v2471_v9, %v2471_v9  ;;  %v2233_v48 = vld [vmem:[#allocation2 + $0x159] sm:$0xff]  ;;  %v2479_v9 = vld [vmem:[#allocation2 + $0xe2] sm:$0xff] }
 0x12c   : > { %v2345_v24 = vpop.permute.xlu0 %2344  ;;  %2629 = vst.msk [vmem:[#allocation3 + $0x44] sm:$0xf] %vm699_vm3, %v8202_v58  ;;  %v1721_v52 = vld [vmem:[#allocation2 + $0x152] sm:$0xff] }
 0x12d   : > { %v1385_v19 = vpop.permute.xlu1 %1384  ;;  %2436 = vst.msk [vmem:[#allocation3 + $0x34] sm:$0xf] %vm1470_vm6, %v2345_v24  ;;  %v2473_v24 = vld [vmem:[#allocation2 + $0x9a] sm:$0xff] }
 0x12e   : > { %1476 = vst.msk [vmem:[#allocation3 + $0x3c] sm:$0xf] %vm1470_vm6, %v1385_v19  ;;  %1434 = vrot.lane.b32.xlu0 %v8067_v16, %s8807_s22  ;;  %v1966_v19 = vld [vmem:[#allocation2 + $0xd8] sm:$0xff] }
 0x12f   : > { %2142 = vrot.lane.b32.xlu1 %v8164_v62, %s8806_s19  ;;  %v8203_v62 = vpack.c.bf16 %v2470_v8, %v2470_v8  ;;  %2628 = vst.msk [vmem:[#allocation3 + $0x38] sm:$0xf] %vm699_vm3, %v8201_v6  ;;  %2631 = vst.msk [vmem:[#allocation3 + $0x5c] sm:$0xf] %vm699_vm3, %v8204_v14  ;;  %v9653_v8 = vpack.c.bf16 %v1721_v52, %v1721_v52 }
 0x130   : > { %v873_v47 = vpop.permute.xlu0 %872 }
 0x131   : > { %v2347_v38 = vpop.permute.xlu1 %2346  ;;  %963 = vst.msk [vmem:[#allocation3 + $0x48] sm:$0xf] %vm956_vm4, %v873_v47  ;;  %v7957_v47 = vpack.c.bf16 %v555_v40, %v555_v40  ;;  %v7959_v40 = vpack.c.bf16 %v557_v3, %v557_v3 }
 0x132   : > { %2437 = vst.msk [vmem:[#allocation3 + $0x40] sm:$0xf] %vm1470_vm6, %v2347_v38  ;;  %2396 = vrot.lane.b32.xlu0 %v8195_v29, %s8807_s22  ;;  %v8206_v29 = vpack.c.bf16 %v2473_v24, %v2473_v24  ;;  %v8208_v38 = vpack.c.bf16 %v2475_v1, %v2475_v1  ;;  %v1969_v1 = vld [vmem:[#allocation2 + $0xf8] sm:$0xff] }
 0x133   : > { %1436 = vrot.lane.b32.xlu1 %v8068_v26, %s8807_s22  ;;  %2630 = vst.msk [vmem:[#allocation3 + $0x50] sm:$0xf] %vm699_vm3, %v8203_v62  ;;  %v9622_v26 = vpack.c.bf16 %v1966_v19, %v1966_v19  ;;  %716 = vst.msk [vmem:[#allocation3 + $0xc0] sm:$0xf] %vm699_vm3, %v7957_v47  ;;  %v1722_v62 = vld [vmem:[#allocation2 + $0x15a] sm:$0xff] }
 0x134   : > { %v1836_v44 = vpop.permute.xlu0 %1835  ;;  %v2664_v60 = vld [vmem:[#allocation3 + $0x30] sm:$0xff]  ;;  %2633 = vst.msk [vmem:[#allocation3 + $0x74] sm:$0xf] %vm699_vm3, %v8206_v29  ;;  %2635 = vst.msk [vmem:[#allocation3 + $0x8c] sm:$0xf] %vm699_vm3, %v8208_v38  ;;  %v9665_v14 = vpack.c.bf16 %v1722_v62, %v1722_v62  ;;  %v1968_v29 = vld [vmem:[#allocation2 + $0xf0] sm:$0xff] }
 0x135   : > { %v875_v53 = vpop.permute.xlu1 %874  ;;  %1925 = vst.msk [vmem:[#allocation3 + $0x4c] sm:$0xf] %vm956_vm4, %v1836_v44  ;;  %v2477_v44 = vld [vmem:[#allocation2 + $0xca] sm:$0xff] }
 0x136   : > { %964 = vst.msk [vmem:[#allocation3 + $0x54] sm:$0xf] %vm956_vm4, %v875_v53  ;;  %888 = vrot.lane.b32.xlu0 %v9272_v25, %s8805_s6  ;;  %v9610_v25 = vpack.c.bf16 %v1710_v4, %v1710_v4  ;;  %v8209_v4 = vpack.c.bf16 %v2476_v51, %v2476_v51  ;;  %v8210_v6 = vpack.c.bf16 %v2477_v44, %v2477_v44  ;;  %v2234_v38 = vld [vmem:[#allocation2 + $0x169] sm:$0xff] }
 0x137   : > { %2398 = vrot.lane.b32.xlu1 %v8196_v43, %s8807_s22  ;;  %v7958_v43 = vpack.c.bf16 %v556_v31, %v556_v31  ;;  %2648 = vst.msk [vmem:[#allocation3 + $0x128] sm:$0xf] %vm699_vm3, %v9653_v8  ;;  %2649 = vst.msk [vmem:[#allocation3 + $0x134] sm:$0xf] %vm699_vm3, %v9665_v14  ;;  %v9700_v31 = vpack.c.bf16 %v2234_v38, %v2234_v38  ;;  %v1971_v38 = vld [vmem:[#allocation2 + $0x110] sm:$0xff] }
 0x138   : > { %v1130_v15 = vpop.permute.xlu0 %1129  ;;  %2636 = vst.msk [vmem:[#allocation3 + $0x98] sm:$0xf] %vm699_vm3, %v8209_v4  ;;  %2637 = vst.msk [vmem:[#allocation3 + $0xa4] sm:$0xf] %vm699_vm3, %v8210_v6  ;;  %v2225_v4 = vld [vmem:[#allocation2 + $0xf9] sm:$0xff] }
 0x139   : > { %v1838_v59 = vpop.permute.xlu1 %1837  ;;  %v2666_v12 = vld [vmem:[#allocation3 + $0x3c] sm:$0xff]  ;;  %1220 = vst.msk [vmem:[#allocation3 + $0x48] sm:$0xf] %vm1213_vm5, %v1130_v15 }
 0x13a   : > { %v8583_v7 = vld [vmem:[#allocation3 + $0x34] ss:$12 sps:$4 sm:$0xff]   ;;  %1926 = vst.msk [vmem:[#allocation3 + $0x58] sm:$0xf] %vm956_vm4, %v1838_v59  ;;  %v7839_v16 = vcombine.low %v2664_v60, %v2666_v12  ;;  %1851 = vrot.lane.b32.xlu0 %v9602_v2, %s8805_s6  ;;  %v8212_v60 = vpack.c.bf16 %v2479_v9, %v2479_v9 }
 0x13b   : > { %890 = vrot.lane.b32.xlu1 %v9286_v33, %s8805_s6  ;;  %3200 = vmatprep.mubr.bf16.mxu0 %v8583_v7  ;;  %v2472_v33 = vld [vmem:[#allocation2 + $0x92] sm:$0xff]  ;;  %717 = vst.msk [vmem:[#allocation3 + $0xcc] sm:$0xf] %vm699_vm3, %v7958_v43  ;;  %v1711_v7 = vld [vmem:[#allocation2 + $0xda] sm:$0xff]  ;;  %718 = vst.msk [vmem:[#allocation3 + $0xd8] sm:$0xf] %vm699_vm3, %v7959_v40 }
 0x13c   : > { %3201 = vmatmul.mubr.bf16.gmra.mxu0 %v7839_v16  ;;  %v2093_v22 = vpop.permute.xlu0 %2092  ;;  %v8205_v28 = vpack.c.bf16 %v2472_v33, %v2472_v33  ;;  %2639 = vst.msk [vmem:[#allocation3 + $0xbc] sm:$0xf] %vm699_vm3, %v8212_v60  ;;  %v9674_v15 = vpack.c.bf16 %v1711_v7, %v1711_v7  ;;  %v1712_v16 = vld [vmem:[#allocation2 + $0xe2] sm:$0xff]  ;;  %1691 = vst.msk [vmem:[#allocation3 + $0x154] sm:$0xf] %vm699_vm3, %v9700_v31  ;;  %v1724_v9 = vld [vmem:[#allocation2 + $0x172] sm:$0xff] }
 0x13d   : > { %v1132_v17 = vpop.permute.xlu1 %1131  ;;  %2182 = vst.msk [vmem:[#allocation3 + $0x4c] sm:$0xf] %vm1213_vm5, %v2093_v22 }
 0x13e   : > { %1221 = vst.msk [vmem:[#allocation3 + $0x54] sm:$0xf] %vm1213_vm5, %v1132_v17  ;;  %1145 = vrot.lane.b32.xlu0 %v9485_v54, %s8806_s19  ;;  %v9632_v54 = vpack.c.bf16 %v1967_v27, %v1967_v27 }
 0x13f   : > { %1853 = vrot.lane.b32.xlu1 %v9610_v25, %s8805_s6  ;;  %2632 = vst.msk [vmem:[#allocation3 + $0x68] sm:$0xf] %vm699_vm3, %v8205_v28 }
 0x140   : > { %v1387_v39 = vpop.permute.xlu0 %1386 }
 0x141   : > { %v2095_v34 = vpop.permute.xlu1 %2094  ;;  %1477 = vst.msk [vmem:[#allocation3 + $0x48] sm:$0xf] %vm1470_vm6, %v1387_v39  ;;  %v9698_v39 = vpack.c.bf16 %v1969_v1, %v1969_v1 }
 0x142   : > { %2183 = vst.msk [vmem:[#allocation3 + $0x58] sm:$0xf] %vm1213_vm5, %v2095_v34  ;;  %2108 = vrot.lane.b32.xlu0 %v9622_v26, %s8806_s19 }
 0x143   : > { %1147 = vrot.lane.b32.xlu1 %v9491_v10, %s8806_s19  ;;  %v9642_v10 = vpack.c.bf16 %v2233_v48, %v2233_v48  ;;  %v2224_v48 = vld [vmem:[#allocation2 + $0xf1] sm:$0xff] }
 0x144   : > { %v2349_v53 = vpop.permute.xlu0 %2348  ;;  %v9716_v52 = vpack.c.bf16 %v2224_v48, %v2224_v48 }
 0x145   : > { %v1389_v49 = vpop.permute.xlu1 %1388  ;;  %2438 = vst.msk [vmem:[#allocation3 + $0x4c] sm:$0xf] %vm1470_vm6, %v2349_v53  ;;  %v1521_v53 = vld [vmem:[#allocation2 + $0xf1] sm:$0xff] }
 0x146   : > { %1478 = vst.msk [vmem:[#allocation3 + $0x54] sm:$0xf] %vm1470_vm6, %v1389_v49  ;;  %1402 = vrot.lane.b32.xlu0 %v9509_v13, %s8807_s22  ;;  %v2478_v13 = vld [vmem:[#allocation2 + $0xda] sm:$0xff]  ;;  %v2235_v49 = vld [vmem:[#allocation2 + $0x171] sm:$0xff]  ;;  %v8087_v44 = vpack.c.bf16 %v1521_v53, %v1521_v53  ;;  %v2226_v53 = vld [vmem:[#allocation2 + $0x109] sm:$0xff] }
 0x147   : > { %2110 = vrot.lane.b32.xlu1 %v9632_v54, %s8806_s19  ;;  %1690 = vst.msk [vmem:[#allocation3 + $0x148] sm:$0xf] %vm699_vm3, %v9642_v10  ;;  %v8211_v59 = vpack.c.bf16 %v2478_v13, %v2478_v13  ;;  %v9709_v51 = vpack.c.bf16 %v2235_v49, %v2235_v49  ;;  %v1723_v13 = vld [vmem:[#allocation2 + $0x16a] sm:$0xff]  ;;  %v560_v49 = vld [vmem:[#allocation2 + $0xf8] sm:$0xff] }
 0x148   : > { %v877_v58 = vpop.permute.xlu0 %876  ;;  %1681 = vst.msk [vmem:[#allocation3 + $0xdc] sm:$0xf] %vm699_vm3, %v8087_v44  ;;  %v9723_v60 = vpack.c.bf16 %v1723_v13, %v1723_v13 }
 0x149   : > { %v2351_v56 = vpop.permute.xlu1 %2350  ;;  %965 = vst.msk [vmem:[#allocation3 + $0x60] sm:$0xf] %vm956_vm4, %v877_v58 }
 0x14a   : > { %2439 = vst.msk [vmem:[#allocation3 + $0x58] sm:$0xf] %vm1470_vm6, %v2351_v56  ;;  %2364 = vrot.lane.b32.xlu0 %v9361_v61, %s8807_s22  ;;  %v1522_v56 = vld [vmem:[#allocation2 + $0xf9] sm:$0xff] }
 0x14b   : > { %1404 = vrot.lane.b32.xlu1 %v9515_v20, %s8807_s22  ;;  %2638 = vst.msk [vmem:[#allocation3 + $0xb0] sm:$0xf] %vm699_vm3, %v8211_v59  ;;  %v8088_v6 = vpack.c.bf16 %v1522_v56, %v1522_v56  ;;  %1692 = vst.msk [vmem:[#allocation3 + $0x160] sm:$0xf] %vm699_vm3, %v9709_v51  ;;  %v1523_v56 = vld [vmem:[#allocation2 + $0x109] sm:$0xff] }
 0x14c   : > { %v1840_v20 = vpop.permute.xlu0 %1839  ;;  %v2668_v19 = vld [vmem:[#allocation3 + $0x48] sm:$0xff]  ;;  %2650 = vst.msk [vmem:[#allocation3 + $0x140] sm:$0xf] %vm699_vm3, %v9723_v60 }
 0x14d   : > { %v879_v12 = vpop.permute.xlu1 %878  ;;  %1927 = vst.msk [vmem:[#allocation3 + $0x64] sm:$0xf] %vm956_vm4, %v1840_v20  ;;  %v2492_v20 = vld [vmem:[#allocation2 + $0x182] sm:$0xff] }
 0x14e   : > { %966 = vst.msk [vmem:[#allocation3 + $0x6c] sm:$0xf] %vm956_vm4, %v879_v12  ;;  %892 = vrot.lane.b32.xlu0 %v9314_v41, %s8805_s6  ;;  %v9682_v41 = vpack.c.bf16 %v1712_v16, %v1712_v16  ;;  %v9730_v12 = vpack.c.bf16 %v2225_v4, %v2225_v4  ;;  %v2493_v16 = vld [vmem:[#allocation2 + $0x18a] sm:$0xff] }
 0x14f   : > { %2366 = vrot.lane.b32.xlu1 %v9367_v63, %s8807_s22  ;;  %1682 = vst.msk [vmem:[#allocation3 + $0xe8] sm:$0xf] %vm699_vm3, %v8088_v6  ;;  %v1524_v4 = vld [vmem:[#allocation2 + $0x111] sm:$0xff]  ;;  %v9778_v6 = vpack.c.bf16 %v2226_v53, %v2226_v53 }
 0x150   : > { %v1134_v24 = vpop.permute.xlu0 %1133  ;;  %v8090_v13 = vpack.c.bf16 %v1524_v4, %v1524_v4 }
 0x151   : > { %v1842_v17 = vpop.permute.xlu1 %1841  ;;  %v2670_v22 = vld [vmem:[#allocation3 + $0x54] sm:$0xff]  ;;  %1222 = vst.msk [vmem:[#allocation3 + $0x60] sm:$0xf] %vm1213_vm5, %v1134_v24  ;;  %v8226_v24 = vpack.c.bf16 %v2493_v16, %v2493_v16 }
 0x152   : > { %v8585_v33 = vld [vmem:[#allocation3 + $0x4c] ss:$12 sps:$4 sm:$0xff]   ;;  %1928 = vst.msk [vmem:[#allocation3 + $0x70] sm:$0xf] %vm956_vm4, %v1842_v17  ;;  %v7842_v27 = vcombine.low %v2668_v19, %v2670_v22  ;;  %1855 = vrot.lane.b32.xlu0 %v9674_v15, %s8805_s6 }
 0x153   : > { %894 = vrot.lane.b32.xlu1 %v9322_v46, %s8805_s6  ;;  %3208 = vmatprep.mubr.bf16.mxu0 %v8585_v33  ;;  %v9692_v46 = vpack.c.bf16 %v1968_v29, %v1968_v29  ;;  %v8225_v33 = vpack.c.bf16 %v2492_v20, %v2492_v20  ;;  %2653 = vst.msk [vmem:[#allocation3 + $0x164] sm:$0xf] %vm699_vm3, %v8226_v24  ;;  %1684 = vst.msk [vmem:[#allocation3 + $0x100] sm:$0xf] %vm699_vm3, %v8090_v13 }
 0x154   : > { %3209 = vmatmul.mubr.bf16.gmra.mxu0 %v7842_v27  ;;  %v2097_v32 = vpop.permute.xlu0 %2096  ;;  %v2494_v27 = vld [vmem:[#allocation2 + $0x19a] sm:$0xff] }
 0x155   : > { %v1136_v28 = vpop.permute.xlu1 %1135  ;;  %2184 = vst.msk [vmem:[#allocation3 + $0x64] sm:$0xf] %vm1213_vm5, %v2097_v32  ;;  %v2495_v32 = vld [vmem:[#allocation2 + $0x1a2] sm:$0xff]  ;;  %v8227_v1 = vpack.c.bf16 %v2494_v27, %v2494_v27 }
 0x156   : > { %1223 = vst.msk [vmem:[#allocation3 + $0x6c] sm:$0xf] %vm1213_vm5, %v1136_v28  ;;  %1149 = vrot.lane.b32.xlu0 %v9602_v2, %s8806_s19  ;;  %v558_v2 = vld [vmem:[#allocation2 + $0xe0] sm:$0xff] }
 0x157   : > { %1857 = vrot.lane.b32.xlu1 %v9682_v41, %s8805_s6  ;;  %v7960_v47 = vpack.c.bf16 %v558_v2, %v558_v2  ;;  %2652 = vst.msk [vmem:[#allocation3 + $0x158] sm:$0xf] %vm699_vm3, %v8225_v33  ;;  %2654 = vst.msk [vmem:[#allocation3 + $0x170] sm:$0xf] %vm699_vm3, %v8227_v1 }
 0x158   : > { %v1391_v36 = vpop.permute.xlu0 %1390 }
 0x159   : > { %v2099_v34 = vpop.permute.xlu1 %2098  ;;  %1479 = vst.msk [vmem:[#allocation3 + $0x60] sm:$0xf] %vm1470_vm6, %v1391_v36  ;;  %v1970_v36 = vld [vmem:[#allocation2 + $0x108] sm:$0xff] }
 0x15a   : > { %2185 = vst.msk [vmem:[#allocation3 + $0x70] sm:$0xf] %vm1213_vm5, %v2099_v34  ;;  %2112 = vrot.lane.b32.xlu0 %v9692_v46, %s8806_s19 }
 0x15b   : > { %1151 = vrot.lane.b32.xlu1 %v9610_v25, %s8806_s19  ;;  %719 = vst.msk [vmem:[#allocation3 + $0xe4] sm:$0xf] %vm699_vm3, %v7960_v47  ;;  %v559_v47 = vld [vmem:[#allocation2 + $0xf0] sm:$0xff] }
 0x15c   : > { %v2353_v25 = vpop.permute.xlu0 %2352  ;;  %v7961_v48 = vpack.c.bf16 %v559_v47, %v559_v47  ;;  %v2229_v47 = vld [vmem:[#allocation2 + $0x129] sm:$0xff] }
 0x15d   : > { %v1393_v43 = vpop.permute.xlu1 %1392  ;;  %2440 = vst.msk [vmem:[#allocation3 + $0x64] sm:$0xf] %vm1470_vm6, %v2353_v25 }
 0x15e   : > { %1480 = vst.msk [vmem:[#allocation3 + $0x6c] sm:$0xf] %vm1470_vm6, %v1393_v43  ;;  %1406 = vrot.lane.b32.xlu0 %v9622_v26, %s8807_s22  ;;  %v9725_v26 = vpack.c.bf16 %v1724_v9, %v1724_v9  ;;  %v9766_v43 = vpack.c.bf16 %v1971_v38, %v1971_v38  ;;  %v1525_v38 = vld [vmem:[#allocation2 + $0x121] sm:$0xff] }
 0x15f   : > { %2114 = vrot.lane.b32.xlu1 %v9698_v39, %s8806_s19  ;;  %720 = vst.msk [vmem:[#allocation3 + $0xf0] sm:$0xf] %vm699_vm3, %v7961_v48 }
 0x160   : > { %v881_v59 = vpop.permute.xlu0 %880  ;;  %2651 = vst.msk [vmem:[#allocation3 + $0x14c] sm:$0xf] %vm699_vm3, %v9725_v26 }
 0x161   : > { %v2355_v58 = vpop.permute.xlu1 %2354  ;;  %967 = vst.msk [vmem:[#allocation3 + $0x78] sm:$0xf] %vm956_vm4, %v881_v59 }
 0x162   : > { %2441 = vst.msk [vmem:[#allocation3 + $0x70] sm:$0xf] %vm1470_vm6, %v2355_v58  ;;  %2368 = vrot.lane.b32.xlu0 %v9716_v52, %s8807_s22  ;;  %v2227_v58 = vld [vmem:[#allocation2 + $0x111] sm:$0xff] }
 0x163   : > { %1408 = vrot.lane.b32.xlu1 %v9632_v54, %s8807_s22 }
 0x164   : > { %v1844_v62 = vpop.permute.xlu0 %1843  ;;  %v2672_v54 = vld [vmem:[#allocation3 + $0x60] sm:$0xff] }
 0x165   : > { %v883_v7 = vpop.permute.xlu1 %882  ;;  %1929 = vst.msk [vmem:[#allocation3 + $0x7c] sm:$0xf] %vm956_vm4, %v1844_v62 }
 0x166   : > { %968 = vst.msk [vmem:[#allocation3 + $0x84] sm:$0xf] %vm956_vm4, %v883_v7  ;;  %896 = vrot.lane.b32.xlu0 %v9361_v61, %s8805_s6  ;;  %v8228_v61 = vpack.c.bf16 %v2495_v32, %v2495_v32  ;;  %v9786_v7 = vpack.c.bf16 %v2227_v58, %v2227_v58  ;;  %v1975_v58 = vld [vmem:[#allocation2 + $0x140] sm:$0xff] }
 0x167   : > { %2370 = vrot.lane.b32.xlu1 %v9730_v12, %s8807_s22 }
 0x168   : > { %v1138_v28 = vpop.permute.xlu0 %1137  ;;  %2655 = vst.msk [vmem:[#allocation3 + $0x17c] sm:$0xf] %vm699_vm3, %v8228_v61  ;;  %v562_v61 = vld [vmem:[#allocation2 + $0x110] sm:$0xff] }
 0x169   : > { %v1846_v17 = vpop.permute.xlu1 %1845  ;;  %v2674_v19 = vld [vmem:[#allocation3 + $0x6c] sm:$0xff]  ;;  %1224 = vst.msk [vmem:[#allocation3 + $0x78] sm:$0xf] %vm1213_vm5, %v1138_v28 }
 0x16a   : > { %v8587_v22 = vld [vmem:[#allocation3 + $0x64] ss:$12 sps:$4 sm:$0xff]   ;;  %1930 = vst.msk [vmem:[#allocation3 + $0x88] sm:$0xf] %vm956_vm4, %v1846_v17  ;;  %v7845_v29 = vcombine.low %v2672_v54, %v2674_v19  ;;  %1859 = vrot.lane.b32.xlu0 %v9407_v18, %s8805_s6 }
 0x16b   : > { %898 = vrot.lane.b32.xlu1 %v9367_v63, %s8805_s6  ;;  %3216 = vmatprep.mubr.bf16.mxu0 %v8587_v22  ;;  %v9760_v63 = vpack.c.bf16 %v1970_v36, %v1970_v36  ;;  %v2228_v36 = vld [vmem:[#allocation2 + $0x121] sm:$0xff] }
 0x16c   : > { %3217 = vmatmul.mubr.bf16.gmra.mxu0 %v7845_v29  ;;  %v2101_v3 = vpop.permute.xlu0 %2100  ;;  %v561_v29 = vld [vmem:[#allocation2 + $0x108] sm:$0xff] }
 0x16d   : > { %v1140_v34 = vpop.permute.xlu1 %1139  ;;  %2186 = vst.msk [vmem:[#allocation3 + $0x7c] sm:$0xf] %vm1213_vm5, %v2101_v3  ;;  %v7963_v1 = vpack.c.bf16 %v561_v29, %v561_v29 }
 0x16e   : > { %1225 = vst.msk [vmem:[#allocation3 + $0x84] sm:$0xf] %vm1213_vm5, %v1140_v34  ;;  %1153 = vrot.lane.b32.xlu0 %v9674_v15, %s8806_s19  ;;  %v7962_v15 = vpack.c.bf16 %v560_v49, %v560_v49 }
 0x16f   : > { %1861 = vrot.lane.b32.xlu1 %v9417_v23, %s8805_s6  ;;  %722 = vst.msk [vmem:[#allocation3 + $0x108] sm:$0xf] %vm699_vm3, %v7963_v1 }
 0x170   : > { %v1395_v2 = vpop.permute.xlu0 %1394  ;;  %721 = vst.msk [vmem:[#allocation3 + $0xfc] sm:$0xf] %vm699_vm3, %v7962_v15 }
 0x171   : > { %v2103_v40 = vpop.permute.xlu1 %2102  ;;  %1481 = vst.msk [vmem:[#allocation3 + $0x78] sm:$0xf] %vm1470_vm6, %v1395_v2  ;;  %v9826_v2 = vpack.c.bf16 %v2228_v36, %v2228_v36 }
 0x172   : > { %2187 = vst.msk [vmem:[#allocation3 + $0x88] sm:$0xf] %vm1213_vm5, %v2103_v40  ;;  %2116 = vrot.lane.b32.xlu0 %v9760_v63, %s8806_s19  ;;  %v1526_v40 = vld [vmem:[#allocation2 + $0x129] sm:$0xff] }
 0x173   : > { %1155 = vrot.lane.b32.xlu1 %v9682_v41, %s8806_s19  ;;  %v8089_v41 = vpack.c.bf16 %v1523_v56, %v1523_v56  ;;  %v8092_v48 = vpack.c.bf16 %v1526_v40, %v1526_v40 }
 0x174   : > { %v2357_v44 = vpop.permute.xlu0 %2356 }
 0x175   : > { %v1397_v25 = vpop.permute.xlu1 %1396  ;;  %2442 = vst.msk [vmem:[#allocation3 + $0x7c] sm:$0xf] %vm1470_vm6, %v2357_v44 }
 0x176   : > { %1482 = vst.msk [vmem:[#allocation3 + $0x84] sm:$0xf] %vm1470_vm6, %v1397_v25  ;;  %1410 = vrot.lane.b32.xlu0 %v9692_v46, %s8807_s22  ;;  %v9834_v25 = vpack.c.bf16 %v2229_v47, %v2229_v47 }
 0x177   : > { %2118 = vrot.lane.b32.xlu1 %v9766_v43, %s8806_s19  ;;  %1683 = vst.msk [vmem:[#allocation3 + $0xf4] sm:$0xf] %vm699_vm3, %v8089_v41  ;;  %1686 = vst.msk [vmem:[#allocation3 + $0x118] sm:$0xf] %vm699_vm3, %v8092_v48  ;;  %v1974_v41 = vld [vmem:[#allocation2 + $0x138] sm:$0xff] }
 0x178   : > { %v885_v59 = vpop.permute.xlu0 %884 }
 0x179   : > { %v2359_v9 = vpop.permute.xlu1 %2358  ;;  %969 = vst.msk [vmem:[#allocation3 + $0x90] sm:$0xf] %vm956_vm4, %v885_v59 }
 0x17a   : > { %2443 = vst.msk [vmem:[#allocation3 + $0x88] sm:$0xf] %vm1470_vm6, %v2359_v9  ;;  %2372 = vrot.lane.b32.xlu0 %v9778_v6, %s8807_s22 }
 0x17b   : > { %1412 = vrot.lane.b32.xlu1 %v9698_v39, %s8807_s22 }
 0x17c   : > { %v1848_v62 = vpop.permute.xlu0 %1847  ;;  %v2676_v20 = vld [vmem:[#allocation3 + $0x78] sm:$0xff] }
 0x17d   : > { %v887_v46 = vpop.permute.xlu1 %886  ;;  %1931 = vst.msk [vmem:[#allocation3 + $0x94] sm:$0xf] %vm956_vm4, %v1848_v62 }
 0x17e   : > { %970 = vst.msk [vmem:[#allocation3 + $0x9c] sm:$0xf] %vm956_vm4, %v887_v46  ;;  %900 = vrot.lane.b32.xlu0 %v9716_v52, %s8805_s6  ;;  %v1972_v52 = vld [vmem:[#allocation2 + $0x120] sm:$0xff] }
 0x17f   : > { %2374 = vrot.lane.b32.xlu1 %v9786_v7, %s8807_s22  ;;  %v9808_v24 = vpack.c.bf16 %v1972_v52, %v1972_v52 }
 0x180   : > { %v1142_v17 = vpop.permute.xlu0 %1141 }
 0x181   : > { %v1850_v54 = vpop.permute.xlu1 %1849  ;;  %v2678_v39 = vld [vmem:[#allocation3 + $0x84] sm:$0xff]  ;;  %1226 = vst.msk [vmem:[#allocation3 + $0x90] sm:$0xf] %vm1213_vm5, %v1142_v17 }
 0x182   : > { %v8589_v16 = vld [vmem:[#allocation3 + $0x7c] ss:$12 sps:$4 sm:$0xff]   ;;  %1932 = vst.msk [vmem:[#allocation3 + $0xa0] sm:$0xf] %vm956_vm4, %v1850_v54  ;;  %v7848_v19 = vcombine.low %v2676_v20, %v2678_v39  ;;  %1863 = vrot.lane.b32.xlu0 %v9463_v50, %s8805_s6  ;;  %v563_v54 = vld [vmem:[#allocation2 + $0x120] sm:$0xff]  ;;  %v9862_v20 = vpack.c.bf16 %v1975_v58, %v1975_v58 }
 0x183   : > { %902 = vrot.lane.b32.xlu1 %v9730_v12, %s8805_s6  ;;  %3224 = vmatprep.mubr.bf16.mxu0 %v8589_v16  ;;  %v1973_v12 = vld [vmem:[#allocation2 + $0x128] sm:$0xff] }
 0x184   : > { %3225 = vmatmul.mubr.bf16.gmra.mxu0 %v7848_v19  ;;  %v2105_v33 = vpop.permute.xlu0 %2104  ;;  %v9814_v32 = vpack.c.bf16 %v1973_v12, %v1973_v12  ;;  %v564_v39 = vld [vmem:[#allocation2 + $0x128] sm:$0xff]  ;;  %v2230_v19 = vld [vmem:[#allocation2 + $0x139] sm:$0xff] }
 0x185   : > { %v1144_v22 = vpop.permute.xlu1 %1143  ;;  %2188 = vst.msk [vmem:[#allocation3 + $0x94] sm:$0xf] %vm1213_vm5, %v2105_v33  ;;  %v7966_v16 = vpack.c.bf16 %v564_v39, %v564_v39  ;;  %v1528_v33 = vld [vmem:[#allocation2 + $0x141] sm:$0xff]  ;;  %v9874_v12 = vpack.c.bf16 %v2230_v19, %v2230_v19 }
 0x186   : > { %1227 = vst.msk [vmem:[#allocation3 + $0x9c] sm:$0xf] %vm1213_vm5, %v1144_v22  ;;  %1157 = vrot.lane.b32.xlu0 %v9407_v18, %s8806_s19  ;;  %v7964_v18 = vpack.c.bf16 %v562_v61, %v562_v61 }
 0x187   : > { %1865 = vrot.lane.b32.xlu1 %v9474_v57, %s8805_s6  ;;  %725 = vst.msk [vmem:[#allocation3 + $0x12c] sm:$0xf] %vm699_vm3, %v7966_v16  ;;  %v8606_v16 = vld [vmem:[#allocation3 + $0x98] ss:$12 sps:$4 sm:$0xff]  }
 0x188   : > { %v921_v28 = vpop.permute.xlu0 %920  ;;  %723 = vst.msk [vmem:[#allocation3 + $0x114] sm:$0xf] %vm699_vm3, %v7964_v18 }
 0x189   : > { %v2107_v27 = vpop.permute.xlu1 %2106  ;;  %987 = vst.msk [vmem:[#allocation3 + $0x168] sm:$0xf] %vm956_vm4, %v921_v28  ;;  %v8094_v28 = vpack.c.bf16 %v1528_v33, %v1528_v33  ;;  %v8608_v33 = vld [vmem:[#allocation3 + $0xc8] ss:$12 sps:$4 sm:$0xff]  }
 0x18a   : > { %2189 = vst.msk [vmem:[#allocation3 + $0xa0] sm:$0xf] %vm1213_vm5, %v2107_v27  ;;  %2120 = vrot.lane.b32.xlu0 %v9808_v24, %s8806_s19  ;;  %v2231_v27 = vld [vmem:[#allocation2 + $0x141] sm:$0xff] }
 0x18b   : > { %1159 = vrot.lane.b32.xlu1 %v9417_v23, %s8806_s19  ;;  %v8091_v23 = vpack.c.bf16 %v1525_v38, %v1525_v38  ;;  %1688 = vst.msk [vmem:[#allocation3 + $0x130] sm:$0xf] %vm699_vm3, %v8094_v28  ;;  %v9882_v61 = vpack.c.bf16 %v2231_v27, %v2231_v27  ;;  %v568_v28 = vld [vmem:[#allocation2 + $0x158] sm:$0xff] }
 0x18c   : > { %v1399_v3 = vpop.permute.xlu0 %1398 }
 0x18d   : > { %v923_v34 = vpop.permute.xlu1 %922  ;;  %1483 = vst.msk [vmem:[#allocation3 + $0x90] sm:$0xf] %vm1470_vm6, %v1399_v3 }
 0x18e   : > { %988 = vst.msk [vmem:[#allocation3 + $0x174] sm:$0xf] %vm956_vm4, %v923_v34  ;;  %1414 = vrot.lane.b32.xlu0 %v9760_v63, %s8807_s22  ;;  %v8598_v34 = vld [vmem:[#allocation3 + $0x8] ss:$12 sps:$4 sm:$0xff]  }
 0x18f   : > { %2122 = vrot.lane.b32.xlu1 %v9814_v32, %s8806_s19  ;;  %1685 = vst.msk [vmem:[#allocation3 + $0x10c] sm:$0xf] %vm699_vm3, %v8091_v23  ;;  %v8597_v23 = vld [vmem:[%s13016_s2 + $0x80] sm:$0xff]  }
 0x190   : > { %v1884_v15 = vpop.permute.xlu0 %1883 }
 0x191   : > { %v1401_v49 = vpop.permute.xlu1 %1400  ;;  %1949 = vst.msk [vmem:[#allocation3 + $0x16c] sm:$0xf] %vm956_vm4, %v1884_v15  ;;  %v1977_v15 = vld [vmem:[#allocation2 + $0x158] sm:$0xff] }
 0x192   : > { %1484 = vst.msk [vmem:[#allocation3 + $0x9c] sm:$0xf] %vm1470_vm6, %v1401_v49  ;;  %2376 = vrot.lane.b32.xlu0 %v9826_v2, %s8807_s22  ;;  %v8599_v49 = vld [vmem:[#allocation3 + $0x20] ss:$12 sps:$4 sm:$0xff]  }
 0x193   : > { %1416 = vrot.lane.b32.xlu1 %v9766_v43, %s8807_s22 }
 0x194   : > { %v2361_v53 = vpop.permute.xlu0 %2360 }
 0x195   : > { %v1886_v63 = vpop.permute.xlu1 %1885  ;;  %2444 = vst.msk [vmem:[#allocation3 + $0x94] sm:$0xf] %vm1470_vm6, %v2361_v53  ;;  %v565_v53 = vld [vmem:[#allocation2 + $0x138] sm:$0xff] }
 0x196   : > { %1950 = vst.msk [vmem:[#allocation3 + $0x178] sm:$0xf] %vm956_vm4, %v1886_v63  ;;  %904 = vrot.lane.b32.xlu0 %v9778_v6, %s8805_s6  ;;  %v9856_v6 = vpack.c.bf16 %v1974_v41, %v1974_v41 }
 0x197   : > { %2378 = vrot.lane.b32.xlu1 %v9834_v25, %s8807_s22 }
 0x198   : > { %v1178_v43 = vpop.permute.xlu0 %1177 }
 0x199   : > { %v2363_v44 = vpop.permute.xlu1 %2362  ;;  %1244 = vst.msk [vmem:[#allocation3 + $0x168] sm:$0xf] %vm1213_vm5, %v1178_v43  ;;  %v7967_v43 = vpack.c.bf16 %v565_v53, %v565_v53 }
 0x19a   : > { %2445 = vst.msk [vmem:[#allocation3 + $0xa0] sm:$0xf] %vm1470_vm6, %v2363_v44  ;;  %1867 = vrot.lane.b32.xlu0 %v9531_v37, %s8805_s6  ;;  %v9915_v44 = vpack.c.bf16 %v1977_v15, %v1977_v15 }
 0x19b   : > { %906 = vrot.lane.b32.xlu1 %v9786_v7, %s8805_s6  ;;  %726 = vst.msk [vmem:[#allocation3 + $0x138] sm:$0xf] %vm699_vm3, %v7967_v43 }
 0x19c   : > { %v2141_v4 = vpop.permute.xlu0 %2140  ;;  %v2680_v9 = vld [vmem:[#allocation3 + $0x90] sm:$0xff] }
 0x19d   : > { %v1180_v56 = vpop.permute.xlu1 %1179  ;;  %2206 = vst.msk [vmem:[#allocation3 + $0x16c] sm:$0xf] %vm1213_vm5, %v2141_v4 }
 0x19e   : > { %1245 = vst.msk [vmem:[#allocation3 + $0x174] sm:$0xf] %vm1213_vm5, %v1180_v56  ;;  %1161 = vrot.lane.b32.xlu0 %v9463_v50, %s8806_s19  ;;  %v7965_v50 = vpack.c.bf16 %v563_v54, %v563_v54 }
 0x19f   : > { %1869 = vrot.lane.b32.xlu1 %v9541_v35, %s8805_s6 }
 0x1a0   : > { %v1435_v46 = vpop.permute.xlu0 %1434  ;;  %724 = vst.msk [vmem:[#allocation3 + $0x120] sm:$0xf] %vm699_vm3, %v7965_v50 }
 0x1a1   : > { %v2143_v13 = vpop.permute.xlu1 %2142  ;;  %v2682_v59 = vld [vmem:[#allocation3 + $0x9c] sm:$0xff]  ;;  %1501 = vst.msk [vmem:[#allocation3 + $0x168] sm:$0xf] %vm1470_vm6, %v1435_v46 }
 0x1a2   : > { %v8591_v7 = vld [vmem:[#allocation3 + $0x94] ss:$12 sps:$4 sm:$0xff]   ;;  %2207 = vst.msk [vmem:[#allocation3 + $0x178] sm:$0xf] %vm1213_vm5, %v2143_v13  ;;  %v7851_v62 = vcombine.low %v2680_v9, %v2682_v59  ;;  %2124 = vrot.lane.b32.xlu0 %v9856_v6, %s8806_s19 }
 0x1a3   : > { %1163 = vrot.lane.b32.xlu1 %v9474_v57, %s8806_s19  ;;  %3232 = vmatprep.mubr.bf16.mxu0 %v8591_v7  ;;  %v1527_v57 = vld [vmem:[#allocation2 + $0x139] sm:$0xff] }
 0x1a4   : > { %3233 = vmatmul.mubr.bf16.gmra.mxu0 %v7851_v62  ;;  %v2397_v22 = vpop.permute.xlu0 %2396  ;;  %v8093_v52 = vpack.c.bf16 %v1527_v57, %v1527_v57  ;;  %v8604_v13 = vld [vmem:[#allocation3 + $0x68] ss:$12 sps:$4 sm:$0xff]   ;;  %v8605_v7 = vld [vmem:[#allocation3 + $0x80] ss:$12 sps:$4 sm:$0xff]   ;;  %v8607_v57 = vld [vmem:[#allocation3 + $0xb0] ss:$12 sps:$4 sm:$0xff]  }
 0x1a5   : > { %v1437_v17 = vpop.permute.xlu1 %1436  ;;  %2462 = vst.msk [vmem:[#allocation3 + $0x16c] sm:$0xf] %vm1470_vm6, %v2397_v22 }
 0x1a6   : > { %1502 = vst.msk [vmem:[#allocation3 + $0x174] sm:$0xf] %vm1470_vm6, %v1437_v17  ;;  %1418 = vrot.lane.b32.xlu0 %v9808_v24, %s8807_s22 }
 0x1a7   : > { %2126 = vrot.lane.b32.xlu1 %v9862_v20, %s8806_s19  ;;  %1687 = vst.msk [vmem:[#allocation3 + $0x124] sm:$0xf] %vm699_vm3, %v8093_v52 }
 0x1a8   : > { %v889_v1 = vpop.permute.xlu0 %888 }
 0x1a9   : > { %v2399_v29 = vpop.permute.xlu1 %2398  ;;  %971 = vst.msk [vmem:[#allocation3 + $0xa8] sm:$0xf] %vm956_vm4, %v889_v1 }
 0x1aa   : > { %2463 = vst.msk [vmem:[#allocation3 + $0x178] sm:$0xf] %vm1470_vm6, %v2399_v29  ;;  %2380 = vrot.lane.b32.xlu0 %v9874_v12, %s8807_s22  ;;  %v7970_v29 = vpack.c.bf16 %v568_v28, %v568_v28 }
 0x1ab   : > { %1420 = vrot.lane.b32.xlu1 %v9814_v32, %s8807_s22 }
 0x1ac   : > { %v1852_v18 = vpop.permute.xlu0 %1851  ;;  %729 = vst.msk [vmem:[#allocation3 + $0x15c] sm:$0xf] %vm699_vm3, %v7970_v29 }
 0x1ad   : > { %v891_v24 = vpop.permute.xlu1 %890  ;;  %1933 = vst.msk [vmem:[#allocation3 + $0xac] sm:$0xf] %vm956_vm4, %v1852_v18  ;;  %v8593_v32 = vld [vmem:[#allocation3 + $0x168] ss:$12 sps:$4 sm:$0xff]  }
 0x1ae   : > { %972 = vst.msk [vmem:[#allocation3 + $0xb4] sm:$0xf] %vm956_vm4, %v891_v24  ;;  %908 = vrot.lane.b32.xlu0 %v9826_v2, %s8805_s6  ;;  %v1976_v2 = vld [vmem:[#allocation2 + $0x150] sm:$0xff] }
 0x1af   : > { %2382 = vrot.lane.b32.xlu1 %v9882_v61, %s8807_s22  ;;  %v9909_v48 = vpack.c.bf16 %v1976_v2, %v1976_v2  ;;  %v8612_v24 = vld [vmem:[#allocation3 + $0xf8] ss:$12 sps:$4 sm:$0xff]  }
 0x1b0   : > { %v1146_v38 = vpop.permute.xlu0 %1145 }
 0x1b1   : > { %v1854_v36 = vpop.permute.xlu1 %1853  ;;  %v8595_v3 = vld [vmem:[#allocation3 + $0x16c] ss:$12 sps:$4 sm:$0xff]   ;;  %1228 = vst.msk [vmem:[#allocation3 + $0xa8] sm:$0xf] %vm1213_vm5, %v1146_v38 }
 0x1b2   : > { %1934 = vst.msk [vmem:[#allocation3 + $0xb8] sm:$0xf] %vm956_vm4, %v1854_v36  ;;  %3304 = vmatprep.mubr.bf16.mxu1 %v8595_v3  ;;  %1871 = vrot.lane.b32.xlu0 %v9573_v30, %s8805_s6 }
 0x1b3   : > { %910 = vrot.lane.b32.xlu1 %v9834_v25, %s8805_s6  ;;  %3305 = vmatmul.mubr.bf16.vlgmr.msra.gmra.mxu1 %v8593_v32  ;;  %v8600_v25 = vld [vmem:[#allocation3 + $0x38] ss:$12 sps:$4 sm:$0xff]  }
 0x1b4   : > { %8385 = vmatpush3.bf16.msra.mxu1 %v9578_v42  ;;  %8388 = vmatprep.mubr.msk.bf16.mxu1 %vm428_vm0, %v8598_v34  ;;  %v2109_v47 = vpop.permute.xlu0 %2108  ;;  %v8613_v34 = vld [vmem:[#allocation3 + $0x110] ss:$12 sps:$4 sm:$0xff]  }
 0x1b5   : > { %v1148_v40 = vpop.permute.xlu1 %1147  ;;  %8386 = vmatprep.subr.bf16.mxu1 %v8597_v23  ;;  %2190 = vst.msk [vmem:[#allocation3 + $0xac] sm:$0xf] %vm1213_vm5, %v2109_v47 }
 0x1b6   : > { %1229 = vst.msk [vmem:[#allocation3 + $0xb4] sm:$0xf] %vm1213_vm5, %v1148_v40  ;;  %1165 = vrot.lane.b32.xlu0 %v9531_v37, %s8806_s19  ;;  %v566_v37 = vld [vmem:[#allocation2 + $0x140] sm:$0xff] }
 0x1b7   : > { %1873 = vrot.lane.b32.xlu1 %v9592_v55, %s8805_s6  ;;  %v7968_v56 = vpack.c.bf16 %v566_v37, %v566_v37  ;;  %v8614_v40 = vld [vmem:[#allocation3 + $0x128] ss:$12 sps:$4 sm:$0xff]   ;;  %v8617_v37 = vld [vmem:[#allocation3 + $0x170] ss:$12 sps:$4 sm:$0xff]  }
 0x1b8   : > { %8387 = vmatpush3.bf16.msra.mxu1 %v8597_v23  ;;  %v1403_v63 = vpop.permute.xlu0 %1402 }
 0x1b9   : > { %v2111_v42 = vpop.permute.xlu1 %2110  ;;  %1485 = vst.msk [vmem:[#allocation3 + $0xa8] sm:$0xf] %vm1470_vm6, %v1403_v63  ;;  %v1275_v63 = vld [vmem:[#allocation2 + $0x170] sm:$0xff] }
 0x1ba   : > { %2191 = vst.msk [vmem:[#allocation3 + $0xb8] sm:$0xf] %vm1213_vm5, %v2111_v42  ;;  %2128 = vrot.lane.b32.xlu0 %v9909_v48, %s8806_s19  ;;  %v8616_v42 = vld [vmem:[#allocation3 + $0x158] ss:$12 sps:$4 sm:$0xff]  }
 0x1bb   : > { %1167 = vrot.lane.b32.xlu1 %v9541_v35, %s8806_s19  ;;  %8389 = vmatmul.mubr.msk.bf16.vlgmr.msra.gmra.mxu1 %vm428_vm0, %v8599_v49  ;;  %727 = vst.msk [vmem:[#allocation3 + $0x144] sm:$0xf] %vm699_vm3, %v7968_v56  ;;  %v8601_v35 = vld [vmem:[#allocation3 + $0x50] ss:$12 sps:$4 sm:$0xff]  }
 0x1bc   : > { %8392 = vmatprep.mubr.msk.bf16.mxu1 %vm428_vm0, %v8600_v25  ;;  %v2365_v4 = vpop.permute.xlu0 %2364  ;;  %v1274_v49 = vld [vmem:[#allocation2 + $0x168] sm:$0xff] }
 0x1bd   : > { %v1405_v41 = vpop.permute.xlu1 %1404  ;;  %2446 = vst.msk [vmem:[#allocation3 + $0xac] sm:$0xf] %vm1470_vm6, %v2365_v4 }
 0x1be   : > { %1486 = vst.msk [vmem:[#allocation3 + $0xb4] sm:$0xf] %vm1470_vm6, %v1405_v41  ;;  %1422 = vrot.lane.b32.xlu0 %v9856_v6, %s8807_s22 }
 0x1bf   : > { %2130 = vrot.lane.b32.xlu1 %v9915_v44, %s8806_s19 }
 0x1c0   : > { %v893_v9 = vpop.permute.xlu0 %892 }
 0x1c1   : > { %v2367_v58 = vpop.permute.xlu1 %2366  ;;  %973 = vst.msk [vmem:[#allocation3 + $0xc0] sm:$0xf] %vm956_vm4, %v893_v9 }
 0x1c2   : > { %2447 = vst.msk [vmem:[#allocation3 + $0xb8] sm:$0xf] %vm1470_vm6, %v2367_v58  ;;  %2384 = vrot.lane.b32.xlu0 %v9625_v45, %s8807_s22 }
 0x1c3   : > { %1424 = vrot.lane.b32.xlu1 %v9862_v20, %s8807_s22  ;;  %8393 = vmatmul.mubr.msk.bf16.gmra.mxu1 %vm428_vm0, %v8601_v35 }
 0x1c4   : > { %8396 = vmatprep.mubr.msk.bf16.mxu1 %vm428_vm0, %v8604_v13  ;;  %v1856_v6 = vpop.permute.xlu0 %1855  ;;  %v2684_v62 = vld [vmem:[#allocation3 + $0xa8] sm:$0xff] }
 0x1c5   : > { %v895_v59 = vpop.permute.xlu1 %894  ;;  %1935 = vst.msk [vmem:[#allocation3 + $0xc4] sm:$0xf] %vm956_vm4, %v1856_v6 }
 0x1c6   : > { %974 = vst.msk [vmem:[#allocation3 + $0xcc] sm:$0xf] %vm956_vm4, %v895_v59  ;;  %912 = vrot.lane.b32.xlu0 %v9874_v12, %s8805_s6  ;;  %v567_v12 = vld [vmem:[#allocation2 + $0x150] sm:$0xff] }
 0x1c7   : > { %2386 = vrot.lane.b32.xlu1 %v9642_v10, %s8807_s22  ;;  %v7969_v27 = vpack.c.bf16 %v567_v12, %v567_v12 }
 0x1c8   : > { %v1150_v50 = vpop.permute.xlu0 %1149 }
 0x1c9   : > { %v1858_v46 = vpop.permute.xlu1 %1857  ;;  %v2686_v54 = vld [vmem:[#allocation3 + $0xb4] sm:$0xff]  ;;  %1230 = vst.msk [vmem:[#allocation3 + $0xc0] sm:$0xf] %vm1213_vm5, %v1150_v50 }
 0x1ca   : > { %v8602_v20 = vld [vmem:[#allocation3 + $0xac] ss:$12 sps:$4 sm:$0xff]   ;;  %1936 = vst.msk [vmem:[#allocation3 + $0xd0] sm:$0xf] %vm956_vm4, %v1858_v46  ;;  %v7854_v39 = vcombine.low %v2684_v62, %v2686_v54  ;;  %1875 = vrot.lane.b32.xlu0 %v9653_v8, %s8805_s6 }
 0x1cb   : > { %914 = vrot.lane.b32.xlu1 %v9882_v61, %s8805_s6  ;;  %3240 = vmatprep.mubr.bf16.mxu0 %v8602_v20  ;;  %728 = vst.msk [vmem:[#allocation3 + $0x150] sm:$0xf] %vm699_vm3, %v7969_v27 }
 0x1cc   : > { %3241 = vmatmul.mubr.bf16.gmra.mxu0 %v7854_v39  ;;  %8397 = vmatmul.mubr.msk.bf16.gmra.mxu1 %vm428_vm0, %v8605_v7  ;;  %v2113_v19 = vpop.permute.xlu0 %2112 }
 0x1cd   : > { %v1152_v17 = vpop.permute.xlu1 %1151  ;;  %8400 = vmatprep.mubr.msk.bf16.mxu1 %vm428_vm0, %v8606_v16  ;;  %2192 = vst.msk [vmem:[#allocation3 + $0xc4] sm:$0xf] %vm1213_vm5, %v2113_v19 }
 0x1ce   : > { %1231 = vst.msk [vmem:[#allocation3 + $0xcc] sm:$0xf] %vm1213_vm5, %v1152_v17  ;;  %1169 = vrot.lane.b32.xlu0 %v9573_v30, %s8806_s19 }
 0x1cf   : > { %1877 = vrot.lane.b32.xlu1 %v9665_v14, %s8805_s6 }
 0x1d0   : > { %v1407_v52 = vpop.permute.xlu0 %1406 }
 0x1d1   : > { %v2115_v22 = vpop.permute.xlu1 %2114  ;;  %1487 = vst.msk [vmem:[#allocation3 + $0xc0] sm:$0xf] %vm1470_vm6, %v1407_v52 }
 0x1d2   : > { %2193 = vst.msk [vmem:[#allocation3 + $0xd0] sm:$0xf] %vm1213_vm5, %v2115_v22  ;;  %2132 = vrot.lane.b32.xlu0 %v9493_v5, %s8806_s19 }
 0x1d3   : > { %1171 = vrot.lane.b32.xlu1 %v9592_v55, %s8806_s19  ;;  %v8609_v55 = vld [vmem:[#allocation3 + $0xe0] ss:$12 sps:$4 sm:$0xff]  }
 0x1d4   : > { %8401 = vmatmul.mubr.msk.bf16.gmra.mxu1 %vm428_vm0, %v8607_v57  ;;  %v2369_v30 = vpop.permute.xlu0 %2368 }
 0x1d5   : > { %v1409_v1 = vpop.permute.xlu1 %1408  ;;  %8404 = vmatprep.mubr.msk.bf16.mxu1 %vm428_vm0, %v8608_v33  ;;  %2448 = vst.msk [vmem:[#allocation3 + $0xc4] sm:$0xf] %vm1470_vm6, %v2369_v30 }
 0x1d6   : > { %1488 = vst.msk [vmem:[#allocation3 + $0xcc] sm:$0xf] %vm1470_vm6, %v1409_v1  ;;  %1426 = vrot.lane.b32.xlu0 %v9909_v48, %s8807_s22  ;;  %v8615_v48 = vld [vmem:[#allocation3 + $0x140] ss:$12 sps:$4 sm:$0xff]  }
 0x1d7   : > { %2134 = vrot.lane.b32.xlu1 %v9495_v11, %s8806_s19 }
 0x1d8   : > { %v897_v61 = vpop.permute.xlu0 %896 }
 0x1d9   : > { %v2371_v5 = vpop.permute.xlu1 %2370  ;;  %975 = vst.msk [vmem:[#allocation3 + $0xd8] sm:$0xf] %vm956_vm4, %v897_v61  ;;  %v10041_v61 = vpop.f32.mrf.mxu0 }
 0x1da   : > { %2449 = vst.msk [vmem:[#allocation3 + $0xd0] sm:$0xf] %vm1470_vm6, %v2371_v5  ;;  %2388 = vrot.lane.b32.xlu0 %v9700_v31, %s8807_s22 }
 0x1db   : > { %1428 = vrot.lane.b32.xlu1 %v9915_v44, %s8807_s22  ;;  %v8066_v44 = vpack.c.bf16 %v1275_v63, %v1275_v63 }
 0x1dc   : > { %8405 = vmatmul.mubr.msk.bf16.gmra.mxu1 %vm428_vm0, %v8609_v55  ;;  %v1860_v11 = vpop.permute.xlu0 %1859  ;;  %v2688_v32 = vld [vmem:[#allocation3 + $0xc0] sm:$0xff] }
 0x1dd   : > { %v899_v18 = vpop.permute.xlu1 %898  ;;  %8408 = vmatprep.mubr.msk.bf16.mxu1 %vm428_vm0, %v8612_v24  ;;  %1937 = vst.msk [vmem:[#allocation3 + $0xdc] sm:$0xf] %vm956_vm4, %v1860_v11  ;;  %v10045_v11 = vpop.f32.mrf.mxu0 }
 0x1de   : > { %976 = vst.msk [vmem:[#allocation3 + $0xe4] sm:$0xf] %vm956_vm4, %v899_v18  ;;  %916 = vrot.lane.b32.xlu0 %v9625_v45, %s8805_s6 }
 0x1df   : > { %2390 = vrot.lane.b32.xlu1 %v9709_v51, %s8807_s22  ;;  %v1980_v51 = vld [vmem:[#allocation2 + $0x180] sm:$0xff] }
 0x1e0   : > { %v1154_v38 = vpop.permute.xlu0 %1153 }
 0x1e1   : > { %v1862_v36 = vpop.permute.xlu1 %1861  ;;  %v2690_v31 = vld [vmem:[#allocation3 + $0xcc] sm:$0xff]  ;;  %1232 = vst.msk [vmem:[#allocation3 + $0xd8] sm:$0xf] %vm1213_vm5, %v1154_v38 }
 0x1e2   : > { %v8610_v3 = vld [vmem:[#allocation3 + $0xc4] ss:$12 sps:$4 sm:$0xff]   ;;  %1938 = vst.msk [vmem:[#allocation3 + $0xe8] sm:$0xf] %vm956_vm4, %v1862_v36  ;;  %v7857_v23 = vcombine.low %v2688_v32, %v2690_v31  ;;  %1879 = vrot.lane.b32.xlu0 %v9723_v60, %s8805_s6  ;;  %v1981_v60 = vld [vmem:[#allocation2 + $0x188] sm:$0xff]  ;;  %v10049_v32 = vpop.f32.mrf.mxu0 }
 0x1e3   : > { %918 = vrot.lane.b32.xlu1 %v9642_v10, %s8805_s6  ;;  %3248 = vmatprep.mubr.bf16.mxu0 %v8610_v3  ;;  %v8161_v10 = vpack.c.bf16 %v1980_v51, %v1980_v51  ;;  %v8162_v25 = vpack.c.bf16 %v1981_v60, %v1981_v60 }
 0x1e4   : > { %3249 = vmatmul.mubr.bf16.gmra.mxu0 %v7857_v23  ;;  %8409 = vmatmul.mubr.msk.bf16.gmra.mxu1 %vm428_vm0, %v8613_v34  ;;  %v2117_v2 = vpop.permute.xlu0 %2116  ;;  %v10053_v51 = vpop.f32.mrf.mxu0 }
 0x1e5   : > { %v1156_v45 = vpop.permute.xlu1 %1155  ;;  %8412 = vmatprep.mubr.msk.bf16.mxu1 %vm428_vm0, %v8614_v40  ;;  %2194 = vst.msk [vmem:[#allocation3 + $0xdc] sm:$0xf] %vm1213_vm5, %v2117_v2 }
 0x1e6   : > { %1233 = vst.msk [vmem:[#allocation3 + $0xe4] sm:$0xf] %vm1213_vm5, %v1156_v45  ;;  %1173 = vrot.lane.b32.xlu0 %v9653_v8, %s8806_s19 }
 0x1e7   : > { %1881 = vrot.lane.b32.xlu1 %v9725_v26, %s8805_s6  ;;  %v8065_v26 = vpack.c.bf16 %v1274_v49, %v1274_v49 }
 0x1e8   : > { %v1411_v15 = vpop.permute.xlu0 %1410 }
 0x1e9   : > { %v2119_v47 = vpop.permute.xlu1 %2118  ;;  %1489 = vst.msk [vmem:[#allocation3 + $0xd8] sm:$0xf] %vm1470_vm6, %v1411_v15 }
 0x1ea   : > { %2195 = vst.msk [vmem:[#allocation3 + $0xe8] sm:$0xf] %vm1213_vm5, %v2119_v47  ;;  %2136 = vrot.lane.b32.xlu0 %v8161_v10, %s8806_s19  ;;  %v10055_v10 = vpop.f32.mrf.mxu0 }
 0x1eb   : > { %1175 = vrot.lane.b32.xlu1 %v9665_v14, %s8806_s19  ;;  %v2237_v14 = vld [vmem:[#allocation2 + $0x189] sm:$0xff] }
 0x1ec   : > { %8413 = vmatmul.mubr.msk.bf16.gmra.mxu1 %vm428_vm0, %v8615_v48  ;;  %v2373_v53 = vpop.permute.xlu0 %2372  ;;  %v8194_v41 = vpack.c.bf16 %v2237_v14, %v2237_v14  ;;  %v10059_v48 = vpop.f32.mrf.mxu0 }
 0x1ed   : > { %v1413_v8 = vpop.permute.xlu1 %1412  ;;  %8416 = vmatprep.mubr.msk.bf16.mxu1 %vm428_vm0, %v8616_v42  ;;  %2450 = vst.msk [vmem:[#allocation3 + $0xdc] sm:$0xf] %vm1470_vm6, %v2373_v53 }
 0x1ee   : > { %1490 = vst.msk [vmem:[#allocation3 + $0xe4] sm:$0xf] %vm1470_vm6, %v1413_v8  ;;  %1430 = vrot.lane.b32.xlu0 %v8065_v26, %s8807_s22  ;;  %v10063_v42 = vpop.f32.mrf.mxu0 }
 0x1ef   : > { %2138 = vrot.lane.b32.xlu1 %v8162_v25, %s8806_s19 }
 0x1f0   : > { %v901_v56 = vpop.permute.xlu0 %900  ;;  %v10067_v63 = vpop.f32.mrf.mxu0 }
 0x1f1   : > { %v2375_v43 = vpop.permute.xlu1 %2374  ;;  %977 = vst.msk [vmem:[#allocation3 + $0xf0] sm:$0xf] %vm956_vm4, %v901_v56 }
 0x1f2   : > { %2451 = vst.msk [vmem:[#allocation3 + $0xe8] sm:$0xf] %vm1470_vm6, %v2375_v43  ;;  %2392 = vrot.lane.b32.xlu0 %v9517_v21, %s8807_s22 }
 0x1f3   : > { %1432 = vrot.lane.b32.xlu1 %v8066_v44, %s8807_s22 }
 0x1f4   : > { %8417 = vmatmul.mubr.msk.bf16.gmra.mxu1 %vm428_vm0, %v8617_v37  ;;  %v1864_v35 = vpop.permute.xlu0 %1863  ;;  %v2692_v13 = vld [vmem:[#allocation3 + $0xd8] sm:$0xff] }
 0x1f5   : > { %v903_v4 = vpop.permute.xlu1 %902  ;;  %1939 = vst.msk [vmem:[#allocation3 + $0xf4] sm:$0xf] %vm956_vm4, %v1864_v35 }
 0x1f6   : > { %978 = vst.msk [vmem:[#allocation3 + $0xfc] sm:$0xf] %vm956_vm4, %v903_v4 }
 0x1f7   : > { %2394 = vrot.lane.b32.xlu1 %v8194_v41, %s8807_s22 }
 0x1f8   : > { %v1158_v6 = vpop.permute.xlu0 %1157 }
 0x1f9   : > { %v1866_v58 = vpop.permute.xlu1 %1865  ;;  %v2694_v9 = vld [vmem:[#allocation3 + $0xe4] sm:$0xff]  ;;  %1234 = vst.msk [vmem:[#allocation3 + $0xf0] sm:$0xf] %vm1213_vm5, %v1158_v6 }
 0x1fa   : > { %v8618_v59 = vld [vmem:[#allocation3 + $0xdc] ss:$12 sps:$4 sm:$0xff]   ;;  %1940 = vst.msk [vmem:[#allocation3 + $0x100] sm:$0xf] %vm956_vm4, %v1866_v58  ;;  %v7860_v7 = vcombine.low %v2692_v13, %v2694_v9 }
 0x1fb   : > { %3256 = vmatprep.mubr.bf16.mxu0 %v8618_v59 }
 0x1fc   : > { %3257 = vmatmul.mubr.bf16.gmra.mxu0 %v7860_v7  ;;  %v2121_v46 = vpop.permute.xlu0 %2120  ;;  %v10071_v53 = vpop.f32.mrf.mxu0 }
 0x1fd   : > { %v1160_v21 = vpop.permute.xlu1 %1159  ;;  %2196 = vst.msk [vmem:[#allocation3 + $0xf4] sm:$0xf] %vm1213_vm5, %v2121_v46 }
 0x1fe   : > { %1235 = vst.msk [vmem:[#allocation3 + $0xfc] sm:$0xf] %vm1213_vm5, %v1160_v21  ;;  %v10075_v43 = vpop.f32.mrf.mxu0 }
 0x200   : > { %v1415_v54 = vpop.permute.xlu0 %1414  ;;  %v10079_v13 = vpop.f32.mrf.mxu0 }
 0x201   : > { %v2123_v62 = vpop.permute.xlu1 %2122  ;;  %1491 = vst.msk [vmem:[#allocation3 + $0xf0] sm:$0xf] %vm1470_vm6, %v1415_v54 }
 0x202   : > { %2197 = vst.msk [vmem:[#allocation3 + $0x100] sm:$0xf] %vm1213_vm5, %v2123_v62  ;;  %v10083_v6 = vpop.f32.mrf.mxu0 }
 0x204   : > { %v2377_v50 = vpop.permute.xlu0 %2376 }
 0x205   : > { %v1417_v20 = vpop.permute.xlu1 %1416  ;;  %2452 = vst.msk [vmem:[#allocation3 + $0xf4] sm:$0xf] %vm1470_vm6, %v2377_v50 }
 0x206   : > { %1492 = vst.msk [vmem:[#allocation3 + $0xfc] sm:$0xf] %vm1470_vm6, %v1417_v20 }
 0x208   : > { %v905_v16 = vpop.permute.xlu0 %904 }
 0x209   : > { %v2379_v39 = vpop.permute.xlu1 %2378  ;;  %979 = vst.msk [vmem:[#allocation3 + $0x108] sm:$0xf] %vm956_vm4, %v905_v16 }
 0x20a   : > { %2453 = vst.msk [vmem:[#allocation3 + $0x100] sm:$0xf] %vm1470_vm6, %v2379_v39 }
 0x20c   : > { %v1868_v19 = vpop.permute.xlu0 %1867  ;;  %v2696_v57 = vld [vmem:[#allocation3 + $0xf0] sm:$0xff] }
 0x20d   : > { %v907_v17 = vpop.permute.xlu1 %906  ;;  %1941 = vst.msk [vmem:[#allocation3 + $0x10c] sm:$0xf] %vm956_vm4, %v1868_v19 }
 0x20e   : > { %980 = vst.msk [vmem:[#allocation3 + $0x114] sm:$0xf] %vm956_vm4, %v907_v17 }
 0x210   : > { %v1162_v12 = vpop.permute.xlu0 %1161 }
 0x211   : > { %v1870_v22 = vpop.permute.xlu1 %1869  ;;  %v2698_v52 = vld [vmem:[#allocation3 + $0xfc] sm:$0xff]  ;;  %1236 = vst.msk [vmem:[#allocation3 + $0x108] sm:$0xf] %vm1213_vm5, %v1162_v12 }
 0x212   : > { %v8620_v33 = vld [vmem:[#allocation3 + $0xf4] ss:$12 sps:$4 sm:$0xff]   ;;  %1942 = vst.msk [vmem:[#allocation3 + $0x118] sm:$0xf] %vm956_vm4, %v1870_v22  ;;  %v7863_v27 = vcombine.low %v2696_v57, %v2698_v52 }
 0x213   : > { %3264 = vmatprep.mubr.bf16.mxu0 %v8620_v33 }
 0x214   : > { %3265 = vmatmul.mubr.bf16.gmra.mxu0 %v7863_v27  ;;  %v2125_v29 = vpop.permute.xlu0 %2124  ;;  %v10085_v21 = vpop.f32.mrf.mxu0 }
 0x215   : > { %v1164_v28 = vpop.permute.xlu1 %1163  ;;  %2198 = vst.msk [vmem:[#allocation3 + $0x10c] sm:$0xf] %vm1213_vm5, %v2125_v29 }
 0x216   : > { %1237 = vst.msk [vmem:[#allocation3 + $0x114] sm:$0xf] %vm1213_vm5, %v1164_v28  ;;  %v10089_v54 = vpop.f32.mrf.mxu0 }
 0x218   : > { %v1419_v30 = vpop.permute.xlu0 %1418  ;;  %v10093_v39 = vpop.f32.mrf.mxu0 }
 0x219   : > { %v2127_v1 = vpop.permute.xlu1 %2126  ;;  %1493 = vst.msk [vmem:[#allocation3 + $0x108] sm:$0xf] %vm1470_vm6, %v1419_v30 }
 0x21a   : > { %2199 = vst.msk [vmem:[#allocation3 + $0x118] sm:$0xf] %vm1213_vm5, %v2127_v1  ;;  %v10097_v19 = vpop.f32.mrf.mxu0 }
 0x21c   : > { %v2381_v55 = vpop.permute.xlu0 %2380 }
 0x21d   : > { %v1421_v5 = vpop.permute.xlu1 %1420  ;;  %2454 = vst.msk [vmem:[#allocation3 + $0x10c] sm:$0xf] %vm1470_vm6, %v2381_v55 }
 0x21e   : > { %1494 = vst.msk [vmem:[#allocation3 + $0x114] sm:$0xf] %vm1470_vm6, %v1421_v5 }
 0x220   : > { %v909_v18 = vpop.permute.xlu0 %908 }
 0x221   : > { %v2383_v24 = vpop.permute.xlu1 %2382  ;;  %981 = vst.msk [vmem:[#allocation3 + $0x120] sm:$0xf] %vm956_vm4, %v909_v18 }
 0x222   : > { %2455 = vst.msk [vmem:[#allocation3 + $0x118] sm:$0xf] %vm1470_vm6, %v2383_v24 }
 0x224   : > { %v1872_v36 = vpop.permute.xlu0 %1871  ;;  %v2700_v3 = vld [vmem:[#allocation3 + $0x108] sm:$0xff] }
 0x225   : > { %v911_v34 = vpop.permute.xlu1 %910  ;;  %1943 = vst.msk [vmem:[#allocation3 + $0x124] sm:$0xf] %vm956_vm4, %v1872_v36 }
 0x226   : > { %982 = vst.msk [vmem:[#allocation3 + $0x12c] sm:$0xf] %vm956_vm4, %v911_v34 }
 0x228   : > { %v1166_v40 = vpop.permute.xlu0 %1165 }
 0x229   : > { %v1874_v31 = vpop.permute.xlu1 %1873  ;;  %v2702_v38 = vld [vmem:[#allocation3 + $0x114] sm:$0xff]  ;;  %1238 = vst.msk [vmem:[#allocation3 + $0x120] sm:$0xf] %vm1213_vm5, %v1166_v40 }
 0x22a   : > { %v8622_v23 = vld [vmem:[#allocation3 + $0x10c] ss:$12 sps:$4 sm:$0xff]   ;;  %1944 = vst.msk [vmem:[#allocation3 + $0x130] sm:$0xf] %vm956_vm4, %v1874_v31  ;;  %v7866_v45 = vcombine.low %v2700_v3, %v2702_v38 }
 0x22b   : > { %3272 = vmatprep.mubr.bf16.mxu0 %v8622_v23 }
 0x22c   : > { %3273 = vmatmul.mubr.bf16.gmra.mxu0 %v7866_v45  ;;  %v2129_v60 = vpop.permute.xlu0 %2128  ;;  %v10101_v57 = vpop.f32.mrf.mxu0 }
 0x22d   : > { %v1168_v2 = vpop.permute.xlu1 %1167  ;;  %2200 = vst.msk [vmem:[#allocation3 + $0x124] sm:$0xf] %vm1213_vm5, %v2129_v60 }
 0x22e   : > { %1239 = vst.msk [vmem:[#allocation3 + $0x12c] sm:$0xf] %vm1213_vm5, %v1168_v2  ;;  %v8271_v1 = vpop.f32.mrf.mxu0 }
 0x230   : > { %v1423_v49 = vpop.permute.xlu0 %1422  ;;  %v8273_v55 = vpop.f32.mrf.mxu0 }
 0x231   : > { %v2131_v47 = vpop.permute.xlu1 %2130  ;;  %1495 = vst.msk [vmem:[#allocation3 + $0x120] sm:$0xf] %vm1470_vm6, %v1423_v49 }
 0x232   : > { %2201 = vst.msk [vmem:[#allocation3 + $0x130] sm:$0xf] %vm1213_vm5, %v2131_v47  ;;  %v8274_v34 = vpop.f32.mrf.mxu0 }
 0x234   : > { %v2385_v25 = vpop.permute.xlu0 %2384 }
 0x235   : > { %v1425_v15 = vpop.permute.xlu1 %1424  ;;  %2456 = vst.msk [vmem:[#allocation3 + $0x124] sm:$0xf] %vm1470_vm6, %v2385_v25  ;;  %v13032_v25 = vlaneseq }
 0x236   : > { %1496 = vst.msk [vmem:[#allocation3 + $0x12c] sm:$0xf] %vm1470_vm6, %v1425_v15 }
 0x238   : > { %v913_v8 = vpop.permute.xlu0 %912 }
 0x239   : > { %v2387_v26 = vpop.permute.xlu1 %2386  ;;  %983 = vst.msk [vmem:[#allocation3 + $0x138] sm:$0xf] %vm956_vm4, %v913_v8 }
 0x23a   : > { %2457 = vst.msk [vmem:[#allocation3 + $0x130] sm:$0xf] %vm1470_vm6, %v2387_v26 }
 0x23c   : > { %v1876_v14 = vpop.permute.xlu0 %1875  ;;  %v2704_v56 = vld [vmem:[#allocation3 + $0x120] sm:$0xff] }
 0x23d   : > { %v915_v44 = vpop.permute.xlu1 %914  ;;  %1945 = vst.msk [vmem:[#allocation3 + $0x13c] sm:$0xf] %vm956_vm4, %v1876_v14 }
 0x23e   : > { %984 = vst.msk [vmem:[#allocation3 + $0x144] sm:$0xf] %vm956_vm4, %v915_v44 }
 0x240   : > { %v1170_v35 = vpop.permute.xlu0 %1169 }
 0x241   : > { %v1878_v37 = vpop.permute.xlu1 %1877  ;;  %v2706_v41 = vld [vmem:[#allocation3 + $0x12c] sm:$0xff]  ;;  %1240 = vst.msk [vmem:[#allocation3 + $0x138] sm:$0xf] %vm1213_vm5, %v1170_v35 }
 0x242   : > { %v8624_v4 = vld [vmem:[#allocation3 + $0x124] ss:$12 sps:$4 sm:$0xff]   ;;  %1946 = vst.msk [vmem:[#allocation3 + $0x148] sm:$0xf] %vm956_vm4, %v1878_v37  ;;  %v7869_v58 = vcombine.low %v2704_v56, %v2706_v41  ;;  %v10115_v37 = vshrl.u32 %v13032_v25, 7  ;;  %v8254_v56 = vadd.f32 %v10059_v48, %v10055_v10 }
 0x243   : > { %3280 = vmatprep.mubr.bf16.mxu0 %v8624_v4 }
 0x244   : > { %3281 = vmatmul.mubr.bf16.gmra.mxu0 %v7869_v58  ;;  %v2133_v59 = vpop.permute.xlu0 %2132  ;;  %v8276_v31 = vpop.f32.mrf.mxu0  ;;  %13126 = vst [vmem:[#allocation17_spill] sm:$0xff] %v10115_v37  ;;  %v8248_v58 = vadd.f32 %v10045_v11, %v10041_v61  ;;  %v10133_v10 = vsub.s32 1, %v10115_v37  ;;  %v10136_v48 = vsub.s32 2, %v10115_v37  ;;  %v8260_v61 = vadd.f32 %v10075_v43, %v10071_v53 }
 0x245   : > { %v1172_v9 = vpop.permute.xlu1 %1171  ;;  %2202 = vst.msk [vmem:[#allocation3 + $0x13c] sm:$0xf] %vm1213_vm5, %v2133_v59  ;;  %v10142_v11 = vadd.f32 %v10083_v6, %v10079_v13  ;;  %v8269_v53 = vadd.f32 %v10097_v19, %v10093_v39  ;;  %v10154_v43 = vadd.f32 %v8271_v1, %v10101_v57  ;;  %v10156_v13 = vadd.f32 %v8274_v34, %v8273_v55 }
 0x246   : > { %1241 = vst.msk [vmem:[#allocation3 + $0x144] sm:$0xf] %vm1213_vm5, %v1172_v9  ;;  %v8277_v23 = vpop.f32.mrf.mxu0  ;;  %v8251_v9 = vadd.f32 %v10053_v51, %v10049_v32  ;;  %13129 = vst [vmem:[#allocation20_spill] sm:$0xff] %v10133_v10  ;;  %v10145_v32 = vsub.s32 3, %v10115_v37  ;;  %v8266_v51 = vadd.f32 %v10089_v54, %v10085_v21 }
 0x247   : > { %13130 = vst [vmem:[#allocation21_spill] sm:$0xff] %v10136_v48  ;;  %v10162_v21 = vadd.f32 %v8277_v23, %v8276_v31 }
 0x248   : > { %v1427_v46 = vpop.permute.xlu0 %1426  ;;  %v8279_v40 = vpop.f32.mrf.mxu0  ;;  %13131 = vst [vmem:[#allocation22_spill] sm:$0xff] %v10145_v32 }
 0x249   : > { %v2135_v7 = vpop.permute.xlu1 %2134  ;;  %1497 = vst.msk [vmem:[#allocation3 + $0x138] sm:$0xf] %vm1470_vm6, %v1427_v46  ;;  %v10130_v46 = vsub.s32 0, %v10115_v37 }
 0x24a   : > { %2203 = vst.msk [vmem:[#allocation3 + $0x148] sm:$0xf] %vm1213_vm5, %v2135_v7  ;;  %v8280_v60 = vpop.f32.mrf.mxu0  ;;  %v8257_v7 = vadd.f32 %v10067_v63, %v10063_v42 }
 0x24b   : > { %13128 = vst [vmem:[#allocation19_spill] sm:$0xff] %v10130_v46  ;;  %v10164_v54 = vadd.f32 %v8280_v60, %v8279_v40 }
 0x24c   : > { %v2389_v20 = vpop.permute.xlu0 %2388 }
 0x24d   : > { %v1429_v62 = vpop.permute.xlu1 %1428  ;;  %2458 = vst.msk [vmem:[#allocation3 + $0x13c] sm:$0xf] %vm1470_vm6, %v2389_v20 }
 0x24e   : > { %1498 = vst.msk [vmem:[#allocation3 + $0x144] sm:$0xf] %vm1470_vm6, %v1429_v62 }
 0x250   : > { %v917_v16 = vpop.permute.xlu0 %916 }
 0x251   : > { %v2391_v50 = vpop.permute.xlu1 %2390  ;;  %985 = vst.msk [vmem:[#allocation3 + $0x150] sm:$0xf] %vm956_vm4, %v917_v16 }
 0x252   : > { %2459 = vst.msk [vmem:[#allocation3 + $0x148] sm:$0xf] %vm1470_vm6, %v2391_v50 }
 0x254   : > { %v1880_v22 = vpop.permute.xlu0 %1879  ;;  %v2708_v33 = vld [vmem:[#allocation3 + $0x138] sm:$0xff] }
 0x255   : > { %v919_v17 = vpop.permute.xlu1 %918  ;;  %1947 = vst.msk [vmem:[#allocation3 + $0x154] sm:$0xf] %vm956_vm4, %v1880_v22 }
 0x256   : > { %986 = vst.msk [vmem:[#allocation3 + $0x15c] sm:$0xf] %vm956_vm4, %v919_v17 }
 0x258   : > { %v1174_v28 = vpop.permute.xlu0 %1173 }
 0x259   : > { %v1882_v52 = vpop.permute.xlu1 %1881  ;;  %v2710_v12 = vld [vmem:[#allocation3 + $0x144] sm:$0xff]  ;;  %1242 = vst.msk [vmem:[#allocation3 + $0x150] sm:$0xf] %vm1213_vm5, %v1174_v28 }
 0x25a   : > { %v8626_v27 = vld [vmem:[#allocation3 + $0x13c] ss:$12 sps:$4 sm:$0xff]   ;;  %1948 = vst.msk [vmem:[#allocation3 + $0x160] sm:$0xf] %vm956_vm4, %v1882_v52  ;;  %v7872_v29 = vcombine.low %v2708_v33, %v2710_v12  ;;  %vm5098_vm4 = vcmask 1047808  }
 0x25b   : > { %3288 = vmatprep.mubr.bf16.mxu0 %v8626_v27 }
 0x25c   : > { %3289 = vmatmul.mubr.bf16.gmra.mxu0 %v7872_v29  ;;  %v2137_v5 = vpop.permute.xlu0 %2136 }
 0x25d   : > { %v1176_v30 = vpop.permute.xlu1 %1175  ;;  %2204 = vst.msk [vmem:[#allocation3 + $0x154] sm:$0xf] %vm1213_vm5, %v2137_v5 }
 0x25e   : > { %1243 = vst.msk [vmem:[#allocation3 + $0x15c] sm:$0xf] %vm1213_vm5, %v1176_v30 }
 0x260   : > { %v1431_v18 = vpop.permute.xlu0 %1430 }
 0x261   : > { %v2139_v24 = vpop.permute.xlu1 %2138  ;;  %1499 = vst.msk [vmem:[#allocation3 + $0x150] sm:$0xf] %vm1470_vm6, %v1431_v18 }
 0x262   : > { %2205 = vst.msk [vmem:[#allocation3 + $0x160] sm:$0xf] %vm1213_vm5, %v2139_v24  ;;  %vm5497_vm5 = vcmask 261121  }
 0x264   : > { %v2393_v3 = vpop.permute.xlu0 %2392  ;;  %v8282_v47 = vpop.f32.mrf.mxu0 }
 0x265   : > { %v1433_v36 = vpop.permute.xlu1 %1432  ;;  %2460 = vst.msk [vmem:[#allocation3 + $0x154] sm:$0xf] %vm1470_vm6, %v2393_v3 }
 0x266   : > { %1500 = vst.msk [vmem:[#allocation3 + $0x15c] sm:$0xf] %vm1470_vm6, %v1433_v36  ;;  %v8283_v8 = vpop.f32.mrf.mxu0 }
 0x267   : > { %v10172_v17 = vadd.f32 %v8283_v8, %v8282_v47  ;;  %v8631_v8 = vld [vmem:[%s13018_s4 + $0x38] sm:$0xff]  }
 0x268   : > { %v8285_v4 = vpop.f32.mrf.mxu0  ;;  %8420 = vmatprep.subr.bf16.mxu1 %v8631_v8 }
 0x269   : > { %v2395_v38 = vpop.permute.xlu1 %2394  ;;  %8421 = vmatpush3.bf16.msra.mxu1 %v8631_v8 }
 0x26a   : > { %2461 = vst.msk [vmem:[#allocation3 + $0x160] sm:$0xf] %vm1470_vm6, %v2395_v38  ;;  %v8286_v42 = vpop.f32.mrf.mxu0  ;;  %vm5101_vm6 = vcmask 1041664  }
 0x26b   : > { %v10174_v19 = vadd.f32 %v8286_v42, %v8285_v4 }
 0x26d   : > { %v8630_v2 = vld [vmem:[#allocation3 + $0x150] ss:$12 sps:$4 sm:$0xff]  }
 0x271   : > { %v8628_v45 = vld [vmem:[#allocation3 + $0x154] ss:$12 sps:$4 sm:$0xff]  }
 0x272   : > { %3296 = vmatprep.mubr.bf16.mxu0 %v8628_v45 }
 0x273   : > { %3297 = vmatmul.mubr.bf16.gmra.mxu0 %v8630_v2  ;;  %v8336_v49 = vpop.f32.mrf.mxu1 }
 0x275   : > { %v8337_v15 = vpop.f32.mrf.mxu1 }
 0x276   : > { %v10112_v26 = vadd.f32 %v8337_v15, %v8336_v49 }
 0x277   : > { %v8339_v44 = vpop.f32.mrf.mxu1 }
 0x279   : > { %v8340_v14 = vpop.f32.mrf.mxu1 }
 0x27a   : > { %v10119_v41 = vadd.f32 %v8340_v14, %v8339_v44 }
 0x27b   : > { %v8390_v35 = vpop.f32.mrf.mxu1 }
 0x27c   : > { %13127 = vst [vmem:[#allocation18_spill] sm:$0xff] %v10119_v41  ;;  %v10125_v59 = vadd.f32 %v8390_v35, %v8254_v56 }
 0x27d   : > { %v3347_v62 = vpop.f32.mrf.mxu1 }
 0x27e   : > { %v10149_v63 = vadd.f32 %v8248_v58, %v3347_v62  ;;  %v10160_v6 = vcombine.high %v10125_v59, %v10125_v59  ;;  %v3884_v52 = vrot.slane %v10125_v59, %v10133_v10  ;;  %v4220_v33 = vrot.slane %v10125_v59, %v10136_v48 }
 0x27f   : > { %v8391_v20 = vpop.f32.mrf.mxu1 }
 0x280   : > { %v10168_v50 = vcombine.high %v10149_v63, %v10149_v63  ;;  %v10170_v16 = vadd.f32 %v8391_v20, %v8257_v7  ;;  %v3868_v12 = vrot.slane %v10149_v63, %v10133_v10  ;;  %v3888_v5 = vrot.slane %v10160_v6, %v10133_v10 }
 0x281   : > { %v3350_v39 = vpop.f32.mrf.mxu1  ;;  %v4224_v34 = vrot.slane %v10160_v6, %v10136_v48  ;;  %v4204_v45 = vrot.slane %v10149_v63, %v10136_v48 }
 0x282   : > { %v10178_v57 = vadd.f32 %v8251_v9, %v3350_v39  ;;  %v3872_v27 = vrot.slane %v10168_v50, %v10133_v10  ;;  %v10200_v55 = vcombine.high %v10170_v16, %v10170_v16  ;;  %v3892_v47 = vrot.slane %v10170_v16, %v10133_v10 }
 0x283   : > { %v8394_v28 = vpop.f32.mrf.mxu1  ;;  %v4208_v15 = vrot.slane %v10168_v50, %v10136_v48 }
 0x284   : > { %v10192_v1 = vcombine.high %v10178_v57, %v10178_v57  ;;  %v3876_v30 = vrot.slane %v10178_v57, %v10133_v10  ;;  %v4121_v18 = vsel %vm3794_vm7, %v3872_v27, %v3868_v12  ;;  %v10207_v31 = vadd.f32 %v8394_v28, %v8266_v51 }
 0x285   : > { %v3363_v24 = vpop.f32.mrf.mxu1  ;;  %v4212_v14 = vrot.slane %v10178_v57, %v10136_v48  ;;  %v3896_v62 = vrot.slane %v10200_v55, %v10133_v10 }
 0x286   : > { %v10209_v3 = vadd.f32 %v8260_v61, %v3363_v24  ;;  %v3880_v38 = vrot.slane %v10192_v1, %v10133_v10  ;;  %v4122_v23 = vsel %vm3796_vm8, %v3876_v30, %v4121_v18  ;;  %v10241_v9 = vcombine.high %v10207_v31, %v10207_v31 }
 0x287   : > { %v8395_v60 = vpop.f32.mrf.mxu1  ;;  %v4216_v61 = vrot.slane %v10192_v1, %v10136_v48  ;;  %v3916_v51 = vrot.slane %v10207_v31, %v10133_v10  ;;  %v4252_v42 = vrot.slane %v10207_v31, %v10136_v48  ;;  %v4588_v27 = vrot.slane %v10207_v31, %v10145_v32 }
 0x288   : > { %v10236_v4 = vcombine.high %v10209_v3, %v10209_v3  ;;  %v4123_v58 = vsel %vm3798_vm9, %v3880_v38, %v4122_v23  ;;  %v10261_v30 = vadd.f32 %v8395_v60, %v8269_v53  ;;  %v4572_v23 = vrot.slane %v10209_v3, %v10145_v32 }
 0x289   : > { %v3366_v35 = vpop.f32.mrf.mxu1  ;;  %v4124_v12 = vsel %vm3800_vm10, %v3884_v52, %v4123_v58  ;;  %v4236_v52 = vrot.slane %v10209_v3, %v10136_v48 }
 0x28a   : > { %v10254_v20 = vadd.f32 %v10142_v11, %v3366_v35  ;;  %v4125_v18 = vsel %vm3802_vm11, %v3888_v5, %v4124_v12  ;;  %v3900_v11 = vrot.slane %v10209_v3, %v10133_v10  ;;  %v3904_v53 = vrot.slane %v10236_v4, %v10133_v10 }
 0x28b   : > { %v4126_v58 = vsel %vm3804_vm12, %v3892_v47, %v4125_v18  ;;  %v4457_v12 = vsel %vm3794_vm7, %v4208_v15, %v4204_v45  ;;  %v4240_v0 = vrot.slane %v10236_v4, %v10136_v48  ;;  %v4576_v22 = vrot.slane %v10236_v4, %v10145_v32 }
 0x28c   : > { %v8288_v39 = vpop.f32.mrf.mxu0  ;;  %v8398_v24 = vpop.f32.mrf.mxu1  ;;  %v10276_v60 = vcombine.high %v10254_v20, %v10254_v20  ;;  %v4127_v38 = vsel %vm3806_vm13, %v3896_v62, %v4126_v58  ;;  %v10293_v47 = vcombine.high %v10261_v30, %v10261_v30  ;;  %v3908_v62 = vrot.slane %v10254_v20, %v10133_v10 }
 0x28d   : > { %v10283_v25 = vadd.f32 %v8398_v24, %v10162_v21  ;;  %4177 = vrot.lane.b32.xlu0 %v4127_v38, %s8805_s6  ;;  %v4228_v21 = vrot.slane %v10170_v16, %v10136_v48  ;;  %v4458_v24 = vsel %vm3796_vm8, %v4212_v14, %v4457_v12  ;;  %v3920_v18 = vrot.slane %v10241_v9, %v10133_v10 }
 0x28e   : > { %v8289_v35 = vpop.f32.mrf.mxu0  ;;  %v3379_v5 = vpop.f32.mrf.mxu1  ;;  %v4244_v38 = vrot.slane %v10254_v20, %v10136_v48  ;;  %v3912_v49 = vrot.slane %v10276_v60, %v10133_v10  ;;  %v4459_v56 = vsel %vm3798_vm9, %v4216_v61, %v4458_v24  ;;  %v4128_v2 = vsel %vm3794_vm7, %v3904_v53, %v3900_v11 }
 0x28f   : > { %v10286_v7 = vadd.f32 %v10154_v43, %v3379_v5  ;;  %v4232_v43 = vrot.slane %v10200_v55, %v10136_v48  ;;  %v4580_v5 = vrot.slane %v10254_v20, %v10145_v32  ;;  %v8290_v58 = vadd.f32 %v8289_v35, %v8288_v39 }
 0x290   : > { %v8291_v28 = vpop.f32.mrf.mxu0  ;;  %v8399_v45 = vpop.f32.mrf.mxu1  ;;  %v10315_v15 = vcombine.high %v10283_v25, %v10283_v25  ;;  %v3924_v8 = vrot.slane %v10261_v30, %v10133_v10  ;;  %v4260_v12 = vrot.slane %v10261_v30, %v10136_v48 }
 0x291   : > { %v10323_v40 = vcombine.high %v10286_v7, %v10286_v7  ;;  %v10330_v29 = vadd.f32 %v8399_v45, %v10164_v54  ;;  %v4460_v54 = vsel %vm3800_vm10, %v4220_v33, %v4459_v56 }
 0x292   : > { %v3382_v44 = vpop.f32.mrf.mxu1  ;;  %v8292_v36 = vpop.f32.mrf.mxu0  ;;  %v4461_v33 = vsel %vm3802_vm11, %v4224_v34, %v4460_v54 }
 0x293   : > { %v8293_v45 = vadd.f32 %v8292_v36, %v8291_v28  ;;  %v10349_v24 = vadd.f32 %v10156_v13, %v3382_v44  ;;  %v3936_v39 = vrot.slane %v10323_v40, %v10133_v10  ;;  %v4272_v13 = vrot.slane %v10323_v40, %v10136_v48 }
 0x294   : > { %v8402_v14 = vpop.f32.mrf.mxu1  ;;  %v10368_v44 = vcombine.high %v10330_v29, %v10330_v29  ;;  %v4462_v28 = vsel %vm3804_vm12, %v4228_v21, %v4461_v33  ;;  %v3928_v21 = vrot.slane %v10293_v47, %v10133_v10  ;;  %v4248_v36 = vrot.slane %v10276_v60, %v10136_v48 }
 0x295   : > { %v10360_v56 = vadd.f32 %v8402_v14, %v8290_v58  ;;  %v4463_v53 = vsel %vm3806_vm13, %v4232_v43, %v4462_v28  ;;  %v4129_v58 = vsel %vm3796_vm8, %v3908_v62, %v4128_v2  ;;  %v10380_v14 = vcombine.high %v10349_v24, %v10349_v24  ;;  %v8632_v43 = vld [vmem:[%s13018_s4 + $0x30] sm:$0xff]  }
 0x296   : > { %v3395_v35 = vpop.f32.mrf.mxu1  ;;  %4513 = vrot.lane.b32.xlu0 %v4463_v53, %s8806_s19  ;;  %v3940_v2 = vrot.slane %v10349_v24, %v10133_v10  ;;  %v4276_v62 = vrot.slane %v10349_v24, %v10136_v48  ;;  %8422 = vmatprep.subr.bf16.mxu1 %v8632_v43  ;;  %v3952_v53 = vrot.slane %v10315_v15, %v10133_v10 }
 0x297   : > { %v10373_v34 = vadd.f32 %v10172_v17, %v3395_v35  ;;  %v4130_v17 = vsel %vm3798_vm9, %v3912_v49, %v4129_v58  ;;  %v10399_v33 = vcombine.high %v10360_v56, %v10360_v56  ;;  %8423 = vmatpush3.bf16.msra.mxu1 %v8632_v43 }
 0x298   : > { %v8403_v11 = vpop.f32.mrf.mxu1  ;;  %v4131_v54 = vsel %vm3800_vm10, %v3916_v51, %v4130_v17  ;;  %v4256_v17 = vrot.slane %v10241_v9, %v10136_v48 }
 0x299   : > { %v10415_v35 = vcombine.high %v10373_v34, %v10373_v34  ;;  %v10417_v49 = vadd.f32 %v8403_v11, %v8293_v45  ;;  %v4132_v61 = vsel %vm3802_vm11, %v3920_v18, %v4131_v54  ;;  %v3964_v11 = vrot.slane %v10373_v34, %v10133_v10 }
 0x29a   : > { %v3398_v28 = vpop.f32.mrf.mxu1  ;;  %v4133_v18 = vsel %vm3804_vm12, %v3924_v8, %v4132_v61  ;;  %v4584_v45 = vrot.slane %v10276_v60, %v10145_v32  ;;  %v13147_v37 = vrot.slane %v10373_v34, %v10145_v32 }
 0x29b   : > { %v10426_v51 = vadd.f32 %v10174_v19, %v3398_v28  ;;  %v4134_v54 = vsel %vm3806_vm13, %v3928_v21, %v4133_v18  ;;  %v4464_v28 = vsel %vm3794_vm7, %v4240_v0, %v4236_v52  ;;  %v3968_v58 = vrot.slane %v10415_v35, %v10133_v10 }
 0x29c   : > { %4179 = vrot.lane.b32.xlu1 %v4134_v54, %s8805_s6  ;;  %v10456_v61 = vcombine.high %v10417_v49, %v10417_v49  ;;  %v4465_v8 = vsel %vm3796_vm8, %v4244_v38, %v4464_v28  ;;  %v4800_v0 = vsel %vm3794_vm7, %v4576_v22, %v4572_v23  ;;  %v3944_v38 = vrot.slane %v10380_v14, %v10133_v10 }
 0x29d   : > { %v10471_v52 = vcombine.high %v10426_v51, %v10426_v51  ;;  %v4466_v21 = vsel %vm3798_vm9, %v4248_v36, %v4465_v8  ;;  %v4801_v18 = vsel %vm3796_vm8, %v4580_v5, %v4800_v0  ;;  %v4264_v54 = vrot.slane %v10293_v47, %v10136_v48  ;;  %v8633_v5 = vld [vmem:[%s13018_s4 + $0x28] sm:$0xff]  }
 0x29e   : > { %v4467_v22 = vsel %vm3800_vm10, %v4252_v42, %v4466_v21  ;;  %v4592_v23 = vrot.slane %v10241_v9, %v10145_v32  ;;  %v4802_v36 = vsel %vm3798_vm9, %v4584_v45, %v4801_v18  ;;  %v4596_v0 = vrot.slane %v10261_v30, %v10145_v32  ;;  %8424 = vmatprep.subr.bf16.mxu1 %v8633_v5 }
 0x29f   : > { %v4468_v8 = vsel %vm3802_vm11, %v4256_v17, %v4467_v22  ;;  %v4803_v42 = vsel %vm3800_vm10, %v4588_v27, %v4802_v36  ;;  %v13132_v21 = vrot.slane %v10286_v7, %v10133_v10  ;;  %v8634_v17 = vld [vmem:[%s13018_s4 + $0x20] sm:$0xff]   ;;  %v4280_v27 = vrot.slane %v10380_v14, %v10136_v48  ;;  %8425 = vmatpush3.bf16.msra.mxu1 %v8633_v5 }
 0x2a0   : > { %v4469_v18 = vsel %vm3804_vm12, %v4260_v12, %v4468_v8  ;;  %v4804_v22 = vsel %vm3802_vm11, %v4592_v23, %v4803_v42  ;;  %v3972_v43 = vrot.slane %v10426_v51, %v10133_v10  ;;  %v3956_v23 = vrot.slane %v10330_v29, %v10133_v10  ;;  %8426 = vmatprep.subr.bf16.mxu1 %v8634_v17 }
 0x2a1   : > { %v4135_v45 = vsel %vm3794_vm7, %v3936_v39, %v13132_v21  ;;  %v4470_v39 = vsel %vm3806_vm13, %v4264_v54, %v4469_v18  ;;  %v10517_v21 = vpop.f32.mrf.mxu1  ;;  %v13133_v8 = vrot.slane %v10283_v25, %v10133_v10  ;;  %v13134_v42 = vrot.slane %v10286_v7, %v10136_v48 }
 0x2a2   : > { %v4136_v19 = vsel %vm3796_vm8, %v3940_v2, %v4135_v45  ;;  %4515 = vrot.lane.b32.xlu1 %v4470_v39, %s8806_s19  ;;  %v4805_v2 = vsel %vm3804_vm12, %v4596_v0, %v4804_v22  ;;  %v3960_v5 = vrot.slane %v10368_v44, %v10133_v10  ;;  %v4292_v39 = vrot.slane %v10330_v29, %v10136_v48 }
 0x2a3   : > { %v4137_v12 = vsel %vm3798_vm9, %v3944_v38, %v4136_v19  ;;  %v4471_v19 = vsel %vm3794_vm7, %v4272_v13, %v13134_v42  ;;  %v4600_v38 = vrot.slane %v10293_v47, %v10145_v32  ;;  %v4288_v13 = vrot.slane %v10315_v15, %v10136_v48  ;;  %8427 = vmatpush3.bf16.msra.mxu1 %v8634_v17 }
 0x2a4   : > { %v8294_v28 = vpop.f32.mrf.mxu0  ;;  %v4138_v54 = vsel %vm3800_vm10, %v13133_v8, %v4137_v12  ;;  %v4472_v45 = vsel %vm3796_vm8, %v4276_v62, %v4471_v19  ;;  %v3411_v8 = vpop.f32.mrf.mxu1  ;;  %v13135_v62 = vrot.slane %v10283_v25, %v10136_v48 }
 0x2a5   : > { %v4139_v0 = vsel %vm3802_vm11, %v3952_v53, %v4138_v54  ;;  %v4473_v12 = vsel %vm3798_vm9, %v4280_v27, %v4472_v45  ;;  %v4806_v53 = vsel %vm3806_vm13, %v4600_v38, %v4805_v2  ;;  %v4142_v2 = vsel %vm3794_vm7, %v3968_v58, %v3964_v11 }
 0x2a6   : > { %v8295_v36 = vpop.f32.mrf.mxu0  ;;  %v4140_v22 = vsel %vm3804_vm12, %v3956_v23, %v4139_v0  ;;  %v4474_v42 = vsel %vm3800_vm10, %v13135_v62, %v4473_v12  ;;  %v3976_v23 = vrot.slane %v10471_v52, %v10133_v10  ;;  %4851 = vrot.lane.b32.xlu1 %v4806_v53, %s8807_s22  ;;  %v4552_v0 = vrot.slane %v10192_v1, %v10145_v32 }
 0x2a7   : > { %v4141_v54 = vsel %vm3806_vm13, %v3960_v5, %v4140_v22  ;;  %v4475_v27 = vsel %vm3802_vm11, %v4288_v13, %v4474_v42  ;;  %v8296_v19 = vadd.f32 %v8295_v36, %v8294_v28  ;;  %v4296_v5 = vrot.slane %v10368_v44, %v10136_v48  ;;  %v8635_v22 = vld [vmem:[%s13018_s4 + $0x18] sm:$0xff]   ;;  %v10584_v13 = vpop.f32.mrf.mxu1 }
 0x2a8   : > { %v8297_v18 = vpop.f32.mrf.mxu0  ;;  %4181 = vrot.lane.b32.xlu0 %v4141_v54, %s8805_s6  ;;  %v4476_v17 = vsel %vm3804_vm12, %v4292_v39, %v4475_v27  ;;  %v4304_v28 = vrot.slane %v10415_v35, %v10136_v48  ;;  %v4640_v36 = vrot.slane %v10415_v35, %v10145_v32  ;;  %v3984_v58 = vrot.slane %v10399_v33, %v10133_v10 }
 0x2a9   : > { %v4143_v11 = vsel %vm3796_vm8, %v3972_v43, %v4142_v2  ;;  %v4477_v39 = vsel %vm3806_vm13, %v4296_v5, %v4476_v17  ;;  %v3988_v12 = vrot.slane %v10417_v49, %v10133_v10  ;;  %v13136_v54 = vrot.slane %v10149_v63, %v10145_v32  ;;  %8428 = vmatprep.subr.bf16.mxu1 %v8635_v22 }
 0x2aa   : > { %v8298_v45 = vpop.f32.mrf.mxu0  ;;  %v4144_v53 = vsel %vm3798_vm9, %v3976_v23, %v4143_v11  ;;  %v13137_v62 = vrot.slane %v10168_v50, %v10145_v32  ;;  %v10598_v42 = vadd.f32 %v8296_v19, %v3411_v8  ;;  %v13138_v27 = vrot.slane %v10360_v56, %v10133_v10  ;;  %8429 = vmatpush3.bf16.msra.mxu1 %v8635_v22 }
 0x2ab   : > { %v13139_v23 = vrot.slane %v10178_v57, %v10145_v32  ;;  %v8299_v17 = vadd.f32 %v8298_v45, %v8297_v18  ;;  %v4308_v11 = vrot.slane %v10426_v51, %v10136_v48  ;;  %v4312_v45 = vrot.slane %v10471_v52, %v10136_v48 }
 0x2ac   : > { %v4793_v43 = vsel %vm3794_vm7, %v13137_v62, %v13136_v54  ;;  %4517 = vrot.lane.b32.xlu0 %v4477_v39, %s8806_s19  ;;  %v4145_v2 = vsel %vm3800_vm10, %v13138_v27, %v4144_v53  ;;  %v3992_v54 = vrot.slane %v10456_v61, %v10133_v10  ;;  %v4564_v53 = vrot.slane %v10170_v16, %v10145_v32 }
 0x2ad   : > { %v4794_v5 = vsel %vm3796_vm8, %v13139_v23, %v4793_v43  ;;  %v4146_v8 = vsel %vm3802_vm11, %v3984_v58, %v4145_v2  ;;  %v13140_v62 = vrot.slane %v10125_v59, %v10145_v32  ;;  %v3414_v43 = vpop.f32.mrf.mxu1  ;;  %v13142_v2 = vrot.slane %v10373_v34, %v10136_v48 }
 0x2ae   : > { %v4795_v19 = vsel %vm3798_vm9, %v4552_v0, %v4794_v5  ;;  %v4147_v39 = vsel %vm3804_vm12, %v3988_v12, %v4146_v8  ;;  %v4568_v0 = vrot.slane %v10200_v55, %v10145_v32  ;;  %v13141_v12 = vrot.slane %v10160_v6, %v10145_v32 }
 0x2af   : > { %v4796_v18 = vsel %vm3800_vm10, %v13140_v62, %v4795_v19  ;;  %v4148_v58 = vsel %vm3806_vm13, %v3992_v54, %v4147_v39  ;;  %v4478_v23 = vsel %vm3794_vm7, %v4304_v28, %v13142_v2  ;;  %v4644_v5 = vrot.slane %v10426_v51, %v10145_v32 }
 0x2b0   : > { %v4797_v27 = vsel %vm3802_vm11, %v13141_v12, %v4796_v18  ;;  %v10638_v22 = vcombine.high %v10598_v42, %v10598_v42  ;;  %4183 = vrot.lane.b32.xlu1 %v4148_v58, %s8805_s6  ;;  %v10642_v8 = vadd.f32 %v8299_v17, %v3414_v43  ;;  %v3996_v19 = vrot.slane %v10598_v42, %v10133_v10 }
 0x2b1   : > { %v4798_v54 = vsel %vm3804_vm12, %v4564_v53, %v4797_v27  ;;  %v4479_v28 = vsel %vm3796_vm8, %v4308_v11, %v4478_v23  ;;  %v4616_v62 = vrot.slane %v10380_v14, %v10145_v32  ;;  %v4332_v18 = vrot.slane %v10598_v42, %v10136_v48  ;;  %v8636_v11 = vld [vmem:[%s13018_s4 + $0x10] sm:$0xff]  }
 0x2b2   : > { %v4799_v39 = vsel %vm3806_vm13, %v4568_v0, %v4798_v54  ;;  %v4668_v58 = vrot.slane %v10598_v42, %v10145_v32  ;;  %v4320_v17 = vrot.slane %v10399_v33, %v10136_v48  ;;  %v4480_v53 = vsel %vm3798_vm9, %v4312_v45, %v4479_v28  ;;  %8430 = vmatprep.subr.bf16.mxu1 %v8636_v11 }
 0x2b3   : > { %4849 = vrot.lane.b32.xlu0 %v4799_v39, %s8807_s22  ;;  %v4324_v43 = vrot.slane %v10417_v49, %v10136_v48  ;;  %v13143_v0 = vrot.slane %v10360_v56, %v10136_v48  ;;  %v13144_v27 = vrot.slane %v10286_v7, %v10145_v32  ;;  %v13145_v2 = vrot.slane %v10323_v40, %v10145_v32 }
 0x2b4   : > { %v4648_v23 = vrot.slane %v10471_v52, %v10145_v32  ;;  %v10678_v54 = vcombine.high %v10642_v8, %v10642_v8  ;;  %v4328_v39 = vrot.slane %v10456_v61, %v10136_v48  ;;  %v4814_v41 = vsel %vm3794_vm7, %v4640_v36, %v13147_v37  ;;  %8431 = vmatpush3.bf16.msra.mxu1 %v8636_v11 }
 0x2b5   : > { %v4481_v12 = vsel %vm3800_vm10, %v13143_v0, %v4480_v53  ;;  %v4807_v45 = vsel %vm3794_vm7, %v13145_v2, %v13144_v27  ;;  %v13146_v53 = vrot.slane %v10349_v24, %v10145_v32  ;;  %v4624_v2 = vrot.slane %v10315_v15, %v10145_v32 }
 0x2b6   : > { %v4482_v28 = vsel %vm3802_vm11, %v4320_v17, %v4481_v12  ;;  %v4628_v12 = vrot.slane %v10330_v29, %v10145_v32  ;;  %v4632_v37 = vrot.slane %v10368_v44, %v10145_v32  ;;  %v4656_v11 = vrot.slane %v10399_v33, %v10145_v32 }
 0x2b7   : > { %v4808_v0 = vsel %vm3796_vm8, %v13146_v53, %v4807_v45  ;;  %v4483_v27 = vsel %vm3804_vm12, %v4324_v43, %v4482_v28  ;;  %v13148_v45 = vrot.slane %v10283_v25, %v10145_v32  ;;  %v4815_v28 = vsel %vm3796_vm8, %v4644_v5, %v4814_v41  ;;  %v8638_v41 = vld [vmem:[%s13018_s4] sm:$0xff]  }
 0x2b8   : > { %v4809_v38 = vsel %vm3798_vm9, %v4616_v62, %v4808_v0  ;;  %v4484_v17 = vsel %vm3806_vm13, %v4328_v39, %v4483_v27  ;;  %v8637_v62 = vld [vmem:[%s13018_s4 + $0x8] sm:$0xff]   ;;  %v4816_v39 = vsel %vm3798_vm9, %v4648_v23, %v4815_v28  ;;  %v4660_v53 = vrot.slane %v10417_v49, %v10145_v32 }
 0x2b9   : > { %v4810_v43 = vsel %vm3800_vm10, %v13148_v45, %v4809_v38  ;;  %4519 = vrot.lane.b32.xlu1 %v4484_v17, %s8806_s19  ;;  %v4004_v38 = vrot.slane %v10642_v8, %v10133_v10  ;;  %v13149_v0 = vrot.slane %v10360_v56, %v10145_v32  ;;  %8432 = vmatprep.subr.bf16.mxu1 %v8637_v62 }
 0x2ba   : > { %v4811_v36 = vsel %vm3802_vm11, %v4624_v2, %v4810_v43  ;;  %v4340_v23 = vrot.slane %v10642_v8, %v10136_v48  ;;  %v4664_v45 = vrot.slane %v10456_v61, %v10145_v32  ;;  %8433 = vmatpush3.bf16.msra.mxu1 %v8637_v62  ;;  %v4676_v43 = vrot.slane %v10642_v8, %v10145_v32 }
 0x2bb   : > { %v4812_v5 = vsel %vm3804_vm12, %v4628_v12, %v4811_v36  ;;  %v4817_v27 = vsel %vm3800_vm10, %v13149_v0, %v4816_v39  ;;  %v4000_v39 = vrot.slane %v10638_v22, %v10133_v10  ;;  %v4008_v62 = vrot.slane %v10678_v54, %v10133_v10  ;;  %8434 = vmatprep.subr.bf16.mxu1 %v8638_v41 }
 0x2bc   : > { %v8300_v2 = vpop.f32.mrf.mxu0  ;;  %v4813_v17 = vsel %vm3806_vm13, %v4632_v37, %v4812_v5  ;;  %v4818_v12 = vsel %vm3802_vm11, %v4656_v11, %v4817_v27  ;;  %v4336_v37 = vrot.slane %v10638_v22, %v10136_v48  ;;  %v4672_v11 = vrot.slane %v10638_v22, %v10145_v32 }
 0x2bd   : > { %4853 = vrot.lane.b32.xlu0 %v4813_v17, %s8807_s22  ;;  %v4819_v28 = vsel %vm3804_vm12, %v4660_v53, %v4818_v12  ;;  %v4149_v27 = vsel %vm3794_vm7, %v4000_v39, %v3996_v19  ;;  %v4344_v17 = vrot.slane %v10678_v54, %v10136_v48  ;;  %v3645_v19 = vrot.slane %v10426_v51, %v10130_v46 }
 0x2be   : > { %v8301_v36 = vpop.f32.mrf.mxu0  ;;  %v4820_v5 = vsel %vm3806_vm13, %v4664_v45, %v4819_v28  ;;  %v4485_v12 = vsel %vm3794_vm7, %v4336_v37, %v4332_v18  ;;  %v4150_v28 = vsel %vm3796_vm8, %v4004_v38, %v4149_v27  ;;  %8435 = vmatpush3.bf16.msra.mxu1 %v8638_v41  ;;  %v3669_v39 = vrot.slane %v10598_v42, %v10130_v46 }
 0x2bf   : > { %v8302_v0 = vadd.f32 %v8301_v36, %v8300_v2  ;;  %4855 = vrot.lane.b32.xlu1 %v4820_v5, %s8807_s22  ;;  %v4680_v2 = vrot.slane %v10678_v54, %v10145_v32  ;;  %v4486_v36 = vsel %vm3796_vm8, %v4340_v23, %v4485_v12  ;;  %v4821_v5 = vsel %vm3794_vm7, %v4672_v11, %v4668_v58 }
 0x2c0   : > { %v8303_v53 = vpop.f32.mrf.mxu0  ;;  %v3677_v18 = vrot.slane %v10642_v8, %v10130_v46  ;;  %v4151_v41 = vsel %vm3798_vm9, %v4008_v62, %v4150_v28  ;;  %v4487_v11 = vsel %vm3798_vm9, %v4344_v17, %v4486_v36 }
 0x2c1   : > { %v10752_v45 = vadd.f32 %v10517_v21, %v8302_v0  ;;  %v4822_v21 = vsel %vm3796_vm8, %v4676_v43, %v4821_v5 }
 0x2c2   : > { %v8304_v37 = vpop.f32.mrf.mxu0  ;;  %v4823_v43 = vsel %vm3798_vm9, %v4680_v2, %v4822_v21  ;;  %v3553_v2 = vrot.slane %v10192_v1, %v10130_v46  ;;  %v13150_v1 = vrot.slane %v10149_v63, %v10130_v46 }
 0x2c3   : > { %v10766_v38 = vcombine.high %v10752_v45, %v10752_v45  ;;  %v8305_v23 = vadd.f32 %v8304_v37, %v8303_v53  ;;  %v4012_v58 = vrot.slane %v10752_v45, %v10133_v10  ;;  %v4348_v0 = vrot.slane %v10752_v45, %v10136_v48 }
 0x2c4   : > { %v4684_v27 = vrot.slane %v10752_v45, %v10145_v32 }
 0x2c5   : > { %v10778_v12 = vadd.f32 %v10584_v13, %v8305_v23  ;;  %v4016_v53 = vrot.slane %v10766_v38, %v10133_v10  ;;  %v4152_v5 = vsel %vm3800_vm10, %v4012_v58, %v4151_v41  ;;  %v4352_v62 = vrot.slane %v10766_v38, %v10136_v48 }
 0x2c6   : > { %v4488_v28 = vsel %vm3800_vm10, %v4348_v0, %v4487_v11  ;;  %v4688_v17 = vrot.slane %v10766_v38, %v10145_v32  ;;  %v4824_v36 = vsel %vm3800_vm10, %v4684_v27, %v4823_v43  ;;  %v13151_v11 = vrot.slane %v10168_v50, %v10130_v46 }
 0x2c7   : > { %v10793_v13 = vcombine.high %v10778_v12, %v10778_v12  ;;  %v4020_v37 = vrot.slane %v10778_v12, %v10133_v10  ;;  %v4153_v21 = vsel %vm3802_vm11, %v4016_v53, %v4152_v5  ;;  %v4356_v23 = vrot.slane %v10778_v12, %v10136_v48 }
 0x2c8   : > { %v4489_v58 = vsel %vm3802_vm11, %v4352_v62, %v4488_v28  ;;  %v4692_v41 = vrot.slane %v10778_v12, %v10145_v32  ;;  %v4825_v0 = vsel %vm3802_vm11, %v4688_v17, %v4824_v36  ;;  %v3795_v27 = vsel %vm3794_vm7, %v13151_v11, %v13150_v1 }
 0x2c9   : > { %v4024_v43 = vrot.slane %v10793_v13, %v10133_v10  ;;  %v4154_v53 = vsel %vm3804_vm12, %v4020_v37, %v4153_v21  ;;  %v4360_v5 = vrot.slane %v10793_v13, %v10136_v48  ;;  %v4490_v62 = vsel %vm3804_vm12, %v4356_v23, %v4489_v58 }
 0x2ca   : > { %v3685_v28 = vrot.slane %v10752_v45, %v10130_v46  ;;  %v4696_v63 = vrot.slane %v10793_v13, %v10145_v32  ;;  %v3561_v50 = vrot.slane %v10160_v6, %v10130_v46  ;;  %v13152_v17 = vrot.slane %v10178_v57, %v10130_v46 }
 0x2cb   : > { %v4155_v37 = vsel %vm3806_vm13, %v4024_v43, %v4154_v53  ;;  %v4826_v21 = vsel %vm3804_vm12, %v4692_v41, %v4825_v0  ;;  %v3585_v58 = vrot.slane %v10276_v60, %v10130_v46  ;;  %v4491_v1 = vsel %vm3806_vm13, %v4360_v5, %v4490_v62 }
 0x2cc   : > { %v3797_v36 = vsel %vm3796_vm8, %v13152_v17, %v3795_v27  ;;  %4185 = vrot.lane.b32.xlu0 %v4155_v37, %s8805_s6  ;;  %v3565_v6 = vrot.slane %v10170_v16, %v10130_v46  ;;  %v3569_v57 = vrot.slane %v10200_v55, %v10130_v46  ;;  %v13153_v11 = vrot.slane %v10125_v59, %v10130_v46 }
 0x2cd   : > { %v3799_v23 = vsel %vm3798_vm9, %v3553_v2, %v3797_v36  ;;  %v3593_v60 = vrot.slane %v10241_v9, %v10130_v46  ;;  %v13154_v0 = vrot.slane %v10209_v3, %v10130_v46  ;;  %v13155_v27 = vrot.slane %v10236_v4, %v10130_v46  ;;  %v10888_v36 = vpop.f32.mrf.mxu1 }
 0x2ce   : > { %v3801_v41 = vsel %vm3800_vm10, %v13153_v11, %v3799_v23  ;;  %v3617_v55 = vrot.slane %v10380_v14, %v10130_v46  ;;  %v4827_v59 = vsel %vm3806_vm13, %v4696_v63, %v4826_v21  ;;  %v3597_v53 = vrot.slane %v10261_v30, %v10130_v46 }
 0x2cf   : > { %v3803_v2 = vsel %vm3802_vm11, %v3561_v50, %v3801_v41  ;;  %v3808_v16 = vsel %vm3794_vm7, %v13155_v27, %v13154_v0  ;;  %v13156_v9 = vrot.slane %v10254_v20, %v10130_v46  ;;  %v3601_v4 = vrot.slane %v10293_v47, %v10130_v46 }
 0x2d0   : > { %v3805_v43 = vsel %vm3804_vm12, %v3565_v6, %v3803_v2  ;;  %v13157_v62 = vrot.slane %v10286_v7, %v10130_v46  ;;  %v13158_v63 = vrot.slane %v10323_v40, %v10130_v46  ;;  %4521 = vrot.lane.b32.xlu0 %v4491_v1, %s8806_s19  ;;  %v13159_v20 = vrot.slane %v10207_v31, %v10130_v46 }
 0x2d1   : > { %v3809_v3 = vsel %vm3796_vm8, %v13156_v9, %v3808_v16  ;;  %v10863_v5 = vsel %vm3806_vm13, %v3569_v57, %v3805_v43  ;;  %v3625_v47 = vrot.slane %v10315_v15, %v10130_v46  ;;  %v13160_v17 = vrot.slane %v10349_v24, %v10130_v46 }
 0x2d2   : > { %v3810_v14 = vsel %vm3798_vm9, %v3585_v58, %v3809_v3  ;;  %v3815_v30 = vsel %vm3794_vm7, %v13158_v63, %v13157_v62  ;;  %v3649_v40 = vrot.slane %v10471_v52, %v10130_v46  ;;  %v3629_v31 = vrot.slane %v10330_v29, %v10130_v46 }
 0x2d3   : > { %v3811_v50 = vsel %vm3800_vm10, %v13159_v20, %v3810_v14  ;;  %v3816_v7 = vsel %vm3796_vm8, %v13160_v17, %v3815_v30  ;;  %v3633_v21 = vrot.slane %v10368_v44, %v10130_v46  ;;  %v13161_v24 = vrot.slane %v10283_v25, %v10130_v46 }
 0x2d4   : > { %v3812_v37 = vsel %vm3802_vm11, %v3593_v60, %v3811_v50  ;;  %v3817_v15 = vsel %vm3798_vm9, %v3617_v55, %v3816_v7  ;;  %v13162_v52 = vrot.slane %v10373_v34, %v10130_v46  ;;  %v13163_v1 = vrot.slane %v10415_v35, %v10130_v46  ;;  %v8306_v11 = vpop.f32.mrf.mxu0  ;;  %4857 = vrot.lane.b32.xlu0 %v4827_v59, %s8807_s22  ;;  %v3427_v60 = vpop.f32.mrf.mxu1 }
 0x2d5   : > { %v3813_v23 = vsel %vm3804_vm12, %v3597_v53, %v3812_v37  ;;  %v3818_v58 = vsel %vm3800_vm10, %v13161_v24, %v3817_v15  ;;  %v3673_v44 = vrot.slane %v10638_v22, %v10130_v46  ;;  %v3681_v34 = vrot.slane %v10678_v54, %v10130_v46 }
 0x2d6   : > { %v3822_v29 = vsel %vm3794_vm7, %v13163_v1, %v13162_v52  ;;  %v10911_v6 = vsel %vm3806_vm13, %v3601_v4, %v3813_v23  ;;  %v3819_v57 = vsel %vm3802_vm11, %v3625_v47, %v3818_v58  ;;  %v3657_v22 = vrot.slane %v10399_v33, %v10130_v46  ;;  %v8411_v8 = vpop.f32.mrf.mxu1 }
 0x2d7   : > { %v3823_v25 = vsel %vm3796_vm8, %v3645_v19, %v3822_v29  ;;  %v3820_v35 = vsel %vm3804_vm12, %v3629_v31, %v3819_v57  ;;  %v3661_v41 = vrot.slane %v10417_v49, %v10130_v46  ;;  %v13164_v54 = vrot.slane %v10360_v56, %v10130_v46  ;;  %v8307_v49 = vpop.f32.mrf.mxu0 }
 0x2d8   : > { %v3824_v2 = vsel %vm3798_vm9, %v3649_v40, %v3823_v25  ;;  %v10928_v51 = vsel %vm3806_vm13, %v3633_v21, %v3820_v35  ;;  %v3689_v0 = vrot.slane %v10766_v38, %v10130_v46  ;;  %v3829_v33 = vsel %vm3794_vm7, %v3673_v44, %v3669_v39  ;;  %v3430_v63 = vpop.f32.mrf.mxu1 }
 0x2d9   : > { %v3825_v19 = vsel %vm3800_vm10, %v13164_v54, %v3824_v2  ;;  %v3665_v27 = vrot.slane %v10456_v61, %v10130_v46  ;;  %v3693_v55 = vrot.slane %v10778_v12, %v10130_v46  ;;  %v3830_v56 = vsel %vm3796_vm8, %v3677_v18, %v3829_v33  ;;  %v8309_v39 = vpop.f32.mrf.mxu0 }
 0x2da   : > { %v3826_v16 = vsel %vm3802_vm11, %v3657_v22, %v3825_v19  ;;  %v8308_v38 = vadd.f32 %v8307_v49, %v8306_v11  ;;  %v3831_v42 = vsel %vm3798_vm9, %v3681_v34, %v3830_v56  ;;  %v3697_v61 = vrot.slane %v10793_v13, %v10130_v46 }
 0x2db   : > { %v3827_v59 = vsel %vm3804_vm12, %v3661_v41, %v3826_v16  ;;  %v3832_v12 = vsel %vm3800_vm10, %v3685_v28, %v3831_v42  ;;  %v8310_v9 = vpop.f32.mrf.mxu0 }
 0x2dc   : > { %v10952_v43 = vsel %vm3806_vm13, %v3665_v27, %v3827_v59  ;;  %v3428_v53 = vadd.f32 %v8308_v38, %v3427_v60  ;;  %v3833_v18 = vsel %vm3802_vm11, %v3689_v0, %v3832_v12  ;;  %v8311_v14 = vadd.f32 %v8310_v9, %v8309_v39 }
 0x2dd   : > { %v3834_v3 = vsel %vm3804_vm12, %v3693_v55, %v3833_v18 }
 0x2de   : > { %v3526_v4 = vcombine.high %v3428_v53, %v3428_v53  ;;  %v10963_v62 = vsel %vm3806_vm13, %v3697_v61, %v3834_v3  ;;  %v3701_v13 = vrot.slane %v3428_v53, %v10130_v46  ;;  %v3431_v45 = vadd.f32 %v8311_v14, %v3430_v63 }
 0x2df   : > { %v4028_v31 = vrot.slane %v3428_v53, %v10133_v10  ;;  %v4364_v21 = vrot.slane %v3428_v53, %v10136_v48  ;;  %v4700_v44 = vrot.slane %v3428_v53, %v10145_v32 }
 0x2e0   : > { %v3705_v30 = vrot.slane %v3526_v4, %v10130_v46  ;;  %v3527_v20 = vcombine.high %v3431_v45, %v3431_v45  ;;  %v3709_v50 = vrot.slane %v3431_v45, %v10130_v46  ;;  %v4032_v40 = vrot.slane %v3526_v4, %v10133_v10 }
 0x2e1   : > { %v4368_v37 = vrot.slane %v3526_v4, %v10136_v48  ;;  %v4036_v23 = vrot.slane %v3431_v45, %v10133_v10  ;;  %v4372_v24 = vrot.slane %v3431_v45, %v10136_v48  ;;  %v4704_v58 = vrot.slane %v3526_v4, %v10145_v32 }
 0x2e2   : > { %v3836_v28 = vsel %vm3794_vm7, %v3705_v30, %v3701_v13  ;;  %v3713_v47 = vrot.slane %v3527_v20, %v10130_v46  ;;  %v4156_v1 = vsel %vm3794_vm7, %v4032_v40, %v4028_v31  ;;  %v4708_v25 = vrot.slane %v3431_v45, %v10145_v32 }
 0x2e3   : > { %v3837_v17 = vsel %vm3796_vm8, %v3709_v50, %v3836_v28  ;;  %v4492_v29 = vsel %vm3794_vm7, %v4368_v37, %v4364_v21  ;;  %v4040_v11 = vrot.slane %v3527_v20, %v10133_v10  ;;  %v4376_v35 = vrot.slane %v3527_v20, %v10136_v48 }
 0x2e4   : > { %v3838_v7 = vsel %vm3798_vm9, %v3713_v47, %v3837_v17  ;;  %v4157_v41 = vsel %vm3796_vm8, %v4036_v23, %v4156_v1  ;;  %v4493_v2 = vsel %vm3796_vm8, %v4372_v24, %v4492_v29  ;;  %v4828_v60 = vsel %vm3794_vm7, %v4704_v58, %v4700_v44 }
 0x2e5   : > { %v4712_v49 = vrot.slane %v3527_v20, %v10145_v32  ;;  %v4158_v27 = vsel %vm3798_vm9, %v4040_v11, %v4157_v41  ;;  %v4494_v55 = vsel %vm3798_vm9, %v4376_v35, %v4493_v2 }
 0x2ec   : > { %v8312_v15 = vpop.f32.mrf.mxu0 }
 0x2ee   : > { %v8313_v52 = vpop.f32.mrf.mxu0 }
 0x2ef   : > { %v8314_v57 = vadd.f32 %v8313_v52, %v8312_v15  ;;  %v8414_v52 = vpop.f32.mrf.mxu1 }
 0x2f0   : > { %v8315_v34 = vpop.f32.mrf.mxu0 }
 0x2f1   : > { %v3436_v22 = vadd.f32 %v10888_v36, %v8314_v57  ;;  %v4829_v36 = vsel %vm3796_vm8, %v4708_v25, %v4828_v60  ;;  %v3443_v44 = vpop.f32.mrf.mxu1 }
 0x2f2   : > { %v8316_v54 = vpop.f32.mrf.mxu0  ;;  %v4830_v4 = vsel %vm3798_vm9, %v4712_v49, %v4829_v36 }
 0x2f3   : > { %v3528_v19 = vcombine.high %v3436_v22, %v3436_v22  ;;  %v8317_v0 = vadd.f32 %v8316_v54, %v8315_v34  ;;  %v4044_v33 = vrot.slane %v3436_v22, %v10133_v10  ;;  %v4380_v16 = vrot.slane %v3436_v22, %v10136_v48  ;;  %v11031_v11 = vpop.f32.mrf.mxu1 }
 0x2f4   : > { %v3717_v39 = vrot.slane %v3436_v22, %v10130_v46  ;;  %v4716_v12 = vrot.slane %v3436_v22, %v10145_v32 }
 0x2f5   : > { %v3439_v56 = vadd.f32 %v8411_v8, %v8317_v0  ;;  %v4048_v38 = vrot.slane %v3528_v19, %v10133_v10  ;;  %v4159_v59 = vsel %vm3800_vm10, %v4044_v33, %v4158_v27  ;;  %v4384_v42 = vrot.slane %v3528_v19, %v10136_v48  ;;  %v3446_v60 = vpop.f32.mrf.mxu1 }
 0x2f6   : > { %v4495_v61 = vsel %vm3800_vm10, %v4380_v16, %v4494_v55  ;;  %v3721_v3 = vrot.slane %v3528_v19, %v10130_v46  ;;  %v4720_v45 = vrot.slane %v3528_v19, %v10145_v32  ;;  %v4831_v28 = vsel %vm3800_vm10, %v4716_v12, %v4830_v4 }
 0x2f7   : > { %v3529_v53 = vcombine.high %v3439_v56, %v3439_v56  ;;  %v4052_v18 = vrot.slane %v3439_v56, %v10133_v10  ;;  %v4160_v9 = vsel %vm3802_vm11, %v4048_v38, %v4159_v59  ;;  %v4388_v8 = vrot.slane %v3439_v56, %v10136_v48 }
 0x2f8   : > { %v3725_v14 = vrot.slane %v3439_v56, %v10130_v46  ;;  %v4496_v30 = vsel %vm3802_vm11, %v4384_v42, %v4495_v61  ;;  %v3839_v50 = vsel %vm3800_vm10, %v3717_v39, %v3838_v7  ;;  %v4724_v31 = vrot.slane %v3439_v56, %v10145_v32 }
 0x2f9   : > { %v4056_v63 = vrot.slane %v3529_v53, %v10133_v10  ;;  %v4161_v13 = vsel %vm3804_vm12, %v4052_v18, %v4160_v9  ;;  %v3729_v20 = vrot.slane %v3529_v53, %v10130_v46  ;;  %v4392_v17 = vrot.slane %v3529_v53, %v10136_v48 }
 0x2fa   : > { %v3840_v40 = vsel %vm3802_vm11, %v3721_v3, %v3839_v50  ;;  %v4497_v37 = vsel %vm3804_vm12, %v4388_v8, %v4496_v30  ;;  %v4832_v15 = vsel %vm3802_vm11, %v4720_v45, %v4831_v28  ;;  %v4728_v24 = vrot.slane %v3529_v53, %v10145_v32 }
 0x2fb   : > { %v4162_v47 = vsel %vm3806_vm13, %v4056_v63, %v4161_v13  ;;  %v3841_v21 = vsel %vm3804_vm12, %v3725_v14, %v3840_v40  ;;  %v4498_v7 = vsel %vm3806_vm13, %v4392_v17, %v4497_v37  ;;  %v4833_v58 = vsel %vm3804_vm12, %v4724_v31, %v4832_v15  ;;  %v11064_v17 = vld [vmem:[%s13017_s3] ss:$0 sm:$0xff] }
 0x2fc   : > { %4187 = vrot.lane.b32.xlu1 %v4162_v47, %s8805_s6  ;;  %v11023_v23 = vsel %vm3806_vm13, %v3729_v20, %v3841_v21  ;;  %v4834_v1 = vsel %vm3806_vm13, %v4728_v24, %v4833_v58 }
 0x2ff   : > { %v4178_v36 = vpop.permute.xlu0 %4177 }
 0x300   : > { %4523 = vrot.lane.b32.xlu1 %v4498_v7, %s8806_s19  ;;  %v4873_v58 = vsel %vm428_vm0, %v10863_v5, %v4178_v36 }
 0x304   : > { %v8318_v29 = vpop.f32.mrf.mxu0  ;;  %4859 = vrot.lane.b32.xlu1 %v4834_v1, %s8807_s22 }
 0x306   : > { %v8319_v57 = vpop.f32.mrf.mxu0 }
 0x307   : > { %v8320_v25 = vadd.f32 %v8319_v57, %v8318_v29 }
 0x308   : > { %v8321_v34 = vpop.f32.mrf.mxu0  ;;  %v4514_v59 = vpop.permute.xlu0 %4513 }
 0x309   : > { %v3444_v35 = vadd.f32 %v8320_v25, %v3443_v44 }
 0x30a   : > { %v8322_v22 = vpop.f32.mrf.mxu0 }
 0x30b   : > { %v3530_v41 = vcombine.high %v3444_v35, %v3444_v35  ;;  %v8323_v2 = vadd.f32 %v8322_v22, %v8321_v34  ;;  %v3733_v54 = vrot.slane %v3444_v35, %v10130_v46  ;;  %v4060_v53 = vrot.slane %v3444_v35, %v10133_v10  ;;  %v4915_v22 = vld [vmem:[%s11073_s26 + $0x8] sm:$0xff] }
 0x30c   : > { %v4396_v9 = vrot.slane %v3444_v35, %v10136_v48  ;;  %v4732_v14 = vrot.slane %v3444_v35, %v10145_v32  ;;  %v4882_v35 = vsel %vm4881_vm14, %v4873_v58, %v4514_v59 }
 0x30d   : > { %v3737_v19 = vrot.slane %v3530_v41, %v10130_v46  ;;  %v3447_v0 = vadd.f32 %v8323_v2, %v3446_v60  ;;  %v4064_v39 = vrot.slane %v3530_v41, %v10133_v10  ;;  %v4400_v12 = vrot.slane %v3530_v41, %v10136_v48 }
 0x30e   : > { %v4180_v56 = vpop.permute.xlu1 %4179  ;;  %v4736_v18 = vrot.slane %v3530_v41, %v10145_v32 }
 0x30f   : > { %v3843_v33 = vsel %vm3794_vm7, %v3737_v19, %v3733_v54  ;;  %v11036_v49 = vcombine.high %v3447_v0, %v3447_v0  ;;  %v3741_v27 = vrot.slane %v3447_v0, %v10130_v46  ;;  %v4068_v3 = vrot.slane %v3447_v0, %v10133_v10 }
 0x310   : > { %v4874_v63 = vsel %vm428_vm0, %v10911_v6, %v4180_v56  ;;  %v4404_v13 = vrot.slane %v3447_v0, %v10136_v48  ;;  %v4163_v45 = vsel %vm3794_vm7, %v4064_v39, %v4060_v53  ;;  %v4740_v28 = vrot.slane %v3447_v0, %v10145_v32  ;;  %v4914_v39 = vld [vmem:[%s11073_s26] sm:$0xff] }
 0x311   : > { %v3745_v16 = vrot.slane %v11036_v49, %v10130_v46  ;;  %v3844_v55 = vsel %vm3796_vm8, %v3741_v27, %v3843_v33  ;;  %v4499_v47 = vsel %vm3794_vm7, %v4400_v12, %v4396_v9  ;;  %v4072_v37 = vrot.slane %v11036_v49, %v10133_v10 }
 0x312   : > { %v4835_v31 = vsel %vm3794_vm7, %v4736_v18, %v4732_v14  ;;  %v4164_v7 = vsel %vm3796_vm8, %v4068_v3, %v4163_v45  ;;  %v4408_v24 = vrot.slane %v11036_v49, %v10136_v48  ;;  %v4500_v29 = vsel %vm3796_vm8, %v4404_v13, %v4499_v47 }
 0x313   : > { %v11043_v38 = vsel %vm3798_vm9, %v3745_v16, %v3844_v55  ;;  %v4744_v44 = vrot.slane %v11036_v49, %v10145_v32  ;;  %v4165_v2 = vsel %vm3798_vm9, %v4072_v37, %v4164_v7 }
 0x314   : > { %v4516_v42 = vpop.permute.xlu1 %4515  ;;  %v4501_v0 = vsel %vm3798_vm9, %v4408_v24, %v4500_v29 }
 0x315   : > { %v4883_v20 = vsel %vm4881_vm14, %v4874_v63, %v4516_v42  ;;  %v8418_v63 = vpop.f32.mrf.mxu1 }
 0x317   : > { %v3459_v58 = vpop.f32.mrf.mxu1 }
 0x318   : > { %v4852_v8 = vpop.permute.xlu1 %4851 }
 0x319   : > { %v4892_v6 = vsel %vm4890_vm15, %v4883_v20, %v4852_v8 }
 0x31a   : > { %v4182_v4 = vpop.permute.xlu0 %4181  ;;  %v4907_v57 = vadd.f32 %v11064_v17, %v4892_v6 }
 0x31b   : > { %v4875_v13 = vsel %vm428_vm0, %v10928_v51, %v4182_v4 }
 0x31c   : > { %v8324_v61 = vpop.f32.mrf.mxu0  ;;  %v11098_v36 = vadd.f32 %v4915_v22, %v4907_v57 }
 0x31e   : > { %v8325_v30 = vpop.f32.mrf.mxu0  ;;  %v4518_v21 = vpop.permute.xlu0 %4517  ;;  %13165 = vst [vmem:[#allocation23_spill] sm:$0xff] %v11098_v36 }
 0x31f   : > { %v8326_v50 = vadd.f32 %v8325_v30, %v8324_v61 }
 0x320   : > { %v8327_v40 = vpop.f32.mrf.mxu0 }
 0x321   : > { %v3452_v15 = vadd.f32 %v8414_v52, %v8326_v50  ;;  %v4836_v52 = vsel %vm3796_vm8, %v4740_v28, %v4835_v31  ;;  %v13038_v31 = vmax.f32 %v11098_v36, 0.0 }
 0x322   : > { %v8328_v1 = vpop.f32.mrf.mxu0  ;;  %v4184_v33 = vpop.permute.xlu1 %4183  ;;  %v4837_v55 = vsel %vm3798_vm9, %v4744_v44, %v4836_v52 }
 0x323   : > { %v3532_v25 = vcombine.high %v3452_v15, %v3452_v15  ;;  %v8329_v34 = vadd.f32 %v8328_v1, %v8327_v40  ;;  %v4076_v41 = vrot.slane %v3452_v15, %v10133_v10  ;;  %v4412_v5 = vrot.slane %v3452_v15, %v10136_v48 }
 0x324   : > { %v4748_v16 = vrot.slane %v3452_v15, %v10145_v32  ;;  %v3749_v12 = vrot.slane %v3452_v15, %v10130_v46  ;;  %v4884_v1 = vsel %vm4881_vm14, %v4875_v13, %v4518_v21  ;;  %v4876_v52 = vsel %vm428_vm0, %v10952_v43, %v4184_v33  ;;  %v4916_v21 = vld [vmem:[%s11073_s26 + $0x10] sm:$0xff] }
 0x325   : > { %v3455_v60 = vadd.f32 %v11031_v11, %v8329_v34  ;;  %v4080_v54 = vrot.slane %v3532_v25, %v10133_v10  ;;  %v4416_v19 = vrot.slane %v3532_v25, %v10136_v48  ;;  %v4166_v49 = vsel %vm3800_vm10, %v4076_v41, %v4165_v2  ;;  %v4850_v56 = vpop.permute.xlu0 %4849 }
 0x326   : > { %v4502_v27 = vsel %vm3800_vm10, %v4412_v5, %v4501_v0  ;;  %v4891_v61 = vsel %vm4890_vm15, %v4882_v35, %v4850_v56  ;;  %v4752_v18 = vrot.slane %v3532_v25, %v10145_v32  ;;  %v4838_v30 = vsel %vm3800_vm10, %v4748_v16, %v4837_v55  ;;  %v13168_v16 = vld [vmem:[#allocation18_spill] sm:$0xff] }
 0x327   : > { %v3533_v59 = vcombine.high %v3455_v60, %v3455_v60  ;;  %v4084_v11 = vrot.slane %v3455_v60, %v10133_v10  ;;  %v4167_v42 = vsel %vm3802_vm11, %v4080_v54, %v4166_v49  ;;  %v4420_v53 = vrot.slane %v3455_v60, %v10136_v48  ;;  %v8419_v54 = vpop.f32.mrf.mxu1 }
 0x328   : > { %v4906_v9 = vadd.f32 %v11064_v17, %v4891_v61  ;;  %v4503_v14 = vsel %vm3802_vm11, %v4416_v19, %v4502_v27  ;;  %v3753_v45 = vrot.slane %v3532_v25, %v10130_v46  ;;  %v3757_v47 = vrot.slane %v3455_v60, %v10130_v46  ;;  %v4917_v19 = vld [vmem:[%s11073_s26 + $0x18] sm:$0xff] }
 0x329   : > { %v4088_v3 = vrot.slane %v3533_v59, %v10133_v10  ;;  %v4168_v8 = vsel %vm3804_vm12, %v4084_v11, %v4167_v42  ;;  %v4424_v50 = vrot.slane %v3533_v59, %v10136_v48  ;;  %v4504_v40 = vsel %vm3804_vm12, %v4420_v53, %v4503_v14 }
 0x32a   : > { %v11115_v28 = vadd.f32 %v4914_v39, %v4906_v9  ;;  %v4756_v37 = vrot.slane %v3455_v60, %v10145_v32  ;;  %v3761_v51 = vrot.slane %v3533_v59, %v10130_v46  ;;  %v3846_v4 = vsel %vm3800_vm10, %v3749_v12, %v11043_v38 }
 0x32b   : > { %v4169_v20 = vsel %vm3806_vm13, %v4088_v3, %v4168_v8  ;;  %v4520_v6 = vpop.permute.xlu1 %4519  ;;  %v4839_v7 = vsel %vm3802_vm11, %v4752_v18, %v4838_v30  ;;  %v3847_v24 = vsel %vm3802_vm11, %v3753_v45, %v3846_v4  ;;  %v4505_v57 = vsel %vm3806_vm13, %v4424_v50, %v4504_v40  ;;  %v3462_v40 = vpop.f32.mrf.mxu1 }
 0x32c   : > { %13166 = vst [vmem:[#allocation24_spill] sm:$0xff] %v11115_v28  ;;  %4189 = vrot.lane.b32.xlu0 %v4169_v20, %s8805_s6  ;;  %v13040_v15 = vmax.f32 %v11115_v28, 0.0  ;;  %v3848_v29 = vsel %vm3804_vm12, %v3757_v47, %v3847_v24  ;;  %v4760_v25 = vrot.slane %v3533_v59, %v10145_v32  ;;  %v4840_v22 = vsel %vm3804_vm12, %v4756_v37, %v4839_v7 }
 0x32d   : > { %v11139_v34 = vsel %vm3806_vm13, %v3761_v51, %v3848_v29  ;;  %v4885_v41 = vsel %vm4881_vm14, %v4876_v52, %v4520_v6  ;;  %v11150_v60 = vadd.f32 %v8418_v63, %v10112_v26  ;;  %v11160_v55 = vadd.f32 %v8419_v54, %v13168_v16 }
 0x32e   : > { %v4938_v38 = vpack.c.bf16 %v13038_v31, %v13040_v15  ;;  %v4841_v27 = vsel %vm3806_vm13, %v4760_v25, %v4840_v22 }
 0x32f   : > { %v4854_v44 = vpop.permute.xlu0 %4853  ;;  %v11166_v59 = vcombine.high %v11150_v60, %v11150_v60  ;;  %v3781_v12 = vrot.slane %v11150_v60, %v10130_v46  ;;  %v4108_v18 = vrot.slane %v11150_v60, %v10133_v10  ;;  %v4444_v9 = vrot.slane %v11150_v60, %v10136_v48 }
 0x330   : > { %v4893_v35 = vsel %vm4890_vm15, %v4884_v1, %v4854_v44  ;;  %4525 = vrot.lane.b32.xlu0 %v4505_v57, %s8806_s19  ;;  %8436 = vmatprep.mubr.bf16.mxu1 %v4938_v38  ;;  %v11178_v3 = vcombine.high %v11160_v55, %v11160_v55  ;;  %v4780_v63 = vrot.slane %v11150_v60, %v10145_v32 }
 0x331   : > { %v4908_v2 = vadd.f32 %v11064_v17, %v4893_v35  ;;  %v4856_v5 = vpop.permute.xlu1 %4855  ;;  %v4112_v30 = vrot.slane %v11166_v59, %v10133_v10  ;;  %v4116_v45 = vrot.slane %v11160_v55, %v10133_v10  ;;  %v4448_v1 = vrot.slane %v11166_v59, %v10136_v48 }
 0x332   : > { %v4894_v43 = vsel %vm4890_vm15, %v4885_v41, %v4856_v5  ;;  %v4452_v29 = vrot.slane %v11160_v55, %v10136_v48  ;;  %v4784_v5 = vrot.slane %v11166_v59, %v10145_v32 }
 0x333   : > { %v11154_v0 = vadd.f32 %v4916_v21, %v4908_v2  ;;  %v4909_v33 = vadd.f32 %v11064_v17, %v4894_v43  ;;  %v8330_v49 = vpop.f32.mrf.mxu0  ;;  %v4456_v2 = vrot.slane %v11178_v3, %v10136_v48 }
 0x334   : > { %4861 = vrot.lane.b32.xlu0 %v4841_v27, %s8807_s22  ;;  %v4788_v27 = vrot.slane %v11160_v55, %v10145_v32 }
 0x335   : > { %13167 = vst [vmem:[#allocation25_spill] sm:$0xff] %v11154_v0  ;;  %v11162_v56 = vadd.f32 %v4917_v19, %v4909_v33  ;;  %v8331_v26 = vpop.f32.mrf.mxu0  ;;  %v13041_v42 = vmax.f32 %v11154_v0, 0.0 }
 0x336   : > { %v8332_v11 = vadd.f32 %v8331_v26, %v8330_v49 }
 0x337   : > { %13169 = vst [vmem:[#allocation18_spill] sm:$0xff] %v11162_v56  ;;  %v13039_v39 = vmax.f32 %v11162_v56, 0.0  ;;  %v8333_v61 = vpop.f32.mrf.mxu0 }
 0x338   : > { %v3460_v53 = vadd.f32 %v8332_v11, %v3459_v58  ;;  %v4120_v58 = vrot.slane %v11178_v3, %v10133_v10 }
 0x339   : > { %v4939_v8 = vpack.c.bf16 %v13039_v39, %v13041_v42  ;;  %v8334_v14 = vpop.f32.mrf.mxu0 }
 0x33a   : > { %v3534_v13 = vcombine.high %v3460_v53, %v3460_v53  ;;  %v4092_v20 = vrot.slane %v3460_v53, %v10133_v10  ;;  %v4428_v50 = vrot.slane %v3460_v53, %v10136_v48  ;;  %v4764_v47 = vrot.slane %v3460_v53, %v10145_v32 }
 0x33b   : > { %8437 = vmatmul.mubr.bf16.vlgmr.msra.gmra.mxu1 %v4939_v8  ;;  %v8335_v6 = vadd.f32 %v8334_v14, %v8333_v61  ;;  %v3765_v44 = vrot.slane %v3460_v53, %v10130_v46  ;;  %v4792_v53 = vrot.slane %v11178_v3, %v10145_v32 }
 0x33c   : > { %v4096_v37 = vrot.slane %v3534_v13, %v10133_v10  ;;  %v4432_v51 = vrot.slane %v3534_v13, %v10136_v48  ;;  %v4768_v4 = vrot.slane %v3534_v13, %v10145_v32  ;;  %v3769_v7 = vrot.slane %v3534_v13, %v10130_v46 }
 0x33d   : > { %v3463_v24 = vadd.f32 %v8335_v6, %v3462_v40 }
 0x33e   : > { %v4170_v38 = vsel %vm3794_vm7, %v4096_v37, %v4092_v20  ;;  %v4506_v57 = vsel %vm3794_vm7, %v4432_v51, %v4428_v50  ;;  %v4842_v25 = vsel %vm3794_vm7, %v4768_v4, %v4764_v47  ;;  %v3850_v60 = vsel %vm3794_vm7, %v3769_v7, %v3765_v44 }
 0x33f   : > { %v3535_v52 = vcombine.high %v3463_v24, %v3463_v24  ;;  %v3773_v21 = vrot.slane %v3463_v24, %v10130_v46  ;;  %v4100_v35 = vrot.slane %v3463_v24, %v10133_v10  ;;  %v4436_v22 = vrot.slane %v3463_v24, %v10136_v48 }
 0x340   : > { %v4772_v41 = vrot.slane %v3463_v24, %v10145_v32 }
 0x341   : > { %v4104_v54 = vrot.slane %v3535_v52, %v10133_v10  ;;  %v4171_v19 = vsel %vm3796_vm8, %v4100_v35, %v4170_v38  ;;  %v4440_v43 = vrot.slane %v3535_v52, %v10136_v48  ;;  %v4507_v33 = vsel %vm3796_vm8, %v4436_v22, %v4506_v57  ;;  %v5650_v38 = vld [vmem:[#allocation8 + $0x8] sm:$0xf]  ;;  %v5843_v35 = vld [vmem:[#allocation8 + $0x10] sm:$0xf] }
 0x342   : > { %v4776_v49 = vrot.slane %v3535_v52, %v10145_v32  ;;  %v4843_v16 = vsel %vm3796_vm8, %v4772_v41, %v4842_v25  ;;  %v3777_v26 = vrot.slane %v3535_v52, %v10130_v46  ;;  %v3851_v8 = vsel %vm3796_vm8, %v3773_v21, %v3850_v60  ;;  %v5977_v60 = vld [vmem:[#allocation8 + $0x14] sm:$0xf] }
 0x343   : > { %v4172_v11 = vsel %vm3798_vm9, %v4104_v54, %v4171_v19  ;;  %v4508_v61 = vsel %vm3798_vm9, %v4440_v43, %v4507_v33  ;;  %v5655_v57 = vrot.slane %v5650_v38, %v10130_v46  ;;  %v5663_v52 = vrot.slane %v5650_v38, %v10136_v48  ;;  %v4186_v54 = vpop.permute.xlu0 %4185 }
 0x344   : > { %v4173_v14 = vsel %vm3800_vm10, %v4108_v18, %v4172_v11  ;;  %v4509_v13 = vsel %vm3800_vm10, %v4444_v9, %v4508_v61  ;;  %v4844_v20 = vsel %vm3798_vm9, %v4776_v49, %v4843_v16  ;;  %v3852_v50 = vsel %vm3798_vm9, %v3777_v26, %v3851_v8 }
 0x345   : > { %v4174_v47 = vsel %vm3802_vm11, %v4112_v30, %v4173_v14  ;;  %v4510_v6 = vsel %vm3802_vm11, %v4448_v1, %v4509_v13  ;;  %v4845_v40 = vsel %vm3800_vm10, %v4780_v63, %v4844_v20  ;;  %v3853_v37 = vsel %vm3800_vm10, %v3781_v12, %v3852_v50  ;;  %v4918_v14 = vld [vmem:[%s11073_s26 + $0x20] sm:$0xff] }
 0x346   : > { %v4175_v51 = vsel %vm3804_vm12, %v4116_v45, %v4174_v47  ;;  %v4511_v4 = vsel %vm3804_vm12, %v4452_v29, %v4510_v6  ;;  %v4846_v18 = vsel %vm3802_vm11, %v4784_v5, %v4845_v40  ;;  %v3785_v9 = vrot.slane %v11166_v59, %v10130_v46  ;;  %v5551_v29 = vld [vmem:[#allocation8 + $0x4] sm:$0xf] }
 0x347   : > { %v4176_v7 = vsel %vm3806_vm13, %v4120_v58, %v4175_v51  ;;  %v4512_v24 = vsel %vm3806_vm13, %v4456_v2, %v4511_v4  ;;  %v4847_v30 = vsel %vm3804_vm12, %v4788_v27, %v4846_v18  ;;  %v3789_v63 = vrot.slane %v11160_v55, %v10130_v46  ;;  %v4522_v33 = vpop.permute.xlu0 %4521  ;;  %v4919_v47 = vld [vmem:[%s11073_s26 + $0x28] sm:$0xff] }
 0x348   : > { %4191 = vrot.lane.b32.xlu1 %v4176_v7, %s8805_s6  ;;  %v4848_v12 = vsel %vm3806_vm13, %v4792_v53, %v4847_v30  ;;  %v3793_v45 = vrot.slane %v11178_v3, %v10130_v46  ;;  %v3854_v1 = vsel %vm3802_vm11, %v3785_v9, %v3853_v37  ;;  %v5556_v44 = vrot.slane %v5551_v29, %v10130_v46  ;;  %v6205_v7 = vld [vmem:[#allocation8 + $0x1c] sm:$0xf] }
 0x349   : > { %v3855_v59 = vsel %vm3804_vm12, %v3789_v63, %v3854_v1  ;;  %v5564_v55 = vrot.slane %v5551_v29, %v10136_v48  ;;  %v5560_v3 = vrot.slane %v5551_v29, %v10133_v10  ;;  %v5568_v25 = vrot.slane %v5551_v29, %v10145_v32 }
 0x34a   : > { %v11255_v58 = vsel %vm3806_vm13, %v3793_v45, %v3855_v59  ;;  %5569 = vrot.lane.b32.xlu0 %v5556_v44, %s8805_s6  ;;  %v5659_v21 = vrot.slane %v5650_v38, %v10133_v10  ;;  %v5667_v22 = vrot.slane %v5650_v38, %v10145_v32  ;;  %v5848_v41 = vrot.slane %v5843_v35, %v10130_v46  ;;  %v6339_v45 = vld [vmem:[#allocation8 + $0x20] sm:$0xf] }
 0x34b   : > { %v5852_v2 = vrot.slane %v5843_v35, %v10133_v10  ;;  %v5856_v5 = vrot.slane %v5843_v35, %v10136_v48  ;;  %v5982_v19 = vrot.slane %v5977_v60, %v10130_v46  ;;  %v5860_v43 = vrot.slane %v5843_v35, %v10145_v32  ;;  %v4858_v27 = vpop.permute.xlu0 %4857 }
 0x34c   : > { %4527 = vrot.lane.b32.xlu1 %v4512_v24, %s8806_s19  ;;  %v5986_v49 = vrot.slane %v5977_v60, %v10133_v10  ;;  %v4877_v26 = vsel %vm428_vm0, %v10963_v62, %v4186_v54  ;;  %v5994_v18 = vrot.slane %v5977_v60, %v10145_v32  ;;  %v5990_v9 = vrot.slane %v5977_v60, %v10136_v48 }
 0x34d   : > { %v4886_v11 = vsel %vm4881_vm14, %v4877_v26, %v4522_v33  ;;  %v6214_v24 = vrot.slane %v6205_v7, %v10133_v10  ;;  %v6210_v30 = vrot.slane %v6205_v7, %v10130_v46  ;;  %v6222_v63 = vrot.slane %v6205_v7, %v10145_v32 }
 0x34e   : > { %5573 = vrot.lane.b32.xlu0 %v5564_v55, %s8805_s6  ;;  %v4895_v61 = vsel %vm4890_vm15, %v4886_v11, %v4858_v27  ;;  %v6348_v1 = vrot.slane %v6339_v45, %v10133_v10  ;;  %v6344_v59 = vrot.slane %v6339_v45, %v10130_v46  ;;  %v6356_v29 = vrot.slane %v6339_v45, %v10145_v32 }
 0x34f   : > { %v4910_v8 = vadd.f32 %v11064_v17, %v4895_v61  ;;  %v6352_v44 = vrot.slane %v6339_v45, %v10136_v48 }
 0x350   : > { %4863 = vrot.lane.b32.xlu1 %v4848_v12, %s8807_s22  ;;  %v6218_v12 = vrot.slane %v6205_v7, %v10136_v48 }
 0x351   : > { %v11298_v40 = vadd.f32 %v4918_v14, %v4910_v8 }
 0x352   : > { %5668 = vrot.lane.b32.xlu0 %v5655_v57, %s8806_s19 }
 0x353   : > { %13170 = vst [vmem:[#allocation26_spill] sm:$0xff] %v11298_v40  ;;  %v13036_v51 = vmax.f32 %v11298_v40, 0.0 }
 0x354   : > { %5571 = vrot.lane.b32.xlu1 %v5560_v3, %s8805_s6 }
 0x356   : > { %5672 = vrot.lane.b32.xlu0 %v5663_v52, %s8806_s19 }
 0x358   : > { %5575 = vrot.lane.b32.xlu1 %v5568_v25, %s8805_s6 }
 0x35a   : > { %5674 = vrot.lane.b32.xlu0 %v5667_v22, %s8806_s19 }
 0x35c   : > { %5670 = vrot.lane.b32.xlu1 %v5659_v21, %s8806_s19 }
 0x35e   : > { %5863 = vrot.lane.b32.xlu0 %v5852_v2, %s8805_s6 }
 0x360   : > { %5861 = vrot.lane.b32.xlu1 %v5848_v41, %s8805_s6  ;;  %v4920_v41 = vld [vmem:[%s11073_s26 + $0x30] sm:$0xff] }
 0x362   : > { %5995 = vrot.lane.b32.xlu0 %v5982_v19, %s8806_s19  ;;  %v4921_v19 = vld [vmem:[%s11073_s26 + $0x38] sm:$0xff]  ;;  %s7413_s26 = scalar_lea.sflag [#allocation7], %s8994_s30 }
 0x364   : > { %5865 = vrot.lane.b32.xlu1 %v5856_v5, %s8805_s6 }
 0x366   : > { %5999 = vrot.lane.b32.xlu0 %v5990_v9, %s8806_s19 }
 0x368   : > { %5867 = vrot.lane.b32.xlu1 %v5860_v43, %s8805_s6 }
 0x36a   : > { %6223 = vrot.lane.b32.xlu0 %v6210_v30, %s8805_s6  ;;  %v11404_v30 = vld [vmem:[%s13019_s5] ss:$0 sm:$0xff] }
 0x36c   : > { %5997 = vrot.lane.b32.xlu1 %v5986_v49, %s8806_s19 }
 0x36e   : > { %v4188_v16 = vpop.permute.xlu1 %4187  ;;  %6227 = vrot.lane.b32.xlu0 %v6218_v12, %s8805_s6 }
 0x36f   : > { %v4878_v13 = vsel %vm428_vm0, %v11023_v23, %v4188_v16 }
 0x370   : > { %6001 = vrot.lane.b32.xlu1 %v5994_v18, %s8806_s19 }
 0x372   : > { %v4524_v53 = vpop.permute.xlu1 %4523  ;;  %6357 = vrot.lane.b32.xlu0 %v6344_v59, %s8806_s19 }
 0x373   : > { %v4887_v20 = vsel %vm4881_vm14, %v4878_v13, %v4524_v53 }
 0x374   : > { %6225 = vrot.lane.b32.xlu1 %v6214_v24, %s8805_s6 }
 0x376   : > { %v4860_v50 = vpop.permute.xlu1 %4859  ;;  %6361 = vrot.lane.b32.xlu0 %v6352_v44, %s8806_s19 }
 0x377   : > { %v4896_v6 = vsel %vm4890_vm15, %v4887_v20, %v4860_v50 }
 0x378   : > { %v4911_v62 = vadd.f32 %v11064_v17, %v4896_v6  ;;  %6229 = vrot.lane.b32.xlu1 %v6222_v63, %s8805_s6 }
 0x37a   : > { %v11301_v37 = vadd.f32 %v4919_v47, %v4911_v62 }
 0x37c   : > { %13171 = vst [vmem:[#allocation27_spill] sm:$0xff] %v11301_v37  ;;  %v13034_v4 = vmax.f32 %v11301_v37, 0.0  ;;  %6359 = vrot.lane.b32.xlu1 %v6348_v1, %s8806_s19 }
 0x37e   : > { %v4940_v23 = vpack.c.bf16 %v13034_v4, %v13036_v51 }
 0x380   : > { %8440 = vmatprep.mubr.bf16.mxu1 %v4940_v23  ;;  %6363 = vrot.lane.b32.xlu1 %v6356_v29, %s8806_s19 }
 0x39e   : > { %v4190_v55 = vpop.permute.xlu0 %4189 }
 0x39f   : > { %v4879_v25 = vsel %vm428_vm0, %v11139_v34, %v4190_v55 }
 0x3a2   : > { %v4526_v3 = vpop.permute.xlu0 %4525 }
 0x3a3   : > { %v4888_v52 = vsel %vm4881_vm14, %v4879_v25, %v4526_v3 }
 0x3a6   : > { %v4862_v38 = vpop.permute.xlu0 %4861 }
 0x3a7   : > { %v4897_v21 = vsel %vm4890_vm15, %v4888_v52, %v4862_v38 }
 0x3a8   : > { %v4912_v22 = vadd.f32 %v11064_v17, %v4897_v21 }
 0x3aa   : > { %v11342_v34 = vadd.f32 %v4920_v41, %v4912_v22 }
 0x3ac   : > { %13172 = vst [vmem:[#allocation28_spill] sm:$0xff] %v11342_v34  ;;  %v13037_v26 = vmax.f32 %v11342_v34, 0.0 }
 0x3ba   : > { %v4192_v57 = vpop.permute.xlu1 %4191 }
 0x3bb   : > { %v4880_v2 = vsel %vm428_vm0, %v11255_v58, %v4192_v57 }
 0x3bc   : > { %v11337_v5 = vpop.permute.xlu0 %5569 }
 0x3be   : > { %v4528_v35 = vpop.permute.xlu1 %4527 }
 0x3bf   : > { %v4889_v60 = vsel %vm4881_vm14, %v4880_v2, %v4528_v35 }
 0x3c0   : > { %v11345_v49 = vpop.permute.xlu0 %5573 }
 0x3c2   : > { %v4864_v54 = vpop.permute.xlu1 %4863 }
 0x3c3   : > { %v4898_v43 = vsel %vm4890_vm15, %v4889_v60, %v4864_v54 }
 0x3c4   : > { %v4913_v33 = vadd.f32 %v11064_v17, %v4898_v43  ;;  %v11358_v61 = vpop.permute.xlu0 %5668 }
 0x3c6   : > { %v11347_v27 = vadd.f32 %v4921_v19, %v4913_v33  ;;  %v11349_v16 = vpop.permute.xlu1 %5571 }
 0x3c7   : > { %v11354_v58 = vsel %vm428_vm0, %v11349_v16, %v11345_v49 }
 0x3c8   : > { %13173 = vst [vmem:[#allocation29_spill] sm:$0xff] %v11347_v27  ;;  %v13035_v11 = vmax.f32 %v11347_v27, 0.0  ;;  %v11366_v8 = vpop.permute.xlu0 %5672 }
 0x3ca   : > { %v4941_v17 = vpack.c.bf16 %v13035_v11, %v13037_v26  ;;  %v11364_v53 = vpop.permute.xlu1 %5575 }
 0x3cc   : > { %8441 = vmatmul.mubr.bf16.gmra.mxu1 %v4941_v17  ;;  %v11375_v20 = vpop.permute.xlu0 %5674 }
 0x3ce   : > { %v11368_v14 = vpop.permute.xlu1 %5670 }
 0x3cf   : > { %v11373_v13 = vsel %vm4881_vm14, %v11368_v14, %v11366_v8 }
 0x3d0   : > { %v11381_v6 = vpop.permute.xlu0 %5863 }
 0x3d2   : > { %v11377_v50 = vpop.permute.xlu1 %5861 }
 0x3d4   : > { %v11390_v18 = vpop.permute.xlu0 %5995 }
 0x3d5   : > { %13177 = vst [vmem:[#allocation33_spill] sm:$0xff] %v11390_v18 }
 0x3d6   : > { %v11379_v47 = vpop.permute.xlu1 %5865 }
 0x3d7   : > { %13174 = vst [vmem:[#allocation30_spill] sm:$0xff] %v11379_v47  ;;  %v11386_v62 = vsel %vm428_vm0, %v11381_v6, %v11379_v47 }
 0x3d8   : > { %13175 = vst [vmem:[#allocation31_spill] sm:$0xff] %v11386_v62  ;;  %v11394_v7 = vpop.permute.xlu0 %5999 }
 0x3d9   : > { %13179 = vst [vmem:[#allocation35_spill] sm:$0xff] %v11394_v7 }
 0x3da   : > { %v11388_v23 = vpop.permute.xlu1 %5867 }
 0x3db   : > { %13176 = vst [vmem:[#allocation32_spill] sm:$0xff] %v11388_v23 }
 0x3de   : > { %v11392_v9 = vpop.permute.xlu1 %5997 }
 0x3df   : > { %13178 = vst [vmem:[#allocation34_spill] sm:$0xff] %v11392_v9  ;;  %v11399_v24 = vsel %vm4881_vm14, %v11392_v9, %v11394_v7 }
 0x3e0   : > { %13180 = vst [vmem:[#allocation36_spill] sm:$0xff] %v11399_v24 }
 0x3fb   : > { %v8438_v63 = vpop.f32.mrf.mxu1 }
 0x3fc   : > { %v5056_v12 = vadd.f32 %v8438_v63, %v11404_v30 }
 0x3fd   : > { %v5047_v45 = vpop.f32.mrf.mxu1 }
 0x3fe   : > { %v11407_v1 = vmax.f32 %v5056_v12, 0.0  ;;  %v5048_v59 = vadd.f32 %v11404_v30, %v5047_v45 }
 0x3ff   : > { %v8439_v29 = vpop.f32.mrf.mxu1 }
 0x400   : > { %v11412_v44 = vcombine.high %v11407_v1, %v11407_v1  ;;  %v5138_v55 = vrot.slane %v11407_v1, %v10130_v46  ;;  %v5216_v3 = vrot.slane %v11407_v1, %v10133_v10  ;;  %v5372_v57 = vrot.slane %v11407_v1, %v10145_v32 }
 0x401   : > { %v5078_v25 = vmax.f32 %v5048_v59, 0.0  ;;  %v5059_v52 = vadd.f32 %v8439_v29, %v11404_v30  ;;  %v5050_v21 = vpop.f32.mrf.mxu1 }
 0x402   : > { %v5051_v35 = vadd.f32 %v11404_v30, %v5050_v21  ;;  %v5220_v22 = vrot.slane %v11412_v44, %v10133_v10  ;;  %v5142_v41 = vrot.slane %v11412_v44, %v10130_v46  ;;  %v5376_v2 = vrot.slane %v11412_v44, %v10145_v32 }
 0x403   : > { %v5111_v60 = vcombine.high %v5078_v25, %v5078_v25  ;;  %v5122_v54 = vrot.slane %v5078_v25, %v10130_v46  ;;  %v5200_v19 = vrot.slane %v5078_v25, %v10133_v10  ;;  %v5278_v43 = vrot.slane %v5078_v25, %v10136_v48 }
 0x404   : > { %v5356_v33 = vrot.slane %v5078_v25, %v10145_v32  ;;  %v5081_v17 = vmax.f32 %v5059_v52, 0.0  ;;  %v5079_v63 = vmax.f32 %v5051_v35, 0.0  ;;  %v5298_v12 = vrot.slane %v11412_v44, %v10136_v48  ;;  %v11443_v52 = vpop.permute.xlu1 %6001  ;;  %v11445_v35 = vpop.permute.xlu0 %6223 }
 0x405   : > { %v5126_v45 = vrot.slane %v5111_v60, %v10130_v46  ;;  %v5204_v59 = vrot.slane %v5111_v60, %v10133_v10  ;;  %v5282_v29 = vrot.slane %v5111_v60, %v10136_v48  ;;  %v5360_v21 = vrot.slane %v5111_v60, %v10145_v32  ;;  %13181 = vst [vmem:[#allocation37_spill] sm:$0xff] %v11443_v52 }
 0x406   : > { %v5114_v4 = vcombine.high %v5081_v17, %v5081_v17  ;;  %v5146_v11 = vrot.slane %v5081_v17, %v10130_v46  ;;  %v5224_v51 = vrot.slane %v5081_v17, %v10133_v10  ;;  %v5302_v25 = vrot.slane %v5081_v17, %v10136_v48  ;;  %13182 = vst [vmem:[#allocation38_spill] sm:$0xff] %v11445_v35 }
 0x407   : > { %v5183_v44 = vsel %vm3794_vm7, %v5126_v45, %v5122_v54  ;;  %v5261_v26 = vsel %vm3794_vm7, %v5204_v59, %v5200_v19  ;;  %v5339_v31 = vsel %vm3794_vm7, %v5282_v29, %v5278_v43  ;;  %v5417_v39 = vsel %vm3794_vm7, %v5360_v21, %v5356_v33 }
 0x408   : > { %v5380_v60 = vrot.slane %v5081_v17, %v10145_v32  ;;  %v5112_v15 = vcombine.high %v5079_v63, %v5079_v63  ;;  %v5130_v42 = vrot.slane %v5079_v63, %v10130_v46  ;;  %v5208_v38 = vrot.slane %v5079_v63, %v10133_v10 }
 0x409   : > { %v5286_v37 = vrot.slane %v5079_v63, %v10136_v48  ;;  %v5364_v27 = vrot.slane %v5079_v63, %v10145_v32  ;;  %v5228_v40 = vrot.slane %v5114_v4, %v10133_v10  ;;  %v5150_v54 = vrot.slane %v5114_v4, %v10130_v46 }
 0x40a   : > { %v5184_v19 = vsel %vm3796_vm8, %v5130_v42, %v5183_v44  ;;  %v5262_v43 = vsel %vm3796_vm8, %v5208_v38, %v5261_v26  ;;  %v5212_v33 = vrot.slane %v5112_v15, %v10133_v10  ;;  %v5134_v17 = vrot.slane %v5112_v15, %v10130_v46  ;;  %v11470_v38 = vpop.permute.xlu1 %6225  ;;  %v11472_v44 = vpop.permute.xlu0 %6227 }
 0x40b   : > { %v5340_v45 = vsel %vm3796_vm8, %v5286_v37, %v5339_v31  ;;  %v5418_v59 = vsel %vm3796_vm8, %v5364_v27, %v5417_v39  ;;  %v5368_v29 = vrot.slane %v5112_v15, %v10145_v32  ;;  %v5384_v63 = vrot.slane %v5114_v4, %v10145_v32 }
 0x40c   : > { %v5263_v21 = vsel %vm3798_vm9, %v5212_v33, %v5262_v43  ;;  %v5185_v34 = vsel %vm3798_vm9, %v5134_v17, %v5184_v19  ;;  %v5290_v42 = vrot.slane %v5112_v15, %v10136_v48  ;;  %v5306_v26 = vrot.slane %v5114_v4, %v10136_v48 }
 0x40d   : > { %v5264_v31 = vsel %vm3800_vm10, %v5216_v3, %v5263_v21  ;;  %v5186_v39 = vsel %vm3800_vm10, %v5138_v55, %v5185_v34  ;;  %v5419_v37 = vsel %vm3798_vm9, %v5368_v29, %v5418_v59  ;;  %v11480_v27 = vsel %vm428_vm0, %v11470_v38, %v11472_v44 }
 0x40e   : > { %13183 = vst [vmem:[#allocation39_spill] sm:$0xff] %v11480_v27  ;;  %v5265_v19 = vsel %vm3802_vm11, %v5220_v22, %v5264_v31  ;;  %v5187_v15 = vsel %vm3802_vm11, %v5142_v41, %v5186_v39  ;;  %v5420_v4 = vsel %vm3800_vm10, %v5372_v57, %v5419_v37  ;;  %v5341_v43 = vsel %vm3798_vm9, %v5290_v42, %v5340_v45 }
 0x40f   : > { %v5266_v33 = vsel %vm3804_vm12, %v5224_v51, %v5265_v19  ;;  %v5188_v3 = vsel %vm3804_vm12, %v5146_v11, %v5187_v15  ;;  %v5421_v34 = vsel %vm3802_vm11, %v5376_v2, %v5420_v4  ;;  %v13184_v55 = vrot.slane %v11407_v1, %v10136_v48 }
 0x410   : > { %v11494_v59 = vsel %vm3806_vm13, %v5228_v40, %v5266_v33  ;;  %v11497_v22 = vsel %vm3806_vm13, %v5150_v54, %v5188_v3  ;;  %v5422_v57 = vsel %vm3804_vm12, %v5380_v60, %v5421_v34  ;;  %v13185_v40 = vlaneseq  ;;  %v11537_v54 = vpop.permute.xlu1 %6229 }
 0x411   : > { %v5342_v17 = vsel %vm3800_vm10, %v13184_v55, %v5341_v43  ;;  %v13049_v51 = vrot.slane %v11494_v59, 7  ;;  %v13048_v11 = vrot.slane %v11497_v22, 7  ;;  %v11505_v1 = vsel %vm3806_vm13, %v5384_v63, %v5422_v57  ;;  %v11541_v63 = vpop.permute.xlu0 %6357 }
 0x412   : > { %v5343_v41 = vsel %vm3802_vm11, %v5298_v12, %v5342_v17  ;;  %vm5088_vm3 = vcmp.lt.s32.totalorder %v13185_v40, 640  ;;  %v13186_v12 = vmov 0.0   ;;  %13187 = vst [vmem:[#allocation40_spill] sm:$0xff] %v11541_v63 }
 0x413   : > { %v5344_v2 = vsel %vm3804_vm12, %v5302_v25, %v5343_v41  ;;  %5446 = vrot.lane.b32.xlu1 %v13049_v51, %s8805_s6  ;;  %5444 = vrot.lane.b32.xlu0 %v13048_v11, %s8805_s6  ;;  %5090 = vst.msk [vmem:[#allocation4] ss:$8 sm:$0xf] %vm5088_vm3, %v13186_v12  ;;  %5091 = vst.msk [vmem:[#allocation4] ss:$8 sm:$0x10] %vm5088_vm3, %v13186_v12 }
 0x414   : > { %v11508_v45 = vsel %vm3806_vm13, %v5306_v26, %v5344_v2  ;;  %5093 = vst.msk [vmem:[#allocation4 + $0x51] ss:$8 sm:$0xf] %vm5088_vm3, %v13186_v12  ;;  %5094 = vst.msk [vmem:[#allocation4 + $0x51] ss:$8 sm:$0x10] %vm5088_vm3, %v13186_v12  ;;  %v11539_v29 = vpop.permute.xlu1 %6359 }
 0x415   : > { %v13047_v25 = vrot.slane %v11505_v1, 7  ;;  %v13046_v60 = vrot.slane %v11508_v45, 7  ;;  %5095 = vst.msk [vmem:[#allocation4] sm:$0xff] %vm428_vm0, %v13186_v12  ;;  %v11545_v42 = vpop.permute.xlu0 %6361 }
 0x416   : > { %5099 = vst.msk [vmem:[#allocation4 + $0x20] sm:$0xff] %vm5098_vm4, %v13186_v12  ;;  %5100 = vst.msk [vmem:[#allocation4 + $0x48] sm:$0xff] %vm5098_vm4, %v13186_v12 }
 0x417   : > { %5097 = vst.msk [vmem:[#allocation4 + $0x50] sm:$0x3] %vm431_vm2, %v13186_v12  ;;  %5450 = vrot.lane.b32.xlu1 %v13047_v25, %s8805_s6  ;;  %5448 = vrot.lane.b32.xlu0 %v13046_v60, %s8805_s6  ;;  %vm5492_vm2 = vcmask 1047809  }
 0x418   : > { %v11543_v21 = vpop.permute.xlu1 %6363  ;;  %5102 = vst.msk [vmem:[#allocation4 + $0x70] sm:$0x3] %vm5101_vm6, %v13186_v12 }
 0x419   : > { %13188 = vst [vmem:[#allocation41_spill] sm:$0xff] %v11543_v21 }
 0x485   : > { %v5447_v26 = vpop.permute.xlu1 %5446  ;;  %v5445_v31 = vpop.permute.xlu0 %5444 }
 0x486   : > { %v5468_v39 = vsel %vm428_vm0, %v5445_v31, %v5447_v26  ;;  %5493 = vst.msk [vmem:[#allocation4] sm:$0xfe] %vm5492_vm2, %v5445_v31 }
 0x487   : > { %5494 = vst [vmem:[#allocation4 + $0x8] sm:$0xfe] %v5468_v39 }
 0x489   : > { %v5451_v37 = vpop.permute.xlu1 %5450  ;;  %v5449_v19 = vpop.permute.xlu0 %5448 }
 0x48a   : > { %5498 = vst.msk [vmem:[#allocation4 + $0x20] sm:$0xfe] %vm5497_vm5, %v5451_v37  ;;  %v5469_v15 = vsel %vm428_vm0, %v5447_v26, %v5449_v19  ;;  %v5470_v4 = vsel %vm428_vm0, %v5449_v19, %v5451_v37 }
 0x48b   : > { %5495 = vst [vmem:[#allocation4 + $0x10] sm:$0xfe] %v5469_v15  ;;  %5496 = vst [vmem:[#allocation4 + $0x18] sm:$0xfe] %v5470_v4 }
 0x48c   : > { %v8442_v43 = vpop.f32.mrf.mxu1 }
 0x48d   : > { %v5072_v33 = vadd.f32 %v8442_v43, %v11404_v30 }
 0x48e   : > { %v5063_v3 = vpop.f32.mrf.mxu1 }
 0x48f   : > { %v11551_v34 = vmax.f32 %v5072_v33, 0.0  ;;  %v5064_v55 = vadd.f32 %v11404_v30, %v5063_v3 }
 0x490   : > { %v8443_v17 = vpop.f32.mrf.mxu1 }
 0x491   : > { %v11556_v57 = vcombine.high %v11551_v34, %v11551_v34  ;;  %v5170_v41 = vrot.slane %v11551_v34, %v10130_v46  ;;  %v5248_v2 = vrot.slane %v11551_v34, %v10133_v10  ;;  %v5326_v40 = vrot.slane %v11551_v34, %v10136_v48 }
 0x492   : > { %v5082_v26 = vmax.f32 %v5064_v55, 0.0  ;;  %v5075_v31 = vadd.f32 %v8443_v17, %v11404_v30  ;;  %v5066_v39 = vpop.f32.mrf.mxu1  ;;  %v5404_v37 = vrot.slane %v11551_v34, %v10145_v32 }
 0x493   : > { %v5067_v19 = vadd.f32 %v11404_v30, %v5066_v39  ;;  %v5174_v15 = vrot.slane %v11556_v57, %v10130_v46  ;;  %v5252_v4 = vrot.slane %v11556_v57, %v10133_v10  ;;  %v5330_v55 = vrot.slane %v11556_v57, %v10136_v48 }
 0x494   : > { %v5115_v43 = vcombine.high %v5082_v26, %v5082_v26  ;;  %v5154_v33 = vrot.slane %v5082_v26, %v10130_v46  ;;  %v5232_v3 = vrot.slane %v5082_v26, %v10133_v10  ;;  %v5310_v17 = vrot.slane %v5082_v26, %v10136_v48 }
 0x495   : > { %v5388_v34 = vrot.slane %v5082_v26, %v10145_v32  ;;  %v5085_v60 = vmax.f32 %v5075_v31, 0.0  ;;  %v5083_v30 = vmax.f32 %v5067_v19, 0.0  ;;  %v5408_v0 = vrot.slane %v11556_v57, %v10145_v32 }
 0x496   : > { %v5158_v39 = vrot.slane %v5115_v43, %v10130_v46  ;;  %v5236_v25 = vrot.slane %v5115_v43, %v10133_v10  ;;  %v5314_v11 = vrot.slane %v5115_v43, %v10136_v48  ;;  %v5392_v51 = vrot.slane %v5115_v43, %v10145_v32 }
 0x497   : > { %v5118_v36 = vcombine.high %v5085_v60, %v5085_v60  ;;  %v5178_v56 = vrot.slane %v5085_v60, %v10130_v46  ;;  %v5256_v28 = vrot.slane %v5085_v60, %v10133_v10  ;;  %v5334_v27 = vrot.slane %v5085_v60, %v10136_v48 }
 0x498   : > { %v5190_v26 = vsel %vm3794_vm7, %v5158_v39, %v5154_v33  ;;  %v5268_v31 = vsel %vm3794_vm7, %v5236_v25, %v5232_v3  ;;  %v5346_v19 = vsel %vm3794_vm7, %v5314_v11, %v5310_v17  ;;  %v5424_v7 = vsel %vm3794_vm7, %v5392_v51, %v5388_v34 }
 0x499   : > { %v5116_v9 = vcombine.high %v5083_v30, %v5083_v30  ;;  %v5162_v43 = vrot.slane %v5083_v30, %v10130_v46  ;;  %v5240_v62 = vrot.slane %v5083_v30, %v10133_v10  ;;  %v5412_v47 = vrot.slane %v5085_v60, %v10145_v32 }
 0x49a   : > { %v5318_v24 = vrot.slane %v5083_v30, %v10136_v48  ;;  %v5396_v57 = vrot.slane %v5083_v30, %v10145_v32  ;;  %v5182_v33 = vrot.slane %v5118_v36, %v10130_v46  ;;  %v5260_v60 = vrot.slane %v5118_v36, %v10133_v10 }
 0x49b   : > { %v5191_v25 = vsel %vm3796_vm8, %v5162_v43, %v5190_v26  ;;  %v5269_v11 = vsel %vm3796_vm8, %v5240_v62, %v5268_v31  ;;  %v5166_v3 = vrot.slane %v5116_v9, %v10130_v46  ;;  %v5244_v51 = vrot.slane %v5116_v9, %v10133_v10 }
 0x49c   : > { %v5347_v17 = vsel %vm3796_vm8, %v5318_v24, %v5346_v19  ;;  %v5425_v34 = vsel %vm3796_vm8, %v5396_v57, %v5424_v7  ;;  %v5322_v39 = vrot.slane %v5116_v9, %v10136_v48  ;;  %v5338_v26 = vrot.slane %v5118_v36, %v10136_v48 }
 0x49d   : > { %v5192_v30 = vsel %vm3798_vm9, %v5166_v3, %v5191_v25  ;;  %v5270_v52 = vsel %vm3798_vm9, %v5244_v51, %v5269_v11  ;;  %v5400_v62 = vrot.slane %v5116_v9, %v10145_v32  ;;  %v5416_v7 = vrot.slane %v5118_v36, %v10145_v32 }
 0x49e   : > { %v5193_v31 = vsel %vm3800_vm10, %v5170_v41, %v5192_v30  ;;  %v5271_v43 = vsel %vm3800_vm10, %v5248_v2, %v5270_v52  ;;  %v5348_v24 = vsel %vm3798_vm9, %v5322_v39, %v5347_v17  ;;  %vm5431_vm7 = vcmask 1040384   ;;  %v11647_v30 = vld [vmem:[#allocation4] sm:$0xff] }
 0x49f   : > { %v5194_v19 = vsel %vm3802_vm11, %v5174_v15, %v5193_v31  ;;  %v5272_v57 = vsel %vm3802_vm11, %v5252_v4, %v5271_v43  ;;  %v5349_v25 = vsel %vm3800_vm10, %v5326_v40, %v5348_v24  ;;  %v5426_v11 = vsel %vm3798_vm9, %v5400_v62, %v5425_v34  ;;  %v11664_v31 = vld [vmem:[#allocation4 + $0x10] sm:$0xff]  ;;  %v11666_v43 = vld [vmem:[#allocation4 + $0x8] sm:$0xff] }
 0x4a0   : > { %v5195_v3 = vsel %vm3804_vm12, %v5178_v56, %v5194_v19  ;;  %v5273_v9 = vsel %vm3804_vm12, %v5256_v28, %v5272_v57  ;;  %v5350_v41 = vsel %vm3802_vm11, %v5330_v55, %v5349_v25  ;;  %v5427_v52 = vsel %vm3800_vm10, %v5404_v37, %v5426_v11  ;;  %v11684_v57 = vld [vmem:[#allocation4 + $0x18] sm:$0xff] }
 0x4a1   : > { %v5196_v2 = vsel %vm3806_vm13, %v5182_v33, %v5195_v3  ;;  %v5274_v36 = vsel %vm3806_vm13, %v5260_v60, %v5273_v9  ;;  %v5351_v15 = vsel %vm3804_vm12, %v5334_v27, %v5350_v41  ;;  %v5428_v4 = vsel %vm3802_vm11, %v5408_v0, %v5427_v52 }
 0x4a2   : > { %v5436_v51 = vrot.slane %v5196_v2, 7  ;;  %v5438_v40 = vrot.slane %v5274_v36, 7  ;;  %v5429_v17 = vsel %vm3804_vm12, %v5412_v47, %v5428_v4  ;;  %v5352_v56 = vsel %vm3806_vm13, %v5338_v26, %v5351_v15  ;;  %v5520_v4 = vld [vmem:[#allocation8] sm:$0xf] }
 0x4a3   : > { %v5430_v28 = vsel %vm3806_vm13, %v5416_v7, %v5429_v17  ;;  %v5440_v37 = vrot.slane %v5352_v56, 7  ;;  %v13189_v0 = vrot.slane %v11494_v59, 7  ;;  %v13190_v27 = vrot.slane %v11497_v22, 7  ;;  %v5514_v59 = vld [vmem:[#allocation4 + $0x20] sm:$0xff] }
 0x4a4   : > { %5460 = vrot.lane.b32.xlu1 %v5436_v51, %s8805_s6  ;;  %5462 = vrot.lane.b32.xlu0 %v5438_v40, %s8805_s6  ;;  %v5442_v55 = vrot.slane %v5430_v28, 7  ;;  %v13191_v34 = vrot.slane %v11505_v1, 7  ;;  %v13192_v60 = vrot.slane %v11508_v45, 7  ;;  %v5585_v22 = vmul.f32 %v11337_v5, %v11647_v30 }
 0x4a5   : > { %v5439_v47 = vsel %vm5431_vm7, %v13189_v0, %v5438_v40  ;;  %v5437_v33 = vsel %vm5431_vm7, %v13190_v27, %v5436_v51  ;;  %v5589_v26 = vmul.f32 %v11364_v53, %v5514_v59  ;;  %v5688_v1 = vmul.f32 %v11375_v20, %v5514_v59  ;;  %v5759_v51 = vld [vmem:[#allocation8 + $0xc] sm:$0xf]  ;;  %v6121_v40 = vld [vmem:[#allocation8 + $0x18] sm:$0xf] }
 0x4a6   : > { %v5443_v12 = vsel %vm5431_vm7, %v13191_v34, %v5442_v55  ;;  %v5441_v39 = vsel %vm5431_vm7, %v13192_v60, %v5440_v37  ;;  %v5684_v45 = vmul.f32 %v11358_v61, %v11647_v30  ;;  %v11662_v62 = vsel %vm428_vm0, %v11337_v5, %v11349_v16  ;;  %v11742_v27 = vld [vmem:[#allocation4] sm:$0xfc] }
 0x4a7   : > { %v5587_v24 = vmul.f32 %v11354_v58, %v11664_v31  ;;  %v5586_v7 = vmul.f32 %v11662_v62, %v11666_v43  ;;  %v11677_v19 = vsel %vm428_vm0, %v11345_v49, %v11364_v53  ;;  %v11682_v16 = vsel %vm4881_vm14, %v11358_v61, %v11368_v14  ;;  %v5752_v34 = vld [vmem:[#allocation4 + $0x20] sm:$0xfe] }
 0x4a8   : > { %5464 = vrot.lane.b32.xlu1 %v5440_v37, %s8805_s6  ;;  %5466 = vrot.lane.b32.xlu0 %v5442_v55, %s8805_s6  ;;  %v5685_v25 = vmul.f32 %v11682_v16, %v11666_v43  ;;  %v5588_v11 = vmul.f32 %v11677_v19, %v11684_v57  ;;  %v11695_v49 = vsel %vm4881_vm14, %v11366_v8, %v11375_v20  ;;  %vm5504_vm8 = vcmask 1040640   ;;  %v5748_v37 = vld [vmem:[#allocation4] sm:$0xfe] }
 0x4a9   : > { %v5687_v14 = vmul.f32 %v11695_v49, %v11684_v57  ;;  %v5686_v3 = vmul.f32 %v11373_v13, %v11664_v31  ;;  %v11712_v17 = vsel %vm428_vm0, %v11377_v50, %v11381_v6  ;;  %v11717_v56 = vsel %vm428_vm0, %v11445_v35, %v11470_v38 }
 0x4aa   : > { %13193 = vst [vmem:[#allocation42_spill] sm:$0xff] %v11712_v17  ;;  %13194 = vst [vmem:[#allocation43_spill] sm:$0xff] %v11717_v56  ;;  %v11722_v28 = vsel %vm428_vm0, %v11472_v44, %v11537_v54  ;;  %v11727_v55 = vsel %vm4881_vm14, %v11541_v63, %v11539_v29  ;;  %v11732_v6 = vsel %vm4881_vm14, %v11539_v29, %v11545_v42  ;;  %vm5805_vm9 = vcmask 1046528  }
 0x4ab   : > { %13195 = vst [vmem:[#allocation44_spill] sm:$0xff] %v11727_v55  ;;  %v11737_v38 = vsel %vm4881_vm14, %v11545_v42, %v11543_v21  ;;  %v11740_v44 = vrot.slane %v5520_v4, %v10130_v46  ;;  %v11749_v29 = vrot.slane %v5520_v4, %v10133_v10  ;;  %v11755_v42 = vrot.slane %v6121_v40, %v10130_v46 }
 0x4ac   : > { %5454 = vrot.lane.b32.xlu1 %v5439_v47, %s8805_s6  ;;  %5452 = vrot.lane.b32.xlu0 %v5437_v33, %s8805_s6  ;;  %v11758_v60 = vrot.slane %v5520_v4, %v10136_v48  ;;  %v11764_v59 = vrot.slane %v5759_v51, %v10133_v10  ;;  %vm7199_vm10 = vcmask 1042432  }
 0x4ad   : > { %13196 = vst [vmem:[#allocation45_spill] sm:$0xff] %v11740_v44  ;;  %13197 = vst [vmem:[#allocation46_spill] sm:$0xff] %v11749_v29 }
 0x4ae   : > { %13199 = vst [vmem:[#allocation48_spill] sm:$0xff] %v11758_v60  ;;  %13201 = vst [vmem:[#allocation50_spill] sm:$0xff] %v11764_v59 }
 0x4b0   : > { %5458 = vrot.lane.b32.xlu1 %v5443_v12, %s8805_s6  ;;  %5456 = vrot.lane.b32.xlu0 %v5441_v39, %s8805_s6  ;;  %v11752_v12 = vrot.slane %v5759_v51, %v10130_v46  ;;  %v11761_v39 = vmul.f32 %v11377_v50, %v5748_v37  ;;  %v11839_v46 = vld [vmem:[#allocation4 + $0x18] sm:$0xfc]  ;;  %s8733_s6 = scalar_lea.vmem %s8732_s28, 2048 }
 0x4b1   : > { %13214 = vst [vmem:[#allocation62_spill] sm:$0xff] %v11839_v46  ;;  %p8735_p7 = scmp.lt.s32.totalorder %s8733_s6, %s8727_s17 }
 0x4b2   : > { %13198 = vst [vmem:[#allocation47_spill] sm:$0xff] %v11752_v12  ;;  %13200 = vst [vmem:[#allocation49_spill] sm:$0xff] %v11761_v39 }
 0x4b3   : > { %p8736_p9 = por %p8735_p7, %p8734_p12 }
 0x4b4   : > { %5605 = vrot.lane.b32.xlu1 %v5585_v22, %s8807_s22  ;;  %5613 = vrot.lane.b32.xlu0 %v5589_v26, %s8807_s22  ;;  %v11767_v22 = vrot.slane %v6121_v40, %v10133_v10  ;;  %v11770_v26 = vrot.slane %v5520_v4, %v10145_v32  ;;  %v11809_v4 = vrot.slane %v6121_v40, %v10136_v48 }
 0x4b5   : > { %v11823_v10 = vrot.slane %v6121_v40, %v10145_v32  ;;  %p8737_p13 = pnand %p8736_p9, %p8730_p6 }
 0x4b6   : > { %13202 = vst [vmem:[#allocation51_spill] sm:$0xff] %v11767_v22  ;;  %13203 = vst [vmem:[#allocation52_spill] sm:$0xff] %v11770_v26 }
 0x4b7   : > { %13211 = vst [vmem:[#allocation59_spill] sm:$0xff] %v11809_v4 }
 0x4b8   : > { %5712 = vrot.lane.b32.xlu1 %v5688_v1, %s8806_s19  ;;  %5704 = vrot.lane.b32.xlu0 %v5684_v45, %s8806_s19  ;;  %v11773_v1 = vmul.f32 %v11390_v18, %v5748_v37  ;;  %v11777_v45 = vmul.f32 %v11445_v35, %v11742_v27 }
 0x4ba   : > { %13204 = vst [vmem:[#allocation53_spill] sm:$0xff] %v11773_v1  ;;  %13205 = vst [vmem:[#allocation54_spill] sm:$0xff] %v11777_v45  ;;  %v11857_v1 = vmul.f32 %v11541_v63, %v11742_v27 }
 0x4bc   : > { %5609 = vrot.lane.b32.xlu1 %v5587_v24, %s8807_s22  ;;  %5607 = vrot.lane.b32.xlu0 %v5586_v7, %s8807_s22  ;;  %v11780_v24 = vrot.slane %v5759_v51, %v10136_v48 }
 0x4be   : > { %13206 = vst [vmem:[#allocation55_spill] sm:$0xff] %v11780_v24 }
 0x4c0   : > { %5706 = vrot.lane.b32.xlu1 %v5685_v25, %s8806_s19  ;;  %5611 = vrot.lane.b32.xlu0 %v5588_v11, %s8807_s22  ;;  %v11783_v11 = vmul.f32 %v11388_v23, %v5752_v34 }
 0x4c4   : > { %5710 = vrot.lane.b32.xlu1 %v5687_v14, %s8806_s19  ;;  %5708 = vrot.lane.b32.xlu0 %v5686_v3, %s8806_s19  ;;  %v13207_v14 = vld [vmem:[#allocation37_spill] sm:$0xff] }
 0x4c5   : > { %v11786_v3 = vmul.f32 %v13207_v14, %v5752_v34  ;;  %v11817_v34 = vmul.f32 %v11749_v29, %v11666_v43 }
 0x4c7   : > { %13208 = vst [vmem:[#allocation56_spill] sm:$0xff] %v11786_v3 }
 0x516   : > { %v5461_v9 = vpop.permute.xlu1 %5460  ;;  %v5463_v41 = vpop.permute.xlu0 %5462 }
 0x517   : > { %5505 = vst.msk [vmem:[#allocation4 + $0x50] sm:$0x1] %vm5504_vm8, %v5461_v9  ;;  %v5474_v8 = vsel %vm428_vm0, %v5461_v9, %v5463_v41  ;;  %v6114_v9 = vld [vmem:[#allocation4 + $0x20] sm:$0xfc] }
 0x518   : > { %5506 = vst [vmem:[#allocation4 + $0x58] sm:$0x1] %v5474_v8  ;;  %v11835_v43 = vmul.f32 %v11537_v54, %v6114_v9  ;;  %v11849_v48 = vmul.f32 %v11543_v21, %v6114_v9  ;;  %v11871_v9 = vmul.f32 %v11722_v28, %v11839_v46 }
 0x51a   : > { %v5465_v52 = vpop.permute.xlu1 %5464  ;;  %v5467_v2 = vpop.permute.xlu0 %5466  ;;  %13216 = vst [vmem:[#allocation64_spill] sm:$0xff] %v11849_v48 }
 0x51b   : > { %v5475_v36 = vsel %vm428_vm0, %v5463_v41, %v5465_v52  ;;  %v5476_v15 = vsel %vm428_vm0, %v5465_v52, %v5467_v2  ;;  %5509 = vst.msk [vmem:[#allocation4 + $0x70] sm:$0x1] %vm437_vm1, %v5467_v2  ;;  %vm6167_vm1 = vcmask 1045504  }
 0x51c   : > { %5507 = vst [vmem:[#allocation4 + $0x60] sm:$0x1] %v5475_v36  ;;  %5508 = vst [vmem:[#allocation4 + $0x68] sm:$0x1] %v5476_v15  ;;  %v11803_v36 = vld [vmem:[#allocation4 + $0x8] sm:$0xfe]  ;;  %v11806_v15 = vrot.slane %v5759_v51, %v10145_v32  ;;  %v11827_v51 = vmul.f32 %v11758_v60, %v11664_v31  ;;  %v11878_v31 = vmul.f32 %v11752_v12, %v5748_v37 }
 0x51d   : > { %13209 = vst [vmem:[#allocation57_spill] sm:$0xff] %v11803_v36  ;;  %v11861_v39 = vmul.f32 %v11712_v17, %v11803_v36  ;;  %v11884_v45 = vmul.f32 %v11764_v59, %v11803_v36  ;;  %v11903_v36 = vmul.f32 %v11755_v42, %v11742_v27 }
 0x51e   : > { %v5455_v0 = vpop.permute.xlu1 %5454  ;;  %v5453_v47 = vpop.permute.xlu0 %5452  ;;  %13210 = vst [vmem:[#allocation58_spill] sm:$0xff] %v11806_v15 }
 0x51f   : > { %v11745_v33 = vsel %vm428_vm0, %v5453_v47, %v5455_v0  ;;  %5499 = vst.msk [vmem:[#allocation4 + $0x28] sm:$0xff] %vm5098_vm4, %v5453_v47  ;;  %v11813_v47 = vmul.f32 %v11740_v44, %v11647_v30  ;;  %v11831_v30 = vmul.f32 %v11770_v26, %v11684_v57  ;;  %v11851_v26 = vld [vmem:[#allocation4 + $0x18] sm:$0xfe]  ;;  %13218 = vst [vmem:[#allocation66_spill] sm:$0xff] %v11861_v39 }
 0x520   : > { %v11790_v41 = vmul.f32 %v11717_v56, %v11745_v33  ;;  %v11794_v8 = vmul.f32 %v11727_v55, %v11745_v33  ;;  %13217 = vst [vmem:[#allocation65_spill] sm:$0xff] %v11851_v26  ;;  %v5591_v59 = vmul.f32 %v11662_v62, %v11745_v33 }
 0x522   : > { %v5459_v7 = vpop.permute.xlu1 %5458  ;;  %v5457_v25 = vpop.permute.xlu0 %5456 }
 0x523   : > { %5503 = vst.msk [vmem:[#allocation4 + $0x48] sm:$0xff] %vm428_vm0, %v5459_v7  ;;  %v11798_v52 = vsel %vm428_vm0, %v5455_v0, %v5457_v25  ;;  %v11801_v2 = vsel %vm428_vm0, %v5457_v25, %v5459_v7  ;;  %v11820_v7 = vld [vmem:[#allocation4 + $0x10] sm:$0xfe]  ;;  %v6111_v25 = vld [vmem:[#allocation4 + $0x8] sm:$0xfc] }
 0x524   : > { %13212 = vst [vmem:[#allocation60_spill] sm:$0xff] %v11820_v7  ;;  %v11837_v0 = vld [vmem:[#allocation4 + $0x10] sm:$0xfc]  ;;  %v11864_v60 = vmul.f32 %v11717_v56, %v6111_v25  ;;  %v11867_v57 = vmul.f32 %v11727_v55, %v6111_v25  ;;  %v11888_v3 = vmul.f32 %v11780_v24, %v11820_v7  ;;  %v11892_v56 = vmul.f32 %v11806_v15, %v11851_v26 }
 0x525   : > { %13213 = vst [vmem:[#allocation61_spill] sm:$0xff] %v11837_v0  ;;  %v11906_v7 = vmul.f32 %v11767_v22, %v6111_v25  ;;  %v11910_v26 = vmul.f32 %v11809_v4, %v11837_v0 }
 0x526   : > { %v5606_v29 = vpop.permute.xlu1 %5605  ;;  %v11841_v40 = vpop.permute.xlu0 %5613  ;;  %v11843_v32 = vld [vmem:[#allocation4 + $0x28] sm:$0xff] }
 0x527   : > { %13215 = vst [vmem:[#allocation63_spill] sm:$0xff] %v11843_v32  ;;  %v5590_v44 = vmul.f32 %v11337_v5, %v11843_v32  ;;  %v11875_v5 = vmul.f32 %v11732_v6, %v11837_v0  ;;  %13219 = vst [vmem:[#allocation67_spill] sm:$0xff] %v11910_v26  ;;  %v5757_v0 = vld [vmem:[#allocation4 + $0x70] sm:$0x1]  ;;  %v5689_v27 = vmul.f32 %v11358_v61, %v11843_v32 }
 0x528   : > { %v11955_v61 = vmul.f32 %v11388_v23, %v5757_v0 }
 0x529   : > { %5615 = vrot.lane.b32.xlu1 %v5590_v44, %s8807_s22  ;;  %v11898_v44 = vld [vmem:[#allocation4 + $0x50] sm:$0x1] }
 0x52a   : > { %v11894_v55 = vpop.permute.xlu1 %5712  ;;  %v5705_v37 = vpop.permute.xlu0 %5704  ;;  %v11896_v12 = vld [vmem:[#allocation4 + $0x48] sm:$0xff] }
 0x52b   : > { %v5594_v15 = vmul.f32 %v11364_v53, %v11896_v12  ;;  %v5693_v24 = vmul.f32 %v11375_v20, %v11896_v12  ;;  %v11926_v53 = vmul.f32 %v11377_v50, %v11898_v44 }
 0x52d   : > { %5623 = vrot.lane.b32.xlu0 %v5594_v15, %s8807_s22  ;;  %5722 = vrot.lane.b32.xlu1 %v5693_v24, %s8806_s19  ;;  %v11935_v24 = vmul.f32 %v11823_v10, %v11839_v46  ;;  %v11948_v46 = vmul.f32 %v11390_v18, %v11898_v44 }
 0x52e   : > { %v5610_v39 = vpop.permute.xlu1 %5609  ;;  %v5608_v48 = vpop.permute.xlu0 %5607 }
 0x52f   : > { %v5625_v4 = vsel %vm4890_vm15, %v5606_v29, %v5608_v48  ;;  %v5626_v20 = vsel %vm4890_vm15, %v5608_v48, %v5610_v39  ;;  %v5690_v48 = vmul.f32 %v11682_v16, %v11745_v33  ;;  %v11960_v29 = vmul.f32 %v11712_v17, %v11745_v33 }
 0x530   : > { %v5641_v25 = vadd.f32 %v5625_v4, %v11813_v47  ;;  %v5642_v22 = vadd.f32 %v5626_v20, %v11817_v34  ;;  %v5593_v34 = vmul.f32 %v11677_v19, %v11801_v2  ;;  %v11968_v16 = vmul.f32 %v11377_v50, %v11843_v32 }
 0x531   : > { %5714 = vrot.lane.b32.xlu0 %v5689_v27, %s8806_s19  ;;  %5617 = vrot.lane.b32.xlu1 %v5591_v59, %s8807_s22  ;;  %13220 = vst [vmem:[#allocation68_spill] sm:$0xff] %v11960_v29  ;;  %v5592_v59 = vmul.f32 %v11354_v58, %v11798_v52  ;;  %v11971_v27 = vmul.f32 %v13207_v14, %v5757_v0 }
 0x532   : > { %v5707_v4 = vpop.permute.xlu1 %5706  ;;  %v5612_v47 = vpop.permute.xlu0 %5611  ;;  %v11979_v19 = vmul.f32 %v11390_v18, %v11843_v32  ;;  %v11989_v0 = vmul.f32 %v11388_v23, %v11896_v12  ;;  %v13224_v23 = vrot.slane %v11790_v41, 2 }
 0x533   : > { %13221 = vst [vmem:[#allocation69_spill] sm:$0xff] %v11971_v27  ;;  %v5724_v20 = vsel %vm4881_vm14, %v5705_v37, %v5707_v4  ;;  %v5627_v15 = vsel %vm4890_vm15, %v5610_v39, %v5612_v47  ;;  %v5628_v62 = vsel %vm4890_vm15, %v5612_v47, %v11841_v40  ;;  %v5691_v39 = vmul.f32 %v11373_v13, %v11798_v52  ;;  %v12004_v47 = vld [vmem:[#allocation4 + $0x70] sm:$0x3] }
 0x534   : > { %v11981_v58 = vadd.f32 %v5724_v20, %v5641_v25  ;;  %v11984_v17 = vadd.f32 %v5627_v15, %v11827_v51  ;;  %v5644_v50 = vadd.f32 %v5628_v62, %v11831_v30  ;;  %v5692_v40 = vmul.f32 %v11695_v49, %v11801_v2  ;;  %13222 = vst [vmem:[#allocation70_spill] sm:$0xff] %v12004_v47 }
 0x535   : > { %5621 = vrot.lane.b32.xlu1 %v5593_v34, %s8807_s22  ;;  %5619 = vrot.lane.b32.xlu0 %v5592_v59, %s8807_s22  ;;  %v6407_v51 = vrot.slane %v11794_v8, 2  ;;  %v12002_v62 = vmul.f32 %v11445_v35, %v11843_v32  ;;  %v13223_v34 = vld [vmem:[#allocation36_spill] sm:$0xff]  ;;  %v12012_v49 = vmul.f32 %v11722_v28, %v11801_v2  ;;  %v12019_v20 = vmul.f32 %v13207_v14, %v11896_v12 }
 0x536   : > { %v5711_v25 = vpop.permute.xlu1 %5710  ;;  %v5709_v30 = vpop.permute.xlu0 %5708  ;;  %v12008_v13 = vmul.f32 %v13223_v34, %v11798_v52  ;;  %v6042_v15 = vrot.slane %v11979_v19, 1  ;;  %v13225_v35 = vrot.slane %v11864_v60, 2  ;;  %v13229_v19 = vrot.slane %v11867_v57, 2  ;;  %v12063_v57 = vld [vmem:[#allocation4 + $0x58] sm:$0x3] }
 0x537   : > { %v5727_v8 = vsel %vm4881_vm14, %v5711_v25, %v11894_v55  ;;  %v5725_v59 = vsel %vm4881_vm14, %v5707_v4, %v5709_v30  ;;  %v12038_v4 = vmul.f32 %v11541_v63, %v11843_v32  ;;  %v13106_v29 = vrot.slane %v12019_v20, 1  ;;  %v12094_v60 = vld [vmem:[#allocation4 + $0x60] sm:$0x3] }
 0x538   : > { %v12022_v37 = vadd.f32 %v5727_v8, %v5644_v50  ;;  %v12024_v18 = vadd.f32 %v5725_v59, %v5642_v22  ;;  %v12032_v55 = vsel %vm6167_vm1, %v13225_v35, %v13224_v23  ;;  %v12042_v22 = vmul.f32 %v11537_v54, %v12004_v47 }
 0x539   : > { %13226 = vst [vmem:[#allocation71_spill] sm:$0xff] %v12032_v55  ;;  %5716 = vrot.lane.b32.xlu1 %v5690_v48, %s8806_s19  ;;  %5718 = vrot.lane.b32.xlu0 %v5691_v39, %s8806_s19  ;;  %13227 = vst [vmem:[#allocation72_spill] sm:$0xff] %v12038_v4  ;;  %v12047_v50 = vsel %vm6167_vm1, %v13229_v19, %v6407_v51  ;;  %v6279_v23 = vrot.slane %v12012_v49, 2  ;;  %v12052_v35 = vmul.f32 %v11537_v54, %v11896_v12  ;;  %v12055_v48 = vld [vmem:[#allocation4 + $0x60] sm:$0x1] }
 0x53a   : > { %13228 = vst [vmem:[#allocation73_spill] sm:$0xff] %v12042_v22  ;;  %13230 = vst [vmem:[#allocation74_spill] sm:$0xff] %v12047_v50  ;;  %v6380_v39 = vmul.f32 %v11732_v6, %v11798_v52  ;;  %v12061_v8 = vmul.f32 %v11737_v38, %v11801_v2  ;;  %v13231_v59 = vrot.slane %v11968_v16, 1  ;;  %v13232_v49 = vld [vmem:[#allocation49_spill] sm:$0xff]  ;;  %v13234_v63 = vrot.slane %v11871_v9, 2 }
 0x53b   : > { %v13233_v19 = vrot.slane %v13232_v49, 1  ;;  %v12077_v50 = vld [vmem:[#allocation4 + $0x68] sm:$0x3]  ;;  %v13236_v55 = vrot.slane %v11989_v0, 1  ;;  %v13237_v14 = vrot.slane %v11783_v11, 1  ;;  %v13238_v49 = vld [vmem:[#allocation53_spill] sm:$0xff]  ;;  %v6023_v11 = vmul.f32 %v13223_v34, %v12055_v48 }
 0x53c   : > { %v12075_v47 = vsel %vm6167_vm1, %v13234_v63, %v6279_v23  ;;  %v13239_v27 = vrot.slane %v13238_v49, 1  ;;  %v6410_v9 = vrot.slane %v6380_v39, 2  ;;  %v13242_v39 = vrot.slane %v11875_v5, 2 }
 0x53d   : > { %v5909_v54 = vsel %vm5805_vm9, %v13233_v19, %v13231_v59  ;;  %13235 = vst [vmem:[#allocation49_spill] sm:$0xff] %v12075_v47  ;;  %v5921_v22 = vsel %vm5805_vm9, %v13237_v14, %v13236_v55  ;;  %v12089_v19 = vmul.f32 %v11543_v21, %v11896_v12  ;;  %5720 = vrot.lane.b32.xlu1 %v5692_v40, %s8806_s19  ;;  %v13240_v14 = vld [vmem:[#allocation44_spill] sm:$0xff]  ;;  %v6060_v34 = vrot.slane %v6023_v11, 1 }
 0x53e   : > { %v6043_v59 = vsel %vm5805_vm9, %v13239_v27, %v6042_v15  ;;  %5940 = vrot.lane.b32.xlu0 %v5921_v22, %s8807_s22  ;;  %v6384_v55 = vmul.f32 %v13240_v14, %v12063_v57  ;;  %v13241_v27 = vld [vmem:[#allocation43_spill] sm:$0xff]  ;;  %v12106_v40 = vsel %vm6167_vm1, %v13242_v39, %v6410_v9  ;;  %v6386_v63 = vmul.f32 %v11737_v38, %v12077_v50  ;;  %v13243_v21 = vld [vmem:[#allocation56_spill] sm:$0xff] }
 0x53f   : > { %v6250_v49 = vmul.f32 %v13241_v27, %v12063_v57  ;;  %v13244_v47 = vrot.slane %v13243_v21, 1  ;;  %v5726_v12 = vsel %vm4881_vm14, %v5709_v30, %v5711_v25  ;;  %v6252_v39 = vmul.f32 %v11722_v28, %v12077_v50 }
 0x540   : > { %v6420_v27 = vrot.slane %v6384_v55, 2  ;;  %v6424_v5 = vrot.slane %v6386_v63, 2  ;;  %v6385_v22 = vmul.f32 %v11732_v6, %v12094_v60  ;;  %v6056_v21 = vrot.slane %v11948_v46, 1 }
 0x541   : > { %v6055_v14 = vsel %vm5805_vm9, %v13244_v47, %v13106_v29  ;;  %v6286_v26 = vrot.slane %v6250_v49, 2  ;;  %5932 = vrot.lane.b32.xlu1 %v5909_v54, %s8807_s22  ;;  %v13245_v47 = vrot.slane %v12008_v13, 1  ;;  %v13246_v30 = vrot.slane %v11790_v41, 2  ;;  %v13248_v54 = vld [vmem:[#allocation54_spill] sm:$0xff] }
 0x542   : > { %6074 = vrot.lane.b32.xlu0 %v6055_v14, %s8806_s19  ;;  %v12130_v25 = vsel %vm6167_vm1, %v6407_v51, %v6420_v27  ;;  %v13247_v6 = vrot.slane %v12002_v62, 2  ;;  %v13249_v63 = vrot.slane %v13248_v54, 2  ;;  %v13250_v46 = vrot.slane %v12061_v8, 2 }
 0x543   : > { %v12127_v11 = vsel %vm5805_vm9, %v13245_v47, %v6060_v34  ;;  %v12135_v28 = vsel %vm6167_vm1, %v13246_v30, %v6286_v26  ;;  %v6290_v34 = vrot.slane %v6252_v39, 2  ;;  %v6422_v14 = vrot.slane %v6385_v22, 2 }
 0x544   : > { %v6271_v55 = vsel %vm6167_vm1, %v13249_v63, %v13247_v6  ;;  %v12145_v49 = vsel %vm6167_vm1, %v13250_v46, %v6424_v5  ;;  %v13251_v51 = vrot.slane %v12052_v35, 2  ;;  %v13252_v41 = vrot.slane %v11835_v43, 2  ;;  %v13257_v63 = vld [vmem:[#allocation47_spill] sm:$0xff] }
 0x545   : > { %v13253_v27 = vrot.slane %v11926_v53, 1  ;;  %v13254_v47 = vrot.slane %v11968_v16, 1  ;;  %v13255_v6 = vrot.slane %v12038_v4, 2  ;;  %v13256_v54 = vrot.slane %v11857_v1, 2  ;;  %6066 = vrot.lane.b32.xlu1 %v6043_v59, %s8806_s19 }
 0x546   : > { %v6283_v26 = vsel %vm6167_vm1, %v13252_v41, %v13251_v51  ;;  %v12165_v22 = vsel %vm5805_vm9, %v6042_v15, %v6056_v21  ;;  %v5742_v43 = vadd.f32 %v5726_v12, %v11984_v17  ;;  %v6416_v39 = vrot.slane %v12089_v19, 2  ;;  %v13258_v21 = vld [vmem:[#allocation50_spill] sm:$0xff]  ;;  %v13259_v12 = vld [vmem:[#allocation55_spill] sm:$0xff] }
 0x547   : > { %v5923_v30 = vsel %vm5805_vm9, %v13254_v47, %v13253_v27  ;;  %v12162_v5 = vsel %vm6167_vm1, %v13256_v54, %v13255_v6  ;;  %v12170_v53 = vsel %vm6167_vm1, %v6279_v23, %v6290_v34  ;;  %v12173_v16 = vsel %vm6167_vm1, %v6410_v9, %v6422_v14  ;;  %6302 = vrot.lane.b32.xlu0 %v6283_v26, %s8807_s22  ;;  %v13260_v23 = vld [vmem:[#allocation58_spill] sm:$0xff]  ;;  %v13263_v6 = vld [vmem:[#allocation64_spill] sm:$0xff] }
 0x548   : > { %v5930_v1 = vrot.slane %v11955_v61, 1  ;;  %v5785_v15 = vmul.f32 %v13257_v63, %v11843_v32  ;;  %v5786_v17 = vmul.f32 %v13258_v21, %v11745_v33  ;;  %v5787_v46 = vmul.f32 %v13259_v12, %v11798_v52  ;;  %v13261_v61 = vld [vmem:[#allocation51_spill] sm:$0xff]  ;;  %v8645_v19 = vld [vmem:[#allocation10 + $0x8] sm:$0xff]  }
 0x549   : > { %v5788_v34 = vmul.f32 %v13260_v23, %v11801_v2  ;;  %v5789_v9 = vmul.f32 %v13257_v63, %v11898_v44  ;;  %v6147_v59 = vmul.f32 %v11755_v42, %v11843_v32  ;;  %v6148_v14 = vmul.f32 %v13261_v61, %v11745_v33  ;;  %6294 = vrot.lane.b32.xlu1 %v6271_v55, %s8807_s22  ;;  %v12202_v32 = vld [vmem:[#allocation4 + $0x58] sm:$0x1]  ;;  %v12215_v55 = vld [vmem:[#allocation4 + $0x50] sm:$0x3] }
 0x54a   : > { %v13262_v51 = vrot.slane %v11989_v0, 1  ;;  %v5807_v26 = vrot.slane %v5785_v15, 1  ;;  %v5810_v27 = vrot.slane %v5786_v17, 1  ;;  %v5813_v47 = vrot.slane %v5787_v46, 1  ;;  %v12204_v0 = vld [vmem:[#allocation4 + $0x68] sm:$0x1] }
 0x54b   : > { %v13264_v54 = vrot.slane %v13263_v6, 2  ;;  %v5816_v44 = vrot.slane %v5788_v34, 1  ;;  %v6169_v63 = vrot.slane %v6147_v59, 2  ;;  %v6172_v4 = vrot.slane %v6148_v14, 2 }
 0x54c   : > { %v5931_v41 = vsel %vm5805_vm9, %v13262_v51, %v5930_v1  ;;  %v13265_v1 = vrot.slane %v11878_v31, 1  ;;  %v13266_v17 = vrot.slane %v11884_v45, 1  ;;  %v13267_v34 = vrot.slane %v11888_v3, 1 }
 0x54d   : > { %v6417_v29 = vsel %vm6167_vm1, %v13264_v54, %v6416_v39  ;;  %5950 = vrot.lane.b32.xlu0 %v5931_v41, %s8807_s22  ;;  %v5818_v14 = vrot.slane %v5789_v9, 1  ;;  %v13268_v31 = vrot.slane %v11892_v56, 1  ;;  %v13269_v9 = vrot.slane %v11903_v36, 2  ;;  %v13271_v56 = vld [vmem:[#allocation59_spill] sm:$0xff]  ;;  %5942 = vrot.lane.b32.xlu1 %v5923_v30, %s8807_s22 }
 0x54e   : > { %v5808_v15 = vsel %vm5805_vm9, %v13265_v1, %v5807_v26  ;;  %v5811_v46 = vsel %vm5805_vm9, %v13266_v17, %v5810_v27  ;;  %v5814_v59 = vsel %vm5805_vm9, %v13267_v34, %v5813_v47  ;;  %v5790_v36 = vmul.f32 %v13258_v21, %v12202_v32 }
 0x54f   : > { %v12218_v51 = vadd.f32 %v5808_v15, %v11981_v58  ;;  %v12221_v41 = vadd.f32 %v5811_v46, %v12024_v18  ;;  %v5817_v6 = vsel %vm5805_vm9, %v13268_v31, %v5816_v44  ;;  %v12226_v45 = vadd.f32 %v5814_v59, %v5742_v43 }
 0x550   : > { %v12229_v54 = vadd.f32 %v5817_v6, %v12022_v37  ;;  %v12232_v3 = vsel %vm5805_vm9, %v5807_v26, %v5818_v14  ;;  %v12237_v58 = vsel %vm6167_vm1, %v13269_v9, %v6169_v63  ;;  %v13270_v18 = vrot.slane %v11906_v7, 2 }
 0x551   : > { %v6149_v43 = vmul.f32 %v13271_v56, %v11798_v52  ;;  %v6150_v37 = vmul.f32 %v11823_v10, %v11801_v2  ;;  %v5792_v26 = vmul.f32 %v13260_v23, %v12204_v0  ;;  %6436 = vrot.lane.b32.xlu0 %v6417_v29, %s8806_s19  ;;  %v6177_v7 = vrot.slane %v11935_v24, 2  ;;  %v13272_v24 = vld [vmem:[#allocation67_spill] sm:$0xff]  ;;  %6428 = vrot.lane.b32.xlu1 %v12162_v5, %s8806_s19 }
 0x552   : > { %v12242_v1 = vsel %vm6167_vm1, %v13270_v18, %v6172_v4  ;;  %v5791_v15 = vmul.f32 %v13259_v12, %v12055_v48  ;;  %v6151_v17 = vmul.f32 %v11755_v42, %v12215_v55  ;;  %v6152_v46 = vmul.f32 %v13261_v61, %v12063_v57 }
 0x553   : > { %v6175_v34 = vrot.slane %v6149_v43, 2  ;;  %v6178_v23 = vrot.slane %v6150_v37, 2  ;;  %v5824_v59 = vrot.slane %v5792_v26, 1  ;;  %v5820_v14 = vrot.slane %v5790_v36, 1  ;;  %v13274_v43 = vld [vmem:[#allocation69_spill] sm:$0xff]  ;;  %v13276_v36 = vld [vmem:[#allocation38_spill] sm:$0xff] }
 0x554   : > { %v5822_v21 = vrot.slane %v5791_v15, 1  ;;  %v6180_v31 = vrot.slane %v6151_v17, 2  ;;  %v6182_v30 = vrot.slane %v6152_v46, 2  ;;  %v6153_v29 = vmul.f32 %v13271_v56, %v12094_v60 }
 0x555   : > { %v13273_v6 = vrot.slane %v13272_v24, 2  ;;  %v12269_v42 = vsel %vm6167_vm1, %v6177_v7, %v6178_v23  ;;  %v12272_v57 = vsel %vm5805_vm9, %v5816_v44, %v5824_v59  ;;  %v12275_v61 = vsel %vm5805_vm9, %v5810_v27, %v5820_v14  ;;  %6076 = vrot.lane.b32.xlu0 %v12165_v22, %s8806_s19  ;;  %v13275_v27 = vld [vmem:[#allocation73_spill] sm:$0xff]  ;;  %v13277_v7 = vld [vmem:[#allocation32_spill] sm:$0xff] }
 0x556   : > { %v12282_v9 = vsel %vm5805_vm9, %v5813_v47, %v5822_v21  ;;  %v12285_v18 = vsel %vm6167_vm1, %v6169_v63, %v6180_v31  ;;  %v12288_v56 = vsel %vm6167_vm1, %v6172_v4, %v6182_v30  ;;  %v6184_v44 = vrot.slane %v6153_v29, 2  ;;  %v13278_v47 = vld [vmem:[#allocation30_spill] sm:$0xff]  ;;  %v13279_v63 = vld [vmem:[#allocation68_spill] sm:$0xff]  ;;  %v13280_v4 = vld [vmem:[#allocation31_spill] sm:$0xff] }
 0x557   : > { %v12266_v12 = vsel %vm6167_vm1, %v13273_v6, %v6175_v34  ;;  %v6064_v37 = vrot.slane %v13274_v43, 1  ;;  %v6292_v26 = vrot.slane %v13275_v27, 2  ;;  %v6249_v5 = vmul.f32 %v13276_v36, %v12215_v55  ;;  %v13283_v29 = vld [vmem:[#allocation34_spill] sm:$0xff]  ;;  %v13284_v24 = vld [vmem:[#allocation33_spill] sm:$0xff] }
 0x558   : > { %v6154_v22 = vmul.f32 %v11823_v10, %v12077_v50  ;;  %v5871_v15 = vsel %vm428_vm0, %v13278_v47, %v13277_v7  ;;  %v5911_v17 = vrot.slane %v13279_v63, 1  ;;  %v12302_v46 = vmul.f32 %v13280_v4, %v11798_v52  ;;  %v13286_v43 = vld [vmem:[#allocation66_spill] sm:$0xff] }
 0x559   : > { %v12305_v59 = vsel %vm6167_vm1, %v6175_v34, %v6184_v44  ;;  %v13281_v14 = vrot.slane %v12019_v20, 1  ;;  %v13282_v31 = vrot.slane %v12052_v35, 2  ;;  %v5885_v50 = vmul.f32 %v5871_v15, %v11801_v2  ;;  %v13285_v34 = vld [vmem:[#allocation60_spill] sm:$0xff]  ;;  %v13287_v35 = vld [vmem:[#allocation65_spill] sm:$0xff] }
 0x55a   : > { %v6186_v30 = vrot.slane %v6154_v22, 2  ;;  %v6003_v6 = vsel %vm4881_vm14, %v13284_v24, %v13283_v29  ;;  %v5879_v20 = vmul.f32 %v13280_v4, %v13285_v34  ;;  %v6284_v44 = vrot.slane %v6249_v5, 2  ;;  %v13291_v29 = vld [vmem:[#allocation37_spill] sm:$0xff] }
 0x55b   : > { %v6065_v21 = vsel %vm5805_vm9, %v13281_v14, %v6064_v37  ;;  %v6293_v10 = vsel %vm6167_vm1, %v13282_v31, %v6292_v26  ;;  %v5910_v37 = vrot.slane %v13286_v43, 1  ;;  %v5880_v27 = vmul.f32 %v5871_v15, %v13287_v35  ;;  %v13289_v31 = vld [vmem:[#allocation57_spill] sm:$0xff] }
 0x55c   : > { %6084 = vrot.lane.b32.xlu1 %v6065_v21, %s8806_s19  ;;  %6312 = vrot.lane.b32.xlu0 %v6293_v10, %s8807_s22  ;;  %v12324_v26 = vsel %vm6167_vm1, %v6178_v23, %v6186_v30  ;;  %v6017_v36 = vmul.f32 %v6003_v6, %v11745_v33  ;;  %v13288_v22 = vrot.slane %v12002_v62, 2  ;;  %v5914_v63 = vrot.slane %v12302_v46, 1  ;;  %v13290_v10 = vld [vmem:[#allocation36_spill] sm:$0xff]  ;;  %v13292_v62 = vld [vmem:[#allocation35_spill] sm:$0xff] }
 0x55d   : > { %v5912_v47 = vsel %vm5805_vm9, %v5910_v37, %v5911_v17  ;;  %v5917_v14 = vrot.slane %v5885_v50, 1  ;;  %v5913_v5 = vrot.slane %v5879_v20, 1  ;;  %v5916_v21 = vrot.slane %v5880_v27, 1  ;;  %v13293_v50 = vld [vmem:[#allocation39_spill] sm:$0xff] }
 0x55e   : > { %v6285_v7 = vsel %vm6167_vm1, %v13288_v22, %v6284_v44  ;;  %v6012_v23 = vmul.f32 %v6003_v6, %v13289_v31  ;;  %v6013_v30 = vmul.f32 %v13290_v10, %v13285_v34  ;;  %v6005_v24 = vsel %vm4881_vm14, %v13292_v62, %v13291_v29  ;;  %v13294_v22 = vld [vmem:[#allocation61_spill] sm:$0xff] }
 0x55f   : > { %v6045_v44 = vrot.slane %v6017_v36, 1  ;;  %v5915_v43 = vsel %vm5805_vm9, %v5913_v5, %v5914_v63  ;;  %v5918_v46 = vsel %vm5805_vm9, %v5916_v21, %v5917_v14  ;;  %v6246_v37 = vmul.f32 %v13293_v50, %v11798_v52 }
 0x560   : > { %6304 = vrot.lane.b32.xlu1 %v6285_v7, %s8807_s22  ;;  %5934 = vrot.lane.b32.xlu0 %v5912_v47, %s8807_s22  ;;  %v6019_v20 = vmul.f32 %v6005_v24, %v11801_v2  ;;  %v6044_v27 = vrot.slane %v6012_v23, 1  ;;  %v6047_v34 = vrot.slane %v6013_v30, 1  ;;  %v6241_v7 = vmul.f32 %v13293_v50, %v13294_v22  ;;  %v13295_v47 = vld [vmem:[#allocation42_spill] sm:$0xff] }
 0x561   : > { %v6014_v36 = vmul.f32 %v6005_v24, %v13287_v35  ;;  %v5888_v5 = vmul.f32 %v13295_v47, %v12202_v32  ;;  %v13296_v31 = vrot.slane %v12008_v13, 1  ;;  %v6276_v29 = vrot.slane %v6246_v37, 2  ;;  %v13299_v47 = vld [vmem:[#allocation49_spill] sm:$0xff] }
 0x562   : > { %v6046_v21 = vsel %vm5805_vm9, %v6044_v27, %v6045_v44  ;;  %v6051_v62 = vrot.slane %v6019_v20, 1  ;;  %v6275_v23 = vrot.slane %v6241_v7, 2  ;;  %v5890_v37 = vmul.f32 %v5871_v15, %v12204_v0  ;;  %v13297_v27 = vld [vmem:[#allocation71_spill] sm:$0xff] }
 0x563   : > { %v6049_v10 = vsel %vm5805_vm9, %v6047_v34, %v13296_v31  ;;  %v6050_v30 = vrot.slane %v6014_v36, 1  ;;  %v5889_v20 = vmul.f32 %v13280_v4, %v12055_v48  ;;  %v6022_v7 = vmul.f32 %v6003_v6, %v12202_v32  ;;  %v13298_v36 = vld [vmem:[#allocation74_spill] sm:$0xff] }
 0x564   : > { %5936 = vrot.lane.b32.xlu1 %v5915_v43, %s8807_s22  ;;  %5938 = vrot.lane.b32.xlu0 %v5918_v46, %s8807_s22  ;;  %v6277_v43 = vsel %vm6167_vm1, %v6275_v23, %v6276_v29  ;;  %v5924_v46 = vrot.slane %v5888_v5, 1  ;;  %v5928_v34 = vrot.slane %v5890_v37, 1  ;;  %v6024_v5 = vmul.f32 %v6005_v24, %v12204_v0  ;;  %v8642_v23 = vld [vmem:[#allocation10 + $0x20] sm:$0xff]   ;;  %v13307_v37 = vld [vmem:[#allocation63_spill] sm:$0xff] }
 0x565   : > { %v6052_v35 = vsel %vm5805_vm9, %v6050_v30, %v6051_v62  ;;  %v5926_v22 = vrot.slane %v5889_v20, 1  ;;  %v6058_v4 = vrot.slane %v6022_v7, 1  ;;  %v13301_v24 = vrot.slane %v12061_v8, 2  ;;  %v13302_v8 = vld [vmem:[#allocation70_spill] sm:$0xff]  ;;  %v13308_v20 = vld [vmem:[#allocation45_spill] sm:$0xff] }
 0x566   : > { %v5925_v13 = vsel %vm5805_vm9, %v5911_v17, %v5924_v46  ;;  %v8639_v17 = vld [vmem:[#allocation10 + $0x38] sm:$0xff]   ;;  %v5929_v15 = vsel %vm5805_vm9, %v5917_v14, %v5928_v34  ;;  %v6062_v31 = vrot.slane %v6024_v5, 1  ;;  %v6251_v14 = vmul.f32 %v13293_v50, %v12094_v60  ;;  %v8646_v46 = vld [vmem:[#allocation10] sm:$0xff]  }
 0x567   : > { %v5927_v48 = vsel %vm5805_vm9, %v5914_v63, %v5926_v22  ;;  %8444 = vmatprep.subr.bf16.mxu1 %v8639_v17  ;;  %v6059_v6 = vsel %vm5805_vm9, %v6045_v44, %v6058_v4  ;;  %v8640_v44 = vld [vmem:[#allocation10 + $0x30] sm:$0xff]   ;;  %v13311_v5 = vld [vmem:[#allocation48_spill] sm:$0xff]  ;;  %vm7182_vm0 = vcmask 1041408  }
 0x568   : > { %6068 = vrot.lane.b32.xlu1 %v6046_v21, %s8806_s19  ;;  %6070 = vrot.lane.b32.xlu0 %v6049_v10, %s8806_s19  ;;  %v13300_v21 = vld [vmem:[#allocation62_spill] sm:$0xff]  ;;  %v6063_v63 = vsel %vm5805_vm9, %v6051_v62, %v6062_v31  ;;  %v6288_v10 = vrot.slane %v6251_v14, 2 }
 0x569   : > { %v6376_v32 = vmul.f32 %v11737_v38, %v13300_v21  ;;  %8445 = vmatpush3.bf16.msra.mxu1 %v8639_v17  ;;  %v8641_v62 = vld [vmem:[#allocation10 + $0x28] sm:$0xff]   ;;  %v13309_v17 = vld [vmem:[#allocation52_spill] sm:$0xff]  ;;  %v5548_v21 = vmul.f32 %v13311_v5, %v11798_v52 }
 0x56a   : > { %v6289_v60 = vsel %vm6167_vm1, %v6276_v29, %v6288_v10  ;;  %8446 = vmatprep.subr.bf16.mxu1 %v8640_v44  ;;  %v13304_v29 = vld [vmem:[#allocation40_spill] sm:$0xff] }
 0x56b   : > { %v6412_v0 = vrot.slane %v6376_v32, 2  ;;  %v6383_v30 = vmul.f32 %v13304_v29, %v12215_v55 }
 0x56c   : > { %6298 = vrot.lane.b32.xlu1 %v6277_v43, %s8807_s22  ;;  %6072 = vrot.lane.b32.xlu0 %v6052_v35, %s8806_s19  ;;  %v13305_v43 = vld [vmem:[#allocation72_spill] sm:$0xff] }
 0x56d   : > { %v6414_v38 = vsel %vm6167_vm1, %v6412_v0, %v13301_v24  ;;  %8447 = vmatpush3.bf16.msra.mxu1 %v8640_v44  ;;  %v13306_v35 = vrot.slane %v13305_v43, 2 }
 0x56e   : > { %8448 = vmatprep.subr.bf16.mxu1 %v8641_v62 }
 0x570   : > { %5944 = vrot.lane.b32.xlu1 %v5925_v13, %s8807_s22  ;;  %6296 = vrot.lane.b32.xlu0 %v13297_v27, %s8807_s22  ;;  %v5546_v27 = vmul.f32 %v13308_v20, %v13307_v37 }
 0x571   : > { %8449 = vmatpush3.bf16.msra.mxu1 %v8641_v62 }
 0x572   : > { %8450 = vmatprep.subr.bf16.mxu1 %v8642_v23 }
 0x574   : > { %6430 = vrot.lane.b32.xlu1 %v13298_v36, %s8806_s19  ;;  %6300 = vrot.lane.b32.xlu0 %v13299_v47, %s8807_s22 }
 0x575   : > { %8451 = vmatpush3.bf16.msra.mxu1 %v8642_v23 }
 0x578   : > { %5948 = vrot.lane.b32.xlu1 %v5929_v15, %s8807_s22  ;;  %5946 = vrot.lane.b32.xlu0 %v5927_v48, %s8807_s22  ;;  %v5549_v15 = vmul.f32 %v13309_v17, %v11801_v2  ;;  %v13310_v48 = vld [vmem:[#allocation46_spill] sm:$0xff] }
 0x579   : > { %v5547_v4 = vmul.f32 %v13310_v48, %v11745_v33 }
 0x57c   : > { %6078 = vrot.lane.b32.xlu1 %v6059_v6, %s8806_s19  ;;  %6432 = vrot.lane.b32.xlu0 %v12106_v40, %s8806_s19  ;;  %v13303_v40 = vld [vmem:[#allocation41_spill] sm:$0xff] }
 0x57d   : > { %v6387_v50 = vmul.f32 %v13303_v40, %v13302_v8 }
 0x580   : > { %6082 = vrot.lane.b32.xlu1 %v6063_v63, %s8806_s19  ;;  %6434 = vrot.lane.b32.xlu0 %v6414_v38, %s8806_s19 }
 0x584   : > { %6308 = vrot.lane.b32.xlu1 %v6289_v60, %s8807_s22  ;;  %6080 = vrot.lane.b32.xlu0 %v12127_v11, %s8806_s19  ;;  %v6426_v11 = vrot.slane %v6387_v50, 2 }
 0x588   : > { %6440 = vrot.lane.b32.xlu1 %v12130_v25, %s8806_s19  ;;  %6306 = vrot.lane.b32.xlu0 %v12135_v28, %s8807_s22  ;;  %v8643_v25 = vld [vmem:[#allocation10 + $0x18] sm:$0xff]   ;;  %v6427_v28 = vsel %vm6167_vm1, %v6416_v39, %v6426_v11 }
 0x589   : > { %8452 = vmatprep.subr.bf16.mxu1 %v8643_v25 }
 0x58a   : > { %8453 = vmatpush3.bf16.msra.mxu1 %v8643_v25 }
 0x58c   : > { %6444 = vrot.lane.b32.xlu1 %v12145_v49, %s8806_s19  ;;  %6310 = vrot.lane.b32.xlu0 %v12170_v53, %s8807_s22  ;;  %v6418_v49 = vrot.slane %v6383_v30, 2  ;;  %v8644_v53 = vld [vmem:[#allocation10 + $0x10] sm:$0xff]  }
 0x58d   : > { %8454 = vmatprep.subr.bf16.mxu1 %v8644_v53 }
 0x58e   : > { %v6419_v55 = vsel %vm6167_vm1, %v13306_v35, %v6418_v49  ;;  %8455 = vmatpush3.bf16.msra.mxu1 %v8644_v53 }
 0x58f   : > { %8456 = vmatprep.subr.bf16.mxu1 %v8645_v19 }
 0x590   : > { %6446 = vrot.lane.b32.xlu1 %v6427_v28, %s8806_s19  ;;  %6442 = vrot.lane.b32.xlu0 %v12173_v16, %s8806_s19 }
 0x592   : > { %8457 = vmatpush3.bf16.msra.mxu1 %v8645_v19 }
 0x593   : > { %8458 = vmatprep.subr.bf16.mxu1 %v8646_v46 }
 0x594   : > { %6438 = vrot.lane.b32.xlu0 %v6419_v55, %s8806_s19 }
 0x596   : > { %8459 = vmatpush3.bf16.msra.mxu1 %v8646_v46 }
 0x59b   : > { %v5616_v39 = vpop.permute.xlu1 %5615 }
 0x59f   : > { %v5723_v13 = vpop.permute.xlu1 %5722  ;;  %v5624_v16 = vpop.permute.xlu0 %5623 }
 0x5a3   : > { %v5618_v34 = vpop.permute.xlu1 %5617  ;;  %v5715_v22 = vpop.permute.xlu0 %5714 }
 0x5a4   : > { %v5629_v7 = vsel %vm4890_vm15, %v5616_v39, %v5618_v34 }
 0x5a5   : > { %v5645_v36 = vadd.f32 %v5629_v7, %v5546_v27 }
 0x5a7   : > { %v5622_v47 = vpop.permute.xlu1 %5621  ;;  %v5620_v32 = vpop.permute.xlu0 %5619 }
 0x5a8   : > { %v5632_v6 = vsel %vm4890_vm15, %v5622_v47, %v5624_v16  ;;  %v5630_v31 = vsel %vm4890_vm15, %v5618_v34, %v5620_v32  ;;  %v5631_v14 = vsel %vm4890_vm15, %v5620_v32, %v5622_v47 }
 0x5a9   : > { %v5648_v0 = vadd.f32 %v5632_v6, %v5549_v15  ;;  %v5646_v63 = vadd.f32 %v5630_v31, %v5547_v4  ;;  %v5647_v24 = vadd.f32 %v5631_v14, %v5548_v21 }
 0x5ab   : > { %v5717_v38 = vpop.permute.xlu1 %5716  ;;  %v5719_v10 = vpop.permute.xlu0 %5718 }
 0x5ac   : > { %v5728_v2 = vsel %vm4881_vm14, %v5715_v22, %v5717_v38  ;;  %v5729_v44 = vsel %vm4881_vm14, %v5717_v38, %v5719_v10 }
 0x5ad   : > { %v5744_v33 = vadd.f32 %v5728_v2, %v5645_v36  ;;  %v5745_v60 = vadd.f32 %v5729_v44, %v5646_v63  ;;  %v8808_v2 = vmov 1966171168  }
 0x5ae   : > { %v6514_v44 = vunpack.c.l.s4 %v8808_v2 }
 0x5af   : > { %v5721_v8 = vpop.permute.xlu1 %5720  ;;  %v12434_v40 = vadd.f32 %v12232_v3, %v5744_v33  ;;  %v12437_v50 = vadd.f32 %v12275_v61, %v5745_v60  ;;  %v13312_v60 = vld [vmem:[#allocation19_spill] sm:$0xff] }
 0x5b0   : > { %v5941_v52 = vpop.permute.xlu0 %5940  ;;  %v5730_v62 = vsel %vm4881_vm14, %v5719_v10, %v5721_v8  ;;  %v5731_v23 = vsel %vm4881_vm14, %v5721_v8, %v5723_v13 }
 0x5b1   : > { %v5746_v11 = vadd.f32 %v5730_v62, %v5647_v24  ;;  %v5747_v29 = vadd.f32 %v5731_v23, %v5648_v0 }
 0x5b3   : > { %v5933_v30 = vpop.permute.xlu1 %5932  ;;  %v12442_v28 = vadd.f32 %v12272_v57, %v5747_v29  ;;  %v12445_v49 = vadd.f32 %v12282_v9, %v5746_v11 }
 0x5b4   : > { %v6075_v25 = vpop.permute.xlu0 %6074 }
 0x5b7   : > { %v6067_v53 = vpop.permute.xlu1 %6066 }
 0x5b9   : > { %v12447_v3 = vpop.permute.xlu0 %6302 }
 0x5bb   : > { %v6295_v43 = vpop.permute.xlu1 %6294 }
 0x5bf   : > { %v12449_v61 = vpop.permute.xlu0 %5950  ;;  %v5943_v35 = vpop.permute.xlu1 %5942 }
 0x5c3   : > { %v12451_v55 = vpop.permute.xlu0 %6436  ;;  %v6429_v19 = vpop.permute.xlu1 %6428 }
 0x5c7   : > { %v12453_v39 = vpop.permute.xlu0 %6076 }
 0x5ce   : > { %v12455_v46 = vpop.permute.xlu1 %6084  ;;  %v12457_v13 = vpop.permute.xlu0 %6312 }
 0x5d2   : > { %v12459_v57 = vpop.permute.xlu1 %6304  ;;  %v5935_v9 = vpop.permute.xlu0 %5934 }
 0x5d3   : > { %v5952_v20 = vsel %vm4890_vm15, %v5933_v30, %v5935_v9  ;;  %v13313_v30 = vld [vmem:[#allocation17_spill] sm:$0xff] }
 0x5d4   : > { %v5968_v34 = vadd.f32 %v5952_v20, %v12218_v51  ;;  %v13314_v20 = vld [vmem:[#allocation20_spill] sm:$0xff] }
 0x5d6   : > { %v5937_v16 = vpop.permute.xlu1 %5936  ;;  %v5939_v37 = vpop.permute.xlu0 %5938 }
 0x5d7   : > { %v5953_v27 = vsel %vm4890_vm15, %v5935_v9, %v5937_v16  ;;  %v5954_v47 = vsel %vm4890_vm15, %v5937_v16, %v5939_v37  ;;  %v5955_v17 = vsel %vm4890_vm15, %v5939_v37, %v5941_v52  ;;  %v6515_v52 = vunpack.c.0.s8 %v6514_v44 }
 0x5d8   : > { %v5969_v22 = vadd.f32 %v5953_v27, %v12221_v41  ;;  %v5970_v21 = vadd.f32 %v5954_v47, %v12226_v45  ;;  %v5971_v32 = vadd.f32 %v5955_v17, %v12229_v54 }
 0x5da   : > { %v6069_v7 = vpop.permute.xlu1 %6068  ;;  %v6071_v36 = vpop.permute.xlu0 %6070 }
 0x5db   : > { %v6086_v15 = vsel %vm4881_vm14, %v6067_v53, %v6069_v7  ;;  %v6087_v48 = vsel %vm4881_vm14, %v6069_v7, %v6071_v36 }
 0x5dc   : > { %v6102_v4 = vadd.f32 %v6086_v15, %v5968_v34  ;;  %v6103_v5 = vadd.f32 %v6087_v48, %v5969_v22  ;;  %v13315_v34 = vld [vmem:[#allocation21_spill] sm:$0xff] }
 0x5de   : > { %v6299_v6 = vpop.permute.xlu1 %6298  ;;  %v6073_v51 = vpop.permute.xlu0 %6072  ;;  %v6196_v41 = vadd.f32 %v12237_v58, %v6102_v4  ;;  %v6197_v31 = vadd.f32 %v12242_v1, %v6103_v5  ;;  %v6472_v58 = vld [vmem:[%s13021_s7] sm:$0xf] }
 0x5df   : > { %v6088_v14 = vsel %vm4881_vm14, %v6071_v36, %v6073_v51  ;;  %v6089_v0 = vsel %vm4881_vm14, %v6073_v51, %v6075_v25  ;;  %v12482_v8 = vrot.slane %v6472_v58, %v13312_v60  ;;  %v12493_v27 = vrot.slane %v6472_v58, %v13314_v20 }
 0x5e0   : > { %v6104_v63 = vadd.f32 %v6088_v14, %v5970_v21  ;;  %v6105_v24 = vadd.f32 %v6089_v0, %v5971_v32 }
 0x5e2   : > { %v5945_v38 = vpop.permute.xlu1 %5944  ;;  %v6297_v10 = vpop.permute.xlu0 %6296  ;;  %v6198_v45 = vadd.f32 %v12266_v12, %v6104_v63  ;;  %v6199_v54 = vadd.f32 %v12269_v42, %v6105_v24  ;;  %v12486_v12 = vsub.s32 %v6515_v52, %v13313_v30 }
 0x5e3   : > { %v6314_v33 = vsel %vm4890_vm15, %v6295_v43, %v6297_v10  ;;  %v5956_v43 = vsel %vm4890_vm15, %v5943_v35, %v5945_v38  ;;  %v6315_v9 = vsel %vm4890_vm15, %v6297_v10, %v6299_v6 }
 0x5e4   : > { %v6330_v1 = vadd.f32 %v6314_v33, %v6196_v41  ;;  %v5972_v22 = vadd.f32 %v5956_v43, %v12434_v40  ;;  %v6331_v15 = vadd.f32 %v6315_v9, %v6197_v31 }
 0x5e6   : > { %v6431_v62 = vpop.permute.xlu1 %6430  ;;  %v6301_v23 = vpop.permute.xlu0 %6300 }
 0x5e7   : > { %v6448_v11 = vsel %vm4881_vm14, %v6429_v19, %v6431_v62  ;;  %v6316_v37 = vsel %vm4890_vm15, %v6299_v6, %v6301_v23  ;;  %v12496_v19 = vrot.slane %v6472_v58, %v13315_v34  ;;  %v6317_v47 = vsel %vm4890_vm15, %v6301_v23, %v12447_v3  ;;  %v13316_v6 = vld [vmem:[#allocation22_spill] sm:$0xff] }
 0x5e8   : > { %v6464_v29 = vadd.f32 %v6448_v11, %v6330_v1  ;;  %v6332_v32 = vadd.f32 %v6316_v37, %v6198_v45  ;;  %v12509_v51 = vrot.slane %v6472_v58, %v13316_v6  ;;  %v6333_v41 = vadd.f32 %v6317_v47, %v6199_v54 }
 0x5ea   : > { %v6494_v42 = vadd.f32 %v12482_v8, %v6464_v29  ;;  %v5949_v25 = vpop.permute.xlu1 %5948  ;;  %v5947_v53 = vpop.permute.xlu0 %5946 }
 0x5eb   : > { %v5959_v48 = vsel %vm4890_vm15, %v5949_v25, %v12449_v61  ;;  %v5957_v3 = vsel %vm4890_vm15, %v5945_v38, %v5947_v53  ;;  %v5958_v63 = vsel %vm4890_vm15, %v5947_v53, %v5949_v25 }
 0x5ec   : > { %v6502_v16 = vmax.f32 %v6494_v42, 0.0  ;;  %v5974_v11 = vadd.f32 %v5958_v63, %v12445_v49 }
 0x5ee   : > { %v6512_v7 = vcombine.high %v6502_v16, %v6502_v16  ;;  %v6519_v36 = vrot.slane %v6502_v16, %v12486_v12  ;;  %v6079_v35 = vpop.permute.xlu1 %6078  ;;  %v6433_v17 = vpop.permute.xlu0 %6432 }
 0x5ef   : > { %v6090_v4 = vsel %vm4881_vm14, %v12453_v39, %v6079_v35  ;;  %v6449_v5 = vsel %vm4881_vm14, %v6431_v62, %v6433_v17  ;;  %v5975_v39 = vadd.f32 %v5959_v48, %v12442_v28  ;;  %v5973_v28 = vadd.f32 %v5957_v3, %v12437_v50 }
 0x5f0   : > { %v6526_v21 = vrot.slane %v6512_v7, %v12486_v12  ;;  %v6527_v40 = vcombine.high %v6519_v36, %v6519_v36  ;;  %v6106_v14 = vadd.f32 %v6090_v4, %v5972_v22  ;;  %v6465_v31 = vadd.f32 %v6449_v5, %v6331_v15 }
 0x5f1   : > { %v12513_v61 = vrot.slane %v6519_v36, %v12486_v12 }
 0x5f2   : > { %v6528_v0 = vcombine.high %v6526_v21, %v6526_v21  ;;  %v6083_v24 = vpop.permute.xlu1 %6082  ;;  %v6435_v10 = vpop.permute.xlu0 %6434  ;;  %v6495_v2 = vadd.f32 %v12493_v27, %v6465_v31  ;;  %v12524_v54 = vrot.slane %v6526_v21, %v12486_v12  ;;  %v12527_v33 = vrot.slane %v6527_v40, %v12486_v12 }
 0x5f3   : > { %v6093_v44 = vsel %vm4881_vm14, %v6083_v24, %v12455_v46  ;;  %v6450_v45 = vsel %vm4881_vm14, %v6433_v17, %v6435_v10  ;;  %v6451_v38 = vsel %vm4881_vm14, %v6435_v10, %v12451_v55  ;;  %v12531_v23 = vadd.f32 %v12285_v18, %v6106_v14 }
 0x5f4   : > { %v6109_v58 = vadd.f32 %v6093_v44, %v5975_v39  ;;  %v6503_v1 = vmax.f32 %v6495_v2, 0.0  ;;  %v6466_v52 = vadd.f32 %v6450_v45, %v6332_v32  ;;  %v6467_v62 = vadd.f32 %v6451_v38, %v6333_v41 }
 0x5f5   : > { %v12534_v46 = vrot.slane %v6528_v0, %v12486_v12  ;;  %v6557_v55 = vcombine.high %v12513_v61, %v12513_v61  ;;  %v6558_v43 = vcombine.high %v12524_v54, %v12524_v54  ;;  %v6559_v9 = vcombine.high %v12527_v33, %v12527_v33 }
 0x5f6   : > { %v12539_v29 = vpop.permute.xlu1 %6308  ;;  %v6081_v30 = vpop.permute.xlu0 %6080  ;;  %v12542_v50 = vadd.f32 %v12324_v26, %v6109_v58  ;;  %v6628_v42 = vcombine.high %v6503_v1, %v6503_v1  ;;  %v6635_v25 = vrot.slane %v6503_v1, %v12486_v12  ;;  %v6496_v18 = vadd.f32 %v12496_v19, %v6466_v52 }
 0x5f7   : > { %v6497_v53 = vadd.f32 %v12509_v51, %v6467_v62  ;;  %v6091_v49 = vsel %vm4881_vm14, %v6079_v35, %v6081_v30  ;;  %v6092_v16 = vsel %vm4881_vm14, %v6081_v30, %v6083_v24 }
 0x5f8   : > { %v6642_v26 = vrot.slane %v6628_v42, %v12486_v12  ;;  %v6643_v37 = vcombine.high %v6635_v25, %v6635_v25  ;;  %v12555_v20 = vrot.slane %v6635_v25, %v12486_v12  ;;  %v6504_v34 = vmax.f32 %v6496_v18, 0.0 }
 0x5f9   : > { %v6505_v7 = vmax.f32 %v6497_v53, 0.0  ;;  %v12559_v36 = vadd.f32 %v6091_v49, %v5973_v28  ;;  %v12561_v47 = vadd.f32 %v6092_v16, %v5974_v11 }
 0x5fa   : > { %v12563_v17 = vpop.permute.xlu0 %6306  ;;  %v6644_v35 = vcombine.high %v6642_v26, %v6642_v26  ;;  %v6658_v15 = vrot.slane %v6642_v26, %v12486_v12  ;;  %v12567_v48 = vrot.slane %v6643_v37, %v12486_v12  ;;  %v6673_v4 = vcombine.high %v12555_v20, %v12555_v20  ;;  %v12571_v5 = vpop.permute.xlu1 %6440 }
 0x5fb   : > { %v6929_v21 = vrot.slane %v12555_v20, %v13312_v60  ;;  %v6728_v40 = vcombine.high %v6504_v34, %v6504_v34  ;;  %v6735_v32 = vrot.slane %v6504_v34, %v12486_v12  ;;  %v6828_v6 = vcombine.high %v6505_v7, %v6505_v7 }
 0x5fc   : > { %v12577_v41 = vrot.slane %v6644_v35, %v12486_v12  ;;  %v6674_v3 = vcombine.high %v6658_v15, %v6658_v15  ;;  %v6675_v14 = vcombine.high %v12567_v48, %v12567_v48  ;;  %v6933_v31 = vrot.slane %v12567_v48, %v13312_v60 }
 0x5fd   : > { %v12584_v0 = vrot.slane %v6673_v4, %v13312_v60  ;;  %v6945_v39 = vrot.slane %v6658_v15, %v13312_v60  ;;  %v6742_v63 = vrot.slane %v6728_v40, %v12486_v12  ;;  %v6743_v24 = vcombine.high %v6735_v32, %v6735_v32 }
 0x5fe   : > { %v6311_v10 = vpop.permute.xlu0 %6310  ;;  %v6676_v2 = vcombine.high %v12577_v41, %v12577_v41  ;;  %v12591_v44 = vrot.slane %v6675_v14, %v13312_v60  ;;  %v6949_v45 = vrot.slane %v12577_v41, %v13312_v60  ;;  %v12596_v38 = vrot.slane %v6674_v3, %v13312_v60  ;;  %v6445_v25 = vpop.permute.xlu1 %6444 }
 0x5ff   : > { %v12600_v28 = vsel %vm5431_vm7, %v12524_v54, %v6945_v39  ;;  %v6744_v58 = vcombine.high %v6742_v63, %v6742_v63  ;;  %v12603_v1 = vrot.slane %v6735_v32, %v12486_v12  ;;  %v12606_v52 = vrot.slane %v6742_v63, %v12486_v12 }
 0x600   : > { %v12609_v62 = vrot.slane %v6676_v2, %v13312_v60  ;;  %v12612_v11 = vrot.slane %v6743_v24, %v12486_v12  ;;  %v6835_v30 = vrot.slane %v6505_v7, %v12486_v12  ;;  %v6842_v42 = vrot.slane %v6828_v6, %v12486_v12 }
 0x601   : > { %v12617_v18 = vrot.slane %v6744_v58, %v12486_v12  ;;  %v6773_v53 = vcombine.high %v12603_v1, %v12603_v1  ;;  %v6774_v49 = vcombine.high %v12606_v52, %v12606_v52  ;;  %v7009_v16 = vrot.slane %v12603_v1, %v13312_v60 }
 0x602   : > { %v6775_v26 = vcombine.high %v12612_v11, %v12612_v11  ;;  %v6843_v37 = vcombine.high %v6835_v30, %v6835_v30  ;;  %v6844_v34 = vcombine.high %v6842_v42, %v6842_v42  ;;  %v12628_v7 = vrot.slane %v6835_v30, %v12486_v12  ;;  %v6443_v35 = vpop.permute.xlu0 %6442 }
 0x603   : > { %v6776_v15 = vcombine.high %v12617_v18, %v12617_v18  ;;  %v12633_v4 = vrot.slane %v6842_v42, %v12486_v12  ;;  %v7013_v40 = vrot.slane %v12612_v11, %v13312_v60  ;;  %v7017_v32 = vrot.slane %v6773_v53, %v13312_v60  ;;  %v6447_v53 = vpop.permute.xlu1 %6446 }
 0x604   : > { %v12639_v6 = vrot.slane %v6843_v37, %v12486_v12  ;;  %v12642_v3 = vrot.slane %v6844_v34, %v12486_v12  ;;  %v6873_v14 = vcombine.high %v12628_v7, %v12628_v7  ;;  %v12653_v2 = vrot.slane %v6774_v49, %v13312_v60 }
 0x605   : > { %v6874_v63 = vcombine.high %v12633_v4, %v12633_v4  ;;  %v12656_v58 = vrot.slane %v6776_v15, %v13312_v60  ;;  %v7089_v30 = vrot.slane %v12628_v7, %v13312_v60  ;;  %v6201_v34 = vadd.f32 %v12288_v56, %v12559_v36 }
 0x606   : > { %v6875_v1 = vcombine.high %v12639_v6, %v12639_v6  ;;  %v6876_v11 = vcombine.high %v12642_v3, %v12642_v3  ;;  %v6318_v15 = vsel %vm4890_vm15, %v12459_v57, %v12563_v17  ;;  %v6319_v42 = vsel %vm4890_vm15, %v12563_v17, %v12539_v29  ;;  %v6439_v49 = vpop.permute.xlu0 %6438 }
 0x607   : > { %v12669_v37 = vrot.slane %v6874_v63, %v13312_v60  ;;  %v6334_v24 = vadd.f32 %v6318_v15, %v12531_v23  ;;  %v6202_v63 = vadd.f32 %v12305_v59, %v12561_v47  ;;  %v6335_v39 = vadd.f32 %v6319_v42, %v6201_v34 }
 0x608   : > { %v12677_v7 = vrot.slane %v6876_v11, %v13312_v60  ;;  %v6320_v56 = vsel %vm4890_vm15, %v12539_v29, %v6311_v10  ;;  %v6321_v57 = vsel %vm4890_vm15, %v6311_v10, %v12457_v13  ;;  %v6455_v36 = vsel %vm4881_vm14, %v6445_v25, %v6447_v53 }
 0x609   : > { %v6336_v11 = vadd.f32 %v6320_v56, %v6202_v63  ;;  %v6337_v22 = vadd.f32 %v6321_v57, %v12542_v50  ;;  %v6453_v17 = vsel %vm4881_vm14, %v12571_v5, %v6443_v35  ;;  %v6454_v23 = vsel %vm4881_vm14, %v6443_v35, %v6445_v25 }
 0x60a   : > { %v6469_v15 = vadd.f32 %v6453_v17, %v6335_v39  ;;  %v6452_v59 = vsel %vm4881_vm14, %v6439_v49, %v12571_v5  ;;  %v7021_v47 = vrot.slane %v6775_v26, %v13312_v60  ;;  %v7093_v29 = vrot.slane %v12639_v6, %v13312_v60 }
 0x60b   : > { %v6471_v13 = vadd.f32 %v6455_v36, %v6337_v22  ;;  %v6470_v10 = vadd.f32 %v6454_v23, %v6336_v11  ;;  %v6468_v42 = vadd.f32 %v6452_v59, %v6334_v24  ;;  %v12700_v53 = vrot.slane %v6873_v14, %v13312_v60 }
 0x60c   : > { %v6499_v50 = vadd.f32 %v12493_v27, %v6469_v15  ;;  %v12704_v34 = vrot.slane %v6875_v1, %v13312_v60  ;;  %v7166_v5 = vsel %vm5431_vm7, %v12513_v61, %v6929_v21  ;;  %v7167_v22 = vsel %vm5431_vm7, %v12527_v33, %v6933_v31 }
 0x60d   : > { %v6501_v25 = vadd.f32 %v12509_v51, %v6471_v13  ;;  %v6500_v26 = vadd.f32 %v12496_v19, %v6470_v10  ;;  %v6498_v27 = vadd.f32 %v12482_v8, %v6468_v42  ;;  %v7168_v20 = vsel %vm5431_vm7, %v6557_v55, %v12584_v0 }
 0x60e   : > { %v6507_v35 = vmax.f32 %v6499_v50, 0.0  ;;  %v7169_v48 = vsel %vm5431_vm7, %v6559_v9, %v12591_v44  ;;  %v7183_v21 = vsel %vm7182_vm0, %v7166_v5, %v7009_v16  ;;  %v7184_v51 = vsel %vm7182_vm0, %v7167_v22, %v7013_v40 }
 0x60f   : > { %v6509_v19 = vmax.f32 %v6501_v25, 0.0  ;;  %v6508_v31 = vmax.f32 %v6500_v26, 0.0  ;;  %v6506_v8 = vmax.f32 %v6498_v27, 0.0  ;;  %v7185_v14 = vsel %vm7182_vm0, %v7168_v20, %v7017_v32 }
 0x610   : > { %v6677_v39 = vcombine.high %v6507_v35, %v6507_v35  ;;  %v6684_v61 = vrot.slane %v6507_v35, %v12486_v12  ;;  %v7186_v55 = vsel %vm7182_vm0, %v7169_v48, %v7021_v47  ;;  %v12735_v0 = vsel %vm7199_vm10, %v7183_v21, %v7089_v30 }
 0x611   : > { %v6877_v33 = vcombine.high %v6509_v19, %v6509_v19  ;;  %v6884_v9 = vrot.slane %v6509_v19, %v12486_v12  ;;  %v6777_v44 = vcombine.high %v6508_v31, %v6508_v31  ;;  %v6784_v16 = vrot.slane %v6508_v31, %v12486_v12 }
 0x612   : > { %v6691_v40 = vrot.slane %v6677_v39, %v12486_v12  ;;  %v6692_v24 = vcombine.high %v6684_v61, %v6684_v61  ;;  %v12741_v1 = vrot.slane %v6684_v61, %v12486_v12  ;;  %v6561_v32 = vcombine.high %v6506_v8, %v6506_v8 }
 0x613   : > { %v6891_v49 = vrot.slane %v6877_v33, %v12486_v12  ;;  %v6892_v63 = vcombine.high %v6884_v9, %v6884_v9  ;;  %v12745_v56 = vrot.slane %v6884_v9, %v12486_v12  ;;  %v6791_v30 = vrot.slane %v6777_v44, %v12486_v12 }
 0x614   : > { %v6693_v57 = vcombine.high %v6691_v40, %v6691_v40  ;;  %v12749_v36 = vrot.slane %v6691_v40, %v12486_v12  ;;  %v12752_v11 = vrot.slane %v6692_v24, %v12486_v12  ;;  %v6722_v17 = vcombine.high %v12741_v1, %v12741_v1 }
 0x615   : > { %v6893_v23 = vcombine.high %v6891_v49, %v6891_v49  ;;  %v12757_v15 = vrot.slane %v6891_v49, %v12486_v12  ;;  %v12760_v59 = vrot.slane %v6892_v63, %v12486_v12  ;;  %v6922_v47 = vcombine.high %v12745_v56, %v12745_v56 }
 0x616   : > { %v7121_v13 = vrot.slane %v12745_v56, %v13312_v60  ;;  %v12767_v10 = vrot.slane %v6693_v57, %v12486_v12  ;;  %v6723_v42 = vcombine.high %v12749_v36, %v12749_v36  ;;  %v6724_v50 = vcombine.high %v12752_v11, %v12752_v11 }
 0x617   : > { %v12774_v5 = vrot.slane %v6893_v23, %v12486_v12  ;;  %v6923_v22 = vcombine.high %v12757_v15, %v12757_v15  ;;  %v6924_v25 = vcombine.high %v12760_v59, %v12760_v59  ;;  %v6792_v26 = vcombine.high %v6784_v16, %v6784_v16 }
 0x618   : > { %v6725_v27 = vcombine.high %v12767_v10, %v12767_v10  ;;  %v6793_v20 = vcombine.high %v6791_v30, %v6791_v30  ;;  %v6800_v35 = vrot.slane %v6784_v16, %v12486_v12  ;;  %v12784_v48 = vrot.slane %v6791_v30, %v12486_v12 }
 0x619   : > { %v6814_v21 = vrot.slane %v6792_v26, %v12486_v12  ;;  %v6961_v19 = vrot.slane %v12741_v1, %v13312_v60  ;;  %v6965_v31 = vrot.slane %v12752_v11, %v13312_v60  ;;  %v6969_v39 = vrot.slane %v6722_v17, %v13312_v60 }
 0x61a   : > { %v12793_v61 = vrot.slane %v6793_v20, %v12486_v12  ;;  %v6822_v33 = vcombine.high %v6800_v35, %v6800_v35  ;;  %v6823_v9 = vcombine.high %v12784_v48, %v12784_v48  ;;  %v6973_v44 = vrot.slane %v6724_v50, %v13312_v60 }
 0x61b   : > { %v6824_v16 = vcombine.high %v6814_v21, %v6814_v21  ;;  %v6977_v40 = vrot.slane %v12749_v36, %v13312_v60  ;;  %v6981_v24 = vrot.slane %v12767_v10, %v13312_v60  ;;  %v12803_v1 = vrot.slane %v6723_v42, %v13312_v60 }
 0x61c   : > { %v6825_v49 = vcombine.high %v12793_v61, %v12793_v61  ;;  %v7041_v63 = vrot.slane %v6800_v35, %v13312_v60  ;;  %v7045_v30 = vrot.slane %v6814_v21, %v13312_v60  ;;  %v7049_v57 = vrot.slane %v6822_v33, %v13312_v60 }
 0x61d   : > { %v7057_v11 = vrot.slane %v12784_v48, %v13312_v60  ;;  %v6568_v17 = vrot.slane %v6506_v8, %v12486_v12  ;;  %v6575_v23 = vrot.slane %v6561_v32, %v12486_v12  ;;  %v7201_v42 = vsel %vm7199_vm10, %v7184_v51, %v7093_v29 }
 0x61e   : > { %v7202_v50 = vsel %vm7199_vm10, %v7185_v14, %v12700_v53  ;;  %v7203_v26 = vsel %vm7199_vm10, %v7186_v55, %v12704_v34  ;;  %v7232_v20 = vcombine.low %v12735_v0, %v7201_v42  ;;  %v7171_v8 = vsel %vm5431_vm7, %v12534_v46, %v6949_v45 }
 0x61f   : > { %v6576_v32 = vcombine.high %v6568_v17, %v6568_v17  ;;  %v6577_v35 = vcombine.high %v6575_v23, %v6575_v23  ;;  %v6584_v6 = vrot.slane %v6568_v17, %v12486_v12  ;;  %v6591_v29 = vrot.slane %v6575_v23, %v12486_v12 }
 0x620   : > { %v7233_v51 = vcombine.low %v7202_v50, %v7203_v26  ;;  %v7172_v53 = vsel %vm5431_vm7, %v6558_v43, %v12596_v38  ;;  %v13317_v41 = vcombine.high %v12534_v46, %v12534_v46  ;;  %v13318_v45 = vrot.slane %v12606_v52, %v13312_v60 }
 0x621   : > { %v6598_v55 = vrot.slane %v6576_v32, %v12486_v12  ;;  %v6605_v0 = vrot.slane %v6577_v35, %v12486_v12  ;;  %v6606_v21 = vcombine.high %v6584_v6, %v6584_v6  ;;  %v6607_v54 = vcombine.high %v6591_v29, %v6591_v29 }
 0x622   : > { %v7173_v34 = vsel %vm5431_vm7, %v13317_v41, %v12609_v62  ;;  %v7187_v14 = vsel %vm7182_vm0, %v12600_v28, %v13318_v45  ;;  %v7248_v33 = vpack.c.bf16 %v7233_v51, %v7232_v20  ;;  %v13319_v43 = vrot.slane %v12617_v18, %v13312_v60 }
 0x623   : > { %v7189_v38 = vsel %vm7182_vm0, %v7172_v53, %v12653_v2  ;;  %v7190_v52 = vsel %vm7182_vm0, %v7173_v34, %v12656_v58  ;;  %v6608_v62 = vcombine.high %v6598_v55, %v6598_v55  ;;  %v6609_v28 = vcombine.high %v6605_v0, %v6605_v0 }
 0x624   : > { %v7188_v46 = vsel %vm7182_vm0, %v7171_v8, %v13319_v43  ;;  %v13320_v17 = vrot.slane %v12633_v4, %v13312_v60  ;;  %v13321_v23 = vrot.slane %v12642_v3, %v13312_v60  ;;  %8460 = vmatprep.mubr.bf16.mxu1 %v7248_v33  ;;  %v7206_v42 = vsel %vm7199_vm10, %v7189_v38, %v12669_v37 }
 0x625   : > { %v7207_v2 = vsel %vm7199_vm10, %v7190_v52, %v12677_v7  ;;  %v7053_v50 = vrot.slane %v6824_v16, %v13312_v60  ;;  %v7125_v4 = vrot.slane %v12760_v59, %v13312_v60  ;;  %v7129_v3 = vrot.slane %v6922_v47, %v13312_v60 }
 0x626   : > { %v7204_v12 = vsel %vm7199_vm10, %v7187_v14, %v13320_v17  ;;  %v7205_v18 = vsel %vm7199_vm10, %v7188_v46, %v13321_v23  ;;  %v7235_v26 = vcombine.low %v7206_v42, %v7207_v2  ;;  %v7133_v20 = vrot.slane %v6924_v25, %v13312_v60  ;;  %v13326_v42 = vld [vmem:[#allocation18_spill] sm:$0xff] }
 0x627   : > { %v7234_v58 = vcombine.low %v7204_v12, %v7205_v18  ;;  %v7174_v8 = vsel %vm5431_vm7, %v6584_v6, %v6961_v19  ;;  %v7175_v37 = vsel %vm5431_vm7, %v6598_v55, %v6965_v31  ;;  %v7176_v7 = vsel %vm5431_vm7, %v6606_v21, %v6969_v39 }
 0x628   : > { %v7177_v32 = vsel %vm5431_vm7, %v6608_v62, %v6973_v44  ;;  %v7191_v35 = vsel %vm7182_vm0, %v7174_v8, %v7041_v63  ;;  %v7192_v59 = vsel %vm7182_vm0, %v7175_v37, %v7045_v30  ;;  %v7193_v51 = vsel %vm7182_vm0, %v7176_v7, %v7049_v57  ;;  %v13324_v62 = vld [vmem:[#allocation24_spill] sm:$0xff] }
 0x629   : > { %v7249_v16 = vpack.c.bf16 %v7235_v26, %v7234_v58  ;;  %v7194_v53 = vsel %vm7182_vm0, %v7177_v32, %v7053_v50  ;;  %v7208_v47 = vsel %vm7199_vm10, %v7191_v35, %v7121_v13  ;;  %v7209_v25 = vsel %vm7199_vm10, %v7192_v59, %v7125_v4  ;;  %v13328_v4 = vld [vmem:[#allocation23_spill] sm:$0xff] }
 0x62a   : > { %v7210_v19 = vsel %vm7199_vm10, %v7193_v51, %v7129_v3  ;;  %v7211_v31 = vsel %vm7199_vm10, %v7194_v53, %v7133_v20  ;;  %v7236_v39 = vcombine.low %v7208_v47, %v7209_v25  ;;  %v6925_v44 = vcombine.high %v12774_v5, %v12774_v5  ;;  %v13332_v25 = vld [vmem:[#allocation26_spill] sm:$0xff] }
 0x62b   : > { %8461 = vmatmul.mubr.bf16.vlgmr.msra.gmra.mxu1 %v7249_v16  ;;  %v6989_v63 = vrot.slane %v6725_v27, %v13312_v60  ;;  %v7237_v30 = vcombine.low %v7210_v19, %v7211_v31  ;;  %v7061_v56 = vrot.slane %v12793_v61, %v13312_v60  ;;  %v7065_v13 = vrot.slane %v6823_v9, %v13312_v60  ;;  %v13330_v16 = vld [vmem:[#allocation28_spill] sm:$0xff] }
 0x62c   : > { %v7069_v57 = vrot.slane %v6825_v49, %v13312_v60  ;;  %v7137_v6 = vrot.slane %v12757_v15, %v13312_v60  ;;  %v7141_v41 = vrot.slane %v12774_v5, %v13312_v60  ;;  %v7145_v27 = vrot.slane %v6923_v22, %v13312_v60 }
 0x62d   : > { %v7149_v61 = vrot.slane %v6925_v44, %v13312_v60  ;;  %v7250_v34 = vpack.c.bf16 %v7237_v30, %v7236_v39  ;;  %v7178_v9 = vsel %vm5431_vm7, %v6591_v29, %v6977_v40  ;;  %v7179_v49 = vsel %vm5431_vm7, %v6605_v0, %v6981_v24  ;;  %v13334_v30 = vld [vmem:[#allocation29_spill] sm:$0xff] }
 0x62e   : > { %v7180_v5 = vsel %vm5431_vm7, %v6607_v54, %v12803_v1  ;;  %v7181_v45 = vsel %vm5431_vm7, %v6609_v28, %v6989_v63  ;;  %v7195_v15 = vsel %vm7182_vm0, %v7178_v9, %v7057_v11  ;;  %v7196_v36 = vsel %vm7182_vm0, %v7179_v49, %v7061_v56  ;;  %v7925_v11 = vld [vmem:[%s13023_s9] ss:$0 sm:$0xff]  ;;  %v13322_v54 = vld [vmem:[#allocation25_spill] sm:$0xff] }
 0x62f   : > { %v7197_v22 = vsel %vm7182_vm0, %v7180_v5, %v7065_v13  ;;  %8464 = vmatprep.mubr.bf16.mxu1 %v7250_v34  ;;  %v7198_v10 = vsel %vm7182_vm0, %v7181_v45, %v7069_v57  ;;  %v7212_v40 = vsel %vm7199_vm10, %v7195_v15, %v7137_v6  ;;  %v7213_v24 = vsel %vm7199_vm10, %v7196_v36, %v7141_v41  ;;  %v13336_v41 = vld [vmem:[#allocation27_spill] sm:$0xff] }
 0x630   : > { %v7214_v1 = vsel %vm7199_vm10, %v7197_v22, %v7145_v27  ;;  %v7215_v29 = vsel %vm7199_vm10, %v7198_v10, %v7149_v61  ;;  %v7238_v14 = vcombine.low %v7212_v40, %v7213_v24  ;;  %v13323_v33 = vmax.f32 %v13322_v54, 0.0 }
 0x631   : > { %v7239_v60 = vcombine.low %v7214_v1, %v7215_v29  ;;  %v13325_v28 = vmax.f32 %v13324_v62, 0.0  ;;  %v13327_v2 = vmax.f32 %v13326_v42, 0.0  ;;  %v13329_v3 = vmax.f32 %v13328_v4, 0.0 }
 0x632   : > { %v13331_v35 = vmax.f32 %v13330_v16, 0.0  ;;  %v13333_v19 = vmax.f32 %v13332_v25, 0.0  ;;  %v13335_v56 = vmax.f32 %v13334_v30, 0.0  ;;  %v13337_v27 = vmax.f32 %v13336_v41, 0.0 }
 0x633   : > { %v7251_v48 = vpack.c.bf16 %v7239_v60, %v7238_v14 }
 0x635   : > { %8465 = vmatmul.mubr.bf16.gmra.mxu1 %v7251_v48 }
 0x6eb   : > { %v8462_v55 = vpop.f32.mrf.mxu1 }
 0x6ec   : > { %v7366_v0 = vadd.f32 %v8462_v55, %v7925_v11 }
 0x6ed   : > { %v7357_v21 = vpop.f32.mrf.mxu1 }
 0x6ee   : > { %v7390_v43 = vadd.f32 %v7366_v0, %v13323_v33  ;;  %v7358_v46 = vadd.f32 %v7925_v11, %v7357_v21 }
 0x6ef   : > { %v8463_v38 = vpop.f32.mrf.mxu1 }
 0x6f0   : > { %v7398_v52 = vmax.f32 %v7390_v43, 0.0  ;;  %v7388_v17 = vadd.f32 %v7358_v46, %v13325_v28  ;;  %v7369_v12 = vadd.f32 %v8463_v38, %v7925_v11 }
 0x6f1   : > { %v7360_v23 = vpop.f32.mrf.mxu1 }
 0x6f2   : > { %7406 = vst [vmem:[%s12942_s21 + $0x10] sm:$0xff] %v7398_v52  ;;  %v7396_v18 = vmax.f32 %v7388_v17, 0.0  ;;  %v7391_v58 = vadd.f32 %v7369_v12, %v13327_v2  ;;  %v7361_v50 = vadd.f32 %v7925_v11, %v7360_v23 }
 0x6f4   : > { %7404 = vst [vmem:[%s12942_s21] sm:$0xff] %v7396_v18  ;;  %v7399_v26 = vmax.f32 %v7391_v58, 0.0  ;;  %v7389_v20 = vadd.f32 %v7361_v50, %v13329_v3 }
 0x6f5   : > { %v8466_v37 = vpop.f32.mrf.mxu1 }
 0x6f6   : > { %7407 = vst [vmem:[%s12942_s21 + $0x18] sm:$0xff] %v7399_v26  ;;  %v7397_v8 = vmax.f32 %v7389_v20, 0.0  ;;  %v7382_v7 = vadd.f32 %v8466_v37, %v7925_v11 }
 0x6f7   : > { %v7373_v32 = vpop.f32.mrf.mxu1 }
 0x6f8   : > { %7405 = vst [vmem:[%s12942_s21 + $0x8] sm:$0xff] %v7397_v8  ;;  %v7394_v59 = vadd.f32 %v7382_v7, %v13331_v35  ;;  %v7374_v51 = vadd.f32 %v7925_v11, %v7373_v32 }
 0x6f9   : > { %v8467_v53 = vpop.f32.mrf.mxu1 }
 0x6fa   : > { %v7402_v47 = vmax.f32 %v7394_v59, 0.0  ;;  %v7392_v31 = vadd.f32 %v7374_v51, %v13333_v19  ;;  %v7385_v39 = vadd.f32 %v8467_v53, %v7925_v11 }
 0x6fb   : > { %v7376_v44 = vpop.f32.mrf.mxu1 }
 0x6fc   : > { %7410 = vst [vmem:[%s12942_s21 + $0x30] sm:$0xff] %v7402_v47  ;;  %v7400_v63 = vmax.f32 %v7392_v31, 0.0  ;;  %v7395_v13 = vadd.f32 %v7385_v39, %v13335_v56  ;;  %v7377_v57 = vadd.f32 %v7925_v11, %v7376_v44 }
 0x6fe   : > { %7408 = vst [vmem:[%s12942_s21 + $0x20] sm:$0xff] %v7400_v63  ;;  %v7403_v6 = vmax.f32 %v7395_v13, 0.0  ;;  %v7393_v61 = vadd.f32 %v7377_v57, %v13337_v27 }
 0x700   : > { %7411 = vst [vmem:[%s12942_s21 + $0x38] sm:$0xff] %v7403_v6  ;;  %v7401_v34 = vmax.f32 %v7393_v61, 0.0 }
 0x702   : > { %7409 = vst [vmem:[%s12942_s21 + $0x28] sm:$0xff] %v7401_v34 }
 0x703   : > { %8740 = shalt.err (!%p8737_p13)
}
 0x704   : > { %s8741_s19 = scalar_lea.hbm %s12969_s11, 1024  ;;  %s8745_s12 = scalar_lea.hbm %s13024_s10, 2048 }
 0x705   : > { %p8742_p5 = scmp.ne.s32.totalorder %s12969_s11, %s8741_s19  ;;  %p8746_p8 = scmp.lt.s32.totalorder %s12969_s11, %s13024_s10 }
 0x706   : > { %p8747_p3 = scmp.lt.s32.totalorder %s8745_s12, %s8741_s19 }
 0x707   : > { %p8743_p0 = pnand %p8742_p5, %p13338_p1 }
 0x708   : > { %p8748_p11 = por %p8747_p3, %p8746_p8 }
 0x709   : > { %p8744_p4 = pneg %p8743_p0 }
 0x70b   : > { %p8749_p10 = pnand %p8748_p11, %p8744_p4 }
 0x70d   : > { %8752 = shalt.err (!%p8749_p10)
}
 0x70e   : > { %s8810_s25 = smov 128   ;;  %s8811_s29 = smov 8  }
 0x70f   : > { %8494 = dma.vmem_to_hbm [thread:$0]  (%p13338_p1), %s12961_s18, 1024, %s12969_s11, %s7413_s26, %s8810_s25, %s8810_s25, %s8811_s29  }
 0x710 PF: > { %s7441_s17 = sand.u32 1, %s8783_s13   ;;  %p13339_p2 = scmp.ne.s32.totalorder %s13113_s20, 0 }
 0x711   : > { %p13340_p6 = scmp.ge.s32.totalorder %s8795_s16, 2  ;;  %s7442_s8 = scalar_lea.sflag [#allocation7], %s7441_s17 }
 0x713   : > { %p8508_p12 = pnand %p13340_p6, %p13339_p2 }
 0x715   : > { %p8509_p7 = pneg %p8508_p12 }
 0x717   : > { %8778 = dma.done.wait (%p8509_p7), %s7442_s8, 1024  }
 0x718   : > { %8780 = vsyncadd (%p8509_p7), %s7442_s8, 4294966272  ;;  %s13341_s28 = sld [smem:[#allocation15_spill]]  ;;  %p24_p9 = scmp.ge.s32.totalorder %s8939_s23, 4  }
 0x719   : > { %s13342_s15 = sld [smem:[#allocation16_spill]]  ;;  %s13343_s13 = smov %s8787_s14 }
 0x71a   : > { %s13345_s16 = smov %s8939_s23  ;;  %26 = sbr.rel (!%p24_p9) target bundleno = 9 (0x9), region = 128 }
 0x71e   : > { %s13344_s14 = smov %s13341_s28 }
 0x71f   :  { %7447 = vsyncpa [#allocation6], 1 }
 0x720   :  { %7449 = vsyncpa [#allocation6 + $0x1], 1 }
 0x721   :  { %7450 = vsyncpa [#allocation9], 1 }
 0x722   :  { %7451 = vsyncpa [#allocation7], 1 }
 0x723   :  { %7453 = vsyncpa [#allocation7 + $0x1], 1 }

</bundles_post_ra>
